<compile_context>
chip_gen: v5e
topology: v5e:2x2
jax: 0.10.0
libtpu: 0.0.40
codegen_flags: <defaults>
</compile_context>

<pallas_src>
import functools

import jax
import jax.numpy as jnp
from jax import lax
from jax.experimental import pallas as pl
from jax.experimental.pallas import tpu as pltpu


# ----------------------------------------------------------------------------
# Fused Inceptionx3 kernel
# ----------------------------------------------------------------------------
def _inceptionx3_kernel(x_ref, mask_ref, rowmap_ref,
                        w014_ref, s014_ref, b014_ref,
                        w3_ref, s3_ref, bb3_ref,
                        w1_ref, s1_ref, bb1_ref,
                        w2_ref, s2_ref, bb2_ref,
                        o_ref,
                        xpad_ref, s01_ref, p2_ref,
                        *, H, W, dims):
    d0, d1, d2, d3 = dims
    d01 = d0 + d1
    Wp = W + 2                           # padded width (pad=1 each side)
    Rspan = (H - 1) * Wp + W             # contiguous flat span covering interior
    base = Wp + 1                        # flat index of interior pixel (0, 0)
    HW = H * W
    f32 = jnp.float32
    bf16 = jnp.bfloat16

    mask = mask_ref[...]                 # (Rspan, 1) f32: 1 on real pixels

    # -- input (1, H*W, Cin) bf16 -> zero-padded flattened (R, Cin) f32 (VMEM) --
    xpad_ref[...] = jnp.zeros_like(xpad_ref)
    for i in range(H):
        xpad_ref[base + i * Wp: base + i * Wp + W, :] = (
            x_ref[0, i * W:(i + 1) * W, :].astype(f32))

    # -- the 9 conv taps are constant sublane shifts of the padded flat image --
    shifts = [base + dh * Wp + dw for dh in (-1, 0, 1) for dw in (-1, 0, 1)]
    xw = [xpad_ref[s: s + Rspan, :] for s in shifts]      # 9 x (Rspan, Cin) f32

    # -- stage 0: fused 1x1 convs [b1_0 | b2_0 | b4_0] + BN + ReLU (one dot) ---
    z014 = jnp.dot(xw[4].astype(bf16), w014_ref[...],
                   preferred_element_type=f32)            # (Rspan, d0+d1+d3)
    z014 = jnp.maximum(z014 * s014_ref[...] + b014_ref[...], 0.0)

    # b1_0|b2_0 back into a padded VMEM buffer (pad positions zeroed) for stage 1
    s01_ref[...] = jnp.zeros_like(s01_ref)
    s01_ref[base: base + Rspan, :] = z014[:, :d01] * mask

    # branch3: 3x3 avg-pool (count_include_pad) on the VPU, then its 1x1 conv.
    pooled = xw[0]
    for t in range(1, 9):
        pooled = pooled + xw[t]
    pooled = (pooled * (1.0 / 9.0)).astype(bf16)
    z3 = jnp.dot(pooled, w3_ref[...], preferred_element_type=f32)
    b3_out = jnp.maximum(z3 * s3_ref[...] + bb3_ref[...], 0.0)   # (Rspan, d2)

    # -- stage 1: block-diagonal 3x3 conv (b1_1 | b2_1) + BN + ReLU ------------
    acc1 = jnp.zeros((Rspan, d01), f32)
    for t, s in enumerate(shifts):
        acc1 = acc1 + jnp.dot(s01_ref[s: s + Rspan, :].astype(bf16), w1_ref[t],
                              preferred_element_type=f32)
    y1 = jnp.maximum(acc1 * s1_ref[...] + bb1_ref[...], 0.0)     # (Rspan, d01)

    p2_ref[...] = jnp.zeros_like(p2_ref)
    p2_ref[base: base + Rspan, :] = y1[:, :d0] * mask

    # -- stage 2: 3x3 conv (b1_2) + BN + ReLU ----------------------------------
    acc2 = jnp.zeros((Rspan, d0), f32)
    for t, s in enumerate(shifts):
        acc2 = acc2 + jnp.dot(p2_ref[s: s + Rspan, :].astype(bf16), w2_ref[t],
                              preferred_element_type=f32)
    b1_out = jnp.maximum(acc2 * s2_ref[...] + bb2_ref[...], 0.0)  # (Rspan, d0)

    # -- epilogue: crop + channel-major transpose via exact 0/1 matmuls, then a
    #    lane-dense (Ctot, H*W) store.  P[q, p] = 1 iff padded-span row q is
    #    output pixel p; sel selects/permutes the branch's channel block.
    qi = lax.broadcasted_iota(jnp.int32, (Rspan, HW), 0)
    P = (qi == rowmap_ref[...]).astype(f32)               # (Rspan, HW)

    def emit(v, c_src, col_off, n_ch, out_off):
        sel = (lax.broadcasted_iota(jnp.int32, (n_ch, c_src), 1) ==
               lax.broadcasted_iota(jnp.int32, (n_ch, c_src), 0) + col_off
               ).astype(f32)                              # (n_ch, c_src)
        cm = lax.dot_general(sel, v, (((1,), (1,)), ((), ())),
                             preferred_element_type=f32)  # (n_ch, Rspan)
        o_ref[0, out_off: out_off + n_ch, :] = jnp.dot(
            cm, P, preferred_element_type=f32).astype(o_ref.dtype)

    emit(b1_out, d0,       0,    d0, 0)                   # branch1
    emit(y1,     d01,      d0,   d1, d0)                  # branch2
    emit(b3_out, d2,       0,    d2, d01)                 # branch3
    emit(z014,   d01 + d3, d01,  d3, d01 + d2)            # branch4


# ----------------------------------------------------------------------------
# Wrapper: one pallas_call for the whole block
# ----------------------------------------------------------------------------
def inceptionx3_forward(x_nchw, p):
    n, cin, h, w = x_nchw.shape
    d0 = p["w2"].shape[-1]
    d01 = p["w1"].shape[-1]
    d1 = d01 - d0
    d2 = p["w3"].shape[-1]
    d3 = p["w014"].shape[-1] - d01
    ctot = d01 + d2 + d3
    wp = w + 2
    r = (h + 2) * wp
    rspan = (h - 1) * wp + w
    hw = h * w

    # Only layout prep on the (tiny) raw input: NCHW -> (N, H*W, Cin) bf16.
    x_rc = jnp.transpose(x_nchw, (0, 2, 3, 1)).reshape(n, hw, cin).astype(jnp.bfloat16)

    # Static index helpers (pad-column mask; output-pixel -> span-row map).
    q = jnp.arange(rspan)
    fj = (q + wp + 1) % wp
    fi = (q + wp + 1) // wp
    mask = (((fi >= 1) & (fi <= h) & (fj >= 1) & (fj <= w))
            .astype(jnp.float32).reshape(rspan, 1))
    pidx = jnp.arange(hw)
    rowmap = ((pidx // w) * wp + (pidx % w)).astype(jnp.int32).reshape(1, hw)

    kernel = functools.partial(_inceptionx3_kernel, H=h, W=w,
                               dims=(d0, d1, d2, d3))

    out = pl.pallas_call(
        kernel,
        out_shape=jax.ShapeDtypeStruct((n, ctot, hw), jnp.float32),
        grid=(n,),
        in_specs=[
            pl.BlockSpec((1, hw, cin), lambda i: (i, 0, 0)),       # x
            pl.BlockSpec((rspan, 1), lambda i: (0, 0)),            # mask
            pl.BlockSpec((1, hw), lambda i: (0, 0)),               # rowmap
            pl.BlockSpec((cin, d01 + d3), lambda i: (0, 0)),       # w014
            pl.BlockSpec((1, d01 + d3), lambda i: (0, 0)),         # s014
            pl.BlockSpec((1, d01 + d3), lambda i: (0, 0)),         # b014
            pl.BlockSpec((cin, d2), lambda i: (0, 0)),             # w3
            pl.BlockSpec((1, d2), lambda i: (0, 0)),               # s3
            pl.BlockSpec((1, d2), lambda i: (0, 0)),               # b3
            pl.BlockSpec((9, d01, d01), lambda i: (0, 0, 0)),      # w1
            pl.BlockSpec((1, d01), lambda i: (0, 0)),              # s1
            pl.BlockSpec((1, d01), lambda i: (0, 0)),              # b1
            pl.BlockSpec((9, d0, d0), lambda i: (0, 0, 0)),        # w2
            pl.BlockSpec((1, d0), lambda i: (0, 0)),               # s2
            pl.BlockSpec((1, d0), lambda i: (0, 0)),               # b2
        ],
        out_specs=pl.BlockSpec((1, ctot, hw), lambda i: (i, 0, 0)),
        scratch_shapes=[
            pltpu.VMEM((r, cin), jnp.float32),    # padded input
            pltpu.VMEM((r, d01), jnp.float32),    # padded b1_0|b2_0
            pltpu.VMEM((r, d0), jnp.float32),     # padded b1 mid
        ],
        compiler_params=pltpu.CompilerParams(
            dimension_semantics=("parallel",)),
    )(x_rc, mask, rowmap,
      p["w014"], p["s014"], p["b014"],
      p["w3"], p["s3"], p["b3"],
      p["w1"], p["s1"], p["b1"],
      p["w2"], p["s2"], p["b2"])

    return out.reshape(n, ctot, h, w)


# ----------------------------------------------------------------------------
# Parameters: per-ConvBlock raw params + fused/folded kernel weights
# ----------------------------------------------------------------------------
def _round_bf16(x):
    return x.astype(jnp.bfloat16).astype(jnp.float32)


def _init_conv_bn(key, cin, cout, k, eps=1e-3):
    """Conv2d(bias=False) + BatchNorm2d(eps=1e-3) folded to per-channel scale/bias."""
    k1, k2, k3, k4, k5 = jax.random.split(key, 5)
    fan_in = cin * k * k
    w = jax.random.normal(k1, (k, k, cin, cout), jnp.float32) / jnp.sqrt(fan_in)
    w = _round_bf16(w)                       # bf16-representable weights
    gamma = 1.0 + 0.1 * jax.random.normal(k2, (cout,), jnp.float32)
    beta = 0.1 * jax.random.normal(k3, (cout,), jnp.float32)
    rmean = 0.1 * jax.random.normal(k4, (cout,), jnp.float32)
    rvar = jax.random.uniform(k5, (cout,), jnp.float32, minval=0.5, maxval=1.5)
    scale = gamma / jnp.sqrt(rvar + eps)
    bias = beta - rmean * scale
    return dict(w=w, scale=scale, bias=bias)


def _taps(w):        # (3,3,cin,cout) -> (9,cin,cout); tap t = (dh+1)*3 + (dw+1)
    return w.reshape(9, w.shape[2], w.shape[3])


def init_inceptionx3_params(key, inp, dims):
    d0, d1, d2, d3 = dims
    ks = jax.random.split(key, 7)
    raw = {
        "b1_0": _init_conv_bn(ks[0], inp, d0, 1),
        "b1_1": _init_conv_bn(ks[1], d0, d0, 3),
        "b1_2": _init_conv_bn(ks[2], d0, d0, 3),
        "b2_0": _init_conv_bn(ks[3], inp, d1, 1),
        "b2_1": _init_conv_bn(ks[4], d1, d1, 3),
        "b3_1": _init_conv_bn(ks[5], inp, d2, 1),
        "b4_0": _init_conv_bn(ks[6], inp, d3, 1),
    }

    # Stage 0 fused 1x1: [b1_0 | b2_0 | b4_0]  (Cin, d0+d1+d3)
    w014 = jnp.concatenate([raw["b1_0"]["w"][0, 0],
                            raw["b2_0"]["w"][0, 0],
                            raw["b4_0"]["w"][0, 0]], axis=-1)
    s014 = jnp.concatenate([raw[b]["scale"] for b in ("b1_0", "b2_0", "b4_0")])
    b014 = jnp.concatenate([raw[b]["bias"] for b in ("b1_0", "b2_0", "b4_0")])

    # branch3 1x1 (applied to the pooled input)
    w3 = raw["b3_1"]["w"][0, 0]
    s3, b3 = raw["b3_1"]["scale"], raw["b3_1"]["bias"]

    # Stage 1: block-diagonal 3x3 taps for b1_1 | b2_1 (d0+d1 fits one MXU tile)
    w1 = jnp.zeros((9, d0 + d1, d0 + d1), jnp.float32)
    w1 = w1.at[:, :d0, :d0].set(_taps(raw["b1_1"]["w"]))
    w1 = w1.at[:, d0:, d0:].set(_taps(raw["b2_1"]["w"]))
    s1 = jnp.concatenate([raw["b1_1"]["scale"], raw["b2_1"]["scale"]])
    b1 = jnp.concatenate([raw["b1_1"]["bias"], raw["b2_1"]["bias"]])

    # Stage 2: b1_2 taps
    w2 = _taps(raw["b1_2"]["w"])
    s2, b2 = raw["b1_2"]["scale"], raw["b1_2"]["bias"]

    fused = dict(
        w014=w014.astype(jnp.bfloat16), s014=s014.reshape(1, -1), b014=b014.reshape(1, -1),
        w3=w3.astype(jnp.bfloat16), s3=s3.reshape(1, -1), b3=b3.reshape(1, -1),
        w1=w1.astype(jnp.bfloat16), s1=s1.reshape(1, -1), b1=b1.reshape(1, -1),
        w2=w2.astype(jnp.bfloat16), s2=s2.reshape(1, -1), b2=b2.reshape(1, -1),
    )
    return fused, raw


# ----------------------------------------------------------------------------
# Pure-JAX reference (conv / avgpool / folded BN / ReLU)
# ----------------------------------------------------------------------------
def _ref_convblock(x, p):
    y = lax.conv_general_dilated(
        _round_bf16(x), p["w"], window_strides=(1, 1), padding="SAME",
        dimension_numbers=("NHWC", "HWIO", "NHWC"))
    return jnp.maximum(y * p["scale"] + p["bias"], 0.0)


def _ref_avgpool3(x):
    n, h, w, c = x.shape
    xp = jnp.pad(x, ((0, 0), (1, 1), (1, 1), (0, 0)))
    acc = jnp.zeros_like(x)
    for i in range(3):
        for j in range(3):
            acc = acc + xp[:, i:i + h, j:j + w, :]
    return acc / 9.0                                   # count_include_pad=True


def ref_forward(x_nchw, raw):
    x = jnp.transpose(x_nchw, (0, 2, 3, 1))
    b1 = _ref_convblock(_ref_convblock(_ref_convblock(x, raw["b1_0"]),
                                       raw["b1_1"]), raw["b1_2"])
    b2 = _ref_convblock(_ref_convblock(x, raw["b2_0"]), raw["b2_1"])
    pooled = _ref_avgpool3(_round_bf16(x))
    y3 = jnp.einsum("nhwc,co->nhwo", pooled, raw["b3_1"]["w"][0, 0])
    b3 = jnp.maximum(y3 * raw["b3_1"]["scale"] + raw["b3_1"]["bias"], 0.0)
    b4 = _ref_convblock(x, raw["b4_0"])
    out = jnp.concatenate([b1, b2, b3, b4], axis=-1)
    return jnp.transpose(out, (0, 3, 1, 2))


if __name__ == "__main__":
    key = jax.random.PRNGKey(0)
    kx, kp = jax.random.split(key)

    N, Cin, H, W = 2, 4, 16, 16
    dims = (8, 8, 8, 8)

    x = jax.random.normal(kx, (N, Cin, H, W), jnp.float32)
    params, raw = init_inceptionx3_params(kp, Cin, dims)

    out = jax.jit(inceptionx3_forward)(x, params)
    out = jax.block_until_ready(out)

    assert out.shape == (N, sum(dims), H, W), out.shape
    ref = ref_forward(x, raw)
    max_err = float(jnp.max(jnp.abs(out - ref)))
    # bf16 MXU inputs + pooled-value bf16 rounding: loosened (expected) tolerance.
    assert jnp.allclose(out, ref, atol=2e-2, rtol=2e-2), f"mismatch: {max_err}"

    print("KERNEL_OK")
</pallas_src>

<mosaic_0001>
module attributes {stable_mosaic.version = 11 : i64} {
  func.func @_inceptionx3_kernel(%arg0: i32, %arg1: memref<1x256x4xbf16, #tpu.memory_space<vmem>>, %arg2: memref<286x1xf32, #tpu.memory_space<vmem>>, %arg3: memref<1x256xi32, #tpu.memory_space<vmem>>, %arg4: memref<4x24xbf16, #tpu.memory_space<vmem>>, %arg5: memref<1x24xf32, #tpu.memory_space<vmem>>, %arg6: memref<1x24xf32, #tpu.memory_space<vmem>>, %arg7: memref<4x8xbf16, #tpu.memory_space<vmem>>, %arg8: memref<1x8xf32, #tpu.memory_space<vmem>>, %arg9: memref<1x8xf32, #tpu.memory_space<vmem>>, %arg10: memref<9x16x16xbf16, #tpu.memory_space<vmem>>, %arg11: memref<1x16xf32, #tpu.memory_space<vmem>>, %arg12: memref<1x16xf32, #tpu.memory_space<vmem>>, %arg13: memref<9x8x8xbf16, #tpu.memory_space<vmem>>, %arg14: memref<1x8xf32, #tpu.memory_space<vmem>>, %arg15: memref<1x8xf32, #tpu.memory_space<vmem>>, %arg16: memref<1x32x256xf32, #tpu.memory_space<vmem>>, %arg17: memref<324x4xf32, #tpu.memory_space<vmem>>, %arg18: memref<324x16xf32, #tpu.memory_space<vmem>>, %arg19: memref<324x8xf32, #tpu.memory_space<vmem>>) attributes {dimension_semantics = [#tpu.dimension_semantics<parallel>], iteration_bounds = array<i64: 2>, scalar_prefetch = 0 : i64, scratch_operands = 3 : i64, tpu.core_type = #tpu.core_type<tc>, window_params = [{transform_indices = @transform_0, window_bounds = array<i64: 1, 256, 4>}, {pipeline_mode = #tpu.pipeline_mode<synchronous>, transform_indices = @transform_1, window_bounds = array<i64: 286, 1>}, {pipeline_mode = #tpu.pipeline_mode<synchronous>, transform_indices = @transform_2, window_bounds = array<i64: 1, 256>}, {pipeline_mode = #tpu.pipeline_mode<synchronous>, transform_indices = @transform_3, window_bounds = array<i64: 4, 24>}, {pipeline_mode = #tpu.pipeline_mode<synchronous>, transform_indices = @transform_4, window_bounds = array<i64: 1, 24>}, {pipeline_mode = #tpu.pipeline_mode<synchronous>, transform_indices = @transform_5, window_bounds = array<i64: 1, 24>}, {pipeline_mode = #tpu.pipeline_mode<synchronous>, transform_indices = @transform_6, window_bounds = array<i64: 4, 8>}, {pipeline_mode = #tpu.pipeline_mode<synchronous>, transform_indices = @transform_7, window_bounds = array<i64: 1, 8>}, {pipeline_mode = #tpu.pipeline_mode<synchronous>, transform_indices = @transform_8, window_bounds = array<i64: 1, 8>}, {pipeline_mode = #tpu.pipeline_mode<synchronous>, transform_indices = @transform_9, window_bounds = array<i64: 9, 16, 16>}, {pipeline_mode = #tpu.pipeline_mode<synchronous>, transform_indices = @transform_10, window_bounds = array<i64: 1, 16>}, {pipeline_mode = #tpu.pipeline_mode<synchronous>, transform_indices = @transform_11, window_bounds = array<i64: 1, 16>}, {pipeline_mode = #tpu.pipeline_mode<synchronous>, transform_indices = @transform_12, window_bounds = array<i64: 9, 8, 8>}, {pipeline_mode = #tpu.pipeline_mode<synchronous>, transform_indices = @transform_13, window_bounds = array<i64: 1, 8>}, {pipeline_mode = #tpu.pipeline_mode<synchronous>, transform_indices = @transform_14, window_bounds = array<i64: 1, 8>}, {transform_indices = @transform_15, window_bounds = array<i64: 1, 32, 256>}]} {
    %c0 = arith.constant 0 : index
    %c0_0 = arith.constant 0 : index
    %0 = vector.load %arg2[%c0, %c0_0] : memref<286x1xf32, #tpu.memory_space<vmem>>, vector<286x1xf32>
    %cst = arith.constant 0.000000e+00 : f32
    %1 = vector.broadcast %cst : f32 to vector<324x4xf32>
    %c0_1 = arith.constant 0 : index
    %c0_2 = arith.constant 0 : index
    %2 = vector.load %arg17[%c0_1, %c0_2] : memref<324x4xf32, #tpu.memory_space<vmem>>, vector<324x4xf32>
    tpu.vector_store %arg17[%c0_1, %c0_2], %1 {strides = array<i32>} : memref<324x4xf32, #tpu.memory_space<vmem>>, vector<324x4xf32>,
    %c0_3 = arith.constant 0 : index
    %c0_4 = arith.constant 0 : index
    %c0_5 = arith.constant 0 : index
    %3 = vector.load %arg1[%c0_3, %c0_4, %c0_5] : memref<1x256x4xbf16, #tpu.memory_space<vmem>>, vector<1x16x4xbf16>
    %4 = vector.shape_cast %3 : vector<1x16x4xbf16> to vector<16x4xbf16>
    %5 = arith.extf %4 : vector<16x4xbf16> to vector<16x4xf32>
    %c19 = arith.constant 19 : index
    %c0_6 = arith.constant 0 : index
    %6 = vector.load %arg17[%c19, %c0_6] : memref<324x4xf32, #tpu.memory_space<vmem>>, vector<16x4xf32>
    tpu.vector_store %arg17[%c19, %c0_6], %5 {strides = array<i32>} : memref<324x4xf32, #tpu.memory_space<vmem>>, vector<16x4xf32>,
    %c0_7 = arith.constant 0 : index
    %c16 = arith.constant 16 : index
    %c0_8 = arith.constant 0 : index
    %7 = vector.load %arg1[%c0_7, %c16, %c0_8] : memref<1x256x4xbf16, #tpu.memory_space<vmem>>, vector<1x16x4xbf16>
    %8 = vector.shape_cast %7 : vector<1x16x4xbf16> to vector<16x4xbf16>
    %9 = arith.extf %8 : vector<16x4xbf16> to vector<16x4xf32>
    %c37 = arith.constant 37 : index
    %c0_9 = arith.constant 0 : index
    %10 = vector.load %arg17[%c37, %c0_9] : memref<324x4xf32, #tpu.memory_space<vmem>>, vector<16x4xf32>
    tpu.vector_store %arg17[%c37, %c0_9], %9 {strides = array<i32>} : memref<324x4xf32, #tpu.memory_space<vmem>>, vector<16x4xf32>,
    %c0_10 = arith.constant 0 : index
    %c32 = arith.constant 32 : index
    %c0_11 = arith.constant 0 : index
    %11 = vector.load %arg1[%c0_10, %c32, %c0_11] : memref<1x256x4xbf16, #tpu.memory_space<vmem>>, vector<1x16x4xbf16>
    %12 = vector.shape_cast %11 : vector<1x16x4xbf16> to vector<16x4xbf16>
    %13 = arith.extf %12 : vector<16x4xbf16> to vector<16x4xf32>
    %c55 = arith.constant 55 : index
    %c0_12 = arith.constant 0 : index
    %14 = vector.load %arg17[%c55, %c0_12] : memref<324x4xf32, #tpu.memory_space<vmem>>, vector<16x4xf32>
    tpu.vector_store %arg17[%c55, %c0_12], %13 {strides = array<i32>} : memref<324x4xf32, #tpu.memory_space<vmem>>, vector<16x4xf32>,
    %c0_13 = arith.constant 0 : index
    %c48 = arith.constant 48 : index
    %c0_14 = arith.constant 0 : index
    %15 = vector.load %arg1[%c0_13, %c48, %c0_14] : memref<1x256x4xbf16, #tpu.memory_space<vmem>>, vector<1x16x4xbf16>
    %16 = vector.shape_cast %15 : vector<1x16x4xbf16> to vector<16x4xbf16>
    %17 = arith.extf %16 : vector<16x4xbf16> to vector<16x4xf32>
    %c73 = arith.constant 73 : index
    %c0_15 = arith.constant 0 : index
    %18 = vector.load %arg17[%c73, %c0_15] : memref<324x4xf32, #tpu.memory_space<vmem>>, vector<16x4xf32>
    tpu.vector_store %arg17[%c73, %c0_15], %17 {strides = array<i32>} : memref<324x4xf32, #tpu.memory_space<vmem>>, vector<16x4xf32>,
    %c0_16 = arith.constant 0 : index
    %c64 = arith.constant 64 : index
    %c0_17 = arith.constant 0 : index
    %19 = vector.load %arg1[%c0_16, %c64, %c0_17] : memref<1x256x4xbf16, #tpu.memory_space<vmem>>, vector<1x16x4xbf16>
    %20 = vector.shape_cast %19 : vector<1x16x4xbf16> to vector<16x4xbf16>
    %21 = arith.extf %20 : vector<16x4xbf16> to vector<16x4xf32>
    %c91 = arith.constant 91 : index
    %c0_18 = arith.constant 0 : index
    %22 = vector.load %arg17[%c91, %c0_18] : memref<324x4xf32, #tpu.memory_space<vmem>>, vector<16x4xf32>
    tpu.vector_store %arg17[%c91, %c0_18], %21 {strides = array<i32>} : memref<324x4xf32, #tpu.memory_space<vmem>>, vector<16x4xf32>,
    %c0_19 = arith.constant 0 : index
    %c80 = arith.constant 80 : index
    %c0_20 = arith.constant 0 : index
    %23 = vector.load %arg1[%c0_19, %c80, %c0_20] : memref<1x256x4xbf16, #tpu.memory_space<vmem>>, vector<1x16x4xbf16>
    %24 = vector.shape_cast %23 : vector<1x16x4xbf16> to vector<16x4xbf16>
    %25 = arith.extf %24 : vector<16x4xbf16> to vector<16x4xf32>
    %c109 = arith.constant 109 : index
    %c0_21 = arith.constant 0 : index
    %26 = vector.load %arg17[%c109, %c0_21] : memref<324x4xf32, #tpu.memory_space<vmem>>, vector<16x4xf32>
    tpu.vector_store %arg17[%c109, %c0_21], %25 {strides = array<i32>} : memref<324x4xf32, #tpu.memory_space<vmem>>, vector<16x4xf32>,
    %c0_22 = arith.constant 0 : index
    %c96 = arith.constant 96 : index
    %c0_23 = arith.constant 0 : index
    %27 = vector.load %arg1[%c0_22, %c96, %c0_23] : memref<1x256x4xbf16, #tpu.memory_space<vmem>>, vector<1x16x4xbf16>
    %28 = vector.shape_cast %27 : vector<1x16x4xbf16> to vector<16x4xbf16>
    %29 = arith.extf %28 : vector<16x4xbf16> to vector<16x4xf32>
    %c127 = arith.constant 127 : index
    %c0_24 = arith.constant 0 : index
    %30 = vector.load %arg17[%c127, %c0_24] : memref<324x4xf32, #tpu.memory_space<vmem>>, vector<16x4xf32>
    tpu.vector_store %arg17[%c127, %c0_24], %29 {strides = array<i32>} : memref<324x4xf32, #tpu.memory_space<vmem>>, vector<16x4xf32>,
    %c0_25 = arith.constant 0 : index
    %c112 = arith.constant 112 : index
    %c0_26 = arith.constant 0 : index
    %31 = vector.load %arg1[%c0_25, %c112, %c0_26] : memref<1x256x4xbf16, #tpu.memory_space<vmem>>, vector<1x16x4xbf16>
    %32 = vector.shape_cast %31 : vector<1x16x4xbf16> to vector<16x4xbf16>
    %33 = arith.extf %32 : vector<16x4xbf16> to vector<16x4xf32>
    %c145 = arith.constant 145 : index
    %c0_27 = arith.constant 0 : index
    %34 = vector.load %arg17[%c145, %c0_27] : memref<324x4xf32, #tpu.memory_space<vmem>>, vector<16x4xf32>
    tpu.vector_store %arg17[%c145, %c0_27], %33 {strides = array<i32>} : memref<324x4xf32, #tpu.memory_space<vmem>>, vector<16x4xf32>,
    %c0_28 = arith.constant 0 : index
    %c128 = arith.constant 128 : index
    %c0_29 = arith.constant 0 : index
    %35 = vector.load %arg1[%c0_28, %c128, %c0_29] : memref<1x256x4xbf16, #tpu.memory_space<vmem>>, vector<1x16x4xbf16>
    %36 = vector.shape_cast %35 : vector<1x16x4xbf16> to vector<16x4xbf16>
    %37 = arith.extf %36 : vector<16x4xbf16> to vector<16x4xf32>
    %c163 = arith.constant 163 : index
    %c0_30 = arith.constant 0 : index
    %38 = vector.load %arg17[%c163, %c0_30] : memref<324x4xf32, #tpu.memory_space<vmem>>, vector<16x4xf32>
    tpu.vector_store %arg17[%c163, %c0_30], %37 {strides = array<i32>} : memref<324x4xf32, #tpu.memory_space<vmem>>, vector<16x4xf32>,
    %c0_31 = arith.constant 0 : index
    %c144 = arith.constant 144 : index
    %c0_32 = arith.constant 0 : index
    %39 = vector.load %arg1[%c0_31, %c144, %c0_32] : memref<1x256x4xbf16, #tpu.memory_space<vmem>>, vector<1x16x4xbf16>
    %40 = vector.shape_cast %39 : vector<1x16x4xbf16> to vector<16x4xbf16>
    %41 = arith.extf %40 : vector<16x4xbf16> to vector<16x4xf32>
    %c181 = arith.constant 181 : index
    %c0_33 = arith.constant 0 : index
    %42 = vector.load %arg17[%c181, %c0_33] : memref<324x4xf32, #tpu.memory_space<vmem>>, vector<16x4xf32>
    tpu.vector_store %arg17[%c181, %c0_33], %41 {strides = array<i32>} : memref<324x4xf32, #tpu.memory_space<vmem>>, vector<16x4xf32>,
    %c0_34 = arith.constant 0 : index
    %c160 = arith.constant 160 : index
    %c0_35 = arith.constant 0 : index
    %43 = vector.load %arg1[%c0_34, %c160, %c0_35] : memref<1x256x4xbf16, #tpu.memory_space<vmem>>, vector<1x16x4xbf16>
    %44 = vector.shape_cast %43 : vector<1x16x4xbf16> to vector<16x4xbf16>
    %45 = arith.extf %44 : vector<16x4xbf16> to vector<16x4xf32>
    %c199 = arith.constant 199 : index
    %c0_36 = arith.constant 0 : index
    %46 = vector.load %arg17[%c199, %c0_36] : memref<324x4xf32, #tpu.memory_space<vmem>>, vector<16x4xf32>
    tpu.vector_store %arg17[%c199, %c0_36], %45 {strides = array<i32>} : memref<324x4xf32, #tpu.memory_space<vmem>>, vector<16x4xf32>,
    %c0_37 = arith.constant 0 : index
    %c176 = arith.constant 176 : index
    %c0_38 = arith.constant 0 : index
    %47 = vector.load %arg1[%c0_37, %c176, %c0_38] : memref<1x256x4xbf16, #tpu.memory_space<vmem>>, vector<1x16x4xbf16>
    %48 = vector.shape_cast %47 : vector<1x16x4xbf16> to vector<16x4xbf16>
    %49 = arith.extf %48 : vector<16x4xbf16> to vector<16x4xf32>
    %c217 = arith.constant 217 : index
    %c0_39 = arith.constant 0 : index
    %50 = vector.load %arg17[%c217, %c0_39] : memref<324x4xf32, #tpu.memory_space<vmem>>, vector<16x4xf32>
    tpu.vector_store %arg17[%c217, %c0_39], %49 {strides = array<i32>} : memref<324x4xf32, #tpu.memory_space<vmem>>, vector<16x4xf32>,
    %c0_40 = arith.constant 0 : index
    %c192 = arith.constant 192 : index
    %c0_41 = arith.constant 0 : index
    %51 = vector.load %arg1[%c0_40, %c192, %c0_41] : memref<1x256x4xbf16, #tpu.memory_space<vmem>>, vector<1x16x4xbf16>
    %52 = vector.shape_cast %51 : vector<1x16x4xbf16> to vector<16x4xbf16>
    %53 = arith.extf %52 : vector<16x4xbf16> to vector<16x4xf32>
    %c235 = arith.constant 235 : index
    %c0_42 = arith.constant 0 : index
    %54 = vector.load %arg17[%c235, %c0_42] : memref<324x4xf32, #tpu.memory_space<vmem>>, vector<16x4xf32>
    tpu.vector_store %arg17[%c235, %c0_42], %53 {strides = array<i32>} : memref<324x4xf32, #tpu.memory_space<vmem>>, vector<16x4xf32>,
    %c0_43 = arith.constant 0 : index
    %c208 = arith.constant 208 : index
    %c0_44 = arith.constant 0 : index
    %55 = vector.load %arg1[%c0_43, %c208, %c0_44] : memref<1x256x4xbf16, #tpu.memory_space<vmem>>, vector<1x16x4xbf16>
    %56 = vector.shape_cast %55 : vector<1x16x4xbf16> to vector<16x4xbf16>
    %57 = arith.extf %56 : vector<16x4xbf16> to vector<16x4xf32>
    %c253 = arith.constant 253 : index
    %c0_45 = arith.constant 0 : index
    %58 = vector.load %arg17[%c253, %c0_45] : memref<324x4xf32, #tpu.memory_space<vmem>>, vector<16x4xf32>
    tpu.vector_store %arg17[%c253, %c0_45], %57 {strides = array<i32>} : memref<324x4xf32, #tpu.memory_space<vmem>>, vector<16x4xf32>,
    %c0_46 = arith.constant 0 : index
    %c224 = arith.constant 224 : index
    %c0_47 = arith.constant 0 : index
    %59 = vector.load %arg1[%c0_46, %c224, %c0_47] : memref<1x256x4xbf16, #tpu.memory_space<vmem>>, vector<1x16x4xbf16>
    %60 = vector.shape_cast %59 : vector<1x16x4xbf16> to vector<16x4xbf16>
    %61 = arith.extf %60 : vector<16x4xbf16> to vector<16x4xf32>
    %c271 = arith.constant 271 : index
    %c0_48 = arith.constant 0 : index
    %62 = vector.load %arg17[%c271, %c0_48] : memref<324x4xf32, #tpu.memory_space<vmem>>, vector<16x4xf32>
    tpu.vector_store %arg17[%c271, %c0_48], %61 {strides = array<i32>} : memref<324x4xf32, #tpu.memory_space<vmem>>, vector<16x4xf32>,
    %c0_49 = arith.constant 0 : index
    %c240 = arith.constant 240 : index
    %c0_50 = arith.constant 0 : index
    %63 = vector.load %arg1[%c0_49, %c240, %c0_50] : memref<1x256x4xbf16, #tpu.memory_space<vmem>>, vector<1x16x4xbf16>
    %64 = vector.shape_cast %63 : vector<1x16x4xbf16> to vector<16x4xbf16>
    %65 = arith.extf %64 : vector<16x4xbf16> to vector<16x4xf32>
    %c289 = arith.constant 289 : index
    %c0_51 = arith.constant 0 : index
    %66 = vector.load %arg17[%c289, %c0_51] : memref<324x4xf32, #tpu.memory_space<vmem>>, vector<16x4xf32>
    tpu.vector_store %arg17[%c289, %c0_51], %65 {strides = array<i32>} : memref<324x4xf32, #tpu.memory_space<vmem>>, vector<16x4xf32>,
    %c0_52 = arith.constant 0 : index
    %c0_53 = arith.constant 0 : index
    %67 = vector.load %arg17[%c0_52, %c0_53] : memref<324x4xf32, #tpu.memory_space<vmem>>, vector<286x4xf32>
    %c1 = arith.constant 1 : index
    %c0_54 = arith.constant 0 : index
    %68 = vector.load %arg17[%c1, %c0_54] : memref<324x4xf32, #tpu.memory_space<vmem>>, vector<286x4xf32>
    %c2 = arith.constant 2 : index
    %c0_55 = arith.constant 0 : index
    %69 = vector.load %arg17[%c2, %c0_55] : memref<324x4xf32, #tpu.memory_space<vmem>>, vector<286x4xf32>
    %c18 = arith.constant 18 : index
    %c0_56 = arith.constant 0 : index
    %70 = vector.load %arg17[%c18, %c0_56] : memref<324x4xf32, #tpu.memory_space<vmem>>, vector<286x4xf32>
    %c19_57 = arith.constant 19 : index
    %c0_58 = arith.constant 0 : index
    %71 = vector.load %arg17[%c19_57, %c0_58] : memref<324x4xf32, #tpu.memory_space<vmem>>, vector<286x4xf32>
    %c20 = arith.constant 20 : index
    %c0_59 = arith.constant 0 : index
    %72 = vector.load %arg17[%c20, %c0_59] : memref<324x4xf32, #tpu.memory_space<vmem>>, vector<286x4xf32>
    %c36 = arith.constant 36 : index
    %c0_60 = arith.constant 0 : index
    %73 = vector.load %arg17[%c36, %c0_60] : memref<324x4xf32, #tpu.memory_space<vmem>>, vector<286x4xf32>
    %c37_61 = arith.constant 37 : index
    %c0_62 = arith.constant 0 : index
    %74 = vector.load %arg17[%c37_61, %c0_62] : memref<324x4xf32, #tpu.memory_space<vmem>>, vector<286x4xf32>
    %c38 = arith.constant 38 : index
    %c0_63 = arith.constant 0 : index
    %75 = vector.load %arg17[%c38, %c0_63] : memref<324x4xf32, #tpu.memory_space<vmem>>, vector<286x4xf32>
    %76 = arith.truncf %71 : vector<286x4xf32> to vector<286x4xbf16>
    %c0_64 = arith.constant 0 : index
    %c0_65 = arith.constant 0 : index
    %77 = vector.load %arg4[%c0_64, %c0_65] : memref<4x24xbf16, #tpu.memory_space<vmem>>, vector<4x24xbf16>
    %cst_66 = arith.constant dense<0.000000e+00> : vector<286x24xf32>
    %78 = tpu.matmul %76, %77, %cst_66 {dimension_numbers = #tpu.dot_dimension_numbers<[1], [0], [0], [1], [0, 0, 1, 1], [], []>} : vector<286x4xbf16>, vector<4x24xbf16>, vector<286x24xf32> -> vector<286x24xf32>
    %c0_67 = arith.constant 0 : index
    %c0_68 = arith.constant 0 : index
    %79 = vector.load %arg5[%c0_67, %c0_68] : memref<1x24xf32, #tpu.memory_space<vmem>>, vector<1x24xf32>
    %80 = vector.broadcast %79 : vector<1x24xf32> to vector<286x24xf32>
    %81 = arith.mulf %78, %80 : vector<286x24xf32>
    %c0_69 = arith.constant 0 : index
    %c0_70 = arith.constant 0 : index
    %82 = vector.load %arg6[%c0_69, %c0_70] : memref<1x24xf32, #tpu.memory_space<vmem>>, vector<1x24xf32>
    %83 = vector.broadcast %82 : vector<1x24xf32> to vector<286x24xf32>
    %84 = arith.addf %81, %83 : vector<286x24xf32>
    %cst_71 = arith.constant 0.000000e+00 : f32
    %85 = vector.broadcast %cst_71 : f32 to vector<286x24xf32>
    %86 = arith.maximumf %84, %85 : vector<286x24xf32>
    %cst_72 = arith.constant 0.000000e+00 : f32
    %87 = vector.broadcast %cst_72 : f32 to vector<324x16xf32>
    %c0_73 = arith.constant 0 : index
    %c0_74 = arith.constant 0 : index
    %88 = vector.load %arg18[%c0_73, %c0_74] : memref<324x16xf32, #tpu.memory_space<vmem>>, vector<324x16xf32>
    tpu.vector_store %arg18[%c0_73, %c0_74], %87 {strides = array<i32>} : memref<324x16xf32, #tpu.memory_space<vmem>>, vector<324x16xf32>,
    %89 = vector.extract_strided_slice %86 {offsets = [0, 0], sizes = [286, 16], strides = [1, 1]} : vector<286x24xf32> to vector<286x16xf32>
    %90 = vector.broadcast %0 : vector<286x1xf32> to vector<286x16xf32>
    %91 = arith.mulf %89, %90 : vector<286x16xf32>
    %c19_75 = arith.constant 19 : index
    %c0_76 = arith.constant 0 : index
    %92 = vector.load %arg18[%c19_75, %c0_76] : memref<324x16xf32, #tpu.memory_space<vmem>>, vector<286x16xf32>
    tpu.vector_store %arg18[%c19_75, %c0_76], %91 {strides = array<i32>} : memref<324x16xf32, #tpu.memory_space<vmem>>, vector<286x16xf32>,
    %93 = arith.addf %67, %68 : vector<286x4xf32>
    %94 = arith.addf %93, %69 : vector<286x4xf32>
    %95 = arith.addf %94, %70 : vector<286x4xf32>
    %96 = arith.addf %95, %71 : vector<286x4xf32>
    %97 = arith.addf %96, %72 : vector<286x4xf32>
    %98 = arith.addf %97, %73 : vector<286x4xf32>
    %99 = arith.addf %98, %74 : vector<286x4xf32>
    %100 = arith.addf %99, %75 : vector<286x4xf32>
    %cst_77 = arith.constant 0.111111112 : f32
    %101 = vector.broadcast %cst_77 : f32 to vector<286x4xf32>
    %102 = arith.mulf %100, %101 : vector<286x4xf32>
    %103 = arith.truncf %102 : vector<286x4xf32> to vector<286x4xbf16>
    %c0_78 = arith.constant 0 : index
    %c0_79 = arith.constant 0 : index
    %104 = vector.load %arg7[%c0_78, %c0_79] : memref<4x8xbf16, #tpu.memory_space<vmem>>, vector<4x8xbf16>
    %cst_80 = arith.constant dense<0.000000e+00> : vector<286x8xf32>
    %105 = tpu.matmul %103, %104, %cst_80 {dimension_numbers = #tpu.dot_dimension_numbers<[1], [0], [0], [1], [0, 0, 1, 1], [], []>} : vector<286x4xbf16>, vector<4x8xbf16>, vector<286x8xf32> -> vector<286x8xf32>
    %c0_81 = arith.constant 0 : index
    %c0_82 = arith.constant 0 : index
    %106 = vector.load %arg8[%c0_81, %c0_82] : memref<1x8xf32, #tpu.memory_space<vmem>>, vector<1x8xf32>
    %107 = vector.broadcast %106 : vector<1x8xf32> to vector<286x8xf32>
    %108 = arith.mulf %105, %107 : vector<286x8xf32>
    %c0_83 = arith.constant 0 : index
    %c0_84 = arith.constant 0 : index
    %109 = vector.load %arg9[%c0_83, %c0_84] : memref<1x8xf32, #tpu.memory_space<vmem>>, vector<1x8xf32>
    %110 = vector.broadcast %109 : vector<1x8xf32> to vector<286x8xf32>
    %111 = arith.addf %108, %110 : vector<286x8xf32>
    %cst_85 = arith.constant 0.000000e+00 : f32
    %112 = vector.broadcast %cst_85 : f32 to vector<286x8xf32>
    %113 = arith.maximumf %111, %112 : vector<286x8xf32>
    %cst_86 = arith.constant 0.000000e+00 : f32
    %114 = vector.broadcast %cst_86 : f32 to vector<286x16xf32>
    %c0_87 = arith.constant 0 : index
    %c0_88 = arith.constant 0 : index
    %115 = vector.load %arg18[%c0_87, %c0_88] : memref<324x16xf32, #tpu.memory_space<vmem>>, vector<286x16xf32>
    %116 = arith.truncf %115 : vector<286x16xf32> to vector<286x16xbf16>
    %c0_89 = arith.constant 0 : index
    %c0_90 = arith.constant 0 : index
    %c0_91 = arith.constant 0 : index
    %117 = vector.load %arg10[%c0_89, %c0_90, %c0_91] : memref<9x16x16xbf16, #tpu.memory_space<vmem>>, vector<1x16x16xbf16>
    %118 = vector.shape_cast %117 : vector<1x16x16xbf16> to vector<16x16xbf16>
    %cst_92 = arith.constant dense<0.000000e+00> : vector<286x16xf32>
    %119 = tpu.matmul %116, %118, %cst_92 {dimension_numbers = #tpu.dot_dimension_numbers<[1], [0], [0], [1], [0, 0, 1, 1], [], []>} : vector<286x16xbf16>, vector<16x16xbf16>, vector<286x16xf32> -> vector<286x16xf32>
    %120 = arith.addf %114, %119 : vector<286x16xf32>
    %c1_93 = arith.constant 1 : index
    %c0_94 = arith.constant 0 : index
    %121 = vector.load %arg18[%c1_93, %c0_94] : memref<324x16xf32, #tpu.memory_space<vmem>>, vector<286x16xf32>
    %122 = arith.truncf %121 : vector<286x16xf32> to vector<286x16xbf16>
    %c1_95 = arith.constant 1 : index
    %c0_96 = arith.constant 0 : index
    %c0_97 = arith.constant 0 : index
    %123 = vector.load %arg10[%c1_95, %c0_96, %c0_97] : memref<9x16x16xbf16, #tpu.memory_space<vmem>>, vector<1x16x16xbf16>
    %124 = vector.shape_cast %123 : vector<1x16x16xbf16> to vector<16x16xbf16>
    %cst_98 = arith.constant dense<0.000000e+00> : vector<286x16xf32>
    %125 = tpu.matmul %122, %124, %cst_98 {dimension_numbers = #tpu.dot_dimension_numbers<[1], [0], [0], [1], [0, 0, 1, 1], [], []>} : vector<286x16xbf16>, vector<16x16xbf16>, vector<286x16xf32> -> vector<286x16xf32>
    %126 = arith.addf %120, %125 : vector<286x16xf32>
    %c2_99 = arith.constant 2 : index
    %c0_100 = arith.constant 0 : index
    %127 = vector.load %arg18[%c2_99, %c0_100] : memref<324x16xf32, #tpu.memory_space<vmem>>, vector<286x16xf32>
    %128 = arith.truncf %127 : vector<286x16xf32> to vector<286x16xbf16>
    %c2_101 = arith.constant 2 : index
    %c0_102 = arith.constant 0 : index
    %c0_103 = arith.constant 0 : index
    %129 = vector.load %arg10[%c2_101, %c0_102, %c0_103] : memref<9x16x16xbf16, #tpu.memory_space<vmem>>, vector<1x16x16xbf16>
    %130 = vector.shape_cast %129 : vector<1x16x16xbf16> to vector<16x16xbf16>
    %cst_104 = arith.constant dense<0.000000e+00> : vector<286x16xf32>
    %131 = tpu.matmul %128, %130, %cst_104 {dimension_numbers = #tpu.dot_dimension_numbers<[1], [0], [0], [1], [0, 0, 1, 1], [], []>} : vector<286x16xbf16>, vector<16x16xbf16>, vector<286x16xf32> -> vector<286x16xf32>
    %132 = arith.addf %126, %131 : vector<286x16xf32>
    %c18_105 = arith.constant 18 : index
    %c0_106 = arith.constant 0 : index
    %133 = vector.load %arg18[%c18_105, %c0_106] : memref<324x16xf32, #tpu.memory_space<vmem>>, vector<286x16xf32>
    %134 = arith.truncf %133 : vector<286x16xf32> to vector<286x16xbf16>
    %c3 = arith.constant 3 : index
    %c0_107 = arith.constant 0 : index
    %c0_108 = arith.constant 0 : index
    %135 = vector.load %arg10[%c3, %c0_107, %c0_108] : memref<9x16x16xbf16, #tpu.memory_space<vmem>>, vector<1x16x16xbf16>
    %136 = vector.shape_cast %135 : vector<1x16x16xbf16> to vector<16x16xbf16>
    %cst_109 = arith.constant dense<0.000000e+00> : vector<286x16xf32>
    %137 = tpu.matmul %134, %136, %cst_109 {dimension_numbers = #tpu.dot_dimension_numbers<[1], [0], [0], [1], [0, 0, 1, 1], [], []>} : vector<286x16xbf16>, vector<16x16xbf16>, vector<286x16xf32> -> vector<286x16xf32>
    %138 = arith.addf %132, %137 : vector<286x16xf32>
    %c19_110 = arith.constant 19 : index
    %c0_111 = arith.constant 0 : index
    %139 = vector.load %arg18[%c19_110, %c0_111] : memref<324x16xf32, #tpu.memory_space<vmem>>, vector<286x16xf32>
    %140 = arith.truncf %139 : vector<286x16xf32> to vector<286x16xbf16>
    %c4 = arith.constant 4 : index
    %c0_112 = arith.constant 0 : index
    %c0_113 = arith.constant 0 : index
    %141 = vector.load %arg10[%c4, %c0_112, %c0_113] : memref<9x16x16xbf16, #tpu.memory_space<vmem>>, vector<1x16x16xbf16>
    %142 = vector.shape_cast %141 : vector<1x16x16xbf16> to vector<16x16xbf16>
    %cst_114 = arith.constant dense<0.000000e+00> : vector<286x16xf32>
    %143 = tpu.matmul %140, %142, %cst_114 {dimension_numbers = #tpu.dot_dimension_numbers<[1], [0], [0], [1], [0, 0, 1, 1], [], []>} : vector<286x16xbf16>, vector<16x16xbf16>, vector<286x16xf32> -> vector<286x16xf32>
    %144 = arith.addf %138, %143 : vector<286x16xf32>
    %c20_115 = arith.constant 20 : index
    %c0_116 = arith.constant 0 : index
    %145 = vector.load %arg18[%c20_115, %c0_116] : memref<324x16xf32, #tpu.memory_space<vmem>>, vector<286x16xf32>
    %146 = arith.truncf %145 : vector<286x16xf32> to vector<286x16xbf16>
    %c5 = arith.constant 5 : index
    %c0_117 = arith.constant 0 : index
    %c0_118 = arith.constant 0 : index
    %147 = vector.load %arg10[%c5, %c0_117, %c0_118] : memref<9x16x16xbf16, #tpu.memory_space<vmem>>, vector<1x16x16xbf16>
    %148 = vector.shape_cast %147 : vector<1x16x16xbf16> to vector<16x16xbf16>
    %cst_119 = arith.constant dense<0.000000e+00> : vector<286x16xf32>
    %149 = tpu.matmul %146, %148, %cst_119 {dimension_numbers = #tpu.dot_dimension_numbers<[1], [0], [0], [1], [0, 0, 1, 1], [], []>} : vector<286x16xbf16>, vector<16x16xbf16>, vector<286x16xf32> -> vector<286x16xf32>
    %150 = arith.addf %144, %149 : vector<286x16xf32>
    %c36_120 = arith.constant 36 : index
    %c0_121 = arith.constant 0 : index
    %151 = vector.load %arg18[%c36_120, %c0_121] : memref<324x16xf32, #tpu.memory_space<vmem>>, vector<286x16xf32>
    %152 = arith.truncf %151 : vector<286x16xf32> to vector<286x16xbf16>
    %c6 = arith.constant 6 : index
    %c0_122 = arith.constant 0 : index
    %c0_123 = arith.constant 0 : index
    %153 = vector.load %arg10[%c6, %c0_122, %c0_123] : memref<9x16x16xbf16, #tpu.memory_space<vmem>>, vector<1x16x16xbf16>
    %154 = vector.shape_cast %153 : vector<1x16x16xbf16> to vector<16x16xbf16>
    %cst_124 = arith.constant dense<0.000000e+00> : vector<286x16xf32>
    %155 = tpu.matmul %152, %154, %cst_124 {dimension_numbers = #tpu.dot_dimension_numbers<[1], [0], [0], [1], [0, 0, 1, 1], [], []>} : vector<286x16xbf16>, vector<16x16xbf16>, vector<286x16xf32> -> vector<286x16xf32>
    %156 = arith.addf %150, %155 : vector<286x16xf32>
    %c37_125 = arith.constant 37 : index
    %c0_126 = arith.constant 0 : index
    %157 = vector.load %arg18[%c37_125, %c0_126] : memref<324x16xf32, #tpu.memory_space<vmem>>, vector<286x16xf32>
    %158 = arith.truncf %157 : vector<286x16xf32> to vector<286x16xbf16>
    %c7 = arith.constant 7 : index
    %c0_127 = arith.constant 0 : index
    %c0_128 = arith.constant 0 : index
    %159 = vector.load %arg10[%c7, %c0_127, %c0_128] : memref<9x16x16xbf16, #tpu.memory_space<vmem>>, vector<1x16x16xbf16>
    %160 = vector.shape_cast %159 : vector<1x16x16xbf16> to vector<16x16xbf16>
    %cst_129 = arith.constant dense<0.000000e+00> : vector<286x16xf32>
    %161 = tpu.matmul %158, %160, %cst_129 {dimension_numbers = #tpu.dot_dimension_numbers<[1], [0], [0], [1], [0, 0, 1, 1], [], []>} : vector<286x16xbf16>, vector<16x16xbf16>, vector<286x16xf32> -> vector<286x16xf32>
    %162 = arith.addf %156, %161 : vector<286x16xf32>
    %c38_130 = arith.constant 38 : index
    %c0_131 = arith.constant 0 : index
    %163 = vector.load %arg18[%c38_130, %c0_131] : memref<324x16xf32, #tpu.memory_space<vmem>>, vector<286x16xf32>
    %164 = arith.truncf %163 : vector<286x16xf32> to vector<286x16xbf16>
    %c8 = arith.constant 8 : index
    %c0_132 = arith.constant 0 : index
    %c0_133 = arith.constant 0 : index
    %165 = vector.load %arg10[%c8, %c0_132, %c0_133] : memref<9x16x16xbf16, #tpu.memory_space<vmem>>, vector<1x16x16xbf16>
    %166 = vector.shape_cast %165 : vector<1x16x16xbf16> to vector<16x16xbf16>
    %cst_134 = arith.constant dense<0.000000e+00> : vector<286x16xf32>
    %167 = tpu.matmul %164, %166, %cst_134 {dimension_numbers = #tpu.dot_dimension_numbers<[1], [0], [0], [1], [0, 0, 1, 1], [], []>} : vector<286x16xbf16>, vector<16x16xbf16>, vector<286x16xf32> -> vector<286x16xf32>
    %168 = arith.addf %162, %167 : vector<286x16xf32>
    %c0_135 = arith.constant 0 : index
    %c0_136 = arith.constant 0 : index
    %169 = vector.load %arg11[%c0_135, %c0_136] : memref<1x16xf32, #tpu.memory_space<vmem>>, vector<1x16xf32>
    %170 = vector.broadcast %169 : vector<1x16xf32> to vector<286x16xf32>
    %171 = arith.mulf %168, %170 : vector<286x16xf32>
    %c0_137 = arith.constant 0 : index
    %c0_138 = arith.constant 0 : index
    %172 = vector.load %arg12[%c0_137, %c0_138] : memref<1x16xf32, #tpu.memory_space<vmem>>, vector<1x16xf32>
    %173 = vector.broadcast %172 : vector<1x16xf32> to vector<286x16xf32>
    %174 = arith.addf %171, %173 : vector<286x16xf32>
    %cst_139 = arith.constant 0.000000e+00 : f32
    %175 = vector.broadcast %cst_139 : f32 to vector<286x16xf32>
    %176 = arith.maximumf %174, %175 : vector<286x16xf32>
    %cst_140 = arith.constant 0.000000e+00 : f32
    %177 = vector.broadcast %cst_140 : f32 to vector<324x8xf32>
    %c0_141 = arith.constant 0 : index
    %c0_142 = arith.constant 0 : index
    %178 = vector.load %arg19[%c0_141, %c0_142] : memref<324x8xf32, #tpu.memory_space<vmem>>, vector<324x8xf32>
    tpu.vector_store %arg19[%c0_141, %c0_142], %177 {strides = array<i32>} : memref<324x8xf32, #tpu.memory_space<vmem>>, vector<324x8xf32>,
    %179 = vector.extract_strided_slice %176 {offsets = [0, 0], sizes = [286, 8], strides = [1, 1]} : vector<286x16xf32> to vector<286x8xf32>
    %180 = vector.broadcast %0 : vector<286x1xf32> to vector<286x8xf32>
    %181 = arith.mulf %179, %180 : vector<286x8xf32>
    %c19_143 = arith.constant 19 : index
    %c0_144 = arith.constant 0 : index
    %182 = vector.load %arg19[%c19_143, %c0_144] : memref<324x8xf32, #tpu.memory_space<vmem>>, vector<286x8xf32>
    tpu.vector_store %arg19[%c19_143, %c0_144], %181 {strides = array<i32>} : memref<324x8xf32, #tpu.memory_space<vmem>>, vector<286x8xf32>,
    %cst_145 = arith.constant 0.000000e+00 : f32
    %183 = vector.broadcast %cst_145 : f32 to vector<286x8xf32>
    %c0_146 = arith.constant 0 : index
    %c0_147 = arith.constant 0 : index
    %184 = vector.load %arg19[%c0_146, %c0_147] : memref<324x8xf32, #tpu.memory_space<vmem>>, vector<286x8xf32>
    %185 = arith.truncf %184 : vector<286x8xf32> to vector<286x8xbf16>
    %c0_148 = arith.constant 0 : index
    %c0_149 = arith.constant 0 : index
    %c0_150 = arith.constant 0 : index
    %186 = vector.load %arg13[%c0_148, %c0_149, %c0_150] : memref<9x8x8xbf16, #tpu.memory_space<vmem>>, vector<1x8x8xbf16>
    %187 = vector.shape_cast %186 : vector<1x8x8xbf16> to vector<8x8xbf16>
    %cst_151 = arith.constant dense<0.000000e+00> : vector<286x8xf32>
    %188 = tpu.matmul %185, %187, %cst_151 {dimension_numbers = #tpu.dot_dimension_numbers<[1], [0], [0], [1], [0, 0, 1, 1], [], []>} : vector<286x8xbf16>, vector<8x8xbf16>, vector<286x8xf32> -> vector<286x8xf32>
    %189 = arith.addf %183, %188 : vector<286x8xf32>
    %c1_152 = arith.constant 1 : index
    %c0_153 = arith.constant 0 : index
    %190 = vector.load %arg19[%c1_152, %c0_153] : memref<324x8xf32, #tpu.memory_space<vmem>>, vector<286x8xf32>
    %191 = arith.truncf %190 : vector<286x8xf32> to vector<286x8xbf16>
    %c1_154 = arith.constant 1 : index
    %c0_155 = arith.constant 0 : index
    %c0_156 = arith.constant 0 : index
    %192 = vector.load %arg13[%c1_154, %c0_155, %c0_156] : memref<9x8x8xbf16, #tpu.memory_space<vmem>>, vector<1x8x8xbf16>
    %193 = vector.shape_cast %192 : vector<1x8x8xbf16> to vector<8x8xbf16>
    %cst_157 = arith.constant dense<0.000000e+00> : vector<286x8xf32>
    %194 = tpu.matmul %191, %193, %cst_157 {dimension_numbers = #tpu.dot_dimension_numbers<[1], [0], [0], [1], [0, 0, 1, 1], [], []>} : vector<286x8xbf16>, vector<8x8xbf16>, vector<286x8xf32> -> vector<286x8xf32>
    %195 = arith.addf %189, %194 : vector<286x8xf32>
    %c2_158 = arith.constant 2 : index
    %c0_159 = arith.constant 0 : index
    %196 = vector.load %arg19[%c2_158, %c0_159] : memref<324x8xf32, #tpu.memory_space<vmem>>, vector<286x8xf32>
    %197 = arith.truncf %196 : vector<286x8xf32> to vector<286x8xbf16>
    %c2_160 = arith.constant 2 : index
    %c0_161 = arith.constant 0 : index
    %c0_162 = arith.constant 0 : index
    %198 = vector.load %arg13[%c2_160, %c0_161, %c0_162] : memref<9x8x8xbf16, #tpu.memory_space<vmem>>, vector<1x8x8xbf16>
    %199 = vector.shape_cast %198 : vector<1x8x8xbf16> to vector<8x8xbf16>
    %cst_163 = arith.constant dense<0.000000e+00> : vector<286x8xf32>
    %200 = tpu.matmul %197, %199, %cst_163 {dimension_numbers = #tpu.dot_dimension_numbers<[1], [0], [0], [1], [0, 0, 1, 1], [], []>} : vector<286x8xbf16>, vector<8x8xbf16>, vector<286x8xf32> -> vector<286x8xf32>
    %201 = arith.addf %195, %200 : vector<286x8xf32>
    %c18_164 = arith.constant 18 : index
    %c0_165 = arith.constant 0 : index
    %202 = vector.load %arg19[%c18_164, %c0_165] : memref<324x8xf32, #tpu.memory_space<vmem>>, vector<286x8xf32>
    %203 = arith.truncf %202 : vector<286x8xf32> to vector<286x8xbf16>
    %c3_166 = arith.constant 3 : index
    %c0_167 = arith.constant 0 : index
    %c0_168 = arith.constant 0 : index
    %204 = vector.load %arg13[%c3_166, %c0_167, %c0_168] : memref<9x8x8xbf16, #tpu.memory_space<vmem>>, vector<1x8x8xbf16>
    %205 = vector.shape_cast %204 : vector<1x8x8xbf16> to vector<8x8xbf16>
    %cst_169 = arith.constant dense<0.000000e+00> : vector<286x8xf32>
    %206 = tpu.matmul %203, %205, %cst_169 {dimension_numbers = #tpu.dot_dimension_numbers<[1], [0], [0], [1], [0, 0, 1, 1], [], []>} : vector<286x8xbf16>, vector<8x8xbf16>, vector<286x8xf32> -> vector<286x8xf32>
    %207 = arith.addf %201, %206 : vector<286x8xf32>
    %c19_170 = arith.constant 19 : index
    %c0_171 = arith.constant 0 : index
    %208 = vector.load %arg19[%c19_170, %c0_171] : memref<324x8xf32, #tpu.memory_space<vmem>>, vector<286x8xf32>
    %209 = arith.truncf %208 : vector<286x8xf32> to vector<286x8xbf16>
    %c4_172 = arith.constant 4 : index
    %c0_173 = arith.constant 0 : index
    %c0_174 = arith.constant 0 : index
    %210 = vector.load %arg13[%c4_172, %c0_173, %c0_174] : memref<9x8x8xbf16, #tpu.memory_space<vmem>>, vector<1x8x8xbf16>
    %211 = vector.shape_cast %210 : vector<1x8x8xbf16> to vector<8x8xbf16>
    %cst_175 = arith.constant dense<0.000000e+00> : vector<286x8xf32>
    %212 = tpu.matmul %209, %211, %cst_175 {dimension_numbers = #tpu.dot_dimension_numbers<[1], [0], [0], [1], [0, 0, 1, 1], [], []>} : vector<286x8xbf16>, vector<8x8xbf16>, vector<286x8xf32> -> vector<286x8xf32>
    %213 = arith.addf %207, %212 : vector<286x8xf32>
    %c20_176 = arith.constant 20 : index
    %c0_177 = arith.constant 0 : index
    %214 = vector.load %arg19[%c20_176, %c0_177] : memref<324x8xf32, #tpu.memory_space<vmem>>, vector<286x8xf32>
    %215 = arith.truncf %214 : vector<286x8xf32> to vector<286x8xbf16>
    %c5_178 = arith.constant 5 : index
    %c0_179 = arith.constant 0 : index
    %c0_180 = arith.constant 0 : index
    %216 = vector.load %arg13[%c5_178, %c0_179, %c0_180] : memref<9x8x8xbf16, #tpu.memory_space<vmem>>, vector<1x8x8xbf16>
    %217 = vector.shape_cast %216 : vector<1x8x8xbf16> to vector<8x8xbf16>
    %cst_181 = arith.constant dense<0.000000e+00> : vector<286x8xf32>
    %218 = tpu.matmul %215, %217, %cst_181 {dimension_numbers = #tpu.dot_dimension_numbers<[1], [0], [0], [1], [0, 0, 1, 1], [], []>} : vector<286x8xbf16>, vector<8x8xbf16>, vector<286x8xf32> -> vector<286x8xf32>
    %219 = arith.addf %213, %218 : vector<286x8xf32>
    %c36_182 = arith.constant 36 : index
    %c0_183 = arith.constant 0 : index
    %220 = vector.load %arg19[%c36_182, %c0_183] : memref<324x8xf32, #tpu.memory_space<vmem>>, vector<286x8xf32>
    %221 = arith.truncf %220 : vector<286x8xf32> to vector<286x8xbf16>
    %c6_184 = arith.constant 6 : index
    %c0_185 = arith.constant 0 : index
    %c0_186 = arith.constant 0 : index
    %222 = vector.load %arg13[%c6_184, %c0_185, %c0_186] : memref<9x8x8xbf16, #tpu.memory_space<vmem>>, vector<1x8x8xbf16>
    %223 = vector.shape_cast %222 : vector<1x8x8xbf16> to vector<8x8xbf16>
    %cst_187 = arith.constant dense<0.000000e+00> : vector<286x8xf32>
    %224 = tpu.matmul %221, %223, %cst_187 {dimension_numbers = #tpu.dot_dimension_numbers<[1], [0], [0], [1], [0, 0, 1, 1], [], []>} : vector<286x8xbf16>, vector<8x8xbf16>, vector<286x8xf32> -> vector<286x8xf32>
    %225 = arith.addf %219, %224 : vector<286x8xf32>
    %c37_188 = arith.constant 37 : index
    %c0_189 = arith.constant 0 : index
    %226 = vector.load %arg19[%c37_188, %c0_189] : memref<324x8xf32, #tpu.memory_space<vmem>>, vector<286x8xf32>
    %227 = arith.truncf %226 : vector<286x8xf32> to vector<286x8xbf16>
    %c7_190 = arith.constant 7 : index
    %c0_191 = arith.constant 0 : index
    %c0_192 = arith.constant 0 : index
    %228 = vector.load %arg13[%c7_190, %c0_191, %c0_192] : memref<9x8x8xbf16, #tpu.memory_space<vmem>>, vector<1x8x8xbf16>
    %229 = vector.shape_cast %228 : vector<1x8x8xbf16> to vector<8x8xbf16>
    %cst_193 = arith.constant dense<0.000000e+00> : vector<286x8xf32>
    %230 = tpu.matmul %227, %229, %cst_193 {dimension_numbers = #tpu.dot_dimension_numbers<[1], [0], [0], [1], [0, 0, 1, 1], [], []>} : vector<286x8xbf16>, vector<8x8xbf16>, vector<286x8xf32> -> vector<286x8xf32>
    %231 = arith.addf %225, %230 : vector<286x8xf32>
    %c38_194 = arith.constant 38 : index
    %c0_195 = arith.constant 0 : index
    %232 = vector.load %arg19[%c38_194, %c0_195] : memref<324x8xf32, #tpu.memory_space<vmem>>, vector<286x8xf32>
    %233 = arith.truncf %232 : vector<286x8xf32> to vector<286x8xbf16>
    %c8_196 = arith.constant 8 : index
    %c0_197 = arith.constant 0 : index
    %c0_198 = arith.constant 0 : index
    %234 = vector.load %arg13[%c8_196, %c0_197, %c0_198] : memref<9x8x8xbf16, #tpu.memory_space<vmem>>, vector<1x8x8xbf16>
    %235 = vector.shape_cast %234 : vector<1x8x8xbf16> to vector<8x8xbf16>
    %cst_199 = arith.constant dense<0.000000e+00> : vector<286x8xf32>
    %236 = tpu.matmul %233, %235, %cst_199 {dimension_numbers = #tpu.dot_dimension_numbers<[1], [0], [0], [1], [0, 0, 1, 1], [], []>} : vector<286x8xbf16>, vector<8x8xbf16>, vector<286x8xf32> -> vector<286x8xf32>
    %237 = arith.addf %231, %236 : vector<286x8xf32>
    %c0_200 = arith.constant 0 : index
    %c0_201 = arith.constant 0 : index
    %238 = vector.load %arg14[%c0_200, %c0_201] : memref<1x8xf32, #tpu.memory_space<vmem>>, vector<1x8xf32>
    %239 = vector.broadcast %238 : vector<1x8xf32> to vector<286x8xf32>
    %240 = arith.mulf %237, %239 : vector<286x8xf32>
    %c0_202 = arith.constant 0 : index
    %c0_203 = arith.constant 0 : index
    %241 = vector.load %arg15[%c0_202, %c0_203] : memref<1x8xf32, #tpu.memory_space<vmem>>, vector<1x8xf32>
    %242 = vector.broadcast %241 : vector<1x8xf32> to vector<286x8xf32>
    %243 = arith.addf %240, %242 : vector<286x8xf32>
    %cst_204 = arith.constant 0.000000e+00 : f32
    %244 = vector.broadcast %cst_204 : f32 to vector<286x8xf32>
    %245 = arith.maximumf %243, %244 : vector<286x8xf32>
    %246 = tpu.iota {dimensions = array<i32: 0>} : vector<286x256xi32>
    %c0_205 = arith.constant 0 : index
    %c0_206 = arith.constant 0 : index
    %247 = vector.load %arg3[%c0_205, %c0_206] : memref<1x256xi32, #tpu.memory_space<vmem>>, vector<1x256xi32>
    %248 = vector.broadcast %247 : vector<1x256xi32> to vector<286x256xi32>
    %249 = arith.cmpi eq, %246, %248 : vector<286x256xi32>
    %250 = arith.extui %249 : vector<286x256xi1> to vector<286x256xi32>
    %251 = arith.sitofp %250 : vector<286x256xi32> to vector<286x256xf32>
    %252 = tpu.iota {dimensions = array<i32: 1>} : vector<8x8xi32>
    %253 = tpu.iota {dimensions = array<i32: 0>} : vector<8x8xi32>
    %c0_i32 = arith.constant 0 : i32
    %254 = vector.broadcast %c0_i32 : i32 to vector<8x8xi32>
    %255 = arith.addi %253, %254 : vector<8x8xi32>
    %256 = arith.cmpi eq, %252, %255 : vector<8x8xi32>
    %257 = arith.extui %256 : vector<8x8xi1> to vector<8x8xi32>
    %258 = arith.sitofp %257 : vector<8x8xi32> to vector<8x8xf32>
    %cst_207 = arith.constant dense<0.000000e+00> : vector<8x286xf32>
    %259 = tpu.matmul %258, %245, %cst_207 {dimension_numbers = #tpu.dot_dimension_numbers<[1], [1], [0], [0], [0, 0, 1, 0], [], []>} : vector<8x8xf32>, vector<286x8xf32>, vector<8x286xf32> -> vector<8x286xf32>
    %cst_208 = arith.constant dense<0.000000e+00> : vector<8x256xf32>
    %260 = tpu.matmul %259, %251, %cst_208 {dimension_numbers = #tpu.dot_dimension_numbers<[1], [0], [0], [1], [0, 0, 1, 1], [], []>} : vector<8x286xf32>, vector<286x256xf32>, vector<8x256xf32> -> vector<8x256xf32>
    %c0_209 = arith.constant 0 : index
    %c0_210 = arith.constant 0 : index
    %c0_211 = arith.constant 0 : index
    %261 = vector.load %arg16[%c0_209, %c0_210, %c0_211] : memref<1x32x256xf32, #tpu.memory_space<vmem>>, vector<1x8x256xf32>
    %262 = vector.shape_cast %261 : vector<1x8x256xf32> to vector<8x256xf32>
    %263 = vector.shape_cast %260 : vector<8x256xf32> to vector<1x8x256xf32>
    tpu.vector_store %arg16[%c0_209, %c0_210, %c0_211], %263 {strides = array<i32>} : memref<1x32x256xf32, #tpu.memory_space<vmem>>, vector<1x8x256xf32>,
    %264 = tpu.iota {dimensions = array<i32: 1>} : vector<8x16xi32>
    %265 = tpu.iota {dimensions = array<i32: 0>} : vector<8x16xi32>
    %c8_i32 = arith.constant 8 : i32
    %266 = vector.broadcast %c8_i32 : i32 to vector<8x16xi32>
    %267 = arith.addi %265, %266 : vector<8x16xi32>
    %268 = arith.cmpi eq, %264, %267 : vector<8x16xi32>
    %269 = arith.extui %268 : vector<8x16xi1> to vector<8x16xi32>
    %270 = arith.sitofp %269 : vector<8x16xi32> to vector<8x16xf32>
    %cst_212 = arith.constant dense<0.000000e+00> : vector<8x286xf32>
    %271 = tpu.matmul %270, %176, %cst_212 {dimension_numbers = #tpu.dot_dimension_numbers<[1], [1], [0], [0], [0, 0, 1, 0], [], []>} : vector<8x16xf32>, vector<286x16xf32>, vector<8x286xf32> -> vector<8x286xf32>
    %cst_213 = arith.constant dense<0.000000e+00> : vector<8x256xf32>
    %272 = tpu.matmul %271, %251, %cst_213 {dimension_numbers = #tpu.dot_dimension_numbers<[1], [0], [0], [1], [0, 0, 1, 1], [], []>} : vector<8x286xf32>, vector<286x256xf32>, vector<8x256xf32> -> vector<8x256xf32>
    %c0_214 = arith.constant 0 : index
    %c8_215 = arith.constant 8 : index
    %c0_216 = arith.constant 0 : index
    %273 = vector.load %arg16[%c0_214, %c8_215, %c0_216] : memref<1x32x256xf32, #tpu.memory_space<vmem>>, vector<1x8x256xf32>
    %274 = vector.shape_cast %273 : vector<1x8x256xf32> to vector<8x256xf32>
    %275 = vector.shape_cast %272 : vector<8x256xf32> to vector<1x8x256xf32>
    tpu.vector_store %arg16[%c0_214, %c8_215, %c0_216], %275 {strides = array<i32>} : memref<1x32x256xf32, #tpu.memory_space<vmem>>, vector<1x8x256xf32>,
    %276 = tpu.iota {dimensions = array<i32: 1>} : vector<8x8xi32>
    %277 = tpu.iota {dimensions = array<i32: 0>} : vector<8x8xi32>
    %c0_i32_217 = arith.constant 0 : i32
    %278 = vector.broadcast %c0_i32_217 : i32 to vector<8x8xi32>
    %279 = arith.addi %277, %278 : vector<8x8xi32>
    %280 = arith.cmpi eq, %276, %279 : vector<8x8xi32>
    %281 = arith.extui %280 : vector<8x8xi1> to vector<8x8xi32>
    %282 = arith.sitofp %281 : vector<8x8xi32> to vector<8x8xf32>
    %cst_218 = arith.constant dense<0.000000e+00> : vector<8x286xf32>
    %283 = tpu.matmul %282, %113, %cst_218 {dimension_numbers = #tpu.dot_dimension_numbers<[1], [1], [0], [0], [0, 0, 1, 0], [], []>} : vector<8x8xf32>, vector<286x8xf32>, vector<8x286xf32> -> vector<8x286xf32>
    %cst_219 = arith.constant dense<0.000000e+00> : vector<8x256xf32>
    %284 = tpu.matmul %283, %251, %cst_219 {dimension_numbers = #tpu.dot_dimension_numbers<[1], [0], [0], [1], [0, 0, 1, 1], [], []>} : vector<8x286xf32>, vector<286x256xf32>, vector<8x256xf32> -> vector<8x256xf32>
    %c0_220 = arith.constant 0 : index
    %c16_221 = arith.constant 16 : index
    %c0_222 = arith.constant 0 : index
    %285 = vector.load %arg16[%c0_220, %c16_221, %c0_222] : memref<1x32x256xf32, #tpu.memory_space<vmem>>, vector<1x8x256xf32>
    %286 = vector.shape_cast %285 : vector<1x8x256xf32> to vector<8x256xf32>
    %287 = vector.shape_cast %284 : vector<8x256xf32> to vector<1x8x256xf32>
    tpu.vector_store %arg16[%c0_220, %c16_221, %c0_222], %287 {strides = array<i32>} : memref<1x32x256xf32, #tpu.memory_space<vmem>>, vector<1x8x256xf32>,
    %288 = tpu.iota {dimensions = array<i32: 1>} : vector<8x24xi32>
    %289 = tpu.iota {dimensions = array<i32: 0>} : vector<8x24xi32>
    %c16_i32 = arith.constant 16 : i32
    %290 = vector.broadcast %c16_i32 : i32 to vector<8x24xi32>
    %291 = arith.addi %289, %290 : vector<8x24xi32>
    %292 = arith.cmpi eq, %288, %291 : vector<8x24xi32>
    %293 = arith.extui %292 : vector<8x24xi1> to vector<8x24xi32>
    %294 = arith.sitofp %293 : vector<8x24xi32> to vector<8x24xf32>
    %cst_223 = arith.constant dense<0.000000e+00> : vector<8x286xf32>
    %295 = tpu.matmul %294, %86, %cst_223 {dimension_numbers = #tpu.dot_dimension_numbers<[1], [1], [0], [0], [0, 0, 1, 0], [], []>} : vector<8x24xf32>, vector<286x24xf32>, vector<8x286xf32> -> vector<8x286xf32>
    %cst_224 = arith.constant dense<0.000000e+00> : vector<8x256xf32>
    %296 = tpu.matmul %295, %251, %cst_224 {dimension_numbers = #tpu.dot_dimension_numbers<[1], [0], [0], [1], [0, 0, 1, 1], [], []>} : vector<8x286xf32>, vector<286x256xf32>, vector<8x256xf32> -> vector<8x256xf32>
    %c0_225 = arith.constant 0 : index
    %c24 = arith.constant 24 : index
    %c0_226 = arith.constant 0 : index
    %297 = vector.load %arg16[%c0_225, %c24, %c0_226] : memref<1x32x256xf32, #tpu.memory_space<vmem>>, vector<1x8x256xf32>
    %298 = vector.shape_cast %297 : vector<1x8x256xf32> to vector<8x256xf32>
    %299 = vector.shape_cast %296 : vector<8x256xf32> to vector<1x8x256xf32>
    tpu.vector_store %arg16[%c0_225, %c24, %c0_226], %299 {strides = array<i32>} : memref<1x32x256xf32, #tpu.memory_space<vmem>>, vector<1x8x256xf32>,
    return
  }
  func.func @transform_0(%arg0: i32) -> (i32, i32, i32) {
    %c0_i32 = arith.constant 0 : i32
    %c0_i32_0 = arith.constant 0 : i32
    %c0_i32_1 = arith.constant 0 : i32
    return %arg0, %c0_i32, %c0_i32_0 : i32, i32, i32
  }
  func.func @transform_1(%arg0: i32) -> (i32, i32) {
    %c0_i32 = arith.constant 0 : i32
    %c0_i32_0 = arith.constant 0 : i32
    %c0_i32_1 = arith.constant 0 : i32
    return %c0_i32, %c0_i32_0 : i32, i32
  }
  func.func @transform_2(%arg0: i32) -> (i32, i32) {
    %c0_i32 = arith.constant 0 : i32
    %c0_i32_0 = arith.constant 0 : i32
    %c0_i32_1 = arith.constant 0 : i32
    return %c0_i32, %c0_i32_0 : i32, i32
  }
  func.func @transform_3(%arg0: i32) -> (i32, i32) {
    %c0_i32 = arith.constant 0 : i32
    %c0_i32_0 = arith.constant 0 : i32
    %c0_i32_1 = arith.constant 0 : i32
    return %c0_i32, %c0_i32_0 : i32, i32
  }
  func.func @transform_4(%arg0: i32) -> (i32, i32) {
    %c0_i32 = arith.constant 0 : i32
    %c0_i32_0 = arith.constant 0 : i32
    %c0_i32_1 = arith.constant 0 : i32
    return %c0_i32, %c0_i32_0 : i32, i32
  }
  func.func @transform_5(%arg0: i32) -> (i32, i32) {
    %c0_i32 = arith.constant 0 : i32
    %c0_i32_0 = arith.constant 0 : i32
    %c0_i32_1 = arith.constant 0 : i32
    return %c0_i32, %c0_i32_0 : i32, i32
  }
  func.func @transform_6(%arg0: i32) -> (i32, i32) {
    %c0_i32 = arith.constant 0 : i32
    %c0_i32_0 = arith.constant 0 : i32
    %c0_i32_1 = arith.constant 0 : i32
    return %c0_i32, %c0_i32_0 : i32, i32
  }
  func.func @transform_7(%arg0: i32) -> (i32, i32) {
    %c0_i32 = arith.constant 0 : i32
    %c0_i32_0 = arith.constant 0 : i32
    %c0_i32_1 = arith.constant 0 : i32
    return %c0_i32, %c0_i32_0 : i32, i32
  }
  func.func @transform_8(%arg0: i32) -> (i32, i32) {
    %c0_i32 = arith.constant 0 : i32
    %c0_i32_0 = arith.constant 0 : i32
    %c0_i32_1 = arith.constant 0 : i32
    return %c0_i32, %c0_i32_0 : i32, i32
  }
  func.func @transform_9(%arg0: i32) -> (i32, i32, i32) {
    %c0_i32 = arith.constant 0 : i32
    %c0_i32_0 = arith.constant 0 : i32
    %c0_i32_1 = arith.constant 0 : i32
    %c0_i32_2 = arith.constant 0 : i32
    return %c0_i32, %c0_i32_0, %c0_i32_1 : i32, i32, i32
  }
  func.func @transform_10(%arg0: i32) -> (i32, i32) {
    %c0_i32 = arith.constant 0 : i32
    %c0_i32_0 = arith.constant 0 : i32
    %c0_i32_1 = arith.constant 0 : i32
    return %c0_i32, %c0_i32_0 : i32, i32
  }
  func.func @transform_11(%arg0: i32) -> (i32, i32) {
    %c0_i32 = arith.constant 0 : i32
    %c0_i32_0 = arith.constant 0 : i32
    %c0_i32_1 = arith.constant 0 : i32
    return %c0_i32, %c0_i32_0 : i32, i32
  }
  func.func @transform_12(%arg0: i32) -> (i32, i32, i32) {
    %c0_i32 = arith.constant 0 : i32
    %c0_i32_0 = arith.constant 0 : i32
    %c0_i32_1 = arith.constant 0 : i32
    %c0_i32_2 = arith.constant 0 : i32
    return %c0_i32, %c0_i32_0, %c0_i32_1 : i32, i32, i32
  }
  func.func @transform_13(%arg0: i32) -> (i32, i32) {
    %c0_i32 = arith.constant 0 : i32
    %c0_i32_0 = arith.constant 0 : i32
    %c0_i32_1 = arith.constant 0 : i32
    return %c0_i32, %c0_i32_0 : i32, i32
  }
  func.func @transform_14(%arg0: i32) -> (i32, i32) {
    %c0_i32 = arith.constant 0 : i32
    %c0_i32_0 = arith.constant 0 : i32
    %c0_i32_1 = arith.constant 0 : i32
    return %c0_i32, %c0_i32_0 : i32, i32
  }
  func.func @transform_15(%arg0: i32) -> (i32, i32, i32) {
    %c0_i32 = arith.constant 0 : i32
    %c0_i32_0 = arith.constant 0 : i32
    %c0_i32_1 = arith.constant 0 : i32
    return %arg0, %c0_i32, %c0_i32_0 : i32, i32, i32
  }
}

</mosaic_0001>

<bundles_post_ra>
// kernel: inceptionx3_forward.1
= control target key start
LH: loop header
LB: loop body
LE: loop exit
PB: predicated region body
PF: predicated region fallthrough
CT: control target
= control target key end

     0   :  { %s9512_s18 = smov 0   ;;  %s14482_s0 = inlined_call_operand.vmem [shape: bf16[2,256,4], index: 0, kind: input, shape index: {}]   ;;  %s14483_s1 = inlined_call_operand.vmem [shape: f32[286,1], index: 1, kind: input, shape index: {}]   ;;  %s14484_s2 = inlined_call_operand.vmem [shape: s32[1,256], index: 2, kind: input, shape index: {}]   ;;  %s14485_s3 = inlined_call_operand.vmem [shape: bf16[4,24], index: 3, kind: input, shape index: {}]   ;;  %s14486_s4 = inlined_call_operand.vmem [shape: f32[1,24], index: 4, kind: input, shape index: {}]   ;;  %s14487_s5 = inlined_call_operand.vmem [shape: f32[1,24], index: 5, kind: input, shape index: {}]   ;;  %s14488_s6 = inlined_call_operand.vmem [shape: bf16[4,8], index: 6, kind: input, shape index: {}]   ;;  %s14489_s7 = inlined_call_operand.vmem [shape: f32[1,8], index: 7, kind: input, shape index: {}]   ;;  %s14490_s8 = inlined_call_operand.vmem [shape: f32[1,8], index: 8, kind: input, shape index: {}]   ;;  %s14491_s9 = inlined_call_operand.vmem [shape: bf16[9,16,16], index: 9, kind: input, shape index: {}]   ;;  %s14492_s10 = inlined_call_operand.vmem [shape: f32[1,16], index: 10, kind: input, shape index: {}]   ;;  %s14493_s11 = inlined_call_operand.vmem [shape: f32[1,16], index: 11, kind: input, shape index: {}]   ;;  %s14494_s12 = inlined_call_operand.vmem [shape: bf16[9,8,8], index: 12, kind: input, shape index: {}]   ;;  %s14495_s13 = inlined_call_operand.vmem [shape: f32[1,8], index: 13, kind: input, shape index: {}]   ;;  %s14496_s14 = inlined_call_operand.vmem [shape: f32[1,8], index: 14, kind: input, shape index: {}]   ;;  %s14497_s15 = inlined_call_operand.vmem [shape: f32[2,32,256], index: 15, kind: output, shape index: {}]  }
   0x1 LB: > { %s8347_s19 = sadd.s32 4294967295, %s9427_s18   ;;  %p8351_p0 = scmp.ge.s32.totalorder %s9427_s18, 1  ;;  %s9427_s18 = sphi %s9512_s18, %s25_s18  }
   0x2   : > { %p437_p1 = scmp.lt.s32.totalorder %s9427_s18, 3 }
   0x4   : > { %p438_p2 = pnand %p8351_p0, %p437_p1 }
   0x6   : > { %441 = sbr.rel (%p438_p2) target bundleno = 2699 (0xa8b), region = 80 }
   0xb   : > { %v498_v0 = vld [vmem:[%s14483_s1 + $0x10] sm:$0xff]  ;;  %v496_v1 = vld [vmem:[%s14483_s1] sm:$0xff]  ;;  %vm1002_vm0 = vcmask 1041408   ;;  %p485_p3 = scmp.lt.s32.totalorder %s8347_s19, 1  ;;  %v9429_v2 = vmov 0   ;;  %vm532_vm1 = vcmask 31744  }
   0xc   : > { %9407 = vset.pattern.permute.xlu1 %v9429_v2  ;;  %9406 = vset.pattern.permute.xlu0 %v9429_v2  ;;  %v500_v3 = vld [vmem:[%s14483_s1 + $0x20] sm:$0xff]  ;;  %v14509_v5 = vmov 0.0   ;;  %v499_v9 = vld [vmem:[%s14483_s1 + $0x18] sm:$0xff]  ;;  %v497_v12 = vld [vmem:[%s14483_s1 + $0x8] sm:$0xff]  ;;  %vm1221_vm2 = vcmask 130048   ;;  %vm573_vm3 = vcmask 27648  }
   0xd   : > { %1276 = vperm.xlu1 %9407, %v498_v0   ;;  %1266 = vperm.xlu0 %9406, %v496_v1   ;;  %v947_v4 = vld [vmem:[%s14485_s3] sm:$0x3]  ;;  %s15472_s19 = smov (!%p485_p3, %s8347_s19), 1  ;;  %533 = vst.msk [vmem:[#allocation2] sm:$0xff] %vm532_vm1, %v14509_v5  ;;  %v501_v16 = vld [vmem:[%s14483_s1 + $0x28] sm:$0xff]  ;;  %v503_v28 = vld [vmem:[%s14483_s1 + $0x38] sm:$0xff] }
   0xe   : > { %9408 = vset.pattern.permute.xlu2 %v9429_v2  ;;  %v1004_v6 = vsel %vm1002_vm0, %v947_v4, 0  ;;  %534 = vst.msk [vmem:[#allocation2 + $0x8] sm:$0xff] %vm532_vm1, %v14509_v5  ;;  %s9305_s28 = sshll.u32 %s15472_s19, 7  ;;  %v1859_v7 = vld [vmem:[%s14488_s6] sm:$0x3]  ;;  %v502_v29 = vld [vmem:[%s14483_s1 + $0x30] sm:$0xff] }
   0xf   : > { %1286 = vperm.xlu2 %9408, %v500_v3   ;;  %1013 = vmatpush.bf16.msra.mxu0 %v1004_v6  ;;  %535 = vst.msk [vmem:[#allocation2 + $0x10] sm:$0xff] %vm532_vm1, %v14509_v5  ;;  %s9548_s20 = scalar_lea.vmem %s14482_s0, %s9305_s28  ;;  %v1915_v8 = vsel %vm1002_vm0, %v1859_v7, 0  ;;  %v504_v35 = vld [vmem:[%s14483_s1 + $0x40] sm:$0xff]  ;;  %v506_v48 = vld [vmem:[%s14483_s1 + $0x50] sm:$0xff]  ;;  %v505_v49 = vld [vmem:[%s14483_s1 + $0x48] sm:$0xff]  ;;  %vm1515_vm4 = vcmask 128000  }
  0x10   : > { %536 = vst.msk [vmem:[#allocation2 + $0x18] sm:$0xff] %vm532_vm1, %v14509_v5  ;;  %v9317_v10 = vld [vmem:[%s9548_s20] sm:$0xff]   ;;  %v9380_v11 = vld [vmem:[%s9548_s20 + $0x8] sm:$0xff]   ;;  %1924 = vmatpush.bf16.msra.mxu1 %v1915_v8  ;;  %v507_v53 = vld [vmem:[%s14483_s1 + $0x58] sm:$0xff]  ;;  %vm4724_vm5 = vcmask 1043456   ;;  %vm14731_vm6 = vcmask 64512  }
  0x11   : > { %537 = vst.msk [vmem:[#allocation2 + $0x20] sm:$0xff] %vm532_vm1, %v14509_v5  ;;  %v9318_v13 = vunpack.c.l.bf16 %v9317_v10  ;;  %v9319_v14 = vunpack.c.h.bf16 %v9317_v10  ;;  %v9322_v15 = vunpack.c.l.bf16 %v9380_v11  ;;  %v9323_v17 = vunpack.c.h.bf16 %v9380_v11  ;;  %v509_v63 = vld [vmem:[%s14483_s1 + $0x68] sm:$0xff]  ;;  %v508_v3 = vld [vmem:[%s14483_s1 + $0x60] sm:$0xff]  ;;  %v510_v8 = vld [vmem:[%s14483_s1 + $0x70] sm:$0xff]  ;;  %s9306_s24 = sshll.u32 %s15472_s19, 6 }
  0x12   : > { %538 = vst.msk [vmem:[#allocation2 + $0x28] sm:$0xff] %vm532_vm1, %v14509_v5  ;;  %vm1262_vm7 = vcmask 125952   ;;  %vm4557_vm8 = vcmask 62464   ;;  %vm4484_vm9 = vcmask 60416   ;;  %s13755_s27 = scalar_lea.vmem %s14497_s15, %s9306_s24 }
  0x13   : > { %539 = vst.msk [vmem:[#allocation2 + $0x30] sm:$0xff] %vm532_vm1, %v14509_v5 }
  0x14   : > { %579 = vst.msk [vmem:[#allocation2 + $0x13] sm:$0xff] %vm532_vm1, %v9318_v13  ;;  %v671_v18 = vld [vmem:[#allocation2] sm:$0xff] }
  0x15   : > { %1281 = vperm.xlu1 %9407, %v499_v9   ;;  %1271 = vperm.xlu0 %9406, %v497_v12   ;;  %580 = vst.msk [vmem:[#allocation2 + $0x1b] sm:$0xff] %vm532_vm1, %v9319_v14  ;;  %v672_v19 = vld [vmem:[#allocation2 + $0x8] sm:$0xff]  ;;  %v9381_v12 = vld [vmem:[%s9548_s20 + $0x10] sm:$0xff]  }
  0x16   : > { %v707_v20 = vld [vmem:[#allocation2 + $0x1] sm:$0xff]  ;;  %585 = vst.msk [vmem:[#allocation2 + $0x25] sm:$0xff] %vm532_vm1, %v9322_v15  ;;  %v708_v22 = vld [vmem:[#allocation2 + $0x9] sm:$0xff] }
  0x17   : > { %v743_v21 = vld [vmem:[#allocation2 + $0x2] sm:$0xff]  ;;  %v744_v23 = vld [vmem:[#allocation2 + $0xa] sm:$0xff]  ;;  %v1517_v24 = vadd.f32 %v707_v20, %v671_v18  ;;  %1291 = vperm.xlu2 %9408, %v501_v16   ;;  %586 = vst.msk [vmem:[#allocation2 + $0x2d] sm:$0xff] %vm532_vm1, %v9323_v17  ;;  %v1518_v25 = vadd.f32 %v708_v22, %v672_v19  ;;  %v511_v17 = vld [vmem:[%s14483_s1 + $0x78] sm:$0xff]  ;;  %v9326_v20 = vunpack.c.l.bf16 %v9381_v12  ;;  %v9327_v22 = vunpack.c.h.bf16 %v9381_v12 }
  0x18   : > { %540 = vst.msk [vmem:[#allocation2 + $0x38] sm:$0xff] %vm532_vm1, %v14509_v5  ;;  %v512_v15 = vld [vmem:[%s14483_s1 + $0x80] sm:$0xff]  ;;  %v513_v18 = vld [vmem:[%s14483_s1 + $0x88] sm:$0xff]  ;;  %v9382_v19 = vld [vmem:[%s9548_s20 + $0x18] sm:$0xff]  }
  0x19   : > { %v1553_v26 = vadd.f32 %v1517_v24, %v743_v21  ;;  %v1554_v27 = vadd.f32 %v1518_v25, %v744_v23  ;;  %541 = vst.msk [vmem:[#allocation2 + $0x40] sm:$0xff] %vm532_vm1, %v14509_v5  ;;  %v9330_v24 = vunpack.c.l.bf16 %v9382_v19 }
  0x1a   : > { %542 = vst.msk [vmem:[#allocation2 + $0x48] sm:$0xff] %vm532_vm1, %v14509_v5 }
  0x1b   : > { %v9586_v30 = vld [vmem:[#allocation2 + $0x12] sm:$0xff]  ;;  %543 = vst.msk [vmem:[#allocation2 + $0x50] sm:$0xff] %vm532_vm1, %v14509_v5 }
  0x1c   : > { %v782_v31 = vld [vmem:[#allocation2 + $0x13] sm:$0xff]  ;;  %v783_v33 = vld [vmem:[#allocation2 + $0x1b] sm:$0xff]  ;;  %v1589_v34 = vadd.f32 %v1553_v26, %v9586_v30  ;;  %544 = vst.msk [vmem:[#allocation2 + $0x58] sm:$0xff] %vm532_vm1, %v14509_v5 }
  0x1d   : > { %v9590_v32 = vld [vmem:[#allocation2 + $0x1a] sm:$0xff]  ;;  %1301 = vperm.xlu1 %9407, %v503_v28   ;;  %1296 = vperm.xlu0 %9406, %v502_v29   ;;  %v929_v37 = vpack.c.bf16 %v783_v33, %v782_v31  ;;  %545 = vst.msk [vmem:[#allocation2 + $0x60] sm:$0xff] %vm532_vm1, %v14509_v5  ;;  %v9603_v41 = vld [vmem:[#allocation2 + $0x24] sm:$0xff]  ;;  %v673_v0 = vld [vmem:[#allocation2 + $0x10] sm:$0xff] }
  0x1e   : > { %v818_v36 = vld [vmem:[#allocation2 + $0x14] sm:$0xff]  ;;  %v1590_v38 = vadd.f32 %v1554_v27, %v9590_v32  ;;  %v819_v39 = vld [vmem:[#allocation2 + $0x1c] sm:$0xff]  ;;  %v1625_v40 = vadd.f32 %v1589_v34, %v782_v31  ;;  %546 = vst.msk [vmem:[#allocation2 + $0x68] sm:$0xff] %vm532_vm1, %v14509_v5  ;;  %v9608_v43 = vld [vmem:[#allocation2 + $0x2c] sm:$0xff]  ;;  %v9331_v27 = vunpack.c.h.bf16 %v9382_v19 }
  0x1f   : > { %8356 = vmatmul.msk.bf16.vlgmr.msra.gmra.mxu0 %vm532_vm1, %v929_v37  ;;  %547 = vst.msk [vmem:[#allocation2 + $0x70] sm:$0xff] %vm532_vm1, %v14509_v5  ;;  %1306 = vperm.xlu2 %9408, %v504_v35   ;;  %v857_v46 = vld [vmem:[#allocation2 + $0x25] sm:$0xff]  ;;  %v858_v50 = vld [vmem:[#allocation2 + $0x2d] sm:$0xff]  ;;  %v674_v4 = vld [vmem:[#allocation2 + $0x18] sm:$0xff] }
  0x20   : > { %v1626_v42 = vadd.f32 %v1590_v38, %v783_v33  ;;  %v1661_v44 = vadd.f32 %v1625_v40, %v818_v36  ;;  %548 = vst.msk [vmem:[#allocation2 + $0x78] sm:$0xff] %vm532_vm1, %v14509_v5  ;;  %v893_v52 = vld [vmem:[#allocation2 + $0x26] sm:$0xff]  ;;  %v894_v54 = vld [vmem:[#allocation2 + $0x2e] sm:$0xff]  ;;  %v710_v6 = vld [vmem:[#allocation2 + $0x19] sm:$0xff] }
  0x21   : > { %549 = vst.msk [vmem:[#allocation2 + $0x80] sm:$0xff] %vm532_vm1, %v14509_v5  ;;  %v784_v60 = vld [vmem:[#allocation2 + $0x23] sm:$0xff]  ;;  %v785_v61 = vld [vmem:[#allocation2 + $0x2b] sm:$0xff]  ;;  %v1520_v10 = vadd.f32 %v710_v6, %v674_v4  ;;  %v515_v34 = vld [vmem:[%s14483_s1 + $0x98] sm:$0xff] }
  0x22   : > { %v1662_v45 = vadd.f32 %v1626_v42, %v819_v39  ;;  %v1697_v47 = vadd.f32 %v1661_v44, %v9603_v41  ;;  %550 = vst.msk [vmem:[#allocation2 + $0x88] sm:$0xff] %vm532_vm1, %v14509_v5  ;;  %v709_v1 = vld [vmem:[#allocation2 + $0x11] sm:$0xff]  ;;  %v930_v7 = vpack.c.bf16 %v785_v61, %v784_v60  ;;  %v747_v13 = vld [vmem:[#allocation2 + $0x22] sm:$0xff] }
  0x23   : > { %551 = vst.msk [vmem:[#allocation2 + $0x90] sm:$0xff] %vm532_vm1, %v14509_v5  ;;  %v1519_v9 = vadd.f32 %v709_v1, %v673_v0  ;;  %v1556_v14 = vadd.f32 %v1520_v10, %v9590_v32  ;;  %v748_v16 = vld [vmem:[#allocation2 + $0x2a] sm:$0xff]  ;;  %v675_v25 = vld [vmem:[#allocation2 + $0x20] sm:$0xff] }
  0x24   : > { %v1698_v51 = vadd.f32 %v1662_v45, %v9608_v43  ;;  %552 = vst.msk [vmem:[#allocation2 + $0x98] sm:$0xff] %vm532_vm1, %v14509_v5  ;;  %v1733_v55 = vadd.f32 %v1697_v47, %v857_v46  ;;  %v9383_v26 = vld [vmem:[%s9548_s20 + $0x20] sm:$0xff]   ;;  %v676_v28 = vld [vmem:[#allocation2 + $0x28] sm:$0xff]  ;;  %v514_v36 = vld [vmem:[%s14483_s1 + $0x90] sm:$0xff] }
  0x25   : > { %553 = vst.msk [vmem:[#allocation2 + $0xa0] sm:$0xff] %vm532_vm1, %v14509_v5  ;;  %1316 = vperm.xlu1 %9407, %v506_v48   ;;  %1311 = vperm.xlu0 %9406, %v505_v49   ;;  %v1555_v11 = vadd.f32 %v1519_v9, %v9586_v30  ;;  %v1592_v23 = vadd.f32 %v1556_v14, %v748_v16  ;;  %v711_v29 = vld [vmem:[#allocation2 + $0x21] sm:$0xff]  ;;  %v712_v30 = vld [vmem:[#allocation2 + $0x29] sm:$0xff]  ;;  %v9334_v32 = vunpack.c.l.bf16 %v9383_v26  ;;  %v9335_v35 = vunpack.c.h.bf16 %v9383_v26 }
  0x26   : > { %v1734_v56 = vadd.f32 %v1698_v51, %v858_v50  ;;  %554 = vst.msk [vmem:[#allocation2 + $0xa8] sm:$0xff] %vm532_vm1, %v14509_v5  ;;  %v1769_v57 = vadd.f32 %v1733_v55, %v893_v52  ;;  %v1521_v37 = vadd.f32 %v711_v29, %v675_v25  ;;  %v1522_v38 = vadd.f32 %v712_v30, %v676_v28  ;;  %v516_v39 = vld [vmem:[%s14483_s1 + $0xa0] sm:$0xff]  ;;  %v518_v48 = vld [vmem:[%s14483_s1 + $0xb0] sm:$0xff]  ;;  %v521_v25 = vld [vmem:[%s14483_s1 + $0xc8] sm:$0xff] }
  0x27   : > { %555 = vst.msk [vmem:[#allocation2 + $0xb0] sm:$0xff] %vm532_vm1, %v14509_v5  ;;  %1321 = vperm.xlu2 %9408, %v507_v53   ;;  %v1591_v21 = vadd.f32 %v1555_v11, %v747_v13  ;;  %v1628_v33 = vadd.f32 %v1592_v23, %v785_v61  ;;  %v520_v29 = vld [vmem:[%s14483_s1 + $0xc0] sm:$0xff] }
  0x28   : > { %v1770_v58 = vadd.f32 %v1734_v56, %v894_v54  ;;  %556 = vst.msk [vmem:[#allocation2 + $0xb8] sm:$0xff] %vm532_vm1, %v14509_v5  ;;  %v1805_v59 = vmul.f32 0.11111111, %v1769_v57  ;;  %v1557_v44 = vadd.f32 %v1521_v37, %v747_v13  ;;  %v1558_v45 = vadd.f32 %v1522_v38, %v748_v16 }
  0x29   : > { %557 = vst.msk [vmem:[#allocation2 + $0xc0] sm:$0xff] %vm532_vm1, %v14509_v5  ;;  %v1627_v31 = vadd.f32 %v1591_v21, %v784_v60  ;;  %v1664_v42 = vadd.f32 %v1628_v33, %v9608_v43  ;;  %v517_v60 = vld [vmem:[%s14483_s1 + $0xa8] sm:$0xff] }
  0x2a   : > { %v1806_v62 = vmul.f32 0.11111111, %v1770_v58  ;;  %558 = vst.msk [vmem:[#allocation2 + $0xc8] sm:$0xff] %vm532_vm1, %v14509_v5 }
  0x2b   : > { %559 = vst.msk [vmem:[#allocation2 + $0xd0] sm:$0xff] %vm532_vm1, %v14509_v5  ;;  %v1663_v40 = vadd.f32 %v1627_v31, %v9603_v41 }
  0x2c   : > { %v1841_v2 = vpack.c.bf16 %v1806_v62, %v1805_v59  ;;  %560 = vst.msk [vmem:[#allocation2 + $0xd8] sm:$0xff] %vm532_vm1, %v14509_v5 }
  0x2d   : > { %561 = vst.msk [vmem:[#allocation2 + $0xe0] sm:$0xff] %vm532_vm1, %v14509_v5  ;;  %1331 = vperm.xlu1 %9407, %v509_v63   ;;  %1326 = vperm.xlu0 %9406, %v508_v3   ;;  %v519_v63 = vld [vmem:[%s14483_s1 + $0xb8] sm:$0xff] }
  0x2e   : > { %8374 = vmatmul.msk.bf16.vlgmr.msra.gmra.mxu1 %vm532_vm1, %v1841_v2  ;;  %562 = vst.msk [vmem:[#allocation2 + $0xe8] sm:$0xff] %vm532_vm1, %v14509_v5 }
  0x2f   : > { %563 = vst.msk [vmem:[#allocation2 + $0xf0] sm:$0xff] %vm532_vm1, %v14509_v5  ;;  %8357 = vmatmul.msk.bf16.gmra.mxu0 %vm532_vm1, %v930_v7  ;;  %1336 = vperm.xlu2 %9408, %v510_v8  }
  0x30   : > { %564 = vst.msk [vmem:[#allocation2 + $0xf8] sm:$0xff] %vm532_vm1, %v14509_v5 }
  0x31   : > { %565 = vst.msk [vmem:[#allocation2 + $0x100] sm:$0xff] %vm532_vm1, %v14509_v5 }
  0x32   : > { %566 = vst.msk [vmem:[#allocation2 + $0x108] sm:$0xff] %vm532_vm1, %v14509_v5 }
  0x33   : > { %567 = vst.msk [vmem:[#allocation2 + $0x110] sm:$0xff] %vm532_vm1, %v14509_v5 }
  0x34   : > { %568 = vst.msk [vmem:[#allocation2 + $0x118] sm:$0xff] %vm532_vm1, %v14509_v5 }
  0x35   : > { %569 = vst.msk [vmem:[#allocation2 + $0x120] sm:$0xff] %vm532_vm1, %v14509_v5  ;;  %1346 = vperm.xlu1 %9407, %v512_v15   ;;  %1341 = vperm.xlu0 %9406, %v511_v17  }
  0x36   : > { %570 = vst.msk [vmem:[#allocation2 + $0x128] sm:$0xff] %vm532_vm1, %v14509_v5 }
  0x37   : > { %571 = vst.msk [vmem:[#allocation2 + $0x130] sm:$0xff] %vm532_vm1, %v14509_v5  ;;  %1351 = vperm.xlu2 %9408, %v513_v18  }
  0x38   : > { %572 = vst.msk [vmem:[#allocation2 + $0x138] sm:$0xff] %vm532_vm1, %v14509_v5 }
  0x39   : > { %591 = vst.msk [vmem:[#allocation2 + $0x37] sm:$0xff] %vm532_vm1, %v9326_v20 }
  0x3a   : > { %592 = vst.msk [vmem:[#allocation2 + $0x3f] sm:$0xff] %vm532_vm1, %v9327_v22 }
  0x3b   : > { %597 = vst.msk [vmem:[#allocation2 + $0x49] sm:$0xff] %vm532_vm1, %v9330_v24 }
  0x3c   : > { %598 = vst.msk [vmem:[#allocation2 + $0x51] sm:$0xff] %vm532_vm1, %v9331_v27  ;;  %v9384_v27 = vld [vmem:[%s9548_s20 + $0x28] sm:$0xff]  }
  0x3d   : > { %1361 = vperm.xlu1 %9407, %v515_v34   ;;  %603 = vst.msk [vmem:[#allocation2 + $0x5b] sm:$0xff] %vm532_vm1, %v9334_v32  ;;  %1356 = vperm.xlu0 %9406, %v514_v36   ;;  %v9338_v30 = vunpack.c.l.bf16 %v9384_v27  ;;  %v522_v34 = vld [vmem:[%s14483_s1 + $0xd0] sm:$0xff] }
  0x3e   : > { %604 = vst.msk [vmem:[#allocation2 + $0x63] sm:$0xff] %vm532_vm1, %v9335_v35  ;;  %v9339_v35 = vunpack.c.h.bf16 %v9384_v27 }
  0x3f   : > { %1366 = vperm.xlu2 %9408, %v516_v39   ;;  %609 = vst.msk [vmem:[#allocation2 + $0x6d] sm:$0xff] %vm532_vm1, %v9338_v30 }
  0x40   : > { %v822_v46 = vld [vmem:[#allocation2 + $0x34] sm:$0xff]  ;;  %610 = vst.msk [vmem:[#allocation2 + $0x75] sm:$0xff] %vm532_vm1, %v9339_v35 }
  0x41   : > { %v859_v47 = vld [vmem:[#allocation2 + $0x35] sm:$0xff]  ;;  %v1699_v50 = vadd.f32 %v1663_v40, %v822_v46  ;;  %v860_v41 = vld [vmem:[#allocation2 + $0x3d] sm:$0xff]  ;;  %1224 = vst.msk [vmem:[#allocation3 + $0x10] sm:$0xff] %vm1221_vm2, %v14509_v5 }
  0x42   : > { %v823_v49 = vld [vmem:[#allocation2 + $0x3c] sm:$0xff]  ;;  %v749_v53 = vld [vmem:[#allocation2 + $0x32] sm:$0xff]  ;;  %v9722_v1 = vld [vmem:[#allocation2 + $0x44] sm:$0xff]  ;;  %1225 = vst.msk [vmem:[#allocation3 + $0x18] sm:$0xff] %vm1221_vm2, %v14509_v5 }
  0x43   : > { %v895_v51 = vld [vmem:[#allocation2 + $0x36] sm:$0xff]  ;;  %v1700_v52 = vadd.f32 %v1664_v42, %v823_v49  ;;  %v896_v55 = vld [vmem:[#allocation2 + $0x3e] sm:$0xff]  ;;  %v1735_v56 = vadd.f32 %v1699_v50, %v859_v47  ;;  %v1593_v58 = vadd.f32 %v1557_v44, %v749_v53  ;;  %v825_v8 = vld [vmem:[#allocation2 + $0x4c] sm:$0xff]  ;;  %1222 = vst.msk [vmem:[#allocation3] sm:$0xff] %vm1221_vm2, %v14509_v5 }
  0x44   : > { %v750_v54 = vld [vmem:[#allocation2 + $0x3a] sm:$0xff]  ;;  %v677_v4 = vld [vmem:[#allocation2 + $0x30] sm:$0xff]  ;;  %v861_v16 = vld [vmem:[#allocation2 + $0x45] sm:$0xff]  ;;  %1223 = vst.msk [vmem:[#allocation3 + $0x8] sm:$0xff] %vm1221_vm2, %v14509_v5 }
  0x45   : > { %v786_v43 = vld [vmem:[#allocation2 + $0x33] sm:$0xff]  ;;  %v787_v57 = vld [vmem:[#allocation2 + $0x3b] sm:$0xff]  ;;  %v1594_v59 = vadd.f32 %v1558_v45, %v750_v54  ;;  %v1736_v61 = vadd.f32 %v1700_v52, %v860_v41  ;;  %v1771_v0 = vadd.f32 %v1735_v56, %v895_v51  ;;  %1376 = vperm.xlu1 %9407, %v518_v48   ;;  %1371 = vperm.xlu0 %9406, %v517_v60   ;;  %v752_v22 = vld [vmem:[#allocation2 + $0x4a] sm:$0xff] }
  0x46   : > { %v931_v62 = vpack.c.bf16 %v787_v57, %v786_v43  ;;  %v1629_v2 = vadd.f32 %v1593_v58, %v786_v43  ;;  %v678_v6 = vld [vmem:[#allocation2 + $0x38] sm:$0xff]  ;;  %v862_v20 = vld [vmem:[#allocation2 + $0x4d] sm:$0xff]  ;;  %v751_v21 = vld [vmem:[#allocation2 + $0x42] sm:$0xff]  ;;  %1226 = vst.msk [vmem:[#allocation3 + $0x20] sm:$0xff] %vm1221_vm2, %v14509_v5 }
  0x47   : > { %v1630_v3 = vadd.f32 %v1594_v59, %v787_v57  ;;  %v1772_v7 = vadd.f32 %v1736_v61, %v896_v55  ;;  %v713_v9 = vld [vmem:[#allocation2 + $0x31] sm:$0xff]  ;;  %v714_v10 = vld [vmem:[#allocation2 + $0x39] sm:$0xff]  ;;  %v1807_v11 = vmul.f32 0.11111111, %v1771_v0  ;;  %1381 = vperm.xlu2 %9408, %v519_v63   ;;  %v897_v36 = vld [vmem:[#allocation2 + $0x46] sm:$0xff]  ;;  %1227 = vst.msk [vmem:[#allocation3 + $0x28] sm:$0xff] %vm1221_vm2, %v14509_v5 }
  0x48   : > { %8358 = vmatmul.msk.bf16.gmra.mxu0 %vm532_vm1, %v931_v62  ;;  %v1665_v12 = vadd.f32 %v1629_v2, %v822_v46  ;;  %v1523_v14 = vadd.f32 %v713_v9, %v677_v4  ;;  %v1524_v17 = vadd.f32 %v714_v10, %v678_v6  ;;  %v898_v37 = vld [vmem:[#allocation2 + $0x4e] sm:$0xff]  ;;  %v788_v38 = vld [vmem:[#allocation2 + $0x43] sm:$0xff]  ;;  %v523_v51 = vld [vmem:[%s14483_s1 + $0xd8] sm:$0xff]  ;;  %1228 = vst.msk [vmem:[#allocation3 + $0x30] sm:$0xff] %vm1221_vm2, %v14509_v5 }
  0x49   : > { %v1666_v13 = vadd.f32 %v1630_v3, %v823_v49  ;;  %v1808_v15 = vmul.f32 0.11111111, %v1772_v7  ;;  %v789_v39 = vld [vmem:[#allocation2 + $0x4b] sm:$0xff]  ;;  %v679_v40 = vld [vmem:[#allocation2 + $0x40] sm:$0xff]  ;;  %v826_v58 = vld [vmem:[#allocation2 + $0x54] sm:$0xff]  ;;  %1229 = vst.msk [vmem:[#allocation3 + $0x38] sm:$0xff] %vm1221_vm2, %v14509_v5 }
  0x4a   : > { %v1701_v18 = vadd.f32 %v1665_v12, %v9722_v1  ;;  %v1559_v23 = vadd.f32 %v1523_v14, %v749_v53  ;;  %v1560_v26 = vadd.f32 %v1524_v17, %v750_v54  ;;  %v680_v47 = vld [vmem:[#allocation2 + $0x48] sm:$0xff]  ;;  %v932_v50 = vpack.c.bf16 %v789_v39, %v788_v38  ;;  %v524_v41 = vld [vmem:[%s14483_s1 + $0xe0] sm:$0xff]  ;;  %v9385_v62 = vld [vmem:[%s9548_s20 + $0x30] sm:$0xff]   ;;  %1230 = vst.msk [vmem:[#allocation3 + $0x40] sm:$0xff] %vm1221_vm2, %v14509_v5 }
  0x4b   : > { %v1702_v19 = vadd.f32 %v1666_v13, %v825_v8  ;;  %v1842_v24 = vpack.c.bf16 %v1808_v15, %v1807_v11  ;;  %v715_v48 = vld [vmem:[#allocation2 + $0x41] sm:$0xff]  ;;  %v716_v49 = vld [vmem:[#allocation2 + $0x49] sm:$0xff]  ;;  %v753_v3 = vld [vmem:[#allocation2 + $0x52] sm:$0xff]  ;;  %v9342_v4 = vunpack.c.l.bf16 %v9385_v62  ;;  %1231 = vst.msk [vmem:[#allocation3 + $0x48] sm:$0xff] %vm1221_vm2, %v14509_v5 }
  0x4c   : > { %v1737_v28 = vadd.f32 %v1701_v18, %v861_v16  ;;  %v1595_v32 = vadd.f32 %v1559_v23, %v751_v21  ;;  %v1596_v33 = vadd.f32 %v1560_v26, %v752_v22  ;;  %v1525_v52 = vadd.f32 %v715_v48, %v679_v40  ;;  %v525_v57 = vld [vmem:[%s14483_s1 + $0xe8] sm:$0xff]  ;;  %v827_v59 = vld [vmem:[#allocation2 + $0x5c] sm:$0xff]  ;;  %v526_v9 = vld [vmem:[%s14483_s1 + $0xf0] sm:$0xff]  ;;  %1232 = vst.msk [vmem:[#allocation3 + $0x50] sm:$0xff] %vm1221_vm2, %v14509_v5 }
  0x4d   : > { %8375 = vmatmul.msk.bf16.gmra.mxu1 %vm532_vm1, %v1842_v24  ;;  %v1738_v31 = vadd.f32 %v1702_v19, %v862_v20  ;;  %1391 = vperm.xlu1 %9407, %v521_v25   ;;  %v1526_v53 = vadd.f32 %v716_v49, %v680_v47  ;;  %v863_v6 = vld [vmem:[#allocation2 + $0x55] sm:$0xff]  ;;  %v864_v7 = vld [vmem:[#allocation2 + $0x5d] sm:$0xff]  ;;  %615 = vst.msk [vmem:[#allocation2 + $0x7f] sm:$0xff] %vm532_vm1, %v9342_v4  ;;  %v866_v47 = vld [vmem:[#allocation2 + $0x6d] sm:$0xff] }
  0x4e   : > { %1386 = vperm.xlu0 %9406, %v520_v29   ;;  %v1773_v42 = vadd.f32 %v1737_v28, %v897_v36  ;;  %v1631_v45 = vadd.f32 %v1595_v32, %v788_v38  ;;  %v1632_v46 = vadd.f32 %v1596_v33, %v789_v39  ;;  %v1561_v60 = vadd.f32 %v1525_v52, %v751_v21  ;;  %v528_v14 = vld [vmem:[%s14483_s1 + $0x100] sm:$0xff]  ;;  %v899_v15 = vld [vmem:[#allocation2 + $0x56] sm:$0xff] }
  0x4f   : > { %1396 = vperm.xlu2 %9408, %v522_v34   ;;  %v1774_v44 = vadd.f32 %v1738_v31, %v898_v37  ;;  %v1562_v61 = vadd.f32 %v1526_v53, %v752_v22  ;;  %v900_v16 = vld [vmem:[#allocation2 + $0x5e] sm:$0xff]  ;;  %v790_v17 = vld [vmem:[#allocation2 + $0x53] sm:$0xff]  ;;  %v529_v31 = vld [vmem:[%s14483_s1 + $0x108] sm:$0xff]  ;;  %1233 = vst.msk [vmem:[#allocation3 + $0x58] sm:$0xff] %vm1221_vm2, %v14509_v5 }
  0x50   : > { %v1809_v54 = vmul.f32 0.11111111, %v1773_v42  ;;  %v1667_v55 = vadd.f32 %v1631_v45, %v9722_v1  ;;  %v1668_v56 = vadd.f32 %v1632_v46, %v825_v8  ;;  %v754_v1 = vld [vmem:[#allocation2 + $0x5a] sm:$0xff]  ;;  %v1597_v10 = vadd.f32 %v1561_v60, %v753_v3  ;;  %v681_v23 = vld [vmem:[#allocation2 + $0x50] sm:$0xff]  ;;  %v828_v36 = vld [vmem:[#allocation2 + $0x64] sm:$0xff]  ;;  %1234 = vst.msk [vmem:[#allocation3 + $0x60] sm:$0xff] %vm1221_vm2, %v14509_v5 }
  0x51   : > { %v1810_v43 = vmul.f32 0.11111111, %v1774_v44  ;;  %v527_v8 = vld [vmem:[%s14483_s1 + $0xf8] sm:$0xff]  ;;  %v1598_v11 = vadd.f32 %v1562_v61, %v754_v1  ;;  %v530_v28 = vld [vmem:[%s14483_s1 + $0x110] sm:$0xff]  ;;  %v865_v46 = vld [vmem:[#allocation2 + $0x65] sm:$0xff]  ;;  %1235 = vst.msk [vmem:[#allocation3 + $0x68] sm:$0xff] %vm1221_vm2, %v14509_v5 }
  0x52   : > { %v1703_v0 = vadd.f32 %v1667_v55, %v826_v58  ;;  %v1704_v2 = vadd.f32 %v1668_v56, %v827_v59  ;;  %v791_v18 = vld [vmem:[#allocation2 + $0x5b] sm:$0xff]  ;;  %v1633_v19 = vadd.f32 %v1597_v10, %v790_v17  ;;  %v717_v24 = vld [vmem:[#allocation2 + $0x51] sm:$0xff]  ;;  %1236 = vst.msk [vmem:[#allocation3 + $0x70] sm:$0xff] %vm1221_vm2, %v14509_v5 }
  0x53   : > { %v1843_v63 = vpack.c.bf16 %v1810_v43, %v1809_v54  ;;  %v1634_v20 = vadd.f32 %v1598_v11, %v791_v18  ;;  %v682_v25 = vld [vmem:[#allocation2 + $0x58] sm:$0xff]  ;;  %v933_v27 = vpack.c.bf16 %v791_v18, %v790_v17  ;;  %v1527_v33 = vadd.f32 %v717_v24, %v681_v23  ;;  %v829_v37 = vld [vmem:[#allocation2 + $0x6c] sm:$0xff]  ;;  %v755_v48 = vld [vmem:[#allocation2 + $0x62] sm:$0xff]  ;;  %1237 = vst.msk [vmem:[#allocation3 + $0x78] sm:$0xff] %vm1221_vm2, %v14509_v5 }
  0x54   : > { %v1739_v12 = vadd.f32 %v1703_v0, %v863_v6  ;;  %v1740_v13 = vadd.f32 %v1704_v2, %v864_v7  ;;  %v718_v26 = vld [vmem:[#allocation2 + $0x59] sm:$0xff]  ;;  %v1669_v29 = vadd.f32 %v1633_v19, %v826_v58  ;;  %v901_v43 = vld [vmem:[#allocation2 + $0x66] sm:$0xff]  ;;  %v902_v55 = vld [vmem:[#allocation2 + $0x6e] sm:$0xff]  ;;  %1238 = vst.msk [vmem:[#allocation3 + $0x80] sm:$0xff] %vm1221_vm2, %v14509_v5 }
  0x55   : > { %1406 = vperm.xlu1 %9407, %v524_v41   ;;  %v1670_v30 = vadd.f32 %v1634_v20, %v827_v59  ;;  %v531_v32 = vld [vmem:[%s14483_s1 + $0x118] sm:$0x3f]  ;;  %v1528_v38 = vadd.f32 %v718_v26, %v682_v25  ;;  %v1563_v42 = vadd.f32 %v1527_v33, %v753_v3  ;;  %v793_v60 = vld [vmem:[#allocation2 + $0x6b] sm:$0xff]  ;;  %v719_v0 = vld [vmem:[#allocation2 + $0x61] sm:$0xff]  ;;  %1239 = vst.msk [vmem:[#allocation3 + $0x88] sm:$0xff] %vm1221_vm2, %v14509_v5 }
  0x56   : > { %1401 = vperm.xlu0 %9406, %v523_v51   ;;  %v1775_v21 = vadd.f32 %v1739_v12, %v899_v15  ;;  %v1776_v22 = vadd.f32 %v1740_v13, %v900_v16  ;;  %v1705_v39 = vadd.f32 %v1669_v29, %v828_v36  ;;  %v9386_v44 = vld [vmem:[%s9548_s20 + $0x38] sm:$0xff]   ;;  %v756_v51 = vld [vmem:[#allocation2 + $0x6a] sm:$0xff]  ;;  %v9778_v16 = vld [vmem:[%s9548_s20 + $0x40] sm:$0xff]   ;;  %1240 = vst.msk [vmem:[#allocation3 + $0x90] sm:$0xff] %vm1221_vm2, %v14509_v5 }
  0x57   : > { %1411 = vperm.xlu2 %9408, %v525_v57   ;;  %v1706_v40 = vadd.f32 %v1670_v30, %v829_v37  ;;  %v1564_v49 = vadd.f32 %v1528_v38, %v754_v1  ;;  %v9346_v41 = vunpack.c.l.bf16 %v9386_v44  ;;  %v1599_v54 = vadd.f32 %v1563_v42, %v755_v48  ;;  %v792_v57 = vld [vmem:[#allocation2 + $0x63] sm:$0xff]  ;;  %v867_v18 = vld [vmem:[#allocation2 + $0x75] sm:$0xff]  ;;  %1241 = vst.msk [vmem:[#allocation3 + $0x98] sm:$0xff] %vm1221_vm2, %v14509_v5 }
  0x58   : > { %8359 = vmatmul.msk.bf16.gmra.mxu0 %vm532_vm1, %v932_v50  ;;  %v1811_v34 = vmul.f32 0.11111111, %v1775_v21  ;;  %v1812_v35 = vmul.f32 0.11111111, %v1776_v22  ;;  %v9343_v50 = vunpack.c.h.bf16 %v9385_v62  ;;  %v1741_v52 = vadd.f32 %v1705_v39, %v865_v46  ;;  %v684_v2 = vld [vmem:[#allocation2 + $0x68] sm:$0xff]  ;;  %v831_v12 = vld [vmem:[#allocation2 + $0x7c] sm:$0xff] }
  0x59   : > { %v1742_v53 = vadd.f32 %v1706_v40, %v866_v47  ;;  %621 = vst.msk [vmem:[#allocation2 + $0x91] sm:$0xff] %vm532_vm1, %v9346_v41  ;;  %v1600_v56 = vadd.f32 %v1564_v49, %v756_v51  ;;  %v1635_v61 = vadd.f32 %v1599_v54, %v792_v57  ;;  %v720_v3 = vld [vmem:[#allocation2 + $0x69] sm:$0xff]  ;;  %v934_v1 = vpack.c.bf16 %v793_v60, %v792_v57  ;;  %v757_v19 = vld [vmem:[#allocation2 + $0x72] sm:$0xff]  ;;  %v868_v23 = vld [vmem:[#allocation2 + $0x7d] sm:$0xff] }
  0x5a   : > { %v1844_v45 = vpack.c.bf16 %v1812_v35, %v1811_v34  ;;  %616 = vst.msk [vmem:[#allocation2 + $0x87] sm:$0xff] %vm532_vm1, %v9343_v50  ;;  %v1777_v58 = vadd.f32 %v1741_v52, %v901_v43  ;;  %v1530_v11 = vadd.f32 %v720_v3, %v684_v2  ;;  %v9347_v21 = vunpack.c.h.bf16 %v9386_v44  ;;  %v758_v24 = vld [vmem:[#allocation2 + $0x7a] sm:$0xff]  ;;  %v721_v39 = vld [vmem:[#allocation2 + $0x71] sm:$0xff] }
  0x5b   : > { %v1778_v59 = vadd.f32 %v1742_v53, %v902_v55  ;;  %v1636_v62 = vadd.f32 %v1600_v56, %v793_v60  ;;  %v1671_v7 = vadd.f32 %v1635_v61, %v828_v36  ;;  %v9350_v22 = vunpack.c.l.bf16 %v9778_v16  ;;  %v904_v30 = vld [vmem:[#allocation2 + $0x7e] sm:$0xff]  ;;  %1242 = vst.msk [vmem:[#allocation3 + $0xa0] sm:$0xff] %vm1221_vm2, %v14509_v5 }
  0x5c   : > { %v1813_v4 = vmul.f32 0.11111111, %v1777_v58  ;;  %v1566_v20 = vadd.f32 %v1530_v11, %v756_v51  ;;  %622 = vst.msk [vmem:[#allocation2 + $0x99] sm:$0xff] %vm532_vm1, %v9347_v21  ;;  %v795_v33 = vld [vmem:[#allocation2 + $0x7b] sm:$0xff] }
  0x5d   : > { %8376 = vmatmul.msk.bf16.gmra.mxu1 %vm532_vm1, %v1843_v63  ;;  %1421 = vperm.xlu1 %9407, %v527_v8   ;;  %v683_v63 = vld [vmem:[#allocation2 + $0x60] sm:$0xff]  ;;  %v1814_v6 = vmul.f32 0.11111111, %v1778_v59  ;;  %v1672_v10 = vadd.f32 %v1636_v62, %v829_v37  ;;  %627 = vst.msk [vmem:[#allocation2 + $0xa3] sm:$0xff] %vm532_vm1, %v9350_v22  ;;  %v685_v37 = vld [vmem:[#allocation2 + $0x70] sm:$0xff]  ;;  %v686_v38 = vld [vmem:[#allocation2 + $0x78] sm:$0xff] }
  0x5e   : > { %1416 = vperm.xlu0 %9406, %v526_v9   ;;  %v1529_v8 = vadd.f32 %v719_v0, %v683_v63  ;;  %v830_v9 = vld [vmem:[#allocation2 + $0x74] sm:$0xff]  ;;  %v1602_v29 = vadd.f32 %v1566_v20, %v758_v24  ;;  %v1531_v49 = vadd.f32 %v721_v39, %v685_v37  ;;  %v9308_v59 = vld [vmem:[%s14491_s9 + $0x8] sm:$0xff]  ;;  %v9307_v60 = vld [vmem:[%s14491_s9] sm:$0xff]  ;;  %1243 = vst.msk [vmem:[#allocation3 + $0xa8] sm:$0xff] %vm1221_vm2, %v14509_v5 }
  0x5f   : > { %1426 = vperm.xlu2 %9408, %v528_v14   ;;  %v1845_v13 = vpack.c.bf16 %v1814_v6, %v1813_v4  ;;  %v1707_v14 = vadd.f32 %v1671_v7, %v830_v9  ;;  %v1708_v17 = vadd.f32 %v1672_v10, %v831_v12  ;;  %v722_v40 = vld [vmem:[#allocation2 + $0x79] sm:$0xff]  ;;  %2312 = vmatpush.bf16.msra.mxu2 %v9308_v59  ;;  %v2189_v4 = vld [vmem:[#allocation3 + $0x9] sm:$0xff]  ;;  %v2132_v7 = vld [vmem:[#allocation3] sm:$0xff] }
  0x60   : > { %v1565_v15 = vadd.f32 %v1529_v8, %v755_v48  ;;  %v1638_v36 = vadd.f32 %v1602_v29, %v795_v33  ;;  %v1532_v50 = vadd.f32 %v722_v40, %v686_v38  ;;  %v1567_v56 = vadd.f32 %v1531_v49, %v757_v19  ;;  %2471 = vmatpush.bf16.msra.mxu3 %v9307_v60  ;;  %v2133_v8 = vld [vmem:[#allocation3 + $0x8] sm:$0xff] }
  0x61   : > { %v1743_v25 = vadd.f32 %v1707_v14, %v867_v18  ;;  %v832_v47 = vld [vmem:[#allocation2 + $0x84] sm:$0xff]  ;;  %v833_v41 = vld [vmem:[#allocation2 + $0x8c] sm:$0xff]  ;;  %1244 = vst.msk [vmem:[#allocation3 + $0xb0] sm:$0xff] %vm1221_vm2, %v14509_v5 }
  0x62   : > { %v1601_v26 = vadd.f32 %v1565_v15, %v757_v19  ;;  %v1674_v48 = vadd.f32 %v1638_v36, %v831_v12  ;;  %v869_v54 = vld [vmem:[#allocation2 + $0x85] sm:$0xff]  ;;  %v870_v43 = vld [vmem:[#allocation2 + $0x8d] sm:$0xff]  ;;  %v1568_v57 = vadd.f32 %v1532_v50, %v758_v24  ;;  %v2168_v12 = vpack.c.bf16 %v2133_v8, %v2132_v7  ;;  %1245 = vst.msk [vmem:[#allocation3 + $0xb8] sm:$0xff] %vm1221_vm2, %v14509_v5 }
  0x63   : > { %v9797_v55 = vld [vmem:[#allocation2 + $0x82] sm:$0xff]  ;;  %v9801_v58 = vld [vmem:[#allocation2 + $0x8a] sm:$0xff]  ;;  %v9838_v22 = vld [vmem:[#allocation2 + $0x94] sm:$0xff]  ;;  %1246 = vst.msk [vmem:[#allocation3 + $0xc0] sm:$0xff] %vm1221_vm2, %v14509_v5 }
  0x64   : > { %v1710_v53 = vadd.f32 %v1674_v48, %v833_v41  ;;  %v905_v62 = vld [vmem:[#allocation2 + $0x86] sm:$0xff]  ;;  %v1603_v0 = vadd.f32 %v1567_v56, %v9797_v55  ;;  %v1604_v2 = vadd.f32 %v1568_v57, %v9801_v58  ;;  %v906_v3 = vld [vmem:[#allocation2 + $0x8e] sm:$0xff]  ;;  %8420 = vmatmul.msk.bf16.vlgmr.msra.gmra.mxu3 %vm1221_vm2, %v2168_v12  ;;  %v872_v29 = vld [vmem:[#allocation2 + $0x9d] sm:$0xff]  ;;  %1247 = vst.msk [vmem:[#allocation3 + $0xc8] sm:$0xff] %vm1221_vm2, %v14509_v5 }
  0x65   : > { %1436 = vperm.xlu1 %9407, %v530_v28   ;;  %v1744_v28 = vadd.f32 %v1708_v17, %v868_v23  ;;  %v796_v10 = vld [vmem:[#allocation2 + $0x83] sm:$0xff]  ;;  %v797_v11 = vld [vmem:[#allocation2 + $0x8b] sm:$0xff]  ;;  %1248 = vst.msk [vmem:[#allocation3 + $0xd0] sm:$0xff] %vm1221_vm2, %v14509_v5  ;;  %v907_v39 = vld [vmem:[#allocation2 + $0x96] sm:$0xff] }
  0x66   : > { %1431 = vperm.xlu0 %9406, %v529_v31   ;;  %v794_v31 = vld [vmem:[#allocation2 + $0x73] sm:$0xff]  ;;  %v1746_v63 = vadd.f32 %v1710_v53, %v870_v43  ;;  %v1639_v14 = vadd.f32 %v1603_v0, %v796_v10  ;;  %v1640_v15 = vadd.f32 %v1604_v2, %v797_v11  ;;  %v936_v17 = vpack.c.bf16 %v797_v11, %v796_v10  ;;  %v9840_v23 = vld [vmem:[#allocation2 + $0x9c] sm:$0xff]  ;;  %v688_v36 = vld [vmem:[#allocation2 + $0x88] sm:$0xff] }
  0x67   : > { %1441 = vperm.xlu2 %9408, %v531_v32   ;;  %v1637_v34 = vadd.f32 %v1601_v26, %v794_v31  ;;  %v1780_v35 = vadd.f32 %v1744_v28, %v904_v30  ;;  %v935_v42 = vpack.c.bf16 %v795_v33, %v794_v31  ;;  %v871_v28 = vld [vmem:[#allocation2 + $0x95] sm:$0xff]  ;;  %v9865_v30 = vld [vmem:[%s14487_s5] ss:$0 sm:$0xff]  ;;  %v724_v37 = vld [vmem:[#allocation2 + $0x89] sm:$0xff]  ;;  %1249 = vst.msk [vmem:[#allocation3 + $0xd8] sm:$0xff] %vm1221_vm2, %v14509_v5  ;;  %v9351_v2 = vunpack.c.h.bf16 %v9778_v16 }
  0x68   : > { %8360 = vmatmul.msk.bf16.gmra.mxu0 %vm532_vm1, %v933_v27  ;;  %v903_v27 = vld [vmem:[#allocation2 + $0x76] sm:$0xff]  ;;  %v1675_v20 = vadd.f32 %v1639_v14, %v832_v47  ;;  %v1676_v21 = vadd.f32 %v1640_v15, %v833_v41  ;;  %v687_v31 = vld [vmem:[#allocation2 + $0x80] sm:$0xff]  ;;  %1250 = vst.msk [vmem:[#allocation3 + $0xe0] sm:$0xff] %vm1221_vm2, %v14509_v5  ;;  %v9388_v0 = vld [vmem:[%s9548_s20 + $0x48] sm:$0xff]  }
  0x69   : > { %v1779_v32 = vadd.f32 %v1743_v25, %v903_v27  ;;  %v1816_v46 = vmul.f32 0.11111111, %v1780_v35  ;;  %v9856_v27 = vld [vmem:[%s14486_s4] ss:$0 sm:$0xff]  ;;  %1251 = vst.msk [vmem:[#allocation3 + $0xe8] sm:$0xff] %vm1221_vm2, %v14509_v5  ;;  %v689_v41 = vld [vmem:[#allocation2 + $0x90] sm:$0xff]  ;;  %v9354_v7 = vunpack.c.l.bf16 %v9388_v0  ;;  %v9355_v12 = vunpack.c.h.bf16 %v9388_v0 }
  0x6a   : > { %v1711_v25 = vadd.f32 %v1675_v20, %v9838_v22  ;;  %v1712_v26 = vadd.f32 %v1676_v21, %v9840_v23  ;;  %v908_v40 = vld [vmem:[#allocation2 + $0x9e] sm:$0xff]  ;;  %1252 = vst.msk [vmem:[#allocation3 + $0xf0] sm:$0xff] %vm1221_vm2, %v14509_v5  ;;  %v761_v56 = vld [vmem:[#allocation2 + $0x92] sm:$0xff] }
  0x6b   : > { %v1815_v44 = vmul.f32 0.11111111, %v1779_v32  ;;  %v723_v32 = vld [vmem:[#allocation2 + $0x81] sm:$0xff]  ;;  %1253 = vst.msk [vmem:[#allocation3 + $0xf8] sm:$0xff] %vm1221_vm2, %v14509_v5  ;;  %v726_v14 = vld [vmem:[#allocation2 + $0x99] sm:$0xff] }
  0x6c   : > { %v1748_v35 = vadd.f32 %v1712_v26, %v872_v29  ;;  %1254 = vst.msk [vmem:[#allocation3 + $0x100] sm:$0xff] %vm1221_vm2, %v14509_v5  ;;  %v9914_v8 = vld [vmem:[#allocation2 + $0xa2] sm:$0xff] }
  0x6d   : > { %8377 = vmatmul.msk.bf16.gmra.mxu1 %vm532_vm1, %v1844_v45  ;;  %v1673_v45 = vadd.f32 %v1637_v34, %v830_v9  ;;  %v1846_v52 = vpack.c.bf16 %v1816_v46, %v1815_v44  ;;  %v1747_v34 = vadd.f32 %v1711_v25, %v871_v28  ;;  %v799_v46 = vld [vmem:[#allocation2 + $0x9b] sm:$0xff]  ;;  %1255 = vst.msk [vmem:[#allocation3 + $0x108] sm:$0xff] %vm1221_vm2, %v14509_v5  ;;  %v800_v26 = vld [vmem:[#allocation2 + $0xa3] sm:$0xff] }
  0x6e   : > { %v1784_v50 = vadd.f32 %v1748_v35, %v908_v40  ;;  %1256 = vst.msk [vmem:[#allocation3 + $0x110] sm:$0xff] %vm1221_vm2, %v14509_v5 }
  0x6f   : > { %v1709_v51 = vadd.f32 %v1673_v45, %v832_v47  ;;  %v798_v45 = vld [vmem:[#allocation2 + $0x93] sm:$0xff]  ;;  %v1534_v47 = vadd.f32 %v724_v37, %v688_v36  ;;  %v1783_v49 = vadd.f32 %v1747_v34, %v907_v39  ;;  %1257 = vst.msk [vmem:[#allocation3 + $0x118] sm:$0xff] %vm1221_vm2, %v14509_v5  ;;  %v691_v36 = vld [vmem:[#allocation2 + $0xa0] sm:$0xff] }
  0x70   : > { %v937_v53 = vpack.c.bf16 %v799_v46, %v798_v45  ;;  %1258 = vst.msk [vmem:[#allocation3 + $0x120] sm:$0xff] %vm1221_vm2, %v14509_v5  ;;  %v727_v37 = vld [vmem:[#allocation2 + $0xa1] sm:$0xff] }
  0x71   : > { %v1745_v61 = vadd.f32 %v1709_v51, %v869_v54  ;;  %v725_v51 = vld [vmem:[#allocation2 + $0x91] sm:$0xff]  ;;  %v1570_v57 = vadd.f32 %v1534_v47, %v9801_v58  ;;  %v1819_v60 = vmul.f32 0.11111111, %v1783_v49  ;;  %1259 = vst.msk [vmem:[#allocation3 + $0x128] sm:$0xff] %vm1221_vm2, %v14509_v5 }
  0x72   : > { %v1535_v59 = vadd.f32 %v725_v51, %v689_v41  ;;  %1260 = vst.msk [vmem:[#allocation3 + $0x130] sm:$0xff] %vm1221_vm2, %v14509_v5 }
  0x73   : > { %v1781_v9 = vadd.f32 %v1745_v61, %v905_v62  ;;  %v1820_v61 = vmul.f32 0.11111111, %v1784_v50  ;;  %v762_v62 = vld [vmem:[#allocation2 + $0x9a] sm:$0xff]  ;;  %1261 = vst.msk [vmem:[#allocation3 + $0x138] sm:$0xff] %vm1221_vm2, %v14509_v5 }
  0x74   : > { %628 = vst.msk [vmem:[#allocation2 + $0xab] sm:$0xff] %vm532_vm1, %v9351_v2 }
  0x75   : > { %v1817_v18 = vmul.f32 0.11111111, %v1781_v9  ;;  %v9389_v9 = vld [vmem:[%s9548_s20 + $0x50] sm:$0xff]   ;;  %633 = vst.msk [vmem:[#allocation2 + $0xb5] sm:$0xff] %vm532_vm1, %v9354_v7 }
  0x76   : > { %v9359_v21 = vunpack.c.h.bf16 %v9389_v9  ;;  %634 = vst.msk [vmem:[#allocation2 + $0xbd] sm:$0xff] %vm532_vm1, %v9355_v12 }
  0x78   : > { %8361 = vmatmul.msk.bf16.gmra.mxu0 %vm532_vm1, %v934_v1  ;;  %v2188_v1 = vld [vmem:[#allocation3 + $0x1] sm:$0xff]  ;;  %640 = vst.msk [vmem:[#allocation2 + $0xcf] sm:$0xff] %vm532_vm1, %v9359_v21 }
  0x79   : > { %v2224_v6 = vpack.c.bf16 %v2189_v4, %v2188_v1  ;;  %v1571_v4 = vadd.f32 %v1535_v59, %v761_v56 }
  0x7b   : > { %8398 = vmatmul.msk.bf16.vlgmr.msra.gmra.mxu2 %vm1221_vm2, %v2224_v6  ;;  %v1848_v6 = vpack.c.bf16 %v1820_v61, %v1819_v60  ;;  %v837_v39 = vld [vmem:[#allocation2 + $0xac] sm:$0xff] }
  0x7c   : > { %v910_v47 = vld [vmem:[#allocation2 + $0xae] sm:$0xff] }
  0x7d   : > { %8378 = vmatmul.msk.bf16.gmra.mxu1 %vm532_vm1, %v1845_v13  ;;  %v1782_v13 = vadd.f32 %v1746_v63, %v906_v3  ;;  %v1606_v3 = vadd.f32 %v1570_v57, %v762_v62  ;;  %v764_v50 = vld [vmem:[#allocation2 + $0xaa] sm:$0xff]  ;;  %v9947_v51 = vld [vmem:[#allocation2 + $0xb4] sm:$0xff]  ;;  %v839_v12 = vld [vmem:[#allocation2 + $0xbc] sm:$0xff] }
  0x7e   : > { %v801_v41 = vld [vmem:[#allocation2 + $0xab] sm:$0xff] }
  0x7f   : > { %v1818_v19 = vmul.f32 0.11111111, %v1782_v13  ;;  %v9882_v48 = vpop.permute.xlu0 %1266  ;;  %v690_v13 = vld [vmem:[#allocation2 + $0x98] sm:$0xff]  ;;  %v1642_v15 = vadd.f32 %v1606_v3, %v799_v46  ;;  %v909_v46 = vld [vmem:[#allocation2 + $0xa6] sm:$0xff]  ;;  %v938_v59 = vpack.c.bf16 %v801_v41, %v800_v26 }
  0x80   : > { %v1536_v25 = vadd.f32 %v726_v14, %v690_v13  ;;  %v875_v14 = vld [vmem:[#allocation2 + $0xb5] sm:$0xff] }
  0x81   : > { %v1847_v24 = vpack.c.bf16 %v1818_v19, %v1817_v18  ;;  %v1607_v18 = vadd.f32 %v1571_v4, %v9914_v8  ;;  %v9358_v19 = vunpack.c.l.bf16 %v9389_v9  ;;  %v1678_v29 = vadd.f32 %v1642_v15, %v9840_v23  ;;  %v692_v9 = vld [vmem:[#allocation2 + $0xa8] sm:$0xff]  ;;  %v765_v21 = vld [vmem:[#allocation2 + $0xb2] sm:$0xff] }
  0x82   : > { %v1572_v35 = vadd.f32 %v1536_v25, %v762_v62  ;;  %v876_v25 = vld [vmem:[#allocation2 + $0xbd] sm:$0xff] }
  0x83   : > { %639 = vst.msk [vmem:[#allocation2 + $0xc7] sm:$0xff] %vm532_vm1, %v9358_v19  ;;  %v1714_v23 = vadd.f32 %v1678_v29, %v837_v39 }
  0x84   : > { %v1608_v60 = vadd.f32 %v1572_v35, %v764_v50 }
  0x87   : > { %v9920_v11 = vpop.permute.xlu0 %1271 }
  0x88   : > { %8362 = vmatmul.msk.bf16.gmra.mxu0 %vm532_vm1, %v935_v42  ;;  %v1533_v42 = vadd.f32 %v723_v32, %v687_v31  ;;  %14779 = vst [vmem:[#allocation7_spill] sm:$0xff] %v9920_v11  ;;  %v1643_v32 = vadd.f32 %v1607_v18, %v800_v26  ;;  %v766_v26 = vld [vmem:[#allocation2 + $0xba] sm:$0xff] }
  0x8a   : > { %v1569_v54 = vadd.f32 %v1533_v42, %v9797_v55 }
  0x8c   : > { %v1605_v58 = vadd.f32 %v1569_v54, %v761_v56  ;;  %v1537_v54 = vadd.f32 %v727_v37, %v691_v36  ;;  %v9390_v37 = vld [vmem:[%s9548_s20 + $0x58] sm:$0xff]  }
  0x8d   : > { %8379 = vmatmul.msk.bf16.gmra.mxu1 %vm532_vm1, %v1846_v52 }
  0x8e   : > { %v1641_v16 = vadd.f32 %v1605_v58, %v798_v45  ;;  %v874_v45 = vld [vmem:[#allocation2 + $0xad] sm:$0xff] }
  0x8f   : > { %v1750_v57 = vadd.f32 %v1714_v23, %v874_v45  ;;  %v912_v45 = vld [vmem:[#allocation2 + $0xbe] sm:$0xff] }
  0x90   : > { %v1677_v28 = vadd.f32 %v1641_v16, %v9838_v22  ;;  %v873_v22 = vld [vmem:[#allocation2 + $0xa5] sm:$0xff] }
  0x91   : > { %v1786_v4 = vadd.f32 %v1750_v57, %v910_v47  ;;  %v728_v16 = vld [vmem:[#allocation2 + $0xa9] sm:$0xff]  ;;  %v694_v57 = vld [vmem:[#allocation2 + $0xb8] sm:$0xff] }
  0x92   : > { %v1538_v15 = vadd.f32 %v728_v16, %v692_v9 }
  0x93   : > { %v1822_v19 = vmul.f32 0.11111111, %v1786_v4 }
  0x98   : > { %8363 = vmatmul.msk.bf16.gmra.mxu0 %vm532_vm1, %v936_v17 }
  0x9c   : > { %v1015_v33 = vpop.f32.mrf.mxu0 }
  0x9d   : > { %8380 = vmatmul.msk.bf16.gmra.mxu1 %vm532_vm1, %v1847_v24  ;;  %v1109_v38 = vmul.f32 %v9856_v27, %v1015_v33  ;;  %v9941_v33 = vpop.permute.xlu1 %1276 }
  0x9e   : > { %14781 = vst [vmem:[#allocation9_spill] sm:$0xff] %v9941_v33 }
  0x9f   : > { %v9878_v44 = vadd.f32 %v9865_v30, %v1109_v38  ;;  %v836_v38 = vld [vmem:[#allocation2 + $0xa4] sm:$0xff] }
  0xa0   : > { %v1713_v40 = vadd.f32 %v1677_v28, %v836_v38  ;;  %v1679_v49 = vadd.f32 %v1643_v32, %v836_v38  ;;  %v1574_v28 = vadd.f32 %v1538_v15, %v764_v50  ;;  %v911_v38 = vld [vmem:[#allocation2 + $0xb6] sm:$0xff] }
  0xa1   : > { %14777 = vst [vmem:[#allocation5_spill] sm:$0xff] %v9878_v44  ;;  %v14498_v52 = vmax.f32 %v9878_v44, 0.0  ;;  %v803_v50 = vld [vmem:[#allocation2 + $0xbb] sm:$0xff] }
  0xa2   : > { %v1749_v56 = vadd.f32 %v1713_v40, %v873_v22  ;;  %v9362_v22 = vunpack.c.l.bf16 %v9390_v37  ;;  %v1610_v23 = vadd.f32 %v1574_v28, %v766_v26 }
  0xa3   : > { %v1444_v43 = vmul.f32 %v9882_v48, %v14498_v52 }
  0xa4   : > { %v1017_v63 = vpop.f32.mrf.mxu0  ;;  %v1785_v3 = vadd.f32 %v1749_v56, %v909_v46  ;;  %645 = vst.msk [vmem:[#allocation2 + $0xd9] sm:$0xff] %vm532_vm1, %v9362_v22  ;;  %v1646_v56 = vadd.f32 %v1610_v23, %v803_v50  ;;  %v767_v23 = vld [vmem:[#allocation2 + $0xc2] sm:$0xff] }
  0xa5   : > { %1480 = vst.msk [vmem:[#allocation3 + $0x13] sm:$0xff] %vm1221_vm2, %v1444_v43  ;;  %v1110_v55 = vmul.f32 %v9856_v27, %v1017_v63  ;;  %v9962_v29 = vpop.permute.xlu1 %1281 }
  0xa6   : > { %v1821_v18 = vmul.f32 0.11111111, %v1785_v3  ;;  %14784 = vst [vmem:[#allocation12_spill] sm:$0xff] %v9962_v29 }
  0xa7   : > { %v9910_v1 = vadd.f32 %v9865_v30, %v1110_v55  ;;  %v1715_v55 = vadd.f32 %v1679_v49, %v9947_v51  ;;  %v802_v49 = vld [vmem:[#allocation2 + $0xb3] sm:$0xff] }
  0xa8   : > { %8364 = vmatmul.msk.bf16.gmra.mxu0 %vm532_vm1, %v937_v53  ;;  %v1849_v32 = vpack.c.bf16 %v1822_v19, %v1821_v18 }
  0xa9   : > { %14778 = vst [vmem:[#allocation6_spill] sm:$0xff] %v9910_v1  ;;  %v14499_v10 = vmax.f32 %v9910_v1, 0.0  ;;  %v1751_v36 = vadd.f32 %v1715_v55, %v875_v14 }
  0xab   : > { %v1445_v17 = vmul.f32 %v9920_v11, %v14499_v10  ;;  %v9949_v43 = vpop.f32.mrf.mxu1  ;;  %v1787_v47 = vadd.f32 %v1751_v36, %v911_v38 }
  0xac   : > { %v1020_v20 = vpop.f32.mrf.mxu0  ;;  %14782 = vst [vmem:[#allocation10_spill] sm:$0xff] %v9949_v43  ;;  %v2190_v61 = vld [vmem:[#allocation3 + $0x11] sm:$0xff] }
  0xad   : > { %8381 = vmatmul.msk.bf16.gmra.mxu1 %vm532_vm1, %v1848_v6  ;;  %1481 = vst.msk [vmem:[#allocation3 + $0x1b] sm:$0xff] %vm1221_vm2, %v1445_v17  ;;  %v1111_v24 = vmul.f32 %v9856_v27, %v1020_v20  ;;  %v2134_v2 = vld [vmem:[#allocation3 + $0x10] sm:$0xff]  ;;  %v1644_v6 = vadd.f32 %v1608_v60, %v801_v41  ;;  %v1573_v17 = vadd.f32 %v1537_v54, %v9914_v8 }
  0xae   : > { %v730_v60 = vld [vmem:[#allocation2 + $0xb9] sm:$0xff] }
  0xaf   : > { %v9937_v31 = vadd.f32 %v9865_v30, %v1111_v24  ;;  %v1680_v20 = vadd.f32 %v1644_v6, %v837_v39  ;;  %v1609_v39 = vadd.f32 %v1573_v17, %v765_v21  ;;  %v1540_v4 = vadd.f32 %v730_v60, %v694_v57  ;;  %v841_v17 = vld [vmem:[#allocation2 + $0xcc] sm:$0xff]  ;;  %v804_v60 = vld [vmem:[#allocation2 + $0xc3] sm:$0xff] }
  0xb1   : > { %14780 = vst [vmem:[#allocation8_spill] sm:$0xff] %v9937_v31  ;;  %v14500_v34 = vmax.f32 %v9937_v31, 0.0  ;;  %v1716_v35 = vadd.f32 %v1680_v20, %v839_v12  ;;  %v1645_v41 = vadd.f32 %v1609_v39, %v802_v49  ;;  %v9981_v20 = vpop.permute.xlu2 %1286  ;;  %v1576_v28 = vadd.f32 %v1540_v4, %v766_v26 }
  0xb2   : > { %14787 = vst [vmem:[#allocation15_spill] sm:$0xff] %v9981_v20 }
  0xb3   : > { %v1446_v42 = vmul.f32 %v9941_v33, %v14500_v34  ;;  %v1752_v40 = vadd.f32 %v1716_v35, %v876_v25  ;;  %v9970_v46 = vpop.f32.mrf.mxu1 }
  0xb4   : > { %v1022_v53 = vpop.f32.mrf.mxu0  ;;  %v2191_v62 = vld [vmem:[#allocation3 + $0x19] sm:$0xff]  ;;  %14785 = vst [vmem:[#allocation13_spill] sm:$0xff] %v9970_v46 }
  0xb5   : > { %1482 = vst.msk [vmem:[#allocation3 + $0x23] sm:$0xff] %vm1221_vm2, %v1446_v42  ;;  %v2135_v63 = vld [vmem:[#allocation3 + $0x18] sm:$0xff]  ;;  %v1112_v0 = vmul.f32 %v9856_v27, %v1022_v53  ;;  %v2225_v58 = vpack.c.bf16 %v2191_v62, %v2190_v61  ;;  %v9363_v42 = vunpack.c.h.bf16 %v9390_v37  ;;  %v693_v53 = vld [vmem:[#allocation2 + $0xb0] sm:$0xff]  ;;  %v1788_v54 = vadd.f32 %v1752_v40, %v912_v45 }
  0xb6   : > { %v2169_v7 = vpack.c.bf16 %v2135_v63, %v2134_v2  ;;  %v1823_v62 = vmul.f32 0.11111111, %v1787_v47  ;;  %v939_v63 = vpack.c.bf16 %v803_v50, %v802_v49  ;;  %v878_v40 = vld [vmem:[#allocation2 + $0xcd] sm:$0xff] }
  0xb7   : > { %v9956_v13 = vadd.f32 %v9865_v30, %v1112_v0  ;;  %8399 = vmatmul.msk.bf16.gmra.mxu2 %vm1221_vm2, %v2225_v58  ;;  %646 = vst.msk [vmem:[#allocation2 + $0xe1] sm:$0xff] %vm532_vm1, %v9363_v42  ;;  %v9975_v0 = vld [vmem:[#allocation2 + $0xc4] sm:$0xff]  ;;  %v1681_v58 = vadd.f32 %v1645_v41, %v9947_v51  ;;  %v1824_v6 = vmul.f32 0.11111111, %v1788_v54  ;;  %v914_v54 = vld [vmem:[#allocation2 + $0xce] sm:$0xff] }
  0xb8   : > { %8365 = vmatmul.msk.bf16.gmra.mxu0 %vm532_vm1, %v938_v59  ;;  %8421 = vmatmul.msk.bf16.gmra.mxu3 %vm1221_vm2, %v2169_v7  ;;  %v729_v59 = vld [vmem:[#allocation2 + $0xb1] sm:$0xff]  ;;  %v1682_v7 = vadd.f32 %v1646_v56, %v839_v12  ;;  %v695_v56 = vld [vmem:[#allocation2 + $0xc0] sm:$0xff] }
  0xb9   : > { %14783 = vst [vmem:[#allocation11_spill] sm:$0xff] %v9956_v13  ;;  %v14501_v24 = vmax.f32 %v9956_v13, 0.0  ;;  %v1539_v3 = vadd.f32 %v729_v59, %v693_v53  ;;  %v1717_v25 = vadd.f32 %v1681_v58, %v9975_v0  ;;  %v1850_v36 = vpack.c.bf16 %v1824_v6, %v1823_v62  ;;  %v768_v42 = vld [vmem:[#allocation2 + $0xca] sm:$0xff]  ;;  %v731_v59 = vld [vmem:[#allocation2 + $0xc1] sm:$0xff]  ;;  %v10003_v62 = vpop.permute.xlu2 %1291 }
  0xba   : > { %v1718_v37 = vadd.f32 %v1682_v7, %v841_v17  ;;  %v1612_v50 = vadd.f32 %v1576_v28, %v768_v42  ;;  %v913_v53 = vld [vmem:[#allocation2 + $0xc6] sm:$0xff]  ;;  %14790 = vst [vmem:[#allocation18_spill] sm:$0xff] %v10003_v62 }
  0xbb   : > { %v1447_v8 = vmul.f32 %v9962_v29, %v14501_v24  ;;  %v1575_v12 = vadd.f32 %v1539_v3, %v765_v21  ;;  %v732_v3 = vld [vmem:[#allocation2 + $0xc9] sm:$0xff] }
  0xbc   : > { %v2192_v2 = vld [vmem:[#allocation3 + $0x21] sm:$0xff]  ;;  %v1754_v47 = vadd.f32 %v1718_v37, %v878_v40  ;;  %v842_v37 = vld [vmem:[#allocation2 + $0xd4] sm:$0xff] }
  0xbd   : > { %8382 = vmatmul.msk.bf16.gmra.mxu1 %vm532_vm1, %v1849_v32  ;;  %1483 = vst.msk [vmem:[#allocation3 + $0x2b] sm:$0xff] %vm1221_vm2, %v1447_v8  ;;  %v2136_v16 = vld [vmem:[#allocation3 + $0x20] sm:$0xff]  ;;  %v9391_v32 = vld [vmem:[%s9548_s20 + $0x60] sm:$0xff]   ;;  %v1611_v49 = vadd.f32 %v1575_v12, %v767_v23  ;;  %v10018_v40 = vld [vmem:[#allocation2 + $0xd2] sm:$0xff] }
  0xbe   : > { %v877_v8 = vld [vmem:[#allocation2 + $0xc5] sm:$0xff]  ;;  %v9366_v38 = vunpack.c.l.bf16 %v9391_v32  ;;  %v9367_v39 = vunpack.c.h.bf16 %v9391_v32  ;;  %v1790_v58 = vadd.f32 %v1754_v47, %v914_v54  ;;  %v879_v54 = vld [vmem:[#allocation2 + $0xd5] sm:$0xff] }
  0xbf   : > { %v1753_v26 = vadd.f32 %v1717_v25, %v877_v8  ;;  %v1647_v4 = vadd.f32 %v1611_v49, %v804_v60  ;;  %v843_v8 = vld [vmem:[#allocation2 + $0xdc] sm:$0xff] }
  0xc0   : > { %651 = vst.msk [vmem:[#allocation2 + $0xeb] sm:$0xff] %vm532_vm1, %v9366_v38  ;;  %v1826_v12 = vmul.f32 0.11111111, %v1790_v58  ;;  %v10025_v49 = vld [vmem:[#allocation2 + $0xda] sm:$0xff] }
  0xc1   : > { %652 = vst.msk [vmem:[#allocation2 + $0xf3] sm:$0xff] %vm532_vm1, %v9367_v39  ;;  %v1683_v28 = vadd.f32 %v1647_v4, %v9975_v0 }
  0xc4   : > { %v2193_v9 = vld [vmem:[#allocation3 + $0x29] sm:$0xff] }
  0xc5   : > { %v1025_v61 = vpop.f32.mrf.mxu0  ;;  %v2137_v14 = vld [vmem:[#allocation3 + $0x28] sm:$0xff]  ;;  %v2226_v18 = vpack.c.bf16 %v2193_v9, %v2192_v2  ;;  %v696_v2 = vld [vmem:[#allocation2 + $0xc8] sm:$0xff] }
  0xc6   : > { %v1113_v55 = vmul.f32 %v9856_v27, %v1025_v61  ;;  %v2170_v19 = vpack.c.bf16 %v2137_v14, %v2136_v16  ;;  %v805_v61 = vld [vmem:[#allocation2 + $0xcb] sm:$0xff]  ;;  %v1541_v14 = vadd.f32 %v731_v59, %v695_v56 }
  0xc7   : > { %8400 = vmatmul.msk.bf16.gmra.mxu2 %vm1221_vm2, %v2226_v18  ;;  %v1648_v6 = vadd.f32 %v1612_v50, %v805_v61  ;;  %v940_v16 = vpack.c.bf16 %v805_v61, %v804_v60 }
  0xc8   : > { %v9979_v15 = vadd.f32 %v9865_v30, %v1113_v55  ;;  %8366 = vmatmul.msk.bf16.gmra.mxu0 %vm532_vm1, %v939_v63  ;;  %8422 = vmatmul.msk.bf16.gmra.mxu3 %vm1221_vm2, %v2170_v19  ;;  %v1789_v55 = vadd.f32 %v1753_v26, %v913_v53  ;;  %v1542_v19 = vadd.f32 %v732_v3, %v696_v2  ;;  %v846_v24 = vld [vmem:[#allocation2 + $0xf4] sm:$0xff] }
  0xc9   : > { %v1684_v32 = vadd.f32 %v1648_v6, %v841_v17  ;;  %v1577_v38 = vadd.f32 %v1541_v14, %v767_v23  ;;  %v1719_v17 = vadd.f32 %v1683_v28, %v842_v37  ;;  %v915_v14 = vld [vmem:[#allocation2 + $0xd6] sm:$0xff] }
  0xca   : > { %14786 = vst [vmem:[#allocation14_spill] sm:$0xff] %v9979_v15  ;;  %v14502_v51 = vmax.f32 %v9979_v15, 0.0  ;;  %v9988_v35 = vpop.f32.mrf.mxu1  ;;  %v1825_v25 = vmul.f32 0.11111111, %v1789_v55 }
  0xcb   : > { %14788 = vst [vmem:[#allocation16_spill] sm:$0xff] %v9988_v35  ;;  %v1720_v47 = vadd.f32 %v1684_v32, %v843_v8  ;;  %v1613_v55 = vadd.f32 %v1577_v38, %v10018_v40  ;;  %v1755_v6 = vadd.f32 %v1719_v17, %v879_v54  ;;  %v10043_v38 = vpop.permute.xlu1 %1301  ;;  %v697_v17 = vld [vmem:[#allocation2 + $0xd0] sm:$0xff] }
  0xcc   : > { %v1448_v22 = vmul.f32 %v9981_v20, %v14502_v51  ;;  %v1851_v0 = vpack.c.bf16 %v1826_v12, %v1825_v25  ;;  %v807_v25 = vld [vmem:[#allocation2 + $0xdb] sm:$0xff]  ;;  %14796 = vst [vmem:[#allocation24_spill] sm:$0xff] %v10043_v38 }
  0xcd   : > { %v1027_v45 = vpop.f32.mrf.mxu0  ;;  %8383 = vmatmul.msk.bf16.gmra.mxu1 %vm532_vm1, %v1850_v36 }
  0xce   : > { %1484 = vst.msk [vmem:[#allocation3 + $0x33] sm:$0xff] %vm1221_vm2, %v1448_v22  ;;  %v1114_v21 = vmul.f32 %v9856_v27, %v1027_v45  ;;  %v1578_v22 = vadd.f32 %v1542_v19, %v768_v42  ;;  %v9392_v45 = vld [vmem:[%s9548_s20 + $0x68] sm:$0xff]   ;;  %v880_v42 = vld [vmem:[#allocation2 + $0xdd] sm:$0xff]  ;;  %v806_v19 = vld [vmem:[#allocation2 + $0xd3] sm:$0xff] }
  0xcf   : > { %v9370_v50 = vunpack.c.l.bf16 %v9392_v45  ;;  %v1649_v12 = vadd.f32 %v1613_v55, %v806_v19 }
  0xd0   : > { %v10000_v41 = vadd.f32 %v9865_v30, %v1114_v21  ;;  %v10021_v21 = vpop.permute.xlu0 %1296  ;;  %v1614_v4 = vadd.f32 %v1578_v22, %v10025_v49 }
  0xd1   : > { %14793 = vst [vmem:[#allocation21_spill] sm:$0xff] %v10021_v21 }
  0xd2   : > { %14789 = vst [vmem:[#allocation17_spill] sm:$0xff] %v10000_v41  ;;  %v14503_v57 = vmax.f32 %v10000_v41, 0.0  ;;  %v10005_v63 = vpop.f32.mrf.mxu1  ;;  %v1650_v32 = vadd.f32 %v1614_v4, %v807_v25 }
  0xd3   : > { %14791 = vst [vmem:[#allocation19_spill] sm:$0xff] %v10005_v63 }
  0xd4   : > { %v1449_v7 = vmul.f32 %v10003_v62, %v14503_v57  ;;  %657 = vst.msk [vmem:[#allocation2 + $0xfd] sm:$0xff] %vm532_vm1, %v9370_v50  ;;  %v698_v50 = vld [vmem:[#allocation2 + $0xd8] sm:$0xff] }
  0xd5   : > { %v1030_v9 = vpop.f32.mrf.mxu0  ;;  %v2194_v53 = vld [vmem:[#allocation3 + $0x31] sm:$0xff] }
  0xd6   : > { %1485 = vst.msk [vmem:[#allocation3 + $0x3b] sm:$0xff] %vm1221_vm2, %v1449_v7  ;;  %v1115_v18 = vmul.f32 %v9856_v27, %v1030_v9  ;;  %v2138_v60 = vld [vmem:[#allocation3 + $0x30] sm:$0xff]  ;;  %v1756_v7 = vadd.f32 %v1720_v47, %v880_v42  ;;  %v9371_v9 = vunpack.c.h.bf16 %v9392_v45  ;;  %v1791_v45 = vadd.f32 %v1755_v6, %v915_v14  ;;  %v881_v14 = vld [vmem:[#allocation2 + $0xe5] sm:$0xff] }
  0xd7   : > { %v941_v42 = vpack.c.bf16 %v807_v25, %v806_v19  ;;  %v10063_v19 = vpop.permute.xlu2 %1306 }
  0xd8   : > { %v10014_v36 = vadd.f32 %v9865_v30, %v1115_v18  ;;  %8367 = vmatmul.msk.bf16.gmra.mxu0 %vm532_vm1, %v940_v16  ;;  %v916_v18 = vld [vmem:[#allocation2 + $0xde] sm:$0xff]  ;;  %658 = vst.msk [vmem:[#allocation2 + $0x105] sm:$0xff] %vm532_vm1, %v9371_v9  ;;  %v1827_v55 = vmul.f32 0.11111111, %v1791_v45 }
  0xd9   : > { %14799 = vst [vmem:[#allocation27_spill] sm:$0xff] %v10063_v19 }
  0xda   : > { %14792 = vst [vmem:[#allocation20_spill] sm:$0xff] %v10014_v36  ;;  %v14504_v39 = vmax.f32 %v10014_v36, 0.0  ;;  %v10023_v26 = vpop.f32.mrf.mxu1 }
  0xdb   : > { %14794 = vst [vmem:[#allocation22_spill] sm:$0xff] %v10023_v26  ;;  %v847_v51 = vld [vmem:[#allocation2 + $0xfc] sm:$0xff] }
  0xdc   : > { %v1450_v23 = vmul.f32 %v10021_v21, %v14504_v39 }
  0xdd   : > { %v1032_v56 = vpop.f32.mrf.mxu0  ;;  %v2195_v59 = vld [vmem:[#allocation3 + $0x39] sm:$0xff]  ;;  %8384 = vmatmul.msk.bf16.gmra.mxu1 %vm532_vm1, %v1851_v0  ;;  %v1792_v0 = vadd.f32 %v1756_v7, %v916_v18  ;;  %v10061_v18 = vld [vmem:[%s9548_s20 + $0x70] sm:$0xff]  }
  0xde   : > { %v2139_v61 = vld [vmem:[#allocation3 + $0x38] sm:$0xff]  ;;  %1486 = vst.msk [vmem:[#allocation3 + $0x43] sm:$0xff] %vm1221_vm2, %v1450_v23  ;;  %v1116_v58 = vmul.f32 %v9856_v27, %v1032_v56  ;;  %v2227_v2 = vpack.c.bf16 %v2195_v59, %v2194_v53  ;;  %v733_v23 = vld [vmem:[#allocation2 + $0xd1] sm:$0xff]  ;;  %v1685_v56 = vadd.f32 %v1649_v12, %v842_v37 }
  0xdf   : > { %v2171_v3 = vpack.c.bf16 %v2139_v61, %v2138_v60  ;;  %v734_v53 = vld [vmem:[#allocation2 + $0xd9] sm:$0xff]  ;;  %v10052_v60 = vld [vmem:[#allocation2 + $0xe4] sm:$0xff]  ;;  %v1686_v61 = vadd.f32 %v1650_v32, %v843_v8  ;;  %v882_v12 = vld [vmem:[#allocation2 + $0xed] sm:$0xff] }
  0xe0   : > { %v10037_v16 = vadd.f32 %v9865_v30, %v1116_v58  ;;  %8401 = vmatmul.msk.bf16.gmra.mxu2 %vm1221_vm2, %v2227_v2  ;;  %v1828_v58 = vmul.f32 0.11111111, %v1792_v0  ;;  %v845_v2 = vld [vmem:[#allocation2 + $0xec] sm:$0xff]  ;;  %v1544_v4 = vadd.f32 %v734_v53, %v698_v50  ;;  %v1721_v37 = vadd.f32 %v1685_v56, %v10052_v60  ;;  %v771_v50 = vld [vmem:[#allocation2 + $0xe2] sm:$0xff] }
  0xe1   : > { %8423 = vmatmul.msk.bf16.gmra.mxu3 %vm1221_vm2, %v2171_v3  ;;  %v1543_v3 = vadd.f32 %v733_v23, %v697_v17  ;;  %v1722_v9 = vadd.f32 %v1686_v61, %v845_v2  ;;  %v9374_v0 = vunpack.c.l.bf16 %v10061_v18  ;;  %v772_v23 = vld [vmem:[#allocation2 + $0xea] sm:$0xff] }
  0xe2   : > { %14795 = vst [vmem:[#allocation23_spill] sm:$0xff] %v10037_v16  ;;  %v14505_v28 = vmax.f32 %v10037_v16, 0.0  ;;  %v10045_v22 = vpop.f32.mrf.mxu1  ;;  %v1852_v25 = vpack.c.bf16 %v1828_v58, %v1827_v55  ;;  %v1580_v45 = vadd.f32 %v1544_v4, %v10025_v49  ;;  %v917_v58 = vld [vmem:[#allocation2 + $0xe6] sm:$0xff] }
  0xe3   : > { %14797 = vst [vmem:[#allocation25_spill] sm:$0xff] %v10045_v22  ;;  %v1579_v32 = vadd.f32 %v1543_v3, %v10018_v40  ;;  %v1758_v55 = vadd.f32 %v1722_v9, %v882_v12  ;;  %v918_v3 = vld [vmem:[#allocation2 + $0xee] sm:$0xff] }
  0xe4   : > { %v1451_v47 = vmul.f32 %v10043_v38, %v14505_v28  ;;  %v1616_v52 = vadd.f32 %v1580_v45, %v772_v23  ;;  %663 = vst.msk [vmem:[#allocation2 + $0x10f] sm:$0xff] %vm532_vm1, %v9374_v0  ;;  %v809_v12 = vld [vmem:[#allocation2 + $0xeb] sm:$0xff] }
  0xe5   : > { %v1035_v54 = vpop.f32.mrf.mxu0  ;;  %v1615_v4 = vadd.f32 %v1579_v32, %v771_v50  ;;  %v1794_v9 = vadd.f32 %v1758_v55, %v918_v3 }
  0xe6   : > { %1487 = vst.msk [vmem:[#allocation3 + $0x4b] sm:$0xff] %vm1221_vm2, %v1451_v47  ;;  %v1117_v59 = vmul.f32 %v9856_v27, %v1035_v54  ;;  %v2196_v47 = vld [vmem:[#allocation3 + $0x41] sm:$0xff]  ;;  %v1652_v0 = vadd.f32 %v1616_v52, %v809_v12 }
  0xe7   : > { %v2473_v22 = vpop.f32.mrf.mxu3 }
  0xe8   : > { %v10055_v6 = vadd.f32 %v9865_v30, %v1117_v59  ;;  %8368 = vmatmul.msk.bf16.gmra.mxu0 %vm532_vm1, %v941_v42  ;;  %v2140_v42 = vld [vmem:[#allocation3 + $0x40] sm:$0xff]  ;;  %v1757_v59 = vadd.f32 %v1721_v37, %v881_v14 }
  0xe9   : > { %v808_v37 = vld [vmem:[#allocation2 + $0xe3] sm:$0xff] }
  0xea   : > { %14798 = vst [vmem:[#allocation26_spill] sm:$0xff] %v10055_v6  ;;  %v14506_v7 = vmax.f32 %v10055_v6, 0.0  ;;  %v10065_v8 = vpop.f32.mrf.mxu1  ;;  %v1651_v45 = vadd.f32 %v1615_v4, %v808_v37  ;;  %v1688_v4 = vadd.f32 %v1652_v0, %v845_v2 }
  0xeb   : > { %14800 = vst [vmem:[#allocation28_spill] sm:$0xff] %v10065_v8  ;;  %v849_v43 = vld [vmem:[#allocation2 + $0x10c] sm:$0xff] }
  0xec   : > { %v1452_v17 = vmul.f32 %v10063_v19, %v14506_v7  ;;  %v1687_v3 = vadd.f32 %v1651_v45, %v10052_v60  ;;  %v883_v45 = vld [vmem:[#allocation2 + $0xf5] sm:$0xff] }
  0xed   : > { %v1037_v53 = vpop.f32.mrf.mxu0  ;;  %v2197_v54 = vld [vmem:[#allocation3 + $0x49] sm:$0xff]  ;;  %8385 = vmatmul.msk.bf16.gmra.mxu1 %vm532_vm1, %v1852_v25  ;;  %v699_v25 = vld [vmem:[#allocation2 + $0xe0] sm:$0xff] }
  0xee   : > { %v2141_v56 = vld [vmem:[#allocation3 + $0x48] sm:$0xff]  ;;  %1488 = vst.msk [vmem:[#allocation3 + $0x53] sm:$0xff] %vm1221_vm2, %v1452_v17  ;;  %v1118_v40 = vmul.f32 %v9856_v27, %v1037_v53  ;;  %v2228_v61 = vpack.c.bf16 %v2197_v54, %v2196_v47  ;;  %v1793_v17 = vadd.f32 %v1757_v59, %v917_v58  ;;  %v735_v47 = vld [vmem:[#allocation2 + $0xe1] sm:$0xff]  ;;  %v10083_v53 = vpop.permute.xlu0 %1311  ;;  %v1830_v58 = vmul.f32 0.11111111, %v1794_v9 }
  0xef   : > { %v2172_v49 = vpack.c.bf16 %v2141_v56, %v2140_v42  ;;  %14802 = vst [vmem:[#allocation30_spill] sm:$0xff] %v10083_v53  ;;  %v700_v42 = vld [vmem:[#allocation2 + $0xe8] sm:$0xff]  ;;  %v1723_v2 = vadd.f32 %v1687_v3, %v846_v24  ;;  %v1724_v9 = vadd.f32 %v1688_v4, %v847_v51 }
  0xf0   : > { %v10078_v10 = vadd.f32 %v9865_v30, %v1118_v40  ;;  %8402 = vmatmul.msk.bf16.gmra.mxu2 %vm1221_vm2, %v2228_v61  ;;  %v736_v56 = vld [vmem:[#allocation2 + $0xe9] sm:$0xff]  ;;  %v942_v61 = vpack.c.bf16 %v809_v12, %v808_v37  ;;  %v1829_v55 = vmul.f32 0.11111111, %v1793_v17  ;;  %v10103_v17 = vpop.permute.xlu1 %1316 }
  0xf1   : > { %8424 = vmatmul.msk.bf16.gmra.mxu3 %vm1221_vm2, %v2172_v49  ;;  %v1545_v49 = vadd.f32 %v735_v47, %v699_v25  ;;  %v1546_v52 = vadd.f32 %v736_v56, %v700_v42  ;;  %v10098_v47 = vld [vmem:[#allocation2 + $0xf2] sm:$0xff]  ;;  %14805 = vst [vmem:[#allocation33_spill] sm:$0xff] %v10103_v17  ;;  %v9375_v42 = vunpack.c.h.bf16 %v10061_v18 }
  0xf2   : > { %14801 = vst [vmem:[#allocation29_spill] sm:$0xff] %v10078_v10  ;;  %v14507_v14 = vmax.f32 %v10078_v10, 0.0  ;;  %v10085_v32 = vpop.f32.mrf.mxu1  ;;  %v1853_v25 = vpack.c.bf16 %v1830_v58, %v1829_v55 }
  0xf3   : > { %14803 = vst [vmem:[#allocation31_spill] sm:$0xff] %v10085_v32  ;;  %v1581_v37 = vadd.f32 %v1545_v49, %v771_v50  ;;  %v1582_v0 = vadd.f32 %v1546_v52, %v772_v23  ;;  %v1759_v52 = vadd.f32 %v1723_v2, %v883_v45  ;;  %v811_v2 = vld [vmem:[#allocation2 + $0xfb] sm:$0xff] }
  0xf4   : > { %v1453_v54 = vmul.f32 %v10083_v53, %v14507_v14  ;;  %664 = vst.msk [vmem:[#allocation2 + $0x117] sm:$0xff] %vm532_vm1, %v9375_v42  ;;  %v810_v14 = vld [vmem:[#allocation2 + $0xf3] sm:$0xff] }
  0xf5   : > { %v1040_v40 = vpop.f32.mrf.mxu0  ;;  %v2198_v56 = vld [vmem:[#allocation3 + $0x51] sm:$0xff]  ;;  %v1617_v3 = vadd.f32 %v1581_v37, %v10098_v47 }
  0xf6   : > { %1489 = vst.msk [vmem:[#allocation3 + $0x5b] sm:$0xff] %vm1221_vm2, %v1453_v54  ;;  %v1119_v59 = vmul.f32 %v9856_v27, %v1040_v40  ;;  %v10101_v54 = vld [vmem:[%s9548_s20 + $0x78] sm:$0xff]  }
  0xf7   : > { %v884_v40 = vld [vmem:[#allocation2 + $0xfd] sm:$0xff]  ;;  %v9378_v49 = vunpack.c.l.bf16 %v10101_v54 }
  0xf8   : > { %v10094_v34 = vadd.f32 %v9865_v30, %v1119_v59  ;;  %8369 = vmatmul.msk.bf16.gmra.mxu0 %vm532_vm1, %v942_v61  ;;  %v774_v61 = vld [vmem:[#allocation2 + $0xfa] sm:$0xff]  ;;  %v1760_v39 = vadd.f32 %v1724_v9, %v884_v40  ;;  %v10124_v9 = vpop.permute.xlu2 %1321  ;;  %v701_v40 = vld [vmem:[#allocation2 + $0xf0] sm:$0xff] }
  0xf9   : > { %v2142_v58 = vld [vmem:[#allocation3 + $0x50] sm:$0xff]  ;;  %v1618_v28 = vadd.f32 %v1582_v0, %v774_v61  ;;  %669 = vst.msk [vmem:[#allocation2 + $0x121] sm:$0xff] %vm532_vm1, %v9378_v49 }
  0xfa   : > { %14804 = vst [vmem:[#allocation32_spill] sm:$0xff] %v10094_v34  ;;  %v14508_v12 = vmax.f32 %v10094_v34, 0.0  ;;  %v10105_v60 = vpop.f32.mrf.mxu1  ;;  %v919_v37 = vld [vmem:[#allocation2 + $0xf6] sm:$0xff] }
  0xfb   : > { %14806 = vst [vmem:[#allocation34_spill] sm:$0xff] %v10105_v60  ;;  %v1795_v0 = vadd.f32 %v1759_v52, %v919_v37  ;;  %v10169_v63 = vld [vmem:[#allocation2 + $0x114] sm:$0xff] }
  0xfc   : > { %v1454_v50 = vmul.f32 %v10103_v17, %v14508_v12  ;;  %14808 = vst [vmem:[#allocation36_spill] sm:$0xff] %v10124_v9  ;;  %v848_v12 = vld [vmem:[#allocation2 + $0x104] sm:$0xff] }
  0xfd   : > { %v1042_v59 = vpop.f32.mrf.mxu0  ;;  %v2199_v55 = vld [vmem:[#allocation3 + $0x59] sm:$0xff]  ;;  %8386 = vmatmul.msk.bf16.gmra.mxu1 %vm532_vm1, %v1853_v25  ;;  %v1831_v52 = vmul.f32 0.11111111, %v1795_v0 }
  0xfe   : > { %v2143_v57 = vld [vmem:[#allocation3 + $0x58] sm:$0xff]  ;;  %1490 = vst.msk [vmem:[#allocation3 + $0x63] sm:$0xff] %vm1221_vm2, %v1454_v50  ;;  %v1120_v23 = vmul.f32 %v9856_v27, %v1042_v59  ;;  %v2229_v18 = vpack.c.bf16 %v2199_v55, %v2198_v56  ;;  %v1654_v56 = vadd.f32 %v1618_v28, %v811_v2  ;;  %v737_v59 = vld [vmem:[#allocation2 + $0xf1] sm:$0xff]  ;;  %v2314_v26 = vpop.f32.mrf.mxu2 }
  0xff   : > { %v2173_v4 = vpack.c.bf16 %v2143_v57, %v2142_v58  ;;  %v920_v50 = vld [vmem:[#allocation2 + $0xfe] sm:$0xff]  ;;  %v1653_v57 = vadd.f32 %v1617_v3, %v810_v14  ;;  %v943_v3 = vpack.c.bf16 %v811_v2, %v810_v14  ;;  %v1547_v5 = vadd.f32 %v737_v59, %v701_v40  ;;  %v10139_v2 = vpop.permute.xlu0 %1326 }
 0x100   : > { %v10118_v7 = vadd.f32 %v9865_v30, %v1120_v23  ;;  %8403 = vmatmul.msk.bf16.gmra.mxu2 %vm1221_vm2, %v2229_v18  ;;  %v1796_v42 = vadd.f32 %v1760_v39, %v920_v50  ;;  %v702_v58 = vld [vmem:[#allocation2 + $0xf8] sm:$0xff]  ;;  %v1690_v28 = vadd.f32 %v1654_v56, %v847_v51  ;;  %14811 = vst [vmem:[#allocation39_spill] sm:$0xff] %v10139_v2  ;;  %v10143_v51 = vld [vmem:[#allocation2 + $0x102] sm:$0xff]  ;;  %v9379_v40 = vunpack.c.h.bf16 %v10101_v54 }
 0x101   : > { %8425 = vmatmul.msk.bf16.gmra.mxu3 %vm1221_vm2, %v2173_v4  ;;  %v738_v23 = vld [vmem:[#allocation2 + $0xf9] sm:$0xff]  ;;  %v1689_v18 = vadd.f32 %v1653_v57, %v846_v24  ;;  %v885_v24 = vld [vmem:[#allocation2 + $0x105] sm:$0xff]  ;;  %v1583_v57 = vadd.f32 %v1547_v5, %v10098_v47  ;;  %v10174_v32 = vadd.f32 %v2473_v22, %v2314_v26 }
 0x102   : > { %14807 = vst [vmem:[#allocation35_spill] sm:$0xff] %v10118_v7  ;;  %v14511_v25 = vmax.f32 %v10118_v7, 0.0  ;;  %v10126_v45 = vpop.f32.mrf.mxu1  ;;  %v1832_v39 = vmul.f32 0.11111111, %v1796_v42  ;;  %v1548_v37 = vadd.f32 %v738_v23, %v702_v58  ;;  %v1726_v42 = vadd.f32 %v1690_v28, %v849_v43  ;;  %v886_v23 = vld [vmem:[#allocation2 + $0x10d] sm:$0xff]  ;;  %v851_v8 = vld [vmem:[#allocation2 + $0x11c] sm:$0xff] }
 0x103   : > { %14809 = vst [vmem:[#allocation37_spill] sm:$0xff] %v10126_v45  ;;  %v921_v28 = vld [vmem:[#allocation2 + $0x106] sm:$0xff] }
 0x104   : > { %v1455_v55 = vmul.f32 %v10124_v9, %v14511_v25  ;;  %v1725_v25 = vadd.f32 %v1689_v18, %v848_v12  ;;  %v1854_v0 = vpack.c.bf16 %v1832_v39, %v1831_v52  ;;  %v1584_v56 = vadd.f32 %v1548_v37, %v774_v61  ;;  %670 = vst.msk [vmem:[#allocation2 + $0x129] sm:$0xff] %vm532_vm1, %v9379_v40 }
 0x105   : > { %v1045_v49 = vpop.f32.mrf.mxu0  ;;  %v2200_v58 = vld [vmem:[#allocation3 + $0x61] sm:$0xff]  ;;  %v1619_v39 = vadd.f32 %v1583_v57, %v10143_v51  ;;  %v1762_v37 = vadd.f32 %v1726_v42, %v886_v23  ;;  %v10160_v57 = vpop.permute.xlu1 %1331  ;;  %v703_v23 = vld [vmem:[#allocation2 + $0x100] sm:$0xff] }
 0x106   : > { %1491 = vst.msk [vmem:[#allocation3 + $0x6b] sm:$0xff] %vm1221_vm2, %v1455_v55  ;;  %v1121_v4 = vmul.f32 %v9856_v27, %v1045_v49  ;;  %v776_v49 = vld [vmem:[#allocation2 + $0x10a] sm:$0xff] }
 0x107   : > { %v2144_v47 = vld [vmem:[#allocation3 + $0x60] sm:$0xff]  ;;  %14814 = vst [vmem:[#allocation42_spill] sm:$0xff] %v10160_v57 }
 0x108   : > { %v10134_v50 = vadd.f32 %v9865_v30, %v1121_v4  ;;  %8370 = vmatmul.msk.bf16.gmra.mxu0 %vm532_vm1, %v943_v3  ;;  %v1761_v4 = vadd.f32 %v1725_v25, %v885_v24  ;;  %v922_v25 = vld [vmem:[#allocation2 + $0x10e] sm:$0xff]  ;;  %v812_v24 = vld [vmem:[#allocation2 + $0x103] sm:$0xff] }
 0x109   : > { %v1798_v42 = vadd.f32 %v1762_v37, %v922_v25 }
 0x10a   : > { %14810 = vst [vmem:[#allocation38_spill] sm:$0xff] %v10134_v50  ;;  %v14512_v14 = vmax.f32 %v10134_v50, 0.0  ;;  %v10141_v55 = vpop.f32.mrf.mxu1 }
 0x10b   : > { %14812 = vst [vmem:[#allocation40_spill] sm:$0xff] %v10141_v55  ;;  %v1834_v35 = vmul.f32 0.11111111, %v1798_v42  ;;  %v888_v42 = vld [vmem:[#allocation2 + $0x11d] sm:$0xff] }
 0x10c   : > { %v1456_v59 = vmul.f32 %v10139_v2, %v14512_v14  ;;  %v1620_v14 = vadd.f32 %v1584_v56, %v776_v49 }
 0x10d   : > { %v1047_v3 = vpop.f32.mrf.mxu0  ;;  %v2201_v5 = vld [vmem:[#allocation3 + $0x69] sm:$0xff]  ;;  %8387 = vmatmul.msk.bf16.gmra.mxu1 %vm532_vm1, %v1854_v0 }
 0x10e   : > { %v2145_v18 = vld [vmem:[#allocation3 + $0x68] sm:$0xff]  ;;  %1492 = vst.msk [vmem:[#allocation3 + $0x73] sm:$0xff] %vm1221_vm2, %v1456_v59  ;;  %v1122_v61 = vmul.f32 %v9856_v27, %v1047_v3  ;;  %v2230_v52 = vpack.c.bf16 %v2201_v5, %v2200_v58  ;;  %v1797_v59 = vadd.f32 %v1761_v4, %v921_v28  ;;  %v1655_v3 = vadd.f32 %v1619_v39, %v812_v24 }
 0x10f   : > { %v2174_v54 = vpack.c.bf16 %v2145_v18, %v2144_v47  ;;  %v813_v58 = vld [vmem:[#allocation2 + $0x10b] sm:$0xff]  ;;  %v739_v18 = vld [vmem:[#allocation2 + $0x101] sm:$0xff] }
 0x110   : > { %v10155_v46 = vadd.f32 %v9865_v30, %v1122_v61  ;;  %8404 = vmatmul.msk.bf16.gmra.mxu2 %vm1221_vm2, %v2230_v52  ;;  %v1656_v56 = vadd.f32 %v1620_v14, %v813_v58  ;;  %v704_v47 = vld [vmem:[#allocation2 + $0x108] sm:$0xff]  ;;  %v1833_v39 = vmul.f32 0.11111111, %v1797_v59  ;;  %v1691_v28 = vadd.f32 %v1655_v3, %v848_v12  ;;  %v887_v3 = vld [vmem:[#allocation2 + $0x115] sm:$0xff] }
 0x111   : > { %8426 = vmatmul.msk.bf16.gmra.mxu3 %vm1221_vm2, %v2174_v54  ;;  %v740_v61 = vld [vmem:[#allocation2 + $0x109] sm:$0xff]  ;;  %v944_v54 = vpack.c.bf16 %v813_v58, %v812_v24  ;;  %v1549_v37 = vadd.f32 %v739_v18, %v703_v23  ;;  %v10179_v24 = vpop.permute.xlu2 %1336  ;;  %v777_v23 = vld [vmem:[#allocation2 + $0x112] sm:$0xff] }
 0x112   : > { %14813 = vst [vmem:[#allocation41_spill] sm:$0xff] %v10155_v46  ;;  %v14513_v40 = vmax.f32 %v10155_v46, 0.0  ;;  %v10162_v0 = vpop.f32.mrf.mxu1  ;;  %v1692_v14 = vadd.f32 %v1656_v56, %v849_v43  ;;  %v1550_v25 = vadd.f32 %v740_v61, %v704_v47  ;;  %v1727_v12 = vadd.f32 %v1691_v28, %v10169_v63  ;;  %v923_v28 = vld [vmem:[#allocation2 + $0x116] sm:$0xff] }
 0x113   : > { %14815 = vst [vmem:[#allocation43_spill] sm:$0xff] %v10162_v0  ;;  %v1855_v43 = vpack.c.bf16 %v1834_v35, %v1833_v39  ;;  %v10192_v35 = vld [vmem:[%s14486_s4] ss:$0 sm:$0xff]  ;;  %v852_v0 = vld [vmem:[#allocation2 + $0x124] sm:$0xff] }
 0x114   : > { %v1457_v5 = vmul.f32 %v10160_v57, %v14513_v40  ;;  %14817 = vst [vmem:[#allocation45_spill] sm:$0xff] %v10179_v24  ;;  %v1728_v58 = vadd.f32 %v1692_v14, %v851_v8  ;;  %v1586_v56 = vadd.f32 %v1550_v25, %v776_v49  ;;  %v1763_v39 = vadd.f32 %v1727_v12, %v887_v3  ;;  %v814_v3 = vld [vmem:[#allocation2 + $0x113] sm:$0xff] }
 0x115   : > { %v1050_v52 = vpop.f32.mrf.mxu0  ;;  %v2202_v22 = vld [vmem:[#allocation3 + $0x71] sm:$0xff] }
 0x116   : > { %1493 = vst.msk [vmem:[#allocation3 + $0x7b] sm:$0xff] %vm1221_vm2, %v1457_v5  ;;  %v1123_v4 = vmul.f32 %v9856_v27, %v1050_v52  ;;  %v779_v5 = vld [vmem:[#allocation2 + $0x11a] sm:$0xff]  ;;  %v1764_v14 = vadd.f32 %v1728_v58, %v888_v42  ;;  %v10207_v42 = vpop.permute.xlu0 %1341 }
 0x117   : > { %v2146_v61 = vld [vmem:[#allocation3 + $0x70] sm:$0xff]  ;;  %v1622_v25 = vadd.f32 %v1586_v56, %v779_v5  ;;  %14821 = vst [vmem:[#allocation48_spill] sm:$0xff] %v10207_v42 }
 0x118   : > { %v10172_v40 = vadd.f32 %v9865_v30, %v1123_v4  ;;  %8371 = vmatmul.msk.bf16.gmra.mxu0 %vm532_vm1, %v944_v54  ;;  %v1585_v30 = vadd.f32 %v1549_v37, %v10143_v51  ;;  %v14819_v54 = vmov 0.0   ;;  %v815_v58 = vld [vmem:[#allocation2 + $0x11b] sm:$0xff] }
 0x119   : > { %574 = vst.msk [vmem:[#allocation2 + $0x140] sm:$0xf] %vm573_vm3, %v14819_v54  ;;  %v945_v60 = vpack.c.bf16 %v815_v58, %v814_v3 }
 0x11a   : > { %14816 = vst [vmem:[#allocation44_spill] sm:$0xff] %v10172_v40  ;;  %v14514_v27 = vmax.f32 %v10172_v40, 0.0  ;;  %v10181_v59 = vpop.f32.mrf.mxu1  ;;  %v1621_v37 = vadd.f32 %v1585_v30, %v777_v23 }
 0x11b   : > { %14818 = vst [vmem:[#allocation46_spill] sm:$0xff] %v10181_v59  ;;  %v778_v59 = vld [vmem:[#allocation2 + $0x11a] sm:$0x3f] }
 0x11c   : > { %v1458_v26 = vmul.f32 %v10179_v24, %v14514_v27  ;;  %v1657_v5 = vadd.f32 %v1621_v37, %v814_v3  ;;  %4446 = vst.msk [vmem:[#allocation4 + $0x10] sm:$0xff] %vm14731_vm6, %v14819_v54 }
 0x11d   : > { %v1052_v47 = vpop.f32.mrf.mxu0  ;;  %v2203_v18 = vld [vmem:[#allocation3 + $0x79] sm:$0xff]  ;;  %8388 = vmatmul.msk.bf16.gmra.mxu1 %vm532_vm1, %v1855_v43  ;;  %v1799_v43 = vadd.f32 %v1763_v39, %v923_v28  ;;  %4447 = vst.msk [vmem:[#allocation4 + $0x18] sm:$0xff] %vm14731_vm6, %v14819_v54 }
 0x11e   : > { %v2147_v52 = vld [vmem:[#allocation3 + $0x78] sm:$0xff]  ;;  %1494 = vst.msk [vmem:[#allocation3 + $0x83] sm:$0xff] %vm1221_vm2, %v1458_v26  ;;  %v1124_v51 = vmul.f32 %v10192_v35, %v1052_v47  ;;  %v2231_v49 = vpack.c.bf16 %v2203_v18, %v2202_v22  ;;  %v1658_v47 = vadd.f32 %v1622_v25, %v815_v58  ;;  %v705_v18 = vld [vmem:[#allocation2 + $0x110] sm:$0xff] }
 0x11f   : > { %v2175_v4 = vpack.c.bf16 %v2147_v52, %v2146_v61  ;;  %v10199_v26 = vld [vmem:[%s14487_s5] ss:$0 sm:$0xff]  ;;  %v741_v61 = vld [vmem:[#allocation2 + $0x111] sm:$0xff]  ;;  %v1835_v28 = vmul.f32 0.11111111, %v1799_v43  ;;  %4444 = vst.msk [vmem:[#allocation4] sm:$0xff] %vm14731_vm6, %v14819_v54 }
 0x120   : > { %v10202_v27 = vadd.f32 %v10199_v26, %v1124_v51  ;;  %8405 = vmatmul.msk.bf16.gmra.mxu2 %vm1221_vm2, %v2231_v49  ;;  %v924_v22 = vld [vmem:[#allocation2 + $0x11e] sm:$0xff]  ;;  %v706_v51 = vld [vmem:[#allocation2 + $0x118] sm:$0x3f]  ;;  %v1551_v45 = vadd.f32 %v741_v61, %v705_v18  ;;  %v1694_v37 = vadd.f32 %v1658_v47, %v851_v8  ;;  %4445 = vst.msk [vmem:[#allocation4 + $0x8] sm:$0xff] %vm14731_vm6, %v14819_v54 }
 0x121   : > { %8427 = vmatmul.msk.bf16.gmra.mxu3 %vm1221_vm2, %v2175_v4  ;;  %v1800_v56 = vadd.f32 %v1764_v14, %v924_v22  ;;  %v742_v49 = vld [vmem:[#allocation2 + $0x119] sm:$0x3f]  ;;  %v1693_v14 = vadd.f32 %v1657_v5, %v10169_v63  ;;  %v889_v8 = vld [vmem:[#allocation2 + $0x125] sm:$0xff]  ;;  %v890_v5 = vld [vmem:[#allocation2 + $0x12d] sm:$0xff]  ;;  %4448 = vst.msk [vmem:[#allocation4 + $0x20] sm:$0xff] %vm14731_vm6, %v14819_v54 }
 0x122   : > { %14820 = vst [vmem:[#allocation47_spill] sm:$0xff] %v10202_v27  ;;  %v14515_v12 = vmax.f32 %v10202_v27, 0.0  ;;  %v10209_v30 = vpop.f32.mrf.mxu1  ;;  %v1552_v25 = vadd.f32 %v742_v49, %v706_v51  ;;  %v1587_v58 = vadd.f32 %v1551_v45, %v777_v23  ;;  %v780_v47 = vld [vmem:[#allocation2 + $0x122] sm:$0xff]  ;;  %v9309_v45 = vld [vmem:[%s14491_s9 + $0x10] sm:$0xff] }
 0x123   : > { %14822 = vst [vmem:[#allocation49_spill] sm:$0xff] %v10209_v30  ;;  %v1836_v55 = vmul.f32 0.11111111, %v1800_v56  ;;  %v1729_v18 = vadd.f32 %v1693_v14, %v852_v0  ;;  %2687 = vmatpush.bf16.msrb.mxu0 %v9309_v45  ;;  %v925_v30 = vld [vmem:[#allocation2 + $0x126] sm:$0xff] }
 0x124   : > { %v1459_v52 = vmul.f32 %v10207_v42, %v14515_v12  ;;  %v854_v12 = vld [vmem:[#allocation2 + $0x12c] sm:$0xff]  ;;  %v1588_v61 = vadd.f32 %v1552_v25, %v778_v59  ;;  %v1623_v14 = vadd.f32 %v1587_v58, %v780_v47  ;;  %v10241_v47 = vpop.permute.xlu2 %1351  ;;  %v3330_v42 = vld [vmem:[#allocation3 + $0x6c] sm:$0xff]  ;;  %4449 = vst.msk [vmem:[#allocation4 + $0x28] sm:$0xff] %vm14731_vm6, %v14819_v54 }
 0x125   : > { %v1055_v4 = vpop.f32.mrf.mxu0  ;;  %v1856_v56 = vpack.c.bf16 %v1836_v55, %v1835_v28  ;;  %v1730_v63 = vadd.f32 %v1694_v37, %v854_v12  ;;  %v2204_v49 = vld [vmem:[#allocation3 + $0x81] sm:$0xff]  ;;  %v1765_v37 = vadd.f32 %v1729_v18, %v889_v8  ;;  %14827 = vst [vmem:[#allocation54_spill] sm:$0xff] %v10241_v47 }
 0x126   : > { %1495 = vst.msk [vmem:[#allocation3 + $0x8b] sm:$0xff] %vm1221_vm2, %v1459_v52  ;;  %v1125_v39 = vmul.f32 %v10192_v35, %v1055_v4  ;;  %v10222_v52 = vpop.permute.xlu1 %1346  ;;  %v3332_v2 = vld [vmem:[#allocation3 + $0x7c] sm:$0xff] }
 0x127   : > { %14824 = vst [vmem:[#allocation51_spill] sm:$0xff] %v10222_v52  ;;  %v1766_v25 = vadd.f32 %v1730_v63, %v890_v5  ;;  %v1801_v18 = vadd.f32 %v1765_v37, %v925_v30 }
 0x128   : > { %v10218_v22 = vadd.f32 %v10199_v26, %v1125_v39  ;;  %8372 = vmatmul.msk.bf16.gmra.mxu0 %vm532_vm1, %v945_v60  ;;  %v781_v60 = vld [vmem:[#allocation2 + $0x12a] sm:$0x3f]  ;;  %4450 = vst.msk [vmem:[#allocation4 + $0x30] sm:$0xff] %vm14731_vm6, %v14819_v54 }
 0x129   : > { %v2148_v39 = vld [vmem:[#allocation3 + $0x80] sm:$0xff]  ;;  %4451 = vst.msk [vmem:[#allocation4 + $0x38] sm:$0xff] %vm14731_vm6, %v14819_v54 }
 0x12a   : > { %14823 = vst [vmem:[#allocation50_spill] sm:$0xff] %v10218_v22  ;;  %v14516_v3 = vmax.f32 %v10218_v22, 0.0  ;;  %v10224_v43 = vpop.f32.mrf.mxu1 }
 0x12b   : > { %14825 = vst [vmem:[#allocation52_spill] sm:$0xff] %v10224_v43  ;;  %v816_v43 = vld [vmem:[#allocation2 + $0x123] sm:$0xff] }
 0x12c   : > { %v1460_v51 = vmul.f32 %v10222_v52, %v14516_v3  ;;  %v1624_v3 = vadd.f32 %v1588_v61, %v781_v60  ;;  %v1659_v58 = vadd.f32 %v1623_v14, %v816_v43  ;;  %v853_v61 = vld [vmem:[#allocation2 + $0x12c] sm:$0x3f]  ;;  %v10248_v60 = vpop.f32.mrf.mxu2  ;;  %v856_v14 = vld [vmem:[#allocation2 + $0x13c] sm:$0x3f]  ;;  %4452 = vst.msk [vmem:[#allocation4 + $0x40] sm:$0xff] %vm14731_vm6, %v14819_v54 }
 0x12d   : > { %v1057_v23 = vpop.f32.mrf.mxu0  ;;  %v2205_v4 = vld [vmem:[#allocation3 + $0x89] sm:$0xff]  ;;  %8389 = vmatmul.msk.bf16.gmra.mxu1 %vm532_vm1, %v1856_v56  ;;  %4453 = vst.msk [vmem:[#allocation4 + $0x48] sm:$0xff] %vm14731_vm6, %v14819_v54 }
 0x12e   : > { %v2149_v55 = vld [vmem:[#allocation3 + $0x88] sm:$0xff]  ;;  %1496 = vst.msk [vmem:[#allocation3 + $0x93] sm:$0xff] %vm1221_vm2, %v1460_v51  ;;  %v1126_v12 = vmul.f32 %v10192_v35, %v1057_v23  ;;  %v2232_v28 = vpack.c.bf16 %v2205_v4, %v2204_v49  ;;  %v10251_v4 = vpop.f32.mrf.mxu3 }
 0x12f   : > { %v2176_v59 = vpack.c.bf16 %v2149_v55, %v2148_v39  ;;  %v926_v51 = vld [vmem:[#allocation2 + $0x12e] sm:$0xff]  ;;  %v1695_v55 = vadd.f32 %v1659_v58, %v852_v0  ;;  %4454 = vst.msk [vmem:[#allocation4 + $0x50] sm:$0xff] %vm14731_vm6, %v14819_v54 }
 0x130   : > { %v10236_v22 = vadd.f32 %v10199_v26, %v1126_v12  ;;  %8406 = vmatmul.msk.bf16.gmra.mxu2 %vm1221_vm2, %v2232_v28  ;;  %v817_v23 = vld [vmem:[#allocation2 + $0x12b] sm:$0x3f]  ;;  %v1802_v63 = vadd.f32 %v1766_v25, %v926_v51  ;;  %v1837_v28 = vmul.f32 0.11111111, %v1801_v18  ;;  %v891_v58 = vld [vmem:[#allocation2 + $0x135] sm:$0xff]  ;;  %v10262_v18 = vpop.permute.xlu0 %1356  ;;  %4455 = vst.msk [vmem:[#allocation4 + $0x58] sm:$0xff] %vm14731_vm6, %v14819_v54 }
 0x131   : > { %8428 = vmatmul.msk.bf16.gmra.mxu3 %vm1221_vm2, %v2176_v59  ;;  %v1660_v8 = vadd.f32 %v1624_v3, %v817_v23  ;;  %v946_v45 = vpack.c.bf16 %v817_v23, %v816_v43  ;;  %v855_v59 = vld [vmem:[#allocation2 + $0x134] sm:$0xff]  ;;  %14830 = vst [vmem:[#allocation57_spill] sm:$0xff] %v10262_v18 }
 0x132   : > { %14826 = vst [vmem:[#allocation53_spill] sm:$0xff] %v10236_v22  ;;  %v14518_v49 = vmax.f32 %v10236_v22, 0.0  ;;  %v10243_v56 = vpop.f32.mrf.mxu1  ;;  %v1838_v30 = vmul.f32 0.11111111, %v1802_v63  ;;  %v1731_v25 = vadd.f32 %v1695_v55, %v855_v59  ;;  %v9310_v43 = vld [vmem:[%s14491_s9 + $0x18] sm:$0xff] }
 0x133   : > { %14828 = vst [vmem:[#allocation55_spill] sm:$0xff] %v10243_v56  ;;  %v1696_v3 = vadd.f32 %v1660_v8, %v853_v61  ;;  %2939 = vmatpush.bf16.msrb.mxu1 %v9310_v43 }
 0x134   : > { %v1461_v5 = vmul.f32 %v10241_v47, %v14518_v49  ;;  %v1857_v0 = vpack.c.bf16 %v1838_v30, %v1837_v28  ;;  %4456 = vst.msk [vmem:[#allocation4 + $0x60] sm:$0xff] %vm14731_vm6, %v14819_v54 }
 0x135   : > { %v1060_v39 = vpop.f32.mrf.mxu0  ;;  %v1732_v23 = vadd.f32 %v1696_v3, %v856_v14  ;;  %v2206_v8 = vld [vmem:[#allocation3 + $0x91] sm:$0xff]  ;;  %v1767_v3 = vadd.f32 %v1731_v25, %v891_v58  ;;  %4457 = vst.msk [vmem:[#allocation4 + $0x68] sm:$0xff] %vm14731_vm6, %v14819_v54 }
 0x136   : > { %1497 = vst.msk [vmem:[#allocation3 + $0x9b] sm:$0xff] %vm1221_vm2, %v1461_v5  ;;  %v1127_v12 = vmul.f32 %v10192_v35, %v1060_v39  ;;  %v892_v5 = vld [vmem:[#allocation2 + $0x13d] sm:$0x3f]  ;;  %v2564_v25 = vld [vmem:[#allocation3 + $0xa] sm:$0xff] }
 0x137   : > { %v2150_v39 = vld [vmem:[#allocation3 + $0x90] sm:$0xff]  ;;  %v1768_v22 = vadd.f32 %v1732_v23, %v892_v5  ;;  %4458 = vst.msk [vmem:[#allocation4 + $0x70] sm:$0xff] %vm14731_vm6, %v14819_v54 }
 0x138   : > { %v10255_v37 = vadd.f32 %v10199_v26, %v1127_v12  ;;  %8373 = vmatmul.msk.bf16.gmra.mxu0 %vm532_vm1, %v946_v45  ;;  %v10314_v56 = vpop.permute.xlu0 %1371  ;;  %v3334_v53 = vld [vmem:[#allocation3 + $0x8c] sm:$0xff]  ;;  %4459 = vst.msk [vmem:[#allocation4 + $0x78] sm:$0xff] %vm14731_vm6, %v14819_v54 }
 0x139   : > { %14839 = vst [vmem:[#allocation66_spill] sm:$0xff] %v10314_v56  ;;  %v3083_v21 = vld [vmem:[#allocation3 + $0x93] sm:$0xff] }
 0x13a   : > { %14829 = vst [vmem:[#allocation56_spill] sm:$0xff] %v10255_v37  ;;  %v14520_v51 = vmax.f32 %v10255_v37, 0.0  ;;  %v10264_v63 = vpop.f32.mrf.mxu1  ;;  %v2319_v12 = vpop.f32.mrf.mxu2  ;;  %v928_v37 = vld [vmem:[#allocation2 + $0x13e] sm:$0x3f] }
 0x13b   : > { %14831 = vst [vmem:[#allocation58_spill] sm:$0xff] %v10264_v63  ;;  %v2478_v30 = vpop.f32.mrf.mxu3 }
 0x13c   : > { %v1462_v61 = vmul.f32 %v10262_v18, %v14520_v51  ;;  %v10272_v43 = vadd.f32 %v2478_v30, %v2319_v12  ;;  %v927_v51 = vld [vmem:[#allocation2 + $0x136] sm:$0xff]  ;;  %v3328_v18 = vld [vmem:[#allocation3 + $0x5c] sm:$0xff]  ;;  %4460 = vst.msk [vmem:[#allocation4 + $0x80] sm:$0xff] %vm14731_vm6, %v14819_v54 }
 0x13d   : > { %v2207_v45 = vld [vmem:[#allocation3 + $0x99] sm:$0xff]  ;;  %v1062_v59 = vpop.f32.mrf.mxu0  ;;  %8390 = vmatmul.msk.bf16.gmra.mxu1 %vm532_vm1, %v1857_v0  ;;  %v1804_v0 = vadd.f32 %v1768_v22, %v928_v37  ;;  %4461 = vst.msk [vmem:[#allocation4 + $0x88] sm:$0xff] %vm14731_vm6, %v14819_v54 }
 0x13e   : > { %v2151_v55 = vld [vmem:[#allocation3 + $0x98] sm:$0xff]  ;;  %v2233_v49 = vpack.c.bf16 %v2207_v45, %v2206_v8  ;;  %1498 = vst.msk [vmem:[#allocation3 + $0xa3] sm:$0xff] %vm1221_vm2, %v1462_v61  ;;  %v1128_v14 = vmul.f32 %v10192_v35, %v1062_v59  ;;  %v2563_v45 = vld [vmem:[#allocation3 + $0x2] sm:$0xff]  ;;  %v1803_v61 = vadd.f32 %v1767_v3, %v927_v51 }
 0x13f   : > { %v2177_v28 = vpack.c.bf16 %v2151_v55, %v2150_v39  ;;  %v10280_v39 = vpop.permute.xlu1 %1361  ;;  %v2599_v23 = vpack.c.bf16 %v2564_v25, %v2563_v45  ;;  %v10296_v45 = vpop.permute.xlu2 %1366  ;;  %4462 = vst.msk [vmem:[#allocation4 + $0x90] sm:$0xff] %vm14731_vm6, %v14819_v54 }
 0x140   : > { %8407 = vmatmul.msk.bf16.gmra.mxu2 %vm1221_vm2, %v2233_v49  ;;  %v10277_v8 = vadd.f32 %v10199_v26, %v1128_v14  ;;  %14833 = vst [vmem:[#allocation60_spill] sm:$0xff] %v10280_v39  ;;  %v1839_v30 = vmul.f32 0.11111111, %v1803_v61  ;;  %v1840_v14 = vmul.f32 0.11111111, %v1804_v0  ;;  %v10362_v41 = vpop.permute.xlu0 %1386 }
 0x141   : > { %8429 = vmatmul.msk.bf16.gmra.mxu3 %vm1221_vm2, %v2177_v28  ;;  %14836 = vst [vmem:[#allocation63_spill] sm:$0xff] %v10296_v45 }
 0x142   : > { %14832 = vst [vmem:[#allocation59_spill] sm:$0xff] %v10277_v8  ;;  %v14522_v58 = vmax.f32 %v10277_v8, 0.0  ;;  %v10282_v55 = vpop.f32.mrf.mxu1  ;;  %v2321_v5 = vpop.f32.mrf.mxu2  ;;  %v1858_v3 = vpack.c.bf16 %v1840_v14, %v1839_v30 }
 0x143   : > { %14834 = vst [vmem:[#allocation61_spill] sm:$0xff] %v10282_v55  ;;  %v2480_v59 = vpop.f32.mrf.mxu3 }
 0x144   : > { %v1463_v49 = vmul.f32 %v10280_v39, %v14522_v58  ;;  %v10289_v51 = vadd.f32 %v2480_v59, %v2321_v5  ;;  %14848 = vst [vmem:[#allocation75_spill] sm:$0xff] %v10362_v41 }
 0x145   : > { %v1065_v12 = vpop.f32.mrf.mxu0  ;;  %v2208_v5 = vld [vmem:[#allocation3 + $0xa1] sm:$0xff]  ;;  %4463 = vst.msk [vmem:[#allocation4 + $0x98] sm:$0xff] %vm14731_vm6, %v14819_v54 }
 0x146   : > { %1499 = vst.msk [vmem:[#allocation3 + $0xab] sm:$0xff] %vm1221_vm2, %v1463_v49  ;;  %v1129_v28 = vmul.f32 %v10192_v35, %v1065_v12  ;;  %v2152_v14 = vld [vmem:[#allocation3 + $0xa0] sm:$0xff] }
 0x147   : > { %v10346_v15 = vpop.permute.xlu2 %1381  ;;  %4464 = vst.msk [vmem:[#allocation4 + $0xa0] sm:$0xff] %vm14731_vm6, %v14819_v54 }
 0x148   : > { %v10292_v22 = vadd.f32 %v10199_v26, %v1129_v28  ;;  %8444 = vmatmul.msk.bf16.vlgmr.msrb.gmra.mxu0 %vm1221_vm2, %v2599_v23  ;;  %14845 = vst [vmem:[#allocation72_spill] sm:$0xff] %v10346_v15  ;;  %v10414_v63 = vpop.permute.xlu0 %1401 }
 0x149   : > { %14857 = vst [vmem:[#allocation84_spill] sm:$0xff] %v10414_v63 }
 0x14a   : > { %14835 = vst [vmem:[#allocation62_spill] sm:$0xff] %v10292_v22  ;;  %v14525_v37 = vmax.f32 %v10292_v22, 0.0  ;;  %v10298_v25 = vpop.f32.mrf.mxu1  ;;  %v2324_v61 = vpop.f32.mrf.mxu2 }
 0x14b   : > { %14837 = vst [vmem:[#allocation64_spill] sm:$0xff] %v10298_v25  ;;  %v2483_v28 = vpop.f32.mrf.mxu3 }
 0x14c   : > { %v1464_v49 = vmul.f32 %v10296_v45, %v14525_v37  ;;  %v10306_v8 = vadd.f32 %v2483_v28, %v2324_v61  ;;  %4465 = vst.msk [vmem:[#allocation4 + $0xa8] sm:$0xff] %vm14731_vm6, %v14819_v54 }
 0x14d   : > { %v1067_v0 = vpop.f32.mrf.mxu0  ;;  %v2209_v12 = vld [vmem:[#allocation3 + $0xa9] sm:$0xff]  ;;  %8391 = vmatmul.msk.bf16.gmra.mxu1 %vm532_vm1, %v1858_v3  ;;  %v2816_v3 = vld [vmem:[#allocation3 + $0x1a] sm:$0xff]  ;;  %4466 = vst.msk [vmem:[#allocation4 + $0xb0] sm:$0xff] %vm14731_vm6, %v14819_v54 }
 0x14e   : > { %v2153_v59 = vld [vmem:[#allocation3 + $0xa8] sm:$0xff]  ;;  %1500 = vst.msk [vmem:[#allocation3 + $0xb3] sm:$0xff] %vm1221_vm2, %v1464_v49  ;;  %v1130_v23 = vmul.f32 %v10192_v35, %v1067_v0  ;;  %v2234_v30 = vpack.c.bf16 %v2209_v12, %v2208_v5  ;;  %v2815_v12 = vld [vmem:[#allocation3 + $0x12] sm:$0xff] }
 0x14f   : > { %v2178_v58 = vpack.c.bf16 %v2153_v59, %v2152_v14  ;;  %v10396_v7 = vpop.permute.xlu2 %1396  ;;  %v3337_v33 = vld [vmem:[#allocation3 + $0xa4] sm:$0xff]  ;;  %4467 = vst.msk [vmem:[#allocation4 + $0xb8] sm:$0xff] %vm14731_vm6, %v14819_v54 }
 0x150   : > { %v10309_v22 = vadd.f32 %v10199_v26, %v1130_v23  ;;  %8408 = vmatmul.msk.bf16.gmra.mxu2 %vm1221_vm2, %v2234_v30  ;;  %14854 = vst [vmem:[#allocation81_spill] sm:$0xff] %v10396_v7 }
 0x151   : > { %8430 = vmatmul.msk.bf16.gmra.mxu3 %vm1221_vm2, %v2178_v58  ;;  %v2851_v58 = vpack.c.bf16 %v2816_v3, %v2815_v12  ;;  %4468 = vst.msk [vmem:[#allocation4 + $0xc0] sm:$0xff] %vm14731_vm6, %v14819_v54 }
 0x152   : > { %14838 = vst [vmem:[#allocation65_spill] sm:$0xff] %v10309_v22  ;;  %v14527_v37 = vmax.f32 %v10309_v22, 0.0  ;;  %v10316_v49 = vpop.f32.mrf.mxu1  ;;  %v2326_v61 = vpop.f32.mrf.mxu2 }
 0x153   : > { %14840 = vst [vmem:[#allocation67_spill] sm:$0xff] %v10316_v49  ;;  %v2485_v59 = vpop.f32.mrf.mxu3  ;;  %v10330_v22 = vpop.permute.xlu1 %1376 }
 0x154   : > { %v1465_v0 = vmul.f32 %v10314_v56, %v14527_v37  ;;  %v10323_v23 = vadd.f32 %v2485_v59, %v2326_v61  ;;  %14842 = vst [vmem:[#allocation69_spill] sm:$0xff] %v10330_v22  ;;  %v3326_v56 = vld [vmem:[#allocation3 + $0x4c] sm:$0xff] }
 0x155   : > { %v1070_v5 = vpop.f32.mrf.mxu0  ;;  %4469 = vst.msk [vmem:[#allocation4 + $0xc8] sm:$0xff] %vm14731_vm6, %v14819_v54 }
 0x156   : > { %1501 = vst.msk [vmem:[#allocation3 + $0xbb] sm:$0xff] %vm1221_vm2, %v1465_v0  ;;  %v1131_v28 = vmul.f32 %v10192_v35, %v1070_v5  ;;  %v2210_v5 = vld [vmem:[#allocation3 + $0xb1] sm:$0xff] }
 0x157   : > { %4470 = vst.msk [vmem:[#allocation4 + $0xd0] sm:$0xff] %vm14731_vm6, %v14819_v54 }
 0x158   : > { %v10326_v30 = vadd.f32 %v10199_v26, %v1131_v28  ;;  %8445 = vmatmul.msk.bf16.gmra.mxu0 %vm1221_vm2, %v2851_v58  ;;  %v2154_v28 = vld [vmem:[#allocation3 + $0xb0] sm:$0xff]  ;;  %4471 = vst.msk [vmem:[#allocation4 + $0xd8] sm:$0xff] %vm14731_vm6, %v14819_v54 }
 0x159   : > { %4472 = vst.msk [vmem:[#allocation4 + $0xe0] sm:$0xff] %vm14731_vm6, %v14819_v54 }
 0x15a   : > { %14841 = vst [vmem:[#allocation68_spill] sm:$0xff] %v10326_v30  ;;  %v14531_v14 = vmax.f32 %v10326_v30, 0.0  ;;  %v10332_v37 = vpop.f32.mrf.mxu1 }
 0x15b   : > { %14843 = vst [vmem:[#allocation70_spill] sm:$0xff] %v10332_v37  ;;  %v10380_v34 = vpop.permute.xlu1 %1391 }
 0x15c   : > { %v1466_v0 = vmul.f32 %v10330_v22, %v14531_v14  ;;  %14851 = vst [vmem:[#allocation78_spill] sm:$0xff] %v10380_v34  ;;  %v2835_v22 = vld [vmem:[#allocation3 + $0xb2] sm:$0xff] }
 0x15d   : > { %v1072_v44 = vpop.f32.mrf.mxu0  ;;  %v2211_v3 = vld [vmem:[#allocation3 + $0xb9] sm:$0xff]  ;;  %8468 = vmatmul.msk.bf16.vlgmr.msrb.gmra.mxu1 %vm1221_vm2, %v2851_v58  ;;  %4473 = vst.msk [vmem:[#allocation4 + $0xe8] sm:$0xff] %vm14731_vm6, %v14819_v54 }
 0x15e   : > { %v2155_v61 = vld [vmem:[#allocation3 + $0xb8] sm:$0xff]  ;;  %1502 = vst.msk [vmem:[#allocation3 + $0xc3] sm:$0xff] %vm1221_vm2, %v1466_v0  ;;  %v1132_v12 = vmul.f32 %v10192_v35, %v1072_v44  ;;  %v2235_v59 = vpack.c.bf16 %v2211_v3, %v2210_v5  ;;  %v2818_v44 = vld [vmem:[#allocation3 + $0x2a] sm:$0xff] }
 0x15f   : > { %v2179_v1 = vpack.c.bf16 %v2155_v61, %v2154_v28  ;;  %v2817_v61 = vld [vmem:[#allocation3 + $0x22] sm:$0xff]  ;;  %4474 = vst.msk [vmem:[#allocation4 + $0xf0] sm:$0xff] %vm14731_vm6, %v14819_v54 }
 0x160   : > { %v10341_v31 = vadd.f32 %v10199_v26, %v1132_v12  ;;  %8409 = vmatmul.msk.bf16.gmra.mxu2 %vm1221_vm2, %v2235_v59  ;;  %v2852_v12 = vpack.c.bf16 %v2818_v44, %v2817_v61  ;;  %4475 = vst.msk [vmem:[#allocation4 + $0xf8] sm:$0xff] %vm14731_vm6, %v14819_v54 }
 0x161   : > { %8431 = vmatmul.msk.bf16.gmra.mxu3 %vm1221_vm2, %v2179_v1  ;;  %4476 = vst.msk [vmem:[#allocation4 + $0x100] sm:$0xff] %vm14731_vm6, %v14819_v54 }
 0x162   : > { %14844 = vst [vmem:[#allocation71_spill] sm:$0xff] %v10341_v31  ;;  %v14537_v14 = vmax.f32 %v10341_v31, 0.0  ;;  %v10348_v0 = vpop.f32.mrf.mxu1 }
 0x163   : > { %v2329_v30 = vpop.f32.mrf.mxu2  ;;  %14846 = vst [vmem:[#allocation73_spill] sm:$0xff] %v10348_v0  ;;  %v10430_v55 = vpop.permute.xlu1 %1406 }
 0x164   : > { %v2488_v13 = vpop.f32.mrf.mxu3  ;;  %v1467_v5 = vmul.f32 %v10346_v15, %v14537_v14  ;;  %14860 = vst [vmem:[#allocation87_spill] sm:$0xff] %v10430_v55 }
 0x165   : > { %v10350_v58 = vadd.f32 %v2488_v13, %v2329_v30  ;;  %v1075_v3 = vpop.f32.mrf.mxu0  ;;  %v2156_v6 = vld [vmem:[#allocation3 + $0xc0] sm:$0xff]  ;;  %4477 = vst.msk [vmem:[#allocation4 + $0x108] sm:$0xff] %vm14731_vm6, %v14819_v54 }
 0x166   : > { %1503 = vst.msk [vmem:[#allocation3 + $0xcb] sm:$0xff] %vm1221_vm2, %v1467_v5  ;;  %v1133_v1 = vmul.f32 %v10192_v35, %v1075_v3  ;;  %v2212_v3 = vld [vmem:[#allocation3 + $0xc1] sm:$0xff] }
 0x167   : > { %v2837_v39 = vld [vmem:[#allocation3 + $0xc2] sm:$0xff]  ;;  %4478 = vst.msk [vmem:[#allocation4 + $0x110] sm:$0xff] %vm14731_vm6, %v14819_v54 }
 0x168   : > { %v10358_v59 = vadd.f32 %v10199_v26, %v1133_v1  ;;  %8446 = vmatmul.msk.bf16.gmra.mxu0 %vm1221_vm2, %v2852_v12  ;;  %4479 = vst.msk [vmem:[#allocation4 + $0x118] sm:$0xff] %vm14731_vm6, %v14819_v54 }
 0x169   : > { %4480 = vst.msk [vmem:[#allocation4 + $0x120] sm:$0xff] %vm14731_vm6, %v14819_v54 }
 0x16a   : > { %14847 = vst [vmem:[#allocation74_spill] sm:$0xff] %v10358_v59  ;;  %v14542_v13 = vmax.f32 %v10358_v59, 0.0  ;;  %v10364_v31 = vpop.f32.mrf.mxu1 }
 0x16b   : > { %v2331_v30 = vpop.f32.mrf.mxu2  ;;  %14849 = vst [vmem:[#allocation76_spill] sm:$0xff] %v10364_v31  ;;  %v10448_v31 = vpop.permute.xlu2 %1411 }
 0x16c   : > { %v2490_v28 = vpop.f32.mrf.mxu3  ;;  %v1468_v5 = vmul.f32 %v10362_v41, %v14542_v13  ;;  %14863 = vst [vmem:[#allocation90_spill] sm:$0xff] %v10448_v31  ;;  %v3069_v41 = vld [vmem:[#allocation3 + $0x23] sm:$0xff] }
 0x16d   : > { %v10366_v14 = vadd.f32 %v2490_v28, %v2331_v30  ;;  %v1077_v44 = vpop.f32.mrf.mxu0  ;;  %v2213_v61 = vld [vmem:[#allocation3 + $0xc9] sm:$0xff]  ;;  %8469 = vmatmul.msk.bf16.gmra.mxu1 %vm1221_vm2, %v2852_v12  ;;  %4481 = vst.msk [vmem:[#allocation4 + $0x128] sm:$0xff] %vm14731_vm6, %v14819_v54 }
 0x16e   : > { %v2157_v1 = vld [vmem:[#allocation3 + $0xc8] sm:$0xff]  ;;  %1504 = vst.msk [vmem:[#allocation3 + $0xd3] sm:$0xff] %vm1221_vm2, %v1468_v5  ;;  %v1134_v36 = vmul.f32 %v10192_v35, %v1077_v44  ;;  %v2236_v16 = vpack.c.bf16 %v2213_v61, %v2212_v3  ;;  %v2820_v44 = vld [vmem:[#allocation3 + $0x3a] sm:$0xff]  ;;  %v2819_v3 = vld [vmem:[#allocation3 + $0x32] sm:$0xff] }
 0x16f   : > { %v2180_v10 = vpack.c.bf16 %v2157_v1, %v2156_v6  ;;  %4482 = vst.msk [vmem:[#allocation4 + $0x130] sm:$0xff] %vm14731_vm6, %v14819_v54 }
 0x170   : > { %v10375_v30 = vadd.f32 %v10199_v26, %v1134_v36  ;;  %8410 = vmatmul.msk.bf16.gmra.mxu2 %vm1221_vm2, %v2236_v16  ;;  %v2853_v16 = vpack.c.bf16 %v2820_v44, %v2819_v3  ;;  %4483 = vst.msk [vmem:[#allocation4 + $0x138] sm:$0xff] %vm14731_vm6, %v14819_v54 }
 0x171   : > { %8432 = vmatmul.msk.bf16.gmra.mxu3 %vm1221_vm2, %v2180_v10  ;;  %1263 = vst.msk [vmem:[#allocation3 + $0x140] sm:$0xf] %vm1262_vm7, %v14819_v54 }
 0x172   : > { %14850 = vst [vmem:[#allocation77_spill] sm:$0xff] %v10375_v30  ;;  %v14547_v28 = vmax.f32 %v10375_v30, 0.0  ;;  %v10382_v5 = vpop.f32.mrf.mxu1 }
 0x173   : > { %v2334_v13 = vpop.f32.mrf.mxu2  ;;  %14852 = vst [vmem:[#allocation79_spill] sm:$0xff] %v10382_v5  ;;  %v10464_v5 = vpop.permute.xlu0 %1416 }
 0x174   : > { %v2493_v59 = vpop.f32.mrf.mxu3  ;;  %v1469_v36 = vmul.f32 %v10380_v34, %v14547_v28  ;;  %14866 = vst [vmem:[#allocation93_spill] sm:$0xff] %v10464_v5 }
 0x175   : > { %v10384_v12 = vadd.f32 %v2493_v59, %v2334_v13  ;;  %v1080_v6 = vpop.f32.mrf.mxu0  ;;  %v2158_v40 = vld [vmem:[#allocation3 + $0xd0] sm:$0xff] }
 0x176   : > { %1505 = vst.msk [vmem:[#allocation3 + $0xdb] sm:$0xff] %vm1221_vm2, %v1469_v36  ;;  %v1135_v10 = vmul.f32 %v10192_v35, %v1080_v6  ;;  %v2214_v6 = vld [vmem:[#allocation3 + $0xd1] sm:$0xff] }
 0x177   : > { %v2839_v52 = vld [vmem:[#allocation3 + $0xd2] sm:$0xff] }
 0x178   : > { %v10392_v61 = vadd.f32 %v10199_v26, %v1135_v10  ;;  %8447 = vmatmul.msk.bf16.gmra.mxu0 %vm1221_vm2, %v2853_v16 }
 0x17a   : > { %14853 = vst [vmem:[#allocation80_spill] sm:$0xff] %v10392_v61  ;;  %v14552_v59 = vmax.f32 %v10392_v61, 0.0  ;;  %v10398_v30 = vpop.f32.mrf.mxu1 }
 0x17b   : > { %v2336_v13 = vpop.f32.mrf.mxu2  ;;  %14855 = vst [vmem:[#allocation82_spill] sm:$0xff] %v10398_v30 }
 0x17c   : > { %v2495_v1 = vpop.f32.mrf.mxu3  ;;  %v1470_v36 = vmul.f32 %v10396_v7, %v14552_v59 }
 0x17d   : > { %v10400_v28 = vadd.f32 %v2495_v1, %v2336_v13  ;;  %v1082_v44 = vpop.f32.mrf.mxu0  ;;  %v2215_v3 = vld [vmem:[#allocation3 + $0xd9] sm:$0xff]  ;;  %8470 = vmatmul.msk.bf16.gmra.mxu1 %vm1221_vm2, %v2853_v16 }
 0x17e   : > { %v2159_v10 = vld [vmem:[#allocation3 + $0xd8] sm:$0xff]  ;;  %1506 = vst.msk [vmem:[#allocation3 + $0xe3] sm:$0xff] %vm1221_vm2, %v1470_v36  ;;  %v1136_v50 = vmul.f32 %v10192_v35, %v1082_v44  ;;  %v2237_v46 = vpack.c.bf16 %v2215_v3, %v2214_v6  ;;  %v2822_v44 = vld [vmem:[#allocation3 + $0x4a] sm:$0xff]  ;;  %v2821_v6 = vld [vmem:[#allocation3 + $0x42] sm:$0xff] }
 0x17f   : > { %v2181_v27 = vpack.c.bf16 %v2159_v10, %v2158_v40 }
 0x180   : > { %v10409_v13 = vadd.f32 %v10199_v26, %v1136_v50  ;;  %8411 = vmatmul.msk.bf16.gmra.mxu2 %vm1221_vm2, %v2237_v46 }
 0x181   : > { %8433 = vmatmul.msk.bf16.gmra.mxu3 %vm1221_vm2, %v2181_v27  ;;  %v2854_v27 = vpack.c.bf16 %v2822_v44, %v2821_v6 }
 0x182   : > { %14856 = vst [vmem:[#allocation83_spill] sm:$0xff] %v10409_v13  ;;  %v14555_v1 = vmax.f32 %v10409_v13, 0.0  ;;  %v10416_v36 = vpop.f32.mrf.mxu1 }
 0x183   : > { %v2339_v59 = vpop.f32.mrf.mxu2  ;;  %14858 = vst [vmem:[#allocation85_spill] sm:$0xff] %v10416_v36 }
 0x184   : > { %v2498_v61 = vpop.f32.mrf.mxu3  ;;  %v1471_v50 = vmul.f32 %v10414_v63, %v14555_v1 }
 0x185   : > { %v10418_v16 = vadd.f32 %v2498_v61, %v2339_v59  ;;  %v1085_v40 = vpop.f32.mrf.mxu0  ;;  %v2160_v37 = vld [vmem:[#allocation3 + $0xe0] sm:$0xff] }
 0x186   : > { %1507 = vst.msk [vmem:[#allocation3 + $0xeb] sm:$0xff] %vm1221_vm2, %v1471_v50  ;;  %v1137_v46 = vmul.f32 %v10192_v35, %v1085_v40  ;;  %v2216_v40 = vld [vmem:[#allocation3 + $0xe1] sm:$0xff] }
 0x187   : > { %v2841_v57 = vld [vmem:[#allocation3 + $0xe2] sm:$0xff] }
 0x188   : > { %v10426_v3 = vadd.f32 %v10199_v26, %v1137_v46  ;;  %8448 = vmatmul.msk.bf16.gmra.mxu0 %vm1221_vm2, %v2854_v27 }
 0x18a   : > { %14859 = vst [vmem:[#allocation86_spill] sm:$0xff] %v10426_v3  ;;  %v14556_v61 = vmax.f32 %v10426_v3, 0.0  ;;  %v10432_v13 = vpop.f32.mrf.mxu1 }
 0x18b   : > { %v2341_v59 = vpop.f32.mrf.mxu2  ;;  %14861 = vst [vmem:[#allocation88_spill] sm:$0xff] %v10432_v13 }
 0x18c   : > { %v2500_v10 = vpop.f32.mrf.mxu3  ;;  %v1472_v50 = vmul.f32 %v10430_v55, %v14556_v61 }
 0x18d   : > { %v10434_v1 = vadd.f32 %v2500_v10, %v2341_v59  ;;  %v1087_v44 = vpop.f32.mrf.mxu0  ;;  %v2217_v6 = vld [vmem:[#allocation3 + $0xe9] sm:$0xff]  ;;  %8471 = vmatmul.msk.bf16.gmra.mxu1 %vm1221_vm2, %v2854_v27 }
 0x18e   : > { %v2161_v46 = vld [vmem:[#allocation3 + $0xe8] sm:$0xff]  ;;  %1508 = vst.msk [vmem:[#allocation3 + $0xf3] sm:$0xff] %vm1221_vm2, %v1472_v50  ;;  %v1138_v25 = vmul.f32 %v10192_v35, %v1087_v44  ;;  %v2238_v49 = vpack.c.bf16 %v2217_v6, %v2216_v40  ;;  %v2824_v44 = vld [vmem:[#allocation3 + $0x5a] sm:$0xff]  ;;  %v2823_v40 = vld [vmem:[#allocation3 + $0x52] sm:$0xff] }
 0x18f   : > { %v2182_v0 = vpack.c.bf16 %v2161_v46, %v2160_v37 }
 0x190   : > { %v10443_v59 = vadd.f32 %v10199_v26, %v1138_v25  ;;  %8412 = vmatmul.msk.bf16.gmra.mxu2 %vm1221_vm2, %v2238_v49 }
 0x191   : > { %8434 = vmatmul.msk.bf16.gmra.mxu3 %vm1221_vm2, %v2182_v0  ;;  %v2855_v0 = vpack.c.bf16 %v2824_v44, %v2823_v40 }
 0x192   : > { %14862 = vst [vmem:[#allocation89_spill] sm:$0xff] %v10443_v59  ;;  %v14559_v10 = vmax.f32 %v10443_v59, 0.0  ;;  %v10450_v50 = vpop.f32.mrf.mxu1 }
 0x193   : > { %v2344_v61 = vpop.f32.mrf.mxu2  ;;  %14864 = vst [vmem:[#allocation91_spill] sm:$0xff] %v10450_v50 }
 0x194   : > { %v2503_v3 = vpop.f32.mrf.mxu3  ;;  %v1473_v37 = vmul.f32 %v10448_v31, %v14559_v10 }
 0x195   : > { %v10452_v27 = vadd.f32 %v2503_v3, %v2344_v61  ;;  %v1090_v25 = vpop.f32.mrf.mxu0  ;;  %v2162_v13 = vld [vmem:[#allocation3 + $0xf0] sm:$0xff] }
 0x196   : > { %1509 = vst.msk [vmem:[#allocation3 + $0xfb] sm:$0xff] %vm1221_vm2, %v1473_v37  ;;  %v1139_v49 = vmul.f32 %v10192_v35, %v1090_v25  ;;  %v2218_v25 = vld [vmem:[#allocation3 + $0xf1] sm:$0xff] }
 0x197   : > { %v2843_v17 = vld [vmem:[#allocation3 + $0xf2] sm:$0xff] }
 0x198   : > { %v10460_v6 = vadd.f32 %v10199_v26, %v1139_v49  ;;  %8449 = vmatmul.msk.bf16.gmra.mxu0 %vm1221_vm2, %v2855_v0 }
 0x19a   : > { %14865 = vst [vmem:[#allocation92_spill] sm:$0xff] %v10460_v6  ;;  %v14560_v3 = vmax.f32 %v10460_v6, 0.0  ;;  %v10466_v59 = vpop.f32.mrf.mxu1 }
 0x19b   : > { %v2346_v61 = vpop.f32.mrf.mxu2  ;;  %14867 = vst [vmem:[#allocation94_spill] sm:$0xff] %v10466_v59  ;;  %v10482_v59 = vpop.permute.xlu1 %1421 }
 0x19c   : > { %v2505_v46 = vpop.f32.mrf.mxu3  ;;  %v1474_v37 = vmul.f32 %v10464_v5, %v14560_v3  ;;  %14869 = vst [vmem:[#allocation96_spill] sm:$0xff] %v10482_v59 }
 0x19d   : > { %v10468_v10 = vadd.f32 %v2505_v46, %v2346_v61  ;;  %v1092_v44 = vpop.f32.mrf.mxu0  ;;  %v2219_v40 = vld [vmem:[#allocation3 + $0xf9] sm:$0xff]  ;;  %8472 = vmatmul.msk.bf16.gmra.mxu1 %vm1221_vm2, %v2855_v0 }
 0x19e   : > { %v2163_v49 = vld [vmem:[#allocation3 + $0xf8] sm:$0xff]  ;;  %1510 = vst.msk [vmem:[#allocation3 + $0x103] sm:$0xff] %vm1221_vm2, %v1474_v37  ;;  %v1140_v30 = vmul.f32 %v10192_v35, %v1092_v44  ;;  %v2239_v36 = vpack.c.bf16 %v2219_v40, %v2218_v25  ;;  %v2826_v44 = vld [vmem:[#allocation3 + $0x6a] sm:$0xff]  ;;  %v2825_v25 = vld [vmem:[#allocation3 + $0x62] sm:$0xff] }
 0x19f   : > { %v2183_v50 = vpack.c.bf16 %v2163_v49, %v2162_v13 }
 0x1a0   : > { %v10477_v61 = vadd.f32 %v10199_v26, %v1140_v30  ;;  %8413 = vmatmul.msk.bf16.gmra.mxu2 %vm1221_vm2, %v2239_v36 }
 0x1a1   : > { %8435 = vmatmul.msk.bf16.gmra.mxu3 %vm1221_vm2, %v2183_v50  ;;  %v2856_v50 = vpack.c.bf16 %v2826_v44, %v2825_v25 }
 0x1a2   : > { %14868 = vst [vmem:[#allocation95_spill] sm:$0xff] %v10477_v61  ;;  %v14562_v46 = vmax.f32 %v10477_v61, 0.0  ;;  %v10484_v37 = vpop.f32.mrf.mxu1  ;;  %v10501_v61 = vpop.permute.xlu2 %1426 }
 0x1a3   : > { %v2349_v3 = vpop.f32.mrf.mxu2  ;;  %14870 = vst [vmem:[#allocation97_spill] sm:$0xff] %v10484_v37 }
 0x1a4   : > { %v2508_v6 = vpop.f32.mrf.mxu3  ;;  %v1475_v30 = vmul.f32 %v10482_v59, %v14562_v46  ;;  %14872 = vst [vmem:[#allocation99_spill] sm:$0xff] %v10501_v61 }
 0x1a5   : > { %v10486_v0 = vadd.f32 %v2508_v6, %v2349_v3  ;;  %v1095_v13 = vpop.f32.mrf.mxu0  ;;  %v9311_v6 = vld [vmem:[%s14491_s9 + $0x20] sm:$0xff]  ;;  %v2164_v31 = vld [vmem:[#allocation3 + $0x100] sm:$0xff] }
 0x1a6   : > { %1511 = vst.msk [vmem:[#allocation3 + $0x10b] sm:$0xff] %vm1221_vm2, %v1475_v30  ;;  %v1141_v36 = vmul.f32 %v10192_v35, %v1095_v13  ;;  %3191 = vmatpush.bf16.msrb.mxu2 %v9311_v6  ;;  %v2845_v38 = vld [vmem:[#allocation3 + $0x102] sm:$0xff] }
 0x1a8   : > { %v10494_v40 = vadd.f32 %v10199_v26, %v1141_v36  ;;  %8450 = vmatmul.msk.bf16.gmra.mxu0 %vm1221_vm2, %v2856_v50  ;;  %v2220_v36 = vld [vmem:[#allocation3 + $0x101] sm:$0xff] }
 0x1aa   : > { %14871 = vst [vmem:[#allocation98_spill] sm:$0xff] %v10494_v40  ;;  %v14568_v3 = vmax.f32 %v10494_v40, 0.0  ;;  %v10503_v30 = vpop.f32.mrf.mxu1 }
 0x1ab   : > { %v2351_v49 = vpop.f32.mrf.mxu2  ;;  %14873 = vst [vmem:[#allocation100_spill] sm:$0xff] %v10503_v30  ;;  %v10519_v30 = vpop.permute.xlu0 %1431 }
 0x1ac   : > { %v2510_v46 = vpop.f32.mrf.mxu3  ;;  %v1476_v44 = vmul.f32 %v10501_v61, %v14568_v3  ;;  %14875 = vst [vmem:[#allocation102_spill] sm:$0xff] %v10519_v30 }
 0x1ad   : > { %v10505_v13 = vadd.f32 %v2510_v46, %v2351_v49  ;;  %v1097_v25 = vpop.f32.mrf.mxu0  ;;  %v2221_v37 = vld [vmem:[#allocation3 + $0x109] sm:$0xff]  ;;  %8473 = vmatmul.msk.bf16.gmra.mxu1 %vm1221_vm2, %v2856_v50 }
 0x1ae   : > { %v2165_v59 = vld [vmem:[#allocation3 + $0x108] sm:$0xff]  ;;  %1512 = vst.msk [vmem:[#allocation3 + $0x113] sm:$0xff] %vm1221_vm2, %v1476_v44  ;;  %v1142_v6 = vmul.f32 %v10192_v35, %v1097_v25  ;;  %v2240_v5 = vpack.c.bf16 %v2221_v37, %v2220_v36  ;;  %v2828_v37 = vld [vmem:[#allocation3 + $0x7a] sm:$0xff] }
 0x1af   : > { %v2184_v55 = vpack.c.bf16 %v2165_v59, %v2164_v31  ;;  %v9312_v31 = vld [vmem:[%s14491_s9 + $0x28] sm:$0xff]  ;;  %v2827_v59 = vld [vmem:[#allocation3 + $0x72] sm:$0xff] }
 0x1b0   : > { %v10514_v46 = vadd.f32 %v10199_v26, %v1142_v6  ;;  %8414 = vmatmul.msk.bf16.gmra.mxu2 %vm1221_vm2, %v2240_v5  ;;  %3443 = vmatpush.bf16.msrb.mxu3 %v9312_v31  ;;  %v2857_v36 = vpack.c.bf16 %v2828_v37, %v2827_v59 }
 0x1b1   : > { %8436 = vmatmul.msk.bf16.gmra.mxu3 %vm1221_vm2, %v2184_v55 }
 0x1b2   : > { %14874 = vst [vmem:[#allocation101_spill] sm:$0xff] %v10514_v46  ;;  %v14571_v49 = vmax.f32 %v10514_v46, 0.0  ;;  %v10521_v44 = vpop.f32.mrf.mxu1  ;;  %v10538_v46 = vpop.permute.xlu1 %1436 }
 0x1b3   : > { %v2354_v3 = vpop.f32.mrf.mxu2  ;;  %14876 = vst [vmem:[#allocation103_spill] sm:$0xff] %v10521_v44 }
 0x1b4   : > { %v2513_v40 = vpop.f32.mrf.mxu3  ;;  %v1477_v5 = vmul.f32 %v10519_v30, %v14571_v49  ;;  %14878 = vst [vmem:[#allocation105_spill] sm:$0xff] %v10538_v46 }
 0x1b5   : > { %v10523_v50 = vadd.f32 %v2513_v40, %v2354_v3  ;;  %v1100_v55 = vpop.f32.mrf.mxu0  ;;  %v2166_v63 = vld [vmem:[#allocation3 + $0x110] sm:$0xff] }
 0x1b6   : > { %1513 = vst.msk [vmem:[#allocation3 + $0x11b] sm:$0xff] %vm1221_vm2, %v1477_v5  ;;  %v1143_v25 = vmul.f32 %v10192_v35, %v1100_v55  ;;  %v2222_v5 = vld [vmem:[#allocation3 + $0x111] sm:$0xff] }
 0x1b7   : > { %v2847_v20 = vld [vmem:[#allocation3 + $0x112] sm:$0xff] }
 0x1b8   : > { %v10534_v40 = vadd.f32 %v10199_v26, %v1143_v25  ;;  %8451 = vmatmul.msk.bf16.gmra.mxu0 %vm1221_vm2, %v2857_v36 }
 0x1ba   : > { %14877 = vst [vmem:[#allocation104_spill] sm:$0xff] %v10534_v40  ;;  %v14576_v3 = vmax.f32 %v10534_v40, 0.0  ;;  %v10540_v49 = vpop.f32.mrf.mxu1 }
 0x1bb   : > { %v2356_v6 = vpop.f32.mrf.mxu2  ;;  %14879 = vst [vmem:[#allocation106_spill] sm:$0xff] %v10540_v49  ;;  %v10556_v49 = vpop.permute.xlu2 %1441 }
 0x1bc   : > { %v2515_v44 = vpop.f32.mrf.mxu3  ;;  %v1478_v31 = vmul.f32 %v10538_v46, %v14576_v3  ;;  %14881 = vst [vmem:[#allocation108_spill] sm:$0xff] %v10556_v49 }
 0x1bd   : > { %v10542_v30 = vadd.f32 %v2515_v44, %v2356_v6  ;;  %v1102_v37 = vpop.f32.mrf.mxu0  ;;  %v2223_v55 = vld [vmem:[#allocation3 + $0x119] sm:$0x3f]  ;;  %8474 = vmatmul.msk.bf16.gmra.mxu1 %vm1221_vm2, %v2857_v36  ;;  %v2830_v36 = vld [vmem:[#allocation3 + $0x8a] sm:$0xff] }
 0x1be   : > { %v2167_v59 = vld [vmem:[#allocation3 + $0x118] sm:$0x3f]  ;;  %1514 = vst.msk [vmem:[#allocation3 + $0x123] sm:$0xff] %vm1221_vm2, %v1478_v31  ;;  %v1144_v25 = vmul.f32 %v10192_v35, %v1102_v37  ;;  %v2241_v61 = vpack.c.bf16 %v2223_v55, %v2222_v5 }
 0x1bf   : > { %v2185_v7 = vpack.c.bf16 %v2167_v59, %v2166_v63 }
 0x1c0   : > { %v10551_v44 = vadd.f32 %v10199_v26, %v1144_v25  ;;  %8415 = vmatmul.msk.bf16.gmra.mxu2 %vm1221_vm2, %v2241_v61  ;;  %v2829_v61 = vld [vmem:[#allocation3 + $0x82] sm:$0xff] }
 0x1c1   : > { %8437 = vmatmul.msk.bf16.gmra.mxu3 %vm1221_vm2, %v2185_v7  ;;  %v2858_v37 = vpack.c.bf16 %v2830_v36, %v2829_v61 }
 0x1c2   : > { %14880 = vst [vmem:[#allocation107_spill] sm:$0xff] %v10551_v44  ;;  %v14579_v6 = vmax.f32 %v10551_v44, 0.0  ;;  %v10558_v31 = vpop.f32.mrf.mxu1  ;;  %v3067_v44 = vld [vmem:[#allocation3 + $0x13] sm:$0xff] }
 0x1c3   : > { %v2359_v3 = vpop.f32.mrf.mxu2  ;;  %14882 = vst [vmem:[#allocation109_spill] sm:$0xff] %v10558_v31 }
 0x1c4   : > { %v2518_v40 = vpop.f32.mrf.mxu3  ;;  %v1479_v26 = vmul.f32 %v10556_v49, %v14579_v6  ;;  %v3319_v49 = vld [vmem:[#allocation3 + $0x14] sm:$0xff] }
 0x1c5   : > { %v10560_v35 = vadd.f32 %v2518_v40, %v2359_v3  ;;  %v2689_v63 = vpop.f32.mrf.mxu0  ;;  %v3068_v40 = vld [vmem:[#allocation3 + $0x1b] sm:$0xff] }
 0x1c6   : > { %1516 = vst.msk [vmem:[#allocation3 + $0x12b] sm:$0x3f] %vm1515_vm4, %v1479_v26  ;;  %v2779_v7 = vadd.f32 %v2689_v63, %v10174_v32  ;;  %v3320_v3 = vld [vmem:[#allocation3 + $0x1c] sm:$0xff]  ;;  %v3103_v6 = vpack.c.bf16 %v3068_v40, %v3067_v44 }
 0x1c7   : > { %v3355_v26 = vpack.c.bf16 %v3320_v3, %v3319_v49  ;;  %v2832_v63 = vld [vmem:[#allocation3 + $0x9a] sm:$0xff]  ;;  %v3322_v3 = vld [vmem:[#allocation3 + $0x2c] sm:$0xff] }
 0x1c8   : > { %8452 = vmatmul.msk.bf16.gmra.mxu0 %vm1221_vm2, %v2858_v37 }
 0x1ca   : > { %v10567_v59 = vpop.f32.mrf.mxu1 }
 0x1cb   : > { %v2361_v5 = vpop.f32.mrf.mxu2  ;;  %14883 = vst [vmem:[#allocation110_spill] sm:$0xff] %v10567_v59  ;;  %v2831_v59 = vld [vmem:[#allocation3 + $0x92] sm:$0xff] }
 0x1cc   : > { %v2520_v55 = vpop.f32.mrf.mxu3  ;;  %v2859_v34 = vpack.c.bf16 %v2832_v63, %v2831_v59  ;;  %v2476_v63 = vadd.f32 %v10251_v4, %v10248_v60 }
 0x1cd   : > { %v10569_v25 = vadd.f32 %v2520_v55, %v2361_v5  ;;  %v2691_v31 = vpop.f32.mrf.mxu0  ;;  %8475 = vmatmul.msk.bf16.gmra.mxu1 %vm1221_vm2, %v2858_v37  ;;  %v3070_v37 = vld [vmem:[#allocation3 + $0x2b] sm:$0xff] }
 0x1d0   : > { %8492 = vmatmul.msk.bf16.vlgmr.msrb.gmra.mxu2 %vm1221_vm2, %v3103_v6 }
 0x1d1   : > { %8516 = vmatmul.msk.bf16.vlgmr.msrb.gmra.mxu3 %vm1221_vm2, %v3355_v26 }
 0x1d2   : > { %v10574_v32 = vpop.f32.mrf.mxu1 }
 0x1d3   : > { %14884 = vst [vmem:[#allocation111_spill] sm:$0xff] %v10574_v32  ;;  %v2364_v36 = vpop.f32.mrf.mxu2 }
 0x1d4   : > { %v2523_v61 = vpop.f32.mrf.mxu3 }
 0x1d5   : > { %v10576_v5 = vadd.f32 %v2523_v61, %v2364_v36  ;;  %v2694_v55 = vpop.f32.mrf.mxu0  ;;  %v3104_v61 = vpack.c.bf16 %v3070_v37, %v3069_v41 }
 0x1d6   : > { %v2781_v46 = vadd.f32 %v2694_v55, %v10272_v43  ;;  %v3321_v43 = vld [vmem:[#allocation3 + $0x24] sm:$0xff] }
 0x1d7   : > { %v10586_v59 = vpack.c.bf16 %v3322_v3, %v3321_v43 }
 0x1d8   : > { %8453 = vmatmul.msk.bf16.gmra.mxu0 %vm1221_vm2, %v2859_v34 }
 0x1da   : > { %v2941_v44 = vpop.f32.mrf.mxu1 }
 0x1db   : > { %v2366_v49 = vpop.f32.mrf.mxu2  ;;  %v10580_v6 = vadd.f32 %v2941_v44, %v2779_v7  ;;  %v2780_v7 = vadd.f32 %v2691_v31, %v2476_v63  ;;  %v3324_v63 = vld [vmem:[#allocation3 + $0x3c] sm:$0xff] }
 0x1dc   : > { %v2525_v40 = vpop.f32.mrf.mxu3 }
 0x1dd   : > { %v10582_v26 = vadd.f32 %v2525_v40, %v2366_v49  ;;  %v2696_v32 = vpop.f32.mrf.mxu0  ;;  %8476 = vmatmul.msk.bf16.gmra.mxu1 %vm1221_vm2, %v2859_v34  ;;  %v2834_v49 = vld [vmem:[#allocation3 + $0xaa] sm:$0xff] }
 0x1de   : > { %v2782_v36 = vadd.f32 %v2696_v32, %v10289_v51  ;;  %v2833_v32 = vld [vmem:[#allocation3 + $0xa2] sm:$0xff] }
 0x1df   : > { %v2860_v3 = vpack.c.bf16 %v2834_v49, %v2833_v32  ;;  %v2836_v32 = vld [vmem:[#allocation3 + $0xba] sm:$0xff] }
 0x1e0   : > { %8493 = vmatmul.msk.bf16.gmra.mxu2 %vm1221_vm2, %v3104_v61  ;;  %v3072_v61 = vld [vmem:[#allocation3 + $0x3b] sm:$0xff] }
 0x1e1   : > { %8517 = vmatmul.msk.bf16.gmra.mxu3 %vm1221_vm2, %v10586_v59 }
 0x1e2   : > { %v2943_v55 = vpop.f32.mrf.mxu1 }
 0x1e3   : > { %v2369_v44 = vpop.f32.mrf.mxu2  ;;  %v10593_v40 = vadd.f32 %v2943_v55, %v2780_v7  ;;  %v3071_v55 = vld [vmem:[#allocation3 + $0x33] sm:$0xff] }
 0x1e4   : > { %v2528_v34 = vpop.f32.mrf.mxu3 }
 0x1e5   : > { %v10595_v51 = vadd.f32 %v2528_v34, %v2369_v44  ;;  %v2699_v41 = vpop.f32.mrf.mxu0  ;;  %v3105_v34 = vpack.c.bf16 %v3072_v61, %v3071_v55  ;;  %v2861_v61 = vpack.c.bf16 %v2836_v32, %v2835_v22  ;;  %v3074_v55 = vld [vmem:[#allocation3 + $0x4b] sm:$0xff] }
 0x1e6   : > { %v2783_v37 = vadd.f32 %v2699_v41, %v10306_v8  ;;  %v3323_v8 = vld [vmem:[#allocation3 + $0x34] sm:$0xff] }
 0x1e7   : > { %v10605_v49 = vpack.c.bf16 %v3324_v63, %v3323_v8 }
 0x1e8   : > { %8454 = vmatmul.msk.bf16.gmra.mxu0 %vm1221_vm2, %v2860_v3 }
 0x1ea   : > { %v2946_v60 = vpop.f32.mrf.mxu1 }
 0x1eb   : > { %v2371_v4 = vpop.f32.mrf.mxu2  ;;  %v10599_v43 = vadd.f32 %v2946_v60, %v2781_v46 }
 0x1ec   : > { %v2530_v31 = vpop.f32.mrf.mxu3 }
 0x1ed   : > { %v10601_v15 = vadd.f32 %v2530_v31, %v2371_v4  ;;  %v2701_v7 = vpop.f32.mrf.mxu0  ;;  %8477 = vmatmul.msk.bf16.gmra.mxu1 %vm1221_vm2, %v2860_v3 }
 0x1ee   : > { %v2784_v44 = vadd.f32 %v2701_v7, %v10323_v23 }
 0x1f0   : > { %8494 = vmatmul.msk.bf16.gmra.mxu2 %vm1221_vm2, %v3105_v34 }
 0x1f1   : > { %8518 = vmatmul.msk.bf16.gmra.mxu3 %vm1221_vm2, %v10605_v49 }
 0x1f2   : > { %v2948_v46 = vpop.f32.mrf.mxu1 }
 0x1f3   : > { %v2374_v41 = vpop.f32.mrf.mxu2  ;;  %v10610_v60 = vadd.f32 %v2948_v46, %v2782_v36  ;;  %v3073_v46 = vld [vmem:[#allocation3 + $0x43] sm:$0xff] }
 0x1f4   : > { %v2533_v4 = vpop.f32.mrf.mxu3 }
 0x1f5   : > { %v10612_v31 = vadd.f32 %v2533_v4, %v2374_v41  ;;  %v2704_v3 = vpop.f32.mrf.mxu0  ;;  %v3106_v4 = vpack.c.bf16 %v3074_v55, %v3073_v46  ;;  %v3076_v46 = vld [vmem:[#allocation3 + $0x5b] sm:$0xff] }
 0x1f6   : > { %v2785_v23 = vadd.f32 %v2704_v3, %v10350_v58  ;;  %v3325_v58 = vld [vmem:[#allocation3 + $0x44] sm:$0xff] }
 0x1f7   : > { %v10622_v22 = vpack.c.bf16 %v3326_v56, %v3325_v58  ;;  %v2838_v3 = vld [vmem:[#allocation3 + $0xca] sm:$0xff] }
 0x1f8   : > { %8455 = vmatmul.msk.bf16.gmra.mxu0 %vm1221_vm2, %v2861_v61  ;;  %v2862_v55 = vpack.c.bf16 %v2838_v3, %v2837_v39 }
 0x1fa   : > { %v2951_v63 = vpop.f32.mrf.mxu1 }
 0x1fb   : > { %v2376_v7 = vpop.f32.mrf.mxu2  ;;  %v10616_v34 = vadd.f32 %v2951_v63, %v2783_v37 }
 0x1fc   : > { %v2535_v8 = vpop.f32.mrf.mxu3 }
 0x1fd   : > { %v10618_v45 = vadd.f32 %v2535_v8, %v2376_v7  ;;  %v2706_v36 = vpop.f32.mrf.mxu0  ;;  %8478 = vmatmul.msk.bf16.gmra.mxu1 %vm1221_vm2, %v2861_v61 }
 0x1fe   : > { %v2786_v41 = vadd.f32 %v2706_v36, %v10366_v14 }
 0x200   : > { %8495 = vmatmul.msk.bf16.gmra.mxu2 %vm1221_vm2, %v3106_v4 }
 0x201   : > { %8519 = vmatmul.msk.bf16.gmra.mxu3 %vm1221_vm2, %v10622_v22 }
 0x202   : > { %v2953_v37 = vpop.f32.mrf.mxu1 }
 0x203   : > { %v2379_v32 = vpop.f32.mrf.mxu2  ;;  %v10627_v63 = vadd.f32 %v2953_v37, %v2784_v44  ;;  %v3075_v37 = vld [vmem:[#allocation3 + $0x53] sm:$0xff] }
 0x204   : > { %v2538_v7 = vpop.f32.mrf.mxu3 }
 0x205   : > { %v10629_v8 = vadd.f32 %v2538_v7, %v2379_v32  ;;  %v2709_v61 = vpop.f32.mrf.mxu0  ;;  %v3107_v7 = vpack.c.bf16 %v3076_v46, %v3075_v37  ;;  %v3078_v37 = vld [vmem:[#allocation3 + $0x6b] sm:$0xff] }
 0x206   : > { %v2787_v14 = vadd.f32 %v2709_v61, %v10384_v12  ;;  %v3327_v12 = vld [vmem:[#allocation3 + $0x54] sm:$0xff] }
 0x207   : > { %v10639_v39 = vpack.c.bf16 %v3328_v18, %v3327_v12  ;;  %v2840_v61 = vld [vmem:[#allocation3 + $0xda] sm:$0xff] }
 0x208   : > { %8456 = vmatmul.msk.bf16.gmra.mxu0 %vm1221_vm2, %v2862_v55  ;;  %v2863_v46 = vpack.c.bf16 %v2840_v61, %v2839_v52 }
 0x20a   : > { %v2956_v56 = vpop.f32.mrf.mxu1 }
 0x20b   : > { %v2381_v36 = vpop.f32.mrf.mxu2  ;;  %v10633_v4 = vadd.f32 %v2956_v56, %v2785_v23 }
 0x20c   : > { %v2540_v58 = vpop.f32.mrf.mxu3 }
 0x20d   : > { %v10635_v47 = vadd.f32 %v2540_v58, %v2381_v36  ;;  %v2711_v44 = vpop.f32.mrf.mxu0  ;;  %8479 = vmatmul.msk.bf16.gmra.mxu1 %vm1221_vm2, %v2862_v55 }
 0x20e   : > { %v2788_v32 = vadd.f32 %v2711_v44, %v10400_v28 }
 0x210   : > { %8496 = vmatmul.msk.bf16.gmra.mxu2 %vm1221_vm2, %v3107_v7 }
 0x211   : > { %8520 = vmatmul.msk.bf16.gmra.mxu3 %vm1221_vm2, %v10639_v39 }
 0x212   : > { %v2958_v23 = vpop.f32.mrf.mxu1 }
 0x213   : > { %v2384_v3 = vpop.f32.mrf.mxu2  ;;  %v10644_v56 = vadd.f32 %v2958_v23, %v2786_v41  ;;  %v3077_v23 = vld [vmem:[#allocation3 + $0x63] sm:$0xff] }
 0x214   : > { %v2543_v36 = vpop.f32.mrf.mxu3 }
 0x215   : > { %v10646_v58 = vadd.f32 %v2543_v36, %v2384_v3  ;;  %v2714_v55 = vpop.f32.mrf.mxu0  ;;  %v3108_v36 = vpack.c.bf16 %v3078_v37, %v3077_v23  ;;  %v3080_v23 = vld [vmem:[#allocation3 + $0x7b] sm:$0xff] }
 0x216   : > { %v2789_v28 = vadd.f32 %v2714_v55, %v10418_v16  ;;  %v3329_v16 = vld [vmem:[#allocation3 + $0x64] sm:$0xff] }
 0x217   : > { %v10656_v52 = vpack.c.bf16 %v3330_v42, %v3329_v16  ;;  %v2842_v55 = vld [vmem:[#allocation3 + $0xea] sm:$0xff] }
 0x218   : > { %8457 = vmatmul.msk.bf16.gmra.mxu0 %vm1221_vm2, %v2863_v46  ;;  %v2864_v37 = vpack.c.bf16 %v2842_v55, %v2841_v57 }
 0x21a   : > { %v2961_v18 = vpop.f32.mrf.mxu1 }
 0x21b   : > { %v2386_v44 = vpop.f32.mrf.mxu2  ;;  %v10650_v7 = vadd.f32 %v2961_v18, %v2787_v14 }
 0x21c   : > { %v2545_v12 = vpop.f32.mrf.mxu3 }
 0x21d   : > { %v10652_v24 = vadd.f32 %v2545_v12, %v2386_v44  ;;  %v2716_v41 = vpop.f32.mrf.mxu0  ;;  %8480 = vmatmul.msk.bf16.gmra.mxu1 %vm1221_vm2, %v2863_v46 }
 0x21e   : > { %v2790_v3 = vadd.f32 %v2716_v41, %v10434_v1 }
 0x220   : > { %8497 = vmatmul.msk.bf16.gmra.mxu2 %vm1221_vm2, %v3108_v36 }
 0x221   : > { %8521 = vmatmul.msk.bf16.gmra.mxu3 %vm1221_vm2, %v10656_v52 }
 0x222   : > { %v2963_v14 = vpop.f32.mrf.mxu1 }
 0x223   : > { %v2389_v61 = vpop.f32.mrf.mxu2  ;;  %v10661_v18 = vadd.f32 %v2963_v14, %v2788_v32  ;;  %v3079_v14 = vld [vmem:[#allocation3 + $0x73] sm:$0xff] }
 0x224   : > { %v2548_v44 = vpop.f32.mrf.mxu3 }
 0x225   : > { %v10663_v12 = vadd.f32 %v2548_v44, %v2389_v61  ;;  %v2719_v46 = vpop.f32.mrf.mxu0  ;;  %v3109_v44 = vpack.c.bf16 %v3080_v23, %v3079_v14  ;;  %v3082_v14 = vld [vmem:[#allocation3 + $0x8b] sm:$0xff] }
 0x226   : > { %v2791_v1 = vadd.f32 %v2719_v46, %v10452_v27  ;;  %v3331_v27 = vld [vmem:[#allocation3 + $0x74] sm:$0xff] }
 0x227   : > { %v10673_v57 = vpack.c.bf16 %v3332_v2, %v3331_v27  ;;  %v2844_v46 = vld [vmem:[#allocation3 + $0xfa] sm:$0xff] }
 0x228   : > { %8458 = vmatmul.msk.bf16.gmra.mxu0 %vm1221_vm2, %v2864_v37  ;;  %v2865_v23 = vpack.c.bf16 %v2844_v46, %v2843_v17 }
 0x22a   : > { %v2966_v42 = vpop.f32.mrf.mxu1 }
 0x22b   : > { %v2391_v41 = vpop.f32.mrf.mxu2  ;;  %v10667_v36 = vadd.f32 %v2966_v42, %v2789_v28 }
 0x22c   : > { %v2550_v16 = vpop.f32.mrf.mxu3 }
 0x22d   : > { %v10669_v9 = vadd.f32 %v2550_v16, %v2391_v41  ;;  %v2721_v32 = vpop.f32.mrf.mxu0  ;;  %8481 = vmatmul.msk.bf16.gmra.mxu1 %vm1221_vm2, %v2864_v37 }
 0x22e   : > { %v2792_v61 = vadd.f32 %v2721_v32, %v10468_v10 }
 0x230   : > { %8498 = vmatmul.msk.bf16.gmra.mxu2 %vm1221_vm2, %v3109_v44 }
 0x231   : > { %8522 = vmatmul.msk.bf16.gmra.mxu3 %vm1221_vm2, %v10673_v57 }
 0x232   : > { %v2968_v28 = vpop.f32.mrf.mxu1 }
 0x233   : > { %v2394_v55 = vpop.f32.mrf.mxu2  ;;  %v10678_v42 = vadd.f32 %v2968_v28, %v2790_v3  ;;  %v3081_v28 = vld [vmem:[#allocation3 + $0x83] sm:$0xff] }
 0x234   : > { %v2553_v41 = vpop.f32.mrf.mxu3 }
 0x235   : > { %v10680_v16 = vadd.f32 %v2553_v41, %v2394_v55  ;;  %v2724_v37 = vpop.f32.mrf.mxu0  ;;  %v3110_v41 = vpack.c.bf16 %v3082_v14, %v3081_v28  ;;  %v3084_v28 = vld [vmem:[#allocation3 + $0x9b] sm:$0xff] }
 0x236   : > { %v2793_v10 = vadd.f32 %v2724_v37, %v10486_v0  ;;  %v3333_v0 = vld [vmem:[#allocation3 + $0x84] sm:$0xff] }
 0x237   : > { %v10690_v17 = vpack.c.bf16 %v3334_v53, %v3333_v0  ;;  %v2846_v37 = vld [vmem:[#allocation3 + $0x10a] sm:$0xff] }
 0x238   : > { %8459 = vmatmul.msk.bf16.gmra.mxu0 %vm1221_vm2, %v2865_v23  ;;  %v2866_v14 = vpack.c.bf16 %v2846_v37, %v2845_v38  ;;  %v3335_v37 = vld [vmem:[#allocation3 + $0x94] sm:$0xff] }
 0x23a   : > { %v2971_v2 = vpop.f32.mrf.mxu1 }
 0x23b   : > { %v2396_v32 = vpop.f32.mrf.mxu2  ;;  %v10684_v44 = vadd.f32 %v2971_v2, %v2791_v1 }
 0x23c   : > { %v2555_v27 = vpop.f32.mrf.mxu3 }
 0x23d   : > { %v10686_v19 = vadd.f32 %v2555_v27, %v2396_v32  ;;  %v2726_v3 = vpop.f32.mrf.mxu0  ;;  %8482 = vmatmul.msk.bf16.gmra.mxu1 %vm1221_vm2, %v2865_v23 }
 0x23e   : > { %v2794_v55 = vadd.f32 %v2726_v3, %v10505_v13 }
 0x240   : > { %8499 = vmatmul.msk.bf16.gmra.mxu2 %vm1221_vm2, %v3110_v41  ;;  %v9313_v41 = vld [vmem:[%s14491_s9 + $0x30] sm:$0xff] }
 0x241   : > { %8523 = vmatmul.msk.bf16.gmra.mxu3 %vm1221_vm2, %v10690_v17  ;;  %3695 = vmatpush.bf16.msra.mxu0 %v9313_v41 }
 0x242   : > { %v2973_v1 = vpop.f32.mrf.mxu1 }
 0x243   : > { %v2399_v46 = vpop.f32.mrf.mxu2  ;;  %v10695_v2 = vadd.f32 %v2973_v1, %v2792_v61  ;;  %v3336_v1 = vld [vmem:[#allocation3 + $0x9c] sm:$0xff] }
 0x244   : > { %v2558_v32 = vpop.f32.mrf.mxu3 }
 0x245   : > { %v10697_v27 = vadd.f32 %v2558_v32, %v2399_v46  ;;  %v2729_v23 = vpop.f32.mrf.mxu0 }
 0x246   : > { %v2795_v13 = vadd.f32 %v2729_v23, %v10523_v50  ;;  %v3111_v50 = vpack.c.bf16 %v3084_v28, %v3083_v21  ;;  %v10710_v23 = vpack.c.bf16 %v3336_v1, %v3335_v37  ;;  %v2848_v1 = vld [vmem:[#allocation3 + $0x11a] sm:$0xff]  ;;  %v3086_v37 = vld [vmem:[#allocation3 + $0xab] sm:$0xff] }
 0x248   : > { %8460 = vmatmul.msk.bf16.gmra.mxu0 %vm1221_vm2, %v2866_v14 }
 0x24a   : > { %v2976_v53 = vpop.f32.mrf.mxu1 }
 0x24b   : > { %v2401_v3 = vpop.f32.mrf.mxu2  ;;  %v10704_v0 = vadd.f32 %v2976_v53, %v2793_v10 }
 0x24c   : > { %v2560_v61 = vpop.f32.mrf.mxu3 }
 0x24d   : > { %v10706_v46 = vadd.f32 %v2560_v61, %v2401_v3  ;;  %v2731_v32 = vpop.f32.mrf.mxu0  ;;  %8483 = vmatmul.msk.bf16.gmra.mxu1 %vm1221_vm2, %v2866_v14  ;;  %v2598_v3 = vld [vmem:[#allocation3 + $0x11a] sm:$0x3f] }
 0x24e   : > { %v2796_v38 = vadd.f32 %v2731_v32, %v10542_v30  ;;  %v2616_v28 = vpack.c.bf16 %v2598_v3, %v2847_v20  ;;  %v9314_v32 = vld [vmem:[%s14491_s9 + $0x38] sm:$0xff]  ;;  %v3085_v3 = vld [vmem:[#allocation3 + $0xa3] sm:$0xff] }
 0x24f   : > { %3947 = vmatpush.bf16.msra.mxu1 %v9314_v32  ;;  %v3112_v29 = vpack.c.bf16 %v3086_v37, %v3085_v3  ;;  %v2849_v37 = vld [vmem:[#allocation3 + $0x122] sm:$0xff] }
 0x250   : > { %8500 = vmatmul.msk.bf16.gmra.mxu2 %vm1221_vm2, %v3111_v50 }
 0x251   : > { %8524 = vmatmul.msk.bf16.gmra.mxu3 %vm1221_vm2, %v10710_v23 }
 0x252   : > { %v2978_v10 = vpop.f32.mrf.mxu1 }
 0x253   : > { %v3193_v53 = vpop.f32.mrf.mxu2  ;;  %v10715_v61 = vadd.f32 %v2978_v10, %v2794_v55  ;;  %v2867_v10 = vpack.c.bf16 %v2848_v1, %v2847_v20 }
 0x254   : > { %v3283_v41 = vadd.f32 %v3193_v53, %v10580_v6  ;;  %v3445_v62 = vpop.f32.mrf.mxu3 }
 0x255   : > { %v2734_v14 = vpop.f32.mrf.mxu0 }
 0x256   : > { %v10718_v30 = vadd.f32 %v3445_v62, %v3283_v41  ;;  %v2797_v21 = vadd.f32 %v2734_v14, %v10560_v35  ;;  %v3338_v41 = vld [vmem:[#allocation3 + $0xac] sm:$0xff] }
 0x257   : > { %v10732_v11 = vpack.c.bf16 %v3338_v41, %v3337_v33  ;;  %v2850_v33 = vld [vmem:[#allocation3 + $0x12a] sm:$0x3f] }
 0x258   : > { %8461 = vmatmul.msk.bf16.gmra.mxu0 %vm1221_vm2, %v2616_v28 }
 0x25a   : > { %v2981_v50 = vpop.f32.mrf.mxu1 }
 0x25b   : > { %v3195_v55 = vpop.f32.mrf.mxu2  ;;  %v10725_v6 = vadd.f32 %v2981_v50, %v2795_v13 }
 0x25c   : > { %v3284_v62 = vadd.f32 %v3195_v55, %v10593_v40  ;;  %v3447_v53 = vpop.f32.mrf.mxu3 }
 0x25d   : > { %v2736_v35 = vpop.f32.mrf.mxu0  ;;  %8484 = vmatmul.msk.bf16.gmra.mxu1 %vm1221_vm2, %v2867_v10 }
 0x25e   : > { %v10729_v14 = vadd.f32 %v3447_v53, %v3284_v62  ;;  %v2798_v28 = vadd.f32 %v2736_v35, %v10569_v25  ;;  %v3088_v62 = vld [vmem:[#allocation3 + $0xbb] sm:$0xff] }
 0x25f   : > { %v3340_v35 = vld [vmem:[#allocation3 + $0xbc] sm:$0xff] }
 0x260   : > { %8501 = vmatmul.msk.bf16.gmra.mxu2 %vm1221_vm2, %v3112_v29 }
 0x261   : > { %8525 = vmatmul.msk.bf16.gmra.mxu3 %vm1221_vm2, %v10732_v11 }
 0x262   : > { %v2983_v20 = vpop.f32.mrf.mxu1 }
 0x263   : > { %v3198_v40 = vpop.f32.mrf.mxu2  ;;  %v10737_v13 = vadd.f32 %v2983_v20, %v2796_v38  ;;  %v2868_v38 = vpack.c.bf16 %v2850_v33, %v2849_v37  ;;  %v3087_v20 = vld [vmem:[#allocation3 + $0xb3] sm:$0xff] }
 0x264   : > { %v3285_v1 = vadd.f32 %v3198_v40, %v10599_v43  ;;  %v3450_v32 = vpop.f32.mrf.mxu3  ;;  %v3113_v40 = vpack.c.bf16 %v3088_v62, %v3087_v20  ;;  %v3824_v62 = vld [vmem:[#allocation3 + $0x2d] sm:$0xff] }
 0x265   : > { %v2739_v50 = vpop.f32.mrf.mxu0 }
 0x266   : > { %v10740_v55 = vadd.f32 %v3450_v32, %v3285_v1  ;;  %v2799_v25 = vadd.f32 %v2739_v50, %v10576_v5  ;;  %v3339_v1 = vld [vmem:[#allocation3 + $0xb4] sm:$0xff] }
 0x267   : > { %v10752_v32 = vpack.c.bf16 %v3340_v35, %v3339_v1  ;;  %v3090_v35 = vld [vmem:[#allocation3 + $0xcb] sm:$0xff] }
 0x268   : > { %8540 = vmatmul.msk.bf16.vlgmr.msra.gmra.mxu0 %vm1221_vm2, %v10586_v59 }
 0x26a   : > { %v2986_v29 = vpop.f32.mrf.mxu1 }
 0x26b   : > { %v3200_v10 = vpop.f32.mrf.mxu2  ;;  %v10745_v53 = vadd.f32 %v2986_v29, %v2797_v21 }
 0x26c   : > { %v3286_v41 = vadd.f32 %v3200_v10, %v10610_v60  ;;  %v3452_v43 = vpop.f32.mrf.mxu3 }
 0x26d   : > { %v2741_v3 = vpop.f32.mrf.mxu0  ;;  %8485 = vmatmul.msk.bf16.gmra.mxu1 %vm1221_vm2, %v2868_v38 }
 0x26e   : > { %v10749_v5 = vadd.f32 %v3452_v43, %v3286_v41  ;;  %v2800_v59 = vadd.f32 %v2741_v3, %v10582_v26  ;;  %v3823_v41 = vld [vmem:[#allocation3 + $0x25] sm:$0xff] }
 0x270   : > { %8502 = vmatmul.msk.bf16.gmra.mxu2 %vm1221_vm2, %v3113_v40  ;;  %v3342_v40 = vld [vmem:[#allocation3 + $0xcc] sm:$0xff] }
 0x271   : > { %8526 = vmatmul.msk.bf16.gmra.mxu3 %vm1221_vm2, %v10752_v32 }
 0x272   : > { %v2988_v60 = vpop.f32.mrf.mxu1 }
 0x273   : > { %v3203_v21 = vpop.f32.mrf.mxu2  ;;  %v10757_v50 = vadd.f32 %v2988_v60, %v2798_v28  ;;  %v3859_v28 = vpack.c.bf16 %v3824_v62, %v3823_v41  ;;  %v3089_v60 = vld [vmem:[#allocation3 + $0xc3] sm:$0xff] }
 0x274   : > { %v3287_v33 = vadd.f32 %v3203_v21, %v10616_v34  ;;  %v3455_v29 = vpop.f32.mrf.mxu3  ;;  %v3114_v21 = vpack.c.bf16 %v3090_v35, %v3089_v60  ;;  %v3826_v35 = vld [vmem:[#allocation3 + $0x3d] sm:$0xff] }
 0x275   : > { %v2744_v37 = vpop.f32.mrf.mxu0 }
 0x276   : > { %v10760_v10 = vadd.f32 %v3455_v29, %v3287_v33  ;;  %v2801_v26 = vadd.f32 %v2744_v37, %v10595_v51  ;;  %v3341_v33 = vld [vmem:[#allocation3 + $0xc4] sm:$0xff] }
 0x277   : > { %v10772_v29 = vpack.c.bf16 %v3342_v40, %v3341_v33  ;;  %v3092_v40 = vld [vmem:[#allocation3 + $0xdb] sm:$0xff] }
 0x278   : > { %8541 = vmatmul.msk.bf16.gmra.mxu0 %vm1221_vm2, %v10605_v49 }
 0x27a   : > { %v2991_v38 = vpop.f32.mrf.mxu1 }
 0x27b   : > { %v3205_v43 = vpop.f32.mrf.mxu2  ;;  %v10765_v3 = vadd.f32 %v2991_v38, %v2799_v25 }
 0x27c   : > { %v3288_v20 = vadd.f32 %v3205_v43, %v10627_v63  ;;  %v3457_v34 = vpop.f32.mrf.mxu3 }
 0x27d   : > { %v2746_v1 = vpop.f32.mrf.mxu0  ;;  %8564 = vmatmul.msk.bf16.vlgmr.msra.gmra.mxu1 %vm1221_vm2, %v3859_v28 }
 0x27e   : > { %v10769_v51 = vadd.f32 %v3457_v34, %v3288_v20  ;;  %v2802_v49 = vadd.f32 %v2746_v1, %v10601_v15  ;;  %v3825_v20 = vld [vmem:[#allocation3 + $0x35] sm:$0xff] }
 0x280   : > { %8503 = vmatmul.msk.bf16.gmra.mxu2 %vm1221_vm2, %v3114_v21  ;;  %v3344_v21 = vld [vmem:[#allocation3 + $0xdc] sm:$0xff] }
 0x281   : > { %8527 = vmatmul.msk.bf16.gmra.mxu3 %vm1221_vm2, %v10772_v29 }
 0x282   : > { %v2993_v63 = vpop.f32.mrf.mxu1 }
 0x283   : > { %v3208_v25 = vpop.f32.mrf.mxu2  ;;  %v10777_v37 = vadd.f32 %v2993_v63, %v2800_v59  ;;  %v3860_v59 = vpack.c.bf16 %v3826_v35, %v3825_v20  ;;  %v3091_v63 = vld [vmem:[#allocation3 + $0xd3] sm:$0xff] }
 0x284   : > { %v3289_v62 = vadd.f32 %v3208_v25, %v10633_v4  ;;  %v3460_v38 = vpop.f32.mrf.mxu3  ;;  %v3115_v25 = vpack.c.bf16 %v3092_v40, %v3091_v63  ;;  %v3828_v40 = vld [vmem:[#allocation3 + $0x4d] sm:$0xff] }
 0x285   : > { %v2749_v41 = vpop.f32.mrf.mxu0 }
 0x286   : > { %v10780_v43 = vadd.f32 %v3460_v38, %v3289_v62  ;;  %v2803_v15 = vadd.f32 %v2749_v41, %v10612_v31  ;;  %v3343_v62 = vld [vmem:[#allocation3 + $0xd4] sm:$0xff] }
 0x287   : > { %v10792_v38 = vpack.c.bf16 %v3344_v21, %v3343_v62  ;;  %v3094_v21 = vld [vmem:[#allocation3 + $0xeb] sm:$0xff] }
 0x288   : > { %8542 = vmatmul.msk.bf16.gmra.mxu0 %vm1221_vm2, %v10622_v22 }
 0x28a   : > { %v2996_v28 = vpop.f32.mrf.mxu1 }
 0x28b   : > { %v3210_v34 = vpop.f32.mrf.mxu2  ;;  %v10785_v1 = vadd.f32 %v2996_v28, %v2801_v26 }
 0x28c   : > { %v3290_v60 = vadd.f32 %v3210_v34, %v10644_v56  ;;  %v3462_v4 = vpop.f32.mrf.mxu3 }
 0x28d   : > { %v2751_v33 = vpop.f32.mrf.mxu0  ;;  %8565 = vmatmul.msk.bf16.gmra.mxu1 %vm1221_vm2, %v3860_v59 }
 0x28e   : > { %v10789_v31 = vadd.f32 %v3462_v4, %v3290_v60  ;;  %v2804_v22 = vadd.f32 %v2751_v33, %v10618_v45  ;;  %v3827_v60 = vld [vmem:[#allocation3 + $0x45] sm:$0xff] }
 0x290   : > { %8504 = vmatmul.msk.bf16.gmra.mxu2 %vm1221_vm2, %v3115_v25  ;;  %v3346_v25 = vld [vmem:[#allocation3 + $0xec] sm:$0xff] }
 0x291   : > { %8528 = vmatmul.msk.bf16.gmra.mxu3 %vm1221_vm2, %v10792_v38 }
 0x292   : > { %v2998_v56 = vpop.f32.mrf.mxu1 }
 0x293   : > { %v3213_v26 = vpop.f32.mrf.mxu2  ;;  %v10797_v41 = vadd.f32 %v2998_v56, %v2802_v49  ;;  %v3861_v49 = vpack.c.bf16 %v3828_v40, %v3827_v60  ;;  %v3093_v56 = vld [vmem:[#allocation3 + $0xe3] sm:$0xff] }
 0x294   : > { %v3291_v35 = vadd.f32 %v3213_v26, %v10650_v7  ;;  %v3465_v28 = vpop.f32.mrf.mxu3  ;;  %v3116_v26 = vpack.c.bf16 %v3094_v21, %v3093_v56  ;;  %v3830_v21 = vld [vmem:[#allocation3 + $0x5d] sm:$0xff] }
 0x295   : > { %v2754_v20 = vpop.f32.mrf.mxu0 }
 0x296   : > { %v10800_v34 = vadd.f32 %v3465_v28, %v3291_v35  ;;  %v2805_v45 = vadd.f32 %v2754_v20, %v10629_v8  ;;  %v3345_v35 = vld [vmem:[#allocation3 + $0xe4] sm:$0xff] }
 0x297   : > { %v10812_v28 = vpack.c.bf16 %v3346_v25, %v3345_v35  ;;  %v3096_v25 = vld [vmem:[#allocation3 + $0xfb] sm:$0xff] }
 0x298   : > { %8543 = vmatmul.msk.bf16.gmra.mxu0 %vm1221_vm2, %v10639_v39 }
 0x29a   : > { %v3001_v59 = vpop.f32.mrf.mxu1 }
 0x29b   : > { %v3215_v4 = vpop.f32.mrf.mxu2  ;;  %v10805_v33 = vadd.f32 %v3001_v59, %v2803_v15 }
 0x29c   : > { %v3292_v63 = vadd.f32 %v3215_v4, %v10661_v18  ;;  %v3467_v7 = vpop.f32.mrf.mxu3 }
 0x29d   : > { %v2756_v62 = vpop.f32.mrf.mxu0  ;;  %8566 = vmatmul.msk.bf16.gmra.mxu1 %vm1221_vm2, %v3861_v49 }
 0x29e   : > { %v10809_v8 = vadd.f32 %v3467_v7, %v3292_v63  ;;  %v2806_v39 = vadd.f32 %v2756_v62, %v10635_v47  ;;  %v3829_v63 = vld [vmem:[#allocation3 + $0x55] sm:$0xff] }
 0x2a0   : > { %8505 = vmatmul.msk.bf16.gmra.mxu2 %vm1221_vm2, %v3116_v26  ;;  %v3348_v26 = vld [vmem:[#allocation3 + $0xfc] sm:$0xff] }
 0x2a1   : > { %8529 = vmatmul.msk.bf16.gmra.mxu3 %vm1221_vm2, %v10812_v28 }
 0x2a2   : > { %v3003_v18 = vpop.f32.mrf.mxu1 }
 0x2a3   : > { %v3218_v15 = vpop.f32.mrf.mxu2  ;;  %v10817_v20 = vadd.f32 %v3003_v18, %v2804_v22  ;;  %v3862_v22 = vpack.c.bf16 %v3830_v21, %v3829_v63  ;;  %v3095_v18 = vld [vmem:[#allocation3 + $0xf3] sm:$0xff] }
 0x2a4   : > { %v3293_v40 = vadd.f32 %v3218_v15, %v10667_v36  ;;  %v3470_v59 = vpop.f32.mrf.mxu3  ;;  %v3117_v15 = vpack.c.bf16 %v3096_v25, %v3095_v18  ;;  %v3832_v25 = vld [vmem:[#allocation3 + $0x6d] sm:$0xff] }
 0x2a5   : > { %v2759_v60 = vpop.f32.mrf.mxu0 }
 0x2a6   : > { %v10820_v4 = vadd.f32 %v3470_v59, %v3293_v40  ;;  %v2807_v47 = vadd.f32 %v2759_v60, %v10646_v58  ;;  %v3347_v40 = vld [vmem:[#allocation3 + $0xf4] sm:$0xff] }
 0x2a7   : > { %v10832_v59 = vpack.c.bf16 %v3348_v26, %v3347_v40  ;;  %v3098_v26 = vld [vmem:[#allocation3 + $0x10b] sm:$0xff] }
 0x2a8   : > { %8544 = vmatmul.msk.bf16.gmra.mxu0 %vm1221_vm2, %v10656_v52 }
 0x2aa   : > { %v3006_v49 = vpop.f32.mrf.mxu1 }
 0x2ab   : > { %v3220_v7 = vpop.f32.mrf.mxu2  ;;  %v10825_v62 = vadd.f32 %v3006_v49, %v2805_v45 }
 0x2ac   : > { %v3294_v56 = vadd.f32 %v3220_v7, %v10678_v42  ;;  %v3472_v36 = vpop.f32.mrf.mxu3 }
 0x2ad   : > { %v2761_v35 = vpop.f32.mrf.mxu0  ;;  %8567 = vmatmul.msk.bf16.gmra.mxu1 %vm1221_vm2, %v3862_v22 }
 0x2ae   : > { %v10829_v58 = vadd.f32 %v3472_v36, %v3294_v56  ;;  %v2808_v52 = vadd.f32 %v2761_v35, %v10652_v24  ;;  %v3831_v56 = vld [vmem:[#allocation3 + $0x65] sm:$0xff] }
 0x2b0   : > { %8506 = vmatmul.msk.bf16.gmra.mxu2 %vm1221_vm2, %v3117_v15  ;;  %v3350_v15 = vld [vmem:[#allocation3 + $0x10c] sm:$0xff] }
 0x2b1   : > { %8530 = vmatmul.msk.bf16.gmra.mxu3 %vm1221_vm2, %v10832_v59 }
 0x2b2   : > { %v3008_v42 = vpop.f32.mrf.mxu1 }
 0x2b3   : > { %v3223_v45 = vpop.f32.mrf.mxu2  ;;  %v10837_v60 = vadd.f32 %v3008_v42, %v2806_v39  ;;  %v3863_v39 = vpack.c.bf16 %v3832_v25, %v3831_v56  ;;  %v3097_v42 = vld [vmem:[#allocation3 + $0x103] sm:$0xff] }
 0x2b4   : > { %v3295_v21 = vadd.f32 %v3223_v45, %v10684_v44  ;;  %v3475_v49 = vpop.f32.mrf.mxu3  ;;  %v3349_v45 = vld [vmem:[#allocation3 + $0x104] sm:$0xff] }
 0x2b5   : > { %v2764_v63 = vpop.f32.mrf.mxu0 }
 0x2b6   : > { %v10840_v7 = vadd.f32 %v3475_v49, %v3295_v21  ;;  %v2809_v24 = vadd.f32 %v2764_v63, %v10663_v12  ;;  %v10854_v21 = vpack.c.bf16 %v3350_v15, %v3349_v45 }
 0x2b8   : > { %8545 = vmatmul.msk.bf16.gmra.mxu0 %vm1221_vm2, %v10673_v57  ;;  %v3118_v57 = vpack.c.bf16 %v3098_v26, %v3097_v42  ;;  %v3834_v26 = vld [vmem:[#allocation3 + $0x7d] sm:$0xff] }
 0x2ba   : > { %v3011_v22 = vpop.f32.mrf.mxu1 }
 0x2bb   : > { %v3225_v36 = vpop.f32.mrf.mxu2  ;;  %v10845_v35 = vadd.f32 %v3011_v22, %v2807_v47 }
 0x2bc   : > { %v10848_v18 = vadd.f32 %v3225_v36, %v10695_v2  ;;  %v10850_v44 = vpop.f32.mrf.mxu3 }
 0x2bd   : > { %v2766_v40 = vpop.f32.mrf.mxu0  ;;  %8568 = vmatmul.msk.bf16.gmra.mxu1 %vm1221_vm2, %v3863_v39 }
 0x2be   : > { %v2810_v12 = vadd.f32 %v2766_v40, %v10669_v9  ;;  %v9315_v9 = vld [vmem:[%s14491_s9 + $0x40] sm:$0xff] }
 0x2bf   : > { %4199 = vmatpush.bf16.msra.mxu2 %v9315_v9  ;;  %v3100_v40 = vld [vmem:[#allocation3 + $0x11b] sm:$0xff] }
 0x2c0   : > { %8507 = vmatmul.msk.bf16.gmra.mxu2 %vm1221_vm2, %v3118_v57 }
 0x2c1   : > { %8531 = vmatmul.msk.bf16.gmra.mxu3 %vm1221_vm2, %v10854_v21 }
 0x2c2   : > { %v3013_v2 = vpop.f32.mrf.mxu1 }
 0x2c3   : > { %v3228_v47 = vpop.f32.mrf.mxu2  ;;  %v10859_v49 = vadd.f32 %v3013_v2, %v2808_v52  ;;  %v3833_v52 = vld [vmem:[#allocation3 + $0x75] sm:$0xff] }
 0x2c4   : > { %v3297_v63 = vadd.f32 %v3228_v47, %v10704_v0  ;;  %v3480_v25 = vpop.f32.mrf.mxu3  ;;  %v3864_v42 = vpack.c.bf16 %v3834_v26, %v3833_v52  ;;  %v3352_v2 = vld [vmem:[#allocation3 + $0x11c] sm:$0xff] }
 0x2c5   : > { %v2769_v22 = vpop.f32.mrf.mxu0 }
 0x2c6   : > { %v10865_v56 = vadd.f32 %v3480_v25, %v3297_v63  ;;  %v2811_v36 = vadd.f32 %v2769_v22, %v10680_v16  ;;  %v3099_v16 = vld [vmem:[#allocation3 + $0x113] sm:$0xff] }
 0x2c7   : > { %v3119_v63 = vpack.c.bf16 %v3100_v40, %v3099_v16  ;;  %v3351_v25 = vld [vmem:[#allocation3 + $0x114] sm:$0xff]  ;;  %v3102_v16 = vld [vmem:[#allocation3 + $0x12b] sm:$0x3f] }
 0x2c8   : > { %8546 = vmatmul.msk.bf16.gmra.mxu0 %vm1221_vm2, %v10690_v17  ;;  %v10879_v9 = vpack.c.bf16 %v3352_v2, %v3351_v25  ;;  %v3836_v40 = vld [vmem:[#allocation3 + $0x8d] sm:$0xff]  ;;  %v3835_v2 = vld [vmem:[#allocation3 + $0x85] sm:$0xff] }
 0x2ca   : > { %v3016_v39 = vpop.f32.mrf.mxu1 }
 0x2cb   : > { %v3230_v15 = vpop.f32.mrf.mxu2  ;;  %v10870_v0 = vadd.f32 %v3016_v39, %v2809_v24 }
 0x2cc   : > { %v10873_v57 = vadd.f32 %v3230_v15, %v10715_v61  ;;  %v10875_v45 = vpop.f32.mrf.mxu3 }
 0x2cd   : > { %v2771_v47 = vpop.f32.mrf.mxu0  ;;  %8569 = vmatmul.msk.bf16.gmra.mxu1 %vm1221_vm2, %v3864_v42 }
 0x2ce   : > { %v2812_v17 = vadd.f32 %v2771_v47, %v10686_v19 }
 0x2d0   : > { %8508 = vmatmul.msk.bf16.gmra.mxu2 %vm1221_vm2, %v3119_v63 }
 0x2d1   : > { %8532 = vmatmul.msk.bf16.gmra.mxu3 %vm1221_vm2, %v10879_v9 }
 0x2d2   : > { %v3018_v61 = vpop.f32.mrf.mxu1 }
 0x2d3   : > { %v3233_v24 = vpop.f32.mrf.mxu2  ;;  %v10884_v22 = vadd.f32 %v3018_v61, %v2810_v12  ;;  %v3865_v12 = vpack.c.bf16 %v3836_v40, %v3835_v2  ;;  %v10899_v61 = vld [vmem:[#allocation3 + $0x124] sm:$0xff] }
 0x2d4   : > { %v3299_v26 = vadd.f32 %v3233_v24, %v10725_v6  ;;  %v3485_v39 = vpop.f32.mrf.mxu3  ;;  %v3354_v24 = vld [vmem:[#allocation3 + $0x12c] sm:$0x3f] }
 0x2d5   : > { %v2774_v52 = vpop.f32.mrf.mxu0 }
 0x2d6   : > { %v10887_v15 = vadd.f32 %v3485_v39, %v3299_v26  ;;  %v2813_v19 = vadd.f32 %v2774_v52, %v10697_v27  ;;  %v3101_v26 = vld [vmem:[#allocation3 + $0x123] sm:$0xff]  ;;  %v3372_v52 = vpack.c.bf16 %v3354_v24, %v10899_v61  ;;  %v3837_v24 = vld [vmem:[#allocation3 + $0x95] sm:$0xff] }
 0x2d7   : > { %v3120_v39 = vpack.c.bf16 %v3102_v16, %v3101_v26  ;;  %v4076_v26 = vld [vmem:[#allocation3 + $0x2e] sm:$0xff] }
 0x2d8   : > { %8547 = vmatmul.msk.bf16.gmra.mxu0 %vm1221_vm2, %v10710_v23 }
 0x2da   : > { %v3021_v42 = vpop.f32.mrf.mxu1 }
 0x2db   : > { %v3235_v47 = vpop.f32.mrf.mxu2  ;;  %v10892_v63 = vadd.f32 %v3021_v42, %v2811_v36 }
 0x2dc   : > { %v10895_v25 = vadd.f32 %v3235_v47, %v10737_v13  ;;  %v10897_v6 = vpop.f32.mrf.mxu3 }
 0x2dd   : > { %14885 = vst [vmem:[#allocation112_spill] sm:$0xff] %v10897_v6  ;;  %v2776_v27 = vpop.f32.mrf.mxu0  ;;  %8570 = vmatmul.msk.bf16.gmra.mxu1 %vm1221_vm2, %v3865_v12 }
 0x2de   : > { %v2814_v23 = vadd.f32 %v2776_v27, %v10706_v46  ;;  %v3838_v46 = vld [vmem:[#allocation3 + $0x9d] sm:$0xff] }
 0x2e0   : > { %8509 = vmatmul.msk.bf16.gmra.mxu2 %vm1221_vm2, %v3120_v39 }
 0x2e1   : > { %8533 = vmatmul.msk.bf16.gmra.mxu3 %vm1221_vm2, %v3372_v52 }
 0x2e2   : > { %v3023_v13 = vpop.f32.mrf.mxu1 }
 0x2e3   : > { %v3238_v36 = vpop.f32.mrf.mxu2  ;;  %v10906_v40 = vadd.f32 %v3023_v13, %v2812_v17  ;;  %v3866_v17 = vpack.c.bf16 %v3838_v46, %v3837_v24 }
 0x2e4   : > { %v3301_v42 = vadd.f32 %v3238_v36, %v10745_v53  ;;  %v3490_v2 = vpop.f32.mrf.mxu3  ;;  %v4075_v36 = vld [vmem:[#allocation3 + $0x26] sm:$0xff] }
 0x2e5   : > { %v3697_v47 = vpop.f32.mrf.mxu0 }
 0x2e6   : > { %v10909_v6 = vadd.f32 %v3490_v2, %v3301_v42  ;;  %v10912_v12 = vadd.f32 %v3697_v47, %v10718_v30 }
 0x2e8   : > { %8548 = vmatmul.msk.bf16.gmra.mxu0 %vm1221_vm2, %v10732_v11  ;;  %v4111_v11 = vpack.c.bf16 %v4076_v26, %v4075_v36  ;;  %v3839_v26 = vld [vmem:[#allocation3 + $0xa5] sm:$0xff] }
 0x2ea   : > { %v3026_v16 = vpop.f32.mrf.mxu1 }
 0x2eb   : > { %v3240_v27 = vpop.f32.mrf.mxu2  ;;  %v10916_v39 = vadd.f32 %v3026_v16, %v2813_v19 }
 0x2ec   : > { %v10919_v53 = vadd.f32 %v3240_v27, %v10757_v50  ;;  %v10921_v52 = vpop.f32.mrf.mxu3 }
 0x2ed   : > { %v3699_v13 = vpop.f32.mrf.mxu0  ;;  %8571 = vmatmul.msk.bf16.gmra.mxu1 %vm1221_vm2, %v3866_v17 }
 0x2ee   : > { %v10925_v30 = vadd.f32 %v3699_v13, %v10729_v14  ;;  %v3840_v14 = vld [vmem:[#allocation3 + $0xad] sm:$0xff]  ;;  %v4078_v13 = vld [vmem:[#allocation3 + $0x3e] sm:$0xff] }
 0x2f0   : > { %8588 = vmatmul.msk.bf16.vlgmr.msra.gmra.mxu2 %vm1221_vm2, %v4111_v11 }
 0x2f2   : > { %v3028_v42 = vpop.f32.mrf.mxu1 }
 0x2f3   : > { %v3243_v2 = vpop.f32.mrf.mxu2  ;;  %v10928_v19 = vadd.f32 %v3028_v42, %v2814_v23  ;;  %v3867_v23 = vpack.c.bf16 %v3840_v14, %v3839_v26  ;;  %v4077_v42 = vld [vmem:[#allocation3 + $0x36] sm:$0xff] }
 0x2f4   : > { %v3303_v47 = vadd.f32 %v3243_v2, %v10765_v3  ;;  %v3495_v50 = vpop.f32.mrf.mxu3 }
 0x2f5   : > { %v3702_v46 = vpop.f32.mrf.mxu0 }
 0x2f6   : > { %v10931_v16 = vadd.f32 %v3495_v50, %v3303_v47  ;;  %v10934_v24 = vadd.f32 %v3702_v46, %v10740_v55 }
 0x2f8   : > { %8549 = vmatmul.msk.bf16.gmra.mxu0 %vm1221_vm2, %v10752_v32  ;;  %v4112_v32 = vpack.c.bf16 %v4078_v13, %v4077_v42  ;;  %v3841_v13 = vld [vmem:[#allocation3 + $0xb5] sm:$0xff] }
 0x2fa   : > { %v10938_v27 = vpop.f32.mrf.mxu1 }
 0x2fb   : > { %v3245_v17 = vpop.f32.mrf.mxu2 }
 0x2fc   : > { %v10941_v36 = vadd.f32 %v3245_v17, %v10777_v37  ;;  %v10943_v3 = vpop.f32.mrf.mxu3 }
 0x2fd   : > { %14887 = vst [vmem:[#allocation114_spill] sm:$0xff] %v10943_v3  ;;  %v3704_v11 = vpop.f32.mrf.mxu0  ;;  %8572 = vmatmul.msk.bf16.gmra.mxu1 %vm1221_vm2, %v3867_v23 }
 0x2fe   : > { %14886 = vst [vmem:[#allocation113_spill] sm:$0xff] %v10941_v36  ;;  %v10947_v55 = vadd.f32 %v3704_v11, %v10749_v5  ;;  %v3842_v5 = vld [vmem:[#allocation3 + $0xbd] sm:$0xff]  ;;  %v4080_v11 = vld [vmem:[#allocation3 + $0x4e] sm:$0xff] }
 0x2ff   : > { %v3868_v42 = vpack.c.bf16 %v3842_v5, %v3841_v13  ;;  %v14913_v36 = vld [vmem:[#allocation9_spill] sm:$0xff] }
 0x300   : > { %8589 = vmatmul.msk.bf16.gmra.mxu2 %vm1221_vm2, %v4112_v32 }
 0x302   : > { %v10950_v2 = vpop.f32.mrf.mxu1 }
 0x303   : > { %v3248_v47 = vpop.f32.mrf.mxu2 }
 0x304   : > { %v3305_v50 = vadd.f32 %v3248_v47, %v10785_v1  ;;  %v3500_v46 = vpop.f32.mrf.mxu3 }
 0x305   : > { %v3707_v37 = vpop.f32.mrf.mxu0 }
 0x306   : > { %v10953_v14 = vadd.f32 %v3500_v46, %v3305_v50  ;;  %v10956_v26 = vadd.f32 %v3707_v37, %v10760_v10  ;;  %v4079_v50 = vld [vmem:[#allocation3 + $0x46] sm:$0xff] }
 0x308   : > { %14888 = vst [vmem:[#allocation115_spill] sm:$0xff] %v10953_v14  ;;  %8550 = vmatmul.msk.bf16.gmra.mxu0 %vm1221_vm2, %v10772_v29  ;;  %v4113_v29 = vpack.c.bf16 %v4080_v11, %v4079_v50  ;;  %v3843_v11 = vld [vmem:[#allocation3 + $0xc5] sm:$0xff]  ;;  %v4093_v14 = vld [vmem:[#allocation3 + $0xb6] sm:$0xff] }
 0x309   : > { %v4082_v50 = vld [vmem:[#allocation3 + $0x5e] sm:$0xff] }
 0x30a   : > { %v10960_v17 = vpop.f32.mrf.mxu1 }
 0x30b   : > { %v3250_v23 = vpop.f32.mrf.mxu2 }
 0x30c   : > { %v10963_v32 = vadd.f32 %v3250_v23, %v10797_v41  ;;  %v10965_v1 = vpop.f32.mrf.mxu3 }
 0x30d   : > { %14890 = vst [vmem:[#allocation117_spill] sm:$0xff] %v10965_v1  ;;  %v3709_v47 = vpop.f32.mrf.mxu0  ;;  %8573 = vmatmul.msk.bf16.gmra.mxu1 %vm1221_vm2, %v3868_v42 }
 0x30e   : > { %14889 = vst [vmem:[#allocation116_spill] sm:$0xff] %v10963_v32  ;;  %v10969_v10 = vadd.f32 %v3709_v47, %v10769_v51  ;;  %v3844_v51 = vld [vmem:[#allocation3 + $0xcd] sm:$0xff] }
 0x310   : > { %8590 = vmatmul.msk.bf16.gmra.mxu2 %vm1221_vm2, %v4113_v29  ;;  %v3869_v29 = vpack.c.bf16 %v3844_v51, %v3843_v11 }
 0x312   : > { %v10972_v46 = vpop.f32.mrf.mxu1 }
 0x313   : > { %v3253_v37 = vpop.f32.mrf.mxu2 }
 0x314   : > { %v3307_v5 = vadd.f32 %v3253_v37, %v10805_v33  ;;  %v3505_v13 = vpop.f32.mrf.mxu3 }
 0x315   : > { %v3712_v41 = vpop.f32.mrf.mxu0 }
 0x316   : > { %v10975_v23 = vadd.f32 %v3505_v13, %v3307_v5  ;;  %v10978_v1 = vadd.f32 %v3712_v41, %v10780_v43  ;;  %v4081_v5 = vld [vmem:[#allocation3 + $0x56] sm:$0xff] }
 0x318   : > { %14891 = vst [vmem:[#allocation118_spill] sm:$0xff] %v10975_v23  ;;  %8551 = vmatmul.msk.bf16.gmra.mxu0 %vm1221_vm2, %v10792_v38  ;;  %v4114_v38 = vpack.c.bf16 %v4082_v50, %v4081_v5  ;;  %v3845_v50 = vld [vmem:[#allocation3 + $0xd5] sm:$0xff] }
 0x319   : > { %v4084_v5 = vld [vmem:[#allocation3 + $0x6e] sm:$0xff] }
 0x31a   : > { %v10982_v42 = vpop.f32.mrf.mxu1 }
 0x31b   : > { %v3255_v47 = vpop.f32.mrf.mxu2 }
 0x31c   : > { %v10985_v32 = vadd.f32 %v3255_v47, %v10817_v20  ;;  %v10987_v33 = vpop.f32.mrf.mxu3 }
 0x31d   : > { %14893 = vst [vmem:[#allocation120_spill] sm:$0xff] %v10987_v33  ;;  %v3714_v37 = vpop.f32.mrf.mxu0  ;;  %8574 = vmatmul.msk.bf16.gmra.mxu1 %vm1221_vm2, %v3869_v29 }
 0x31e   : > { %14892 = vst [vmem:[#allocation119_spill] sm:$0xff] %v10985_v32  ;;  %v10991_v43 = vadd.f32 %v3714_v37, %v10789_v31  ;;  %v3846_v31 = vld [vmem:[#allocation3 + $0xdd] sm:$0xff] }
 0x320   : > { %8591 = vmatmul.msk.bf16.gmra.mxu2 %vm1221_vm2, %v4114_v38  ;;  %v3870_v38 = vpack.c.bf16 %v3846_v31, %v3845_v50 }
 0x322   : > { %v10994_v13 = vpop.f32.mrf.mxu1 }
 0x323   : > { %v3258_v41 = vpop.f32.mrf.mxu2 }
 0x324   : > { %v3309_v51 = vadd.f32 %v3258_v41, %v10825_v62  ;;  %v3510_v11 = vpop.f32.mrf.mxu3 }
 0x325   : > { %v3717_v20 = vpop.f32.mrf.mxu0 }
 0x326   : > { %v10997_v47 = vadd.f32 %v3510_v11, %v3309_v51  ;;  %v11000_v33 = vadd.f32 %v3717_v20, %v10800_v34  ;;  %v4083_v51 = vld [vmem:[#allocation3 + $0x66] sm:$0xff] }
 0x328   : > { %14894 = vst [vmem:[#allocation121_spill] sm:$0xff] %v10997_v47  ;;  %8552 = vmatmul.msk.bf16.gmra.mxu0 %vm1221_vm2, %v10812_v28  ;;  %v4115_v28 = vpack.c.bf16 %v4084_v5, %v4083_v51 }
 0x32a   : > { %v11004_v29 = vpop.f32.mrf.mxu1 }
 0x32b   : > { %v3260_v37 = vpop.f32.mrf.mxu2 }
 0x32c   : > { %v11007_v32 = vadd.f32 %v3260_v37, %v10837_v60  ;;  %v11009_v62 = vpop.f32.mrf.mxu3 }
 0x32d   : > { %14896 = vst [vmem:[#allocation123_spill] sm:$0xff] %v11009_v62  ;;  %v3719_v41 = vpop.f32.mrf.mxu0  ;;  %8575 = vmatmul.msk.bf16.gmra.mxu1 %vm1221_vm2, %v3870_v38  ;;  %v3848_v38 = vld [vmem:[#allocation3 + $0xed] sm:$0xff] }
 0x32e   : > { %14895 = vst [vmem:[#allocation122_spill] sm:$0xff] %v11007_v32  ;;  %v11013_v34 = vadd.f32 %v3719_v41, %v10809_v8  ;;  %v3847_v8 = vld [vmem:[#allocation3 + $0xe5] sm:$0xff] }
 0x32f   : > { %v4086_v41 = vld [vmem:[#allocation3 + $0x7e] sm:$0xff]  ;;  %v3871_v51 = vpack.c.bf16 %v3848_v38, %v3847_v8 }
 0x330   : > { %8592 = vmatmul.msk.bf16.gmra.mxu2 %vm1221_vm2, %v4115_v28  ;;  %v3850_v8 = vld [vmem:[#allocation3 + $0xfd] sm:$0xff] }
 0x332   : > { %v11016_v11 = vpop.f32.mrf.mxu1 }
 0x333   : > { %v3263_v20 = vpop.f32.mrf.mxu2 }
 0x334   : > { %v3311_v31 = vadd.f32 %v3263_v20, %v10845_v35  ;;  %v3515_v50 = vpop.f32.mrf.mxu3  ;;  %v4085_v20 = vld [vmem:[#allocation3 + $0x76] sm:$0xff] }
 0x335   : > { %v11019_v60 = vpop.f32.mrf.mxu0 }
 0x336   : > { %v11021_v37 = vadd.f32 %v3515_v50, %v3311_v31  ;;  %v4116_v31 = vpack.c.bf16 %v4086_v41, %v4085_v20  ;;  %v4088_v20 = vld [vmem:[#allocation3 + $0x8e] sm:$0xff] }
 0x338   : > { %14897 = vst [vmem:[#allocation124_spill] sm:$0xff] %v11021_v37  ;;  %8553 = vmatmul.msk.bf16.gmra.mxu0 %vm1221_vm2, %v10832_v59 }
 0x33a   : > { %v11025_v62 = vpop.f32.mrf.mxu1 }
 0x33b   : > { %v3265_v5 = vpop.f32.mrf.mxu2 }
 0x33c   : > { %v11028_v28 = vadd.f32 %v3265_v5, %v10859_v49  ;;  %v11030_v32 = vpop.f32.mrf.mxu3 }
 0x33d   : > { %14899 = vst [vmem:[#allocation126_spill] sm:$0xff] %v11030_v32  ;;  %v11032_v35 = vpop.f32.mrf.mxu0  ;;  %8576 = vmatmul.msk.bf16.gmra.mxu1 %vm1221_vm2, %v3871_v51  ;;  %v3849_v51 = vld [vmem:[#allocation3 + $0xf5] sm:$0xff] }
 0x33e   : > { %14898 = vst [vmem:[#allocation125_spill] sm:$0xff] %v11028_v28 }
 0x340   : > { %8593 = vmatmul.msk.bf16.gmra.mxu2 %vm1221_vm2, %v4116_v31  ;;  %v3872_v31 = vpack.c.bf16 %v3850_v8, %v3849_v51 }
 0x342   : > { %v11036_v59 = vpop.f32.mrf.mxu1 }
 0x343   : > { %v3268_v50 = vpop.f32.mrf.mxu2 }
 0x344   : > { %v3313_v37 = vadd.f32 %v3268_v50, %v10870_v0  ;;  %v3520_v47 = vpop.f32.mrf.mxu3  ;;  %v4087_v50 = vld [vmem:[#allocation3 + $0x86] sm:$0xff] }
 0x345   : > { %v11039_v38 = vpop.f32.mrf.mxu0 }
 0x346   : > { %v11041_v49 = vadd.f32 %v3520_v47, %v3313_v37  ;;  %v4117_v47 = vpack.c.bf16 %v4088_v20, %v4087_v50 }
 0x348   : > { %14900 = vst [vmem:[#allocation127_spill] sm:$0xff] %v11041_v49  ;;  %8554 = vmatmul.msk.bf16.gmra.mxu0 %vm1221_vm2, %v10854_v21 }
 0x34a   : > { %v11045_v5 = vpop.f32.mrf.mxu1 }
 0x34b   : > { %v3270_v41 = vpop.f32.mrf.mxu2 }
 0x34c   : > { %v11048_v32 = vadd.f32 %v3270_v41, %v10884_v22  ;;  %v11050_v28 = vpop.f32.mrf.mxu3  ;;  %v8606_v22 = vld [vmem:[%s14494_s12 + $0x4] sm:$0xf] }
 0x34d   : > { %14902 = vst [vmem:[#allocation129_spill] sm:$0xff] %v11050_v28  ;;  %v11052_v0 = vpop.f32.mrf.mxu0  ;;  %8577 = vmatmul.msk.bf16.gmra.mxu1 %vm1221_vm2, %v3872_v31  ;;  %v4726_v51 = vsel %vm4724_vm5, %v8606_v22, 0  ;;  %v4090_v31 = vld [vmem:[#allocation3 + $0x9e] sm:$0xff]  ;;  %v4089_v22 = vld [vmem:[#allocation3 + $0x96] sm:$0xff] }
 0x34e   : > { %14901 = vst [vmem:[#allocation128_spill] sm:$0xff] %v11048_v32  ;;  %4735 = vmatpush.bf16.msra.mxu3 %v4726_v51  ;;  %v4118_v51 = vpack.c.bf16 %v4090_v31, %v4089_v22 }
 0x350   : > { %8594 = vmatmul.msk.bf16.gmra.mxu2 %vm1221_vm2, %v4117_v47 }
 0x352   : > { %v11056_v21 = vpop.f32.mrf.mxu1 }
 0x353   : > { %v3273_v37 = vpop.f32.mrf.mxu2 }
 0x354   : > { %v3315_v49 = vadd.f32 %v3273_v37, %v10892_v63  ;;  %v3525_v23 = vpop.f32.mrf.mxu3  ;;  %v3852_v63 = vld [vmem:[#allocation3 + $0x10d] sm:$0xff] }
 0x355   : > { %v11062_v8 = vpop.f32.mrf.mxu0 }
 0x356   : > { %v11065_v41 = vadd.f32 %v3525_v23, %v3315_v49  ;;  %v3851_v49 = vld [vmem:[#allocation3 + $0x105] sm:$0xff] }
 0x357   : > { %v3873_v50 = vpack.c.bf16 %v3852_v63, %v3851_v49  ;;  %v3604_v49 = vld [vmem:[#allocation3 + $0x12c] sm:$0xff] }
 0x358   : > { %14903 = vst [vmem:[#allocation130_spill] sm:$0xff] %v11065_v41  ;;  %8555 = vmatmul.msk.bf16.gmra.mxu0 %vm1221_vm2, %v10879_v9  ;;  %v4094_v41 = vld [vmem:[#allocation3 + $0xbe] sm:$0xff] }
 0x35a   : > { %v11079_v23 = vpop.f32.mrf.mxu1 }
 0x35b   : > { %v3275_v20 = vpop.f32.mrf.mxu2 }
 0x35c   : > { %v11084_v9 = vadd.f32 %v3275_v20, %v10906_v40  ;;  %v11086_v47 = vpop.f32.mrf.mxu3 }
 0x35d   : > { %14905 = vst [vmem:[#allocation132_spill] sm:$0xff] %v11086_v47  ;;  %v11090_v37 = vpop.f32.mrf.mxu0  ;;  %8578 = vmatmul.msk.bf16.gmra.mxu1 %vm1221_vm2, %v3873_v50  ;;  %v4614_v47 = vld [vmem:[#allocation4 + $0x1] sm:$0xff] }
 0x35e   : > { %14904 = vst [vmem:[#allocation131_spill] sm:$0xff] %v11084_v9  ;;  %v4615_v9 = vld [vmem:[#allocation4 + $0x9] sm:$0xff] }
 0x360   : > { %8595 = vmatmul.msk.bf16.gmra.mxu2 %vm1221_vm2, %v4118_v51  ;;  %v3623_v51 = vpack.c.bf16 %v3604_v49, %v10899_v61  ;;  %v3853_v49 = vld [vmem:[#allocation3 + $0x115] sm:$0xff] }
 0x362   : > { %v11106_v40 = vpop.f32.mrf.mxu1 }
 0x363   : > { %v3278_v63 = vpop.f32.mrf.mxu2 }
 0x364   : > { %v3317_v20 = vadd.f32 %v3278_v63, %v10916_v39  ;;  %v3530_v31 = vpop.f32.mrf.mxu3  ;;  %v4650_v39 = vpack.c.bf16 %v4615_v9, %v4614_v47  ;;  %v3854_v63 = vld [vmem:[#allocation3 + $0x11d] sm:$0xff] }
 0x365   : > { %v11113_v50 = vpop.f32.mrf.mxu0  ;;  %v3874_v9 = vpack.c.bf16 %v3854_v63, %v3853_v49  ;;  %v4039_v49 = vadd.f32 %v10938_v27, %v10912_v12 }
 0x366   : > { %v11117_v22 = vadd.f32 %v3530_v31, %v3317_v20  ;;  %8607 = vmatmul.msk.bf16.vlgmr.msra.gmra.mxu3 %vm14731_vm6, %v4650_v39  ;;  %v4092_v31 = vld [vmem:[#allocation3 + $0xae] sm:$0xff]  ;;  %v4091_v39 = vld [vmem:[#allocation3 + $0xa6] sm:$0xff] }
 0x368   : > { %14906 = vst [vmem:[#allocation133_spill] sm:$0xff] %v11117_v22  ;;  %8556 = vmatmul.msk.bf16.gmra.mxu0 %vm1221_vm2, %v3623_v51  ;;  %v4119_v22 = vpack.c.bf16 %v4092_v31, %v4091_v39  ;;  %v11175_v39 = vld [vmem:[%s14493_s11] ss:$0 sm:$0xff] }
 0x36a   : > { %v11132_v61 = vpop.f32.mrf.mxu1 }
 0x36b   : > { %v3280_v20 = vpop.f32.mrf.mxu2 }
 0x36c   : > { %v11137_v47 = vadd.f32 %v3280_v20, %v10928_v19  ;;  %v4613_v19 = vld [vmem:[%s14494_s12] sm:$0xf] }
 0x36d   : > { %v11141_v51 = vpop.f32.mrf.mxu0  ;;  %8579 = vmatmul.msk.bf16.gmra.mxu1 %vm1221_vm2, %v3874_v9  ;;  %v4882_v63 = vsel %vm4724_vm5, %v4613_v19, 0  ;;  %v11164_v20 = vld [vmem:[%s14492_s10] ss:$0 sm:$0xff] }
 0x36e   : > { %14907 = vst [vmem:[#allocation134_spill] sm:$0xff] %v11137_v47  ;;  %4891 = vmatpush.bf16.msrb.mxu0 %v4882_v63  ;;  %v3855_v63 = vld [vmem:[#allocation3 + $0x125] sm:$0xff] }
 0x370   : > { %8596 = vmatmul.msk.bf16.gmra.mxu2 %vm1221_vm2, %v4119_v22 }
 0x372   : > { %v11168_v31 = vpop.f32.mrf.mxu1 }
 0x373   : > { %v4201_v22 = vpop.f32.mrf.mxu2 }
 0x374   : > { %v4291_v9 = vadd.f32 %v4201_v22, %v4039_v49  ;;  %v3856_v49 = vld [vmem:[#allocation3 + $0x12d] sm:$0xff]  ;;  %v4040_v22 = vadd.f32 %v10950_v2, %v10925_v30 }
 0x375   : > { %v11181_v12 = vpop.f32.mrf.mxu0  ;;  %v3875_v30 = vpack.c.bf16 %v3856_v49, %v3855_v63 }
 0x376   : > { %v4331_v27 = vmul.f32 %v11164_v20, %v4291_v9 }
 0x378   : > { %v11189_v19 = vadd.f32 %v11175_v39, %v4331_v27 }
 0x37a   : > { %14908 = vst [vmem:[#allocation135_spill] sm:$0xff] %v11189_v19  ;;  %v14608_v9 = vmax.f32 %v11189_v19, 0.0  ;;  %v11200_v47 = vpop.f32.mrf.mxu1  ;;  %v4120_v19 = vpack.c.bf16 %v4094_v41, %v4093_v14 }
 0x37b   : > { %v4203_v27 = vpop.f32.mrf.mxu2 }
 0x37c   : > { %v4486_v28 = vmul.f32 %v14608_v9, %v9882_v48  ;;  %v4292_v2 = vadd.f32 %v4203_v27, %v4040_v22  ;;  %v8643_v48 = vld [vmem:[%s14494_s12 + $0x8] sm:$0xf]  ;;  %v3605_v27 = vld [vmem:[#allocation3 + $0x134] sm:$0xff] }
 0x37d   : > { %v11211_v32 = vpop.f32.mrf.mxu0  ;;  %8580 = vmatmul.msk.bf16.gmra.mxu1 %vm1221_vm2, %v3875_v30  ;;  %v5094_v63 = vsel %vm4724_vm5, %v8643_v48, 0  ;;  %v14910_v30 = vld [vmem:[#allocation7_spill] sm:$0xff] }
 0x37e   : > { %4522 = vst.msk [vmem:[#allocation4 + $0x13] sm:$0xff] %vm14731_vm6, %v4486_v28  ;;  %v4332_v3 = vmul.f32 %v11164_v20, %v4292_v2  ;;  %5103 = vmatpush.bf16.msrb.mxu1 %v5094_v63  ;;  %v4041_v28 = vadd.f32 %v10960_v17, %v10934_v24  ;;  %v3857_v24 = vld [vmem:[#allocation3 + $0x135] sm:$0xff]  ;;  %v3858_v17 = vld [vmem:[#allocation3 + $0x13d] sm:$0x3f] }
 0x380   : > { %v11222_v49 = vadd.f32 %v11175_v39, %v4332_v3  ;;  %8597 = vmatmul.msk.bf16.gmra.mxu2 %vm1221_vm2, %v4120_v19  ;;  %v3606_v3 = vld [vmem:[#allocation3 + $0x13c] sm:$0x3f] }
 0x381   : > { %v3624_v63 = vpack.c.bf16 %v3606_v3, %v3605_v27 }
 0x382   : > { %14909 = vst [vmem:[#allocation136_spill] sm:$0xff] %v11222_v49  ;;  %v14611_v22 = vmax.f32 %v11222_v49, 0.0  ;;  %v11228_v14 = vpop.f32.mrf.mxu1  ;;  %v4042_v49 = vadd.f32 %v10972_v46, %v10947_v55 }
 0x383   : > { %v4206_v41 = vpop.f32.mrf.mxu2  ;;  %8557 = vmatmul.msk.bf16.gmra.mxu0 %vm1221_vm2, %v3624_v63 }
 0x384   : > { %v4487_v2 = vmul.f32 %v14611_v22, %v14910_v30  ;;  %v4293_v48 = vadd.f32 %v4206_v41, %v4041_v28  ;;  %v3876_v41 = vpack.c.bf16 %v3858_v17, %v3857_v24 }
 0x385   : > { %v11233_v9 = vpop.f32.mrf.mxu0 }
 0x386   : > { %14911 = vst [vmem:[#allocation7_spill] sm:$0xff] %v11233_v9  ;;  %v4333_v19 = vmul.f32 %v11164_v20, %v4293_v48  ;;  %v4616_v9 = vld [vmem:[#allocation4 + $0x11] sm:$0xff] }
 0x387   : > { %4523 = vst.msk [vmem:[#allocation4 + $0x1b] sm:$0xff] %vm14731_vm6, %v4487_v2  ;;  %v4096_v2 = vld [vmem:[#allocation3 + $0xce] sm:$0xff] }
 0x388   : > { %v11238_v54 = vadd.f32 %v11175_v39, %v4333_v19  ;;  %v4095_v19 = vld [vmem:[#allocation3 + $0xc6] sm:$0xff] }
 0x389   : > { %v4121_v46 = vpack.c.bf16 %v4096_v2, %v4095_v19 }
 0x38a   : > { %14912 = vst [vmem:[#allocation137_spill] sm:$0xff] %v11238_v54  ;;  %v14612_v28 = vmax.f32 %v11238_v54, 0.0  ;;  %v11244_v30 = vpop.f32.mrf.mxu1 }
 0x38b   : > { %v4208_v22 = vpop.f32.mrf.mxu2 }
 0x38c   : > { %v4488_v27 = vmul.f32 %v14612_v28, %v14913_v36  ;;  %v4294_v48 = vadd.f32 %v4208_v22, %v4042_v49  ;;  %v4043_v36 = vadd.f32 %v10982_v42, %v10956_v26  ;;  %v4559_v49 = vld [vmem:[#allocation4] sm:$0xff]  ;;  %v4560_v22 = vld [vmem:[#allocation4 + $0x8] sm:$0xff] }
 0x38d   : > { %v11249_v3 = vpop.f32.mrf.mxu0  ;;  %8581 = vmatmul.msk.bf16.gmra.mxu1 %vm1221_vm2, %v3876_v41  ;;  %v4595_v19 = vpack.c.bf16 %v4560_v22, %v4559_v49  ;;  %v4983_v26 = vld [vmem:[#allocation4 + $0x2] sm:$0xff]  ;;  %v4984_v42 = vld [vmem:[#allocation4 + $0xa] sm:$0xff] }
 0x38e   : > { %v4617_v63 = vld [vmem:[#allocation4 + $0x19] sm:$0xff]  ;;  %4524 = vst.msk [vmem:[#allocation4 + $0x23] sm:$0xff] %vm14731_vm6, %v4488_v27  ;;  %v4334_v55 = vmul.f32 %v11164_v20, %v4294_v48 }
 0x38f   : > { %v4651_v24 = vpack.c.bf16 %v4617_v63, %v4616_v9  ;;  %v14915_v48 = vld [vmem:[#allocation12_spill] sm:$0xff] }
 0x390   : > { %v11255_v17 = vadd.f32 %v11175_v39, %v4334_v55  ;;  %8598 = vmatmul.msk.bf16.gmra.mxu2 %vm1221_vm2, %v4121_v46 }
 0x391   : > { %8608 = vmatmul.msk.bf16.gmra.mxu3 %vm14731_vm6, %v4651_v24  ;;  %v4044_v24 = vadd.f32 %v10994_v13, %v10969_v10 }
 0x392   : > { %14914 = vst [vmem:[#allocation9_spill] sm:$0xff] %v11255_v17  ;;  %v14613_v27 = vmax.f32 %v11255_v17, 0.0  ;;  %v11262_v28 = vpop.f32.mrf.mxu1 }
 0x393   : > { %v4211_v41 = vpop.f32.mrf.mxu2  ;;  %8625 = vmatmul.msk.bf16.vlgmr.msrb.gmra.mxu0 %vm14731_vm6, %v4595_v19 }
 0x394   : > { %v4489_v9 = vmul.f32 %v14613_v27, %v14915_v48  ;;  %v4295_v2 = vadd.f32 %v4211_v41, %v4043_v36  ;;  %v5019_v36 = vpack.c.bf16 %v4984_v42, %v4983_v26  ;;  %v4098_v41 = vld [vmem:[#allocation3 + $0xde] sm:$0xff] }
 0x395   : > { %v11267_v63 = vpop.f32.mrf.mxu0  ;;  %v4618_v17 = vld [vmem:[#allocation4 + $0x21] sm:$0xff] }
 0x396   : > { %4525 = vst.msk [vmem:[#allocation4 + $0x2b] sm:$0xff] %vm14731_vm6, %v4489_v9  ;;  %v4335_v55 = vmul.f32 %v11164_v20, %v4295_v2  ;;  %v14917_v9 = vld [vmem:[#allocation15_spill] sm:$0xff] }
 0x398   : > { %v11272_v46 = vadd.f32 %v11175_v39, %v4335_v55  ;;  %v4097_v55 = vld [vmem:[#allocation3 + $0xd6] sm:$0xff] }
 0x399   : > { %v4122_v13 = vpack.c.bf16 %v4098_v41, %v4097_v55  ;;  %v4561_v55 = vld [vmem:[#allocation4 + $0x10] sm:$0xff] }
 0x39a   : > { %14916 = vst [vmem:[#allocation12_spill] sm:$0xff] %v11272_v46  ;;  %v14616_v48 = vmax.f32 %v11272_v46, 0.0  ;;  %v11278_v49 = vpop.f32.mrf.mxu1 }
 0x39b   : > { %v4213_v22 = vpop.f32.mrf.mxu2 }
 0x39c   : > { %v4490_v2 = vmul.f32 %v14616_v48, %v14917_v9  ;;  %v4296_v27 = vadd.f32 %v4213_v22, %v4044_v24  ;;  %v4045_v24 = vadd.f32 %v11004_v29, %v10978_v1  ;;  %v14919_v48 = vld [vmem:[#allocation18_spill] sm:$0xff]  ;;  %v4986_v29 = vld [vmem:[#allocation4 + $0x1a] sm:$0xff] }
 0x39d   : > { %v11283_v54 = vpop.f32.mrf.mxu0  ;;  %v4619_v19 = vld [vmem:[#allocation4 + $0x29] sm:$0xff]  ;;  %8644 = vmatmul.msk.bf16.vlgmr.msrb.gmra.mxu1 %vm14731_vm6, %v5019_v36  ;;  %v4562_v36 = vld [vmem:[#allocation4 + $0x18] sm:$0xff] }
 0x39e   : > { %4526 = vst.msk [vmem:[#allocation4 + $0x33] sm:$0xff] %vm14731_vm6, %v4490_v2  ;;  %v4336_v10 = vmul.f32 %v11164_v20, %v4296_v27  ;;  %v4652_v26 = vpack.c.bf16 %v4619_v19, %v4618_v17 }
 0x3a0   : > { %v11289_v42 = vadd.f32 %v11175_v39, %v4336_v10  ;;  %8599 = vmatmul.msk.bf16.gmra.mxu2 %vm1221_vm2, %v4122_v13  ;;  %v4596_v10 = vpack.c.bf16 %v4562_v36, %v4561_v55  ;;  %v4046_v13 = vadd.f32 %v11016_v11, %v10991_v43 }
 0x3a1   : > { %8609 = vmatmul.msk.bf16.gmra.mxu3 %vm14731_vm6, %v4652_v26 }
 0x3a2   : > { %14918 = vst [vmem:[#allocation15_spill] sm:$0xff] %v11289_v42  ;;  %v14617_v22 = vmax.f32 %v11289_v42, 0.0  ;;  %v11296_v9 = vpop.f32.mrf.mxu1 }
 0x3a3   : > { %v4216_v2 = vpop.f32.mrf.mxu2  ;;  %8626 = vmatmul.msk.bf16.gmra.mxu0 %vm14731_vm6, %v4596_v10  ;;  %v4099_v10 = vld [vmem:[#allocation3 + $0xe6] sm:$0xff] }
 0x3a4   : > { %v4491_v17 = vmul.f32 %v14617_v22, %v14919_v48  ;;  %v4297_v27 = vadd.f32 %v4216_v2, %v4045_v24  ;;  %v4985_v24 = vld [vmem:[#allocation4 + $0x12] sm:$0xff]  ;;  %v4100_v22 = vld [vmem:[#allocation3 + $0xee] sm:$0xff] }
 0x3a5   : > { %v11301_v41 = vpop.f32.mrf.mxu0  ;;  %v4620_v46 = vld [vmem:[#allocation4 + $0x31] sm:$0xff]  ;;  %v4123_v11 = vpack.c.bf16 %v4100_v22, %v4099_v10  ;;  %v4563_v22 = vld [vmem:[#allocation4 + $0x20] sm:$0xff] }
 0x3a6   : > { %14920 = vst [vmem:[#allocation18_spill] sm:$0xff] %v11301_v41  ;;  %v4337_v19 = vmul.f32 %v11164_v20, %v4297_v27  ;;  %v11317_v27 = vpack.c.bf16 %v4986_v29, %v4985_v24  ;;  %v4047_v29 = vadd.f32 %v11025_v62, %v11000_v33  ;;  %v4988_v62 = vld [vmem:[#allocation4 + $0x2a] sm:$0xff] }
 0x3a7   : > { %4527 = vst.msk [vmem:[#allocation4 + $0x3b] sm:$0xff] %vm14731_vm6, %v4491_v17  ;;  %v14922_v17 = vld [vmem:[#allocation21_spill] sm:$0xff] }
 0x3a8   : > { %v11306_v1 = vadd.f32 %v11175_v39, %v4337_v19 }
 0x3aa   : > { %14921 = vst [vmem:[#allocation138_spill] sm:$0xff] %v11306_v1  ;;  %v14621_v48 = vmax.f32 %v11306_v1, 0.0  ;;  %v11312_v26 = vpop.f32.mrf.mxu1 }
 0x3ab   : > { %v4218_v2 = vpop.f32.mrf.mxu2 }
 0x3ac   : > { %v4492_v36 = vmul.f32 %v14621_v48, %v14922_v17  ;;  %v4298_v55 = vadd.f32 %v4218_v2, %v4046_v13  ;;  %v4564_v17 = vld [vmem:[#allocation4 + $0x28] sm:$0xff] }
 0x3ad   : > { %v11319_v19 = vpop.f32.mrf.mxu0  ;;  %8645 = vmatmul.msk.bf16.gmra.mxu1 %vm14731_vm6, %v11317_v27  ;;  %v4597_v10 = vpack.c.bf16 %v4564_v17, %v4563_v22  ;;  %v4101_v48 = vld [vmem:[#allocation3 + $0xf6] sm:$0xff] }
 0x3ae   : > { %v4621_v42 = vld [vmem:[#allocation4 + $0x39] sm:$0xff]  ;;  %4528 = vst.msk [vmem:[#allocation4 + $0x43] sm:$0xff] %vm14731_vm6, %v4492_v36  ;;  %v4338_v43 = vmul.f32 %v11164_v20, %v4298_v55 }
 0x3af   : > { %v4653_v41 = vpack.c.bf16 %v4621_v42, %v4620_v46  ;;  %v14924_v36 = vld [vmem:[#allocation24_spill] sm:$0xff] }
 0x3b0   : > { %v11326_v1 = vadd.f32 %v11175_v39, %v4338_v43  ;;  %8600 = vmatmul.msk.bf16.gmra.mxu2 %vm1221_vm2, %v4123_v11  ;;  %v4048_v43 = vadd.f32 %v11036_v59, %v11013_v34 }
 0x3b1   : > { %8610 = vmatmul.msk.bf16.gmra.mxu3 %vm14731_vm6, %v4653_v41 }
 0x3b2   : > { %14923 = vst [vmem:[#allocation21_spill] sm:$0xff] %v11326_v1  ;;  %v14622_v13 = vmax.f32 %v11326_v1, 0.0  ;;  %v11333_v24 = vpop.f32.mrf.mxu1 }
 0x3b3   : > { %v4221_v2 = vpop.f32.mrf.mxu2  ;;  %8627 = vmatmul.msk.bf16.gmra.mxu0 %vm14731_vm6, %v4597_v10 }
 0x3b4   : > { %v4493_v46 = vmul.f32 %v14622_v13, %v14924_v36  ;;  %v4299_v42 = vadd.f32 %v4221_v2, %v4047_v29  ;;  %v4987_v2 = vld [vmem:[#allocation4 + $0x22] sm:$0xff] }
 0x3b5   : > { %v11340_v41 = vpop.f32.mrf.mxu0  ;;  %v11354_v22 = vpack.c.bf16 %v4988_v62, %v4987_v2  ;;  %v4622_v10 = vld [vmem:[#allocation4 + $0x41] sm:$0xff] }
 0x3b6   : > { %4529 = vst.msk [vmem:[#allocation4 + $0x4b] sm:$0xff] %vm14731_vm6, %v4493_v46  ;;  %v4339_v55 = vmul.f32 %v11164_v20, %v4299_v42  ;;  %v4102_v46 = vld [vmem:[#allocation3 + $0xfe] sm:$0xff] }
 0x3b7   : > { %14925 = vst [vmem:[#allocation24_spill] sm:$0xff] %v11340_v41  ;;  %v14927_v42 = vld [vmem:[#allocation27_spill] sm:$0xff]  ;;  %v4124_v59 = vpack.c.bf16 %v4102_v46, %v4101_v48  ;;  %v3797_v41 = vadd.f32 %v11019_v60, %v10820_v4  ;;  %v14929_v46 = vld [vmem:[#allocation30_spill] sm:$0xff] }
 0x3b8   : > { %v11343_v33 = vadd.f32 %v11175_v39, %v4339_v55 }
 0x3ba   : > { %14926 = vst [vmem:[#allocation139_spill] sm:$0xff] %v11343_v33  ;;  %v14624_v11 = vmax.f32 %v11343_v33, 0.0  ;;  %v11349_v29 = vpop.f32.mrf.mxu1  ;;  %v3799_v33 = vadd.f32 %v11039_v38, %v10840_v7 }
 0x3bb   : > { %v4223_v36 = vpop.f32.mrf.mxu2 }
 0x3bc   : > { %v4494_v17 = vmul.f32 %v14624_v11, %v14927_v42  ;;  %v4300_v55 = vadd.f32 %v4223_v36, %v4048_v43  ;;  %v4049_v43 = vadd.f32 %v11045_v5, %v3797_v41  ;;  %v3798_v5 = vadd.f32 %v11032_v35, %v10829_v58  ;;  %v4990_v41 = vld [vmem:[#allocation4 + $0x3a] sm:$0xff] }
 0x3bd   : > { %v4623_v13 = vld [vmem:[#allocation4 + $0x49] sm:$0xff]  ;;  %8646 = vmatmul.msk.bf16.gmra.mxu1 %vm14731_vm6, %v11354_v22  ;;  %v11365_v62 = vpop.f32.mrf.mxu0 }
 0x3be   : > { %4530 = vst.msk [vmem:[#allocation4 + $0x53] sm:$0xff] %vm14731_vm6, %v4494_v17  ;;  %v4340_v34 = vmul.f32 %v11164_v20, %v4300_v55  ;;  %v4654_v1 = vpack.c.bf16 %v4623_v13, %v4622_v10  ;;  %v4566_v13 = vld [vmem:[#allocation4 + $0x38] sm:$0xff]  ;;  %v4565_v17 = vld [vmem:[#allocation4 + $0x30] sm:$0xff] }
 0x3bf   : > { %v4598_v10 = vpack.c.bf16 %v4566_v13, %v4565_v17  ;;  %v4104_v13 = vld [vmem:[#allocation3 + $0x10e] sm:$0xff] }
 0x3c0   : > { %v11363_v42 = vadd.f32 %v11175_v39, %v4340_v34  ;;  %8601 = vmatmul.msk.bf16.gmra.mxu2 %vm1221_vm2, %v4124_v59  ;;  %v4050_v34 = vadd.f32 %v11056_v21, %v3798_v5 }
 0x3c1   : > { %8611 = vmatmul.msk.bf16.gmra.mxu3 %vm14731_vm6, %v4654_v1 }
 0x3c2   : > { %14928 = vst [vmem:[#allocation27_spill] sm:$0xff] %v11363_v42  ;;  %v14625_v2 = vmax.f32 %v11363_v42, 0.0  ;;  %v11371_v36 = vpop.f32.mrf.mxu1 }
 0x3c3   : > { %v4226_v48 = vpop.f32.mrf.mxu2  ;;  %8628 = vmatmul.msk.bf16.gmra.mxu0 %vm14731_vm6, %v4598_v10 }
 0x3c4   : > { %v4495_v4 = vmul.f32 %v14625_v2, %v14929_v46  ;;  %v4301_v60 = vadd.f32 %v4226_v48, %v4049_v43  ;;  %v4989_v46 = vld [vmem:[#allocation4 + $0x32] sm:$0xff] }
 0x3c5   : > { %v11386_v43 = vpop.f32.mrf.mxu0  ;;  %v11393_v35 = vpack.c.bf16 %v4990_v41, %v4989_v46  ;;  %v4624_v10 = vld [vmem:[#allocation4 + $0x51] sm:$0xff]  ;;  %v4051_v41 = vadd.f32 %v11079_v23, %v3799_v33 }
 0x3c6   : > { %4531 = vst.msk [vmem:[#allocation4 + $0x5b] sm:$0xff] %vm14731_vm6, %v4495_v4  ;;  %v4341_v55 = vmul.f32 %v11164_v20, %v4301_v60  ;;  %v14931_v60 = vld [vmem:[#allocation33_spill] sm:$0xff] }
 0x3c8   : > { %v11381_v1 = vadd.f32 %v11175_v39, %v4341_v55  ;;  %v4103_v55 = vld [vmem:[#allocation3 + $0x106] sm:$0xff] }
 0x3c9   : > { %v4125_v5 = vpack.c.bf16 %v4104_v13, %v4103_v55  ;;  %v14933_v13 = vld [vmem:[#allocation36_spill] sm:$0xff] }
 0x3ca   : > { %14930 = vst [vmem:[#allocation30_spill] sm:$0xff] %v11381_v1  ;;  %v14627_v59 = vmax.f32 %v11381_v1, 0.0  ;;  %v11388_v48 = vpop.f32.mrf.mxu1  ;;  %v4567_v55 = vld [vmem:[#allocation4 + $0x40] sm:$0xff] }
 0x3cb   : > { %v4228_v4 = vpop.f32.mrf.mxu2 }
 0x3cc   : > { %v4496_v58 = vmul.f32 %v14627_v59, %v14931_v60  ;;  %v4302_v17 = vadd.f32 %v4228_v4, %v4050_v34 }
 0x3cd   : > { %v4625_v11 = vld [vmem:[#allocation4 + $0x59] sm:$0xff]  ;;  %8647 = vmatmul.msk.bf16.gmra.mxu1 %vm14731_vm6, %v11393_v35  ;;  %v11413_v7 = vpop.f32.mrf.mxu0 }
 0x3ce   : > { %4532 = vst.msk [vmem:[#allocation4 + $0x63] sm:$0xff] %vm14731_vm6, %v4496_v58  ;;  %v4342_v21 = vmul.f32 %v11164_v20, %v4302_v17  ;;  %v4655_v2 = vpack.c.bf16 %v4625_v11, %v4624_v10  ;;  %v4568_v58 = vld [vmem:[#allocation4 + $0x48] sm:$0xff]  ;;  %v3548_v17 = vadd.f32 %v10850_v44, %v10848_v18 }
 0x3cf   : > { %v4599_v33 = vpack.c.bf16 %v4568_v58, %v4567_v55  ;;  %v4991_v18 = vld [vmem:[#allocation4 + $0x42] sm:$0xff] }
 0x3d0   : > { %v11402_v60 = vadd.f32 %v11175_v39, %v4342_v21  ;;  %8602 = vmatmul.msk.bf16.gmra.mxu2 %vm1221_vm2, %v4125_v5  ;;  %v4992_v21 = vld [vmem:[#allocation4 + $0x4a] sm:$0xff] }
 0x3d1   : > { %8612 = vmatmul.msk.bf16.gmra.mxu3 %vm14731_vm6, %v4655_v2  ;;  %v3800_v2 = vadd.f32 %v11052_v0, %v3548_v17  ;;  %v11431_v0 = vpack.c.bf16 %v4992_v21, %v4991_v18  ;;  %v4105_v17 = vld [vmem:[#allocation3 + $0x116] sm:$0xff] }
 0x3d2   : > { %14932 = vst [vmem:[#allocation33_spill] sm:$0xff] %v11402_v60  ;;  %v14628_v34 = vmax.f32 %v11402_v60, 0.0  ;;  %v11408_v46 = vpop.f32.mrf.mxu1 }
 0x3d3   : > { %v4231_v4 = vpop.f32.mrf.mxu2  ;;  %8629 = vmatmul.msk.bf16.gmra.mxu0 %vm14731_vm6, %v4599_v33  ;;  %v4052_v5 = vadd.f32 %v11106_v40, %v3800_v2 }
 0x3d4   : > { %v4497_v11 = vmul.f32 %v14628_v34, %v14933_v13  ;;  %v4303_v38 = vadd.f32 %v4231_v4, %v4051_v41  ;;  %v4106_v13 = vld [vmem:[#allocation3 + $0x11e] sm:$0xff] }
 0x3d5   : > { %v4626_v55 = vld [vmem:[#allocation4 + $0x61] sm:$0xff]  ;;  %v11434_v40 = vpop.f32.mrf.mxu0  ;;  %v4126_v2 = vpack.c.bf16 %v4106_v13, %v4105_v17  ;;  %v14937_v13 = vld [vmem:[#allocation42_spill] sm:$0xff] }
 0x3d6   : > { %4533 = vst.msk [vmem:[#allocation4 + $0x6b] sm:$0xff] %vm14731_vm6, %v4497_v11  ;;  %v4343_v23 = vmul.f32 %v11164_v20, %v4303_v38  ;;  %v14935_v11 = vld [vmem:[#allocation39_spill] sm:$0xff] }
 0x3d8   : > { %v11421_v10 = vadd.f32 %v11175_v39, %v4343_v23 }
 0x3da   : > { %14934 = vst [vmem:[#allocation36_spill] sm:$0xff] %v11421_v10  ;;  %v14629_v41 = vmax.f32 %v11421_v10, 0.0  ;;  %v11426_v4 = vpop.f32.mrf.mxu1 }
 0x3db   : > { %v4233_v44 = vpop.f32.mrf.mxu2 }
 0x3dc   : > { %v4498_v58 = vmul.f32 %v14629_v41, %v14935_v11  ;;  %v4304_v38 = vadd.f32 %v4233_v44, %v4052_v5  ;;  %v3801_v11 = vadd.f32 %v11062_v8, %v10865_v56  ;;  %v3550_v8 = vadd.f32 %v10875_v45, %v10873_v57 }
 0x3dd   : > { %v4627_v23 = vld [vmem:[#allocation4 + $0x69] sm:$0xff]  ;;  %8648 = vmatmul.msk.bf16.gmra.mxu1 %vm14731_vm6, %v11431_v0  ;;  %v3803_v41 = vadd.f32 %v11113_v50, %v10887_v15 }
 0x3de   : > { %4534 = vst.msk [vmem:[#allocation4 + $0x73] sm:$0xff] %vm14731_vm6, %v4498_v58  ;;  %v4344_v33 = vmul.f32 %v11164_v20, %v4304_v38  ;;  %v4656_v59 = vpack.c.bf16 %v4627_v23, %v4626_v55  ;;  %v4053_v5 = vadd.f32 %v11132_v61, %v3801_v11  ;;  %v4570_v38 = vld [vmem:[#allocation4 + $0x58] sm:$0xff]  ;;  %v4569_v55 = vld [vmem:[#allocation4 + $0x50] sm:$0xff]  ;;  %v3802_v23 = vadd.f32 %v11090_v37, %v3550_v8 }
 0x3df   : > { %v4600_v61 = vpack.c.bf16 %v4570_v38, %v4569_v55  ;;  %v4994_v11 = vld [vmem:[#allocation4 + $0x5a] sm:$0xff]  ;;  %v4108_v38 = vld [vmem:[#allocation3 + $0x12e] sm:$0xff] }
 0x3e0   : > { %v11442_v21 = vadd.f32 %v11175_v39, %v4344_v33  ;;  %8603 = vmatmul.msk.bf16.gmra.mxu2 %vm1221_vm2, %v4126_v2  ;;  %v11458_v33 = vpop.f32.mrf.mxu0 }
 0x3e1   : > { %8613 = vmatmul.msk.bf16.gmra.mxu3 %vm14731_vm6, %v4656_v59 }
 0x3e2   : > { %14936 = vst [vmem:[#allocation39_spill] sm:$0xff] %v11442_v21  ;;  %v14630_v18 = vmax.f32 %v11442_v21, 0.0  ;;  %v11448_v44 = vpop.f32.mrf.mxu1  ;;  %v14956_v21 = vld [vmem:[#allocation115_spill] sm:$0xff] }
 0x3e3   : > { %v4236_v58 = vpop.f32.mrf.mxu2  ;;  %8630 = vmatmul.msk.bf16.gmra.mxu0 %vm14731_vm6, %v4600_v61 }
 0x3e4   : > { %v4499_v17 = vmul.f32 %v14630_v18, %v14937_v13  ;;  %v4305_v56 = vadd.f32 %v4236_v58, %v4053_v5  ;;  %v4054_v5 = vadd.f32 %v11168_v31, %v3802_v23  ;;  %v4993_v58 = vld [vmem:[#allocation4 + $0x52] sm:$0xff] }
 0x3e5   : > { %v11471_v8 = vpack.c.bf16 %v4994_v11, %v4993_v58  ;;  %v4055_v11 = vadd.f32 %v11200_v47, %v3803_v41 }
 0x3e6   : > { %4535 = vst.msk [vmem:[#allocation4 + $0x7b] sm:$0xff] %vm14731_vm6, %v4499_v17  ;;  %v4345_v59 = vmul.f32 %v11164_v20, %v4305_v56  ;;  %v4107_v17 = vld [vmem:[#allocation3 + $0x126] sm:$0xff]  ;;  %v14939_v56 = vld [vmem:[#allocation45_spill] sm:$0xff] }
 0x3e7   : > { %v4127_v23 = vpack.c.bf16 %v4108_v38, %v4107_v17  ;;  %v4572_v38 = vld [vmem:[#allocation4 + $0x68] sm:$0xff] }
 0x3e8   : > { %v11461_v2 = vadd.f32 %v11175_v39, %v4345_v59  ;;  %v4628_v59 = vld [vmem:[#allocation4 + $0x71] sm:$0xff] }
 0x3ea   : > { %14938 = vst [vmem:[#allocation42_spill] sm:$0xff] %v11461_v2  ;;  %v14631_v57 = vmax.f32 %v11461_v2, 0.0  ;;  %v11466_v45 = vpop.f32.mrf.mxu1 }
 0x3eb   : > { %v4238_v13 = vpop.f32.mrf.mxu2 }
 0x3ec   : > { %v4500_v37 = vmul.f32 %v14631_v57, %v14939_v56  ;;  %v4306_v55 = vadd.f32 %v4238_v13, %v4054_v5  ;;  %v11485_v5 = vpop.f32.mrf.mxu0  ;;  %v14941_v56 = vld [vmem:[#allocation48_spill] sm:$0xff] }
 0x3ed   : > { %v4629_v61 = vld [vmem:[#allocation4 + $0x79] sm:$0xff]  ;;  %8649 = vmatmul.msk.bf16.gmra.mxu1 %vm14731_vm6, %v11471_v8 }
 0x3ee   : > { %4536 = vst.msk [vmem:[#allocation4 + $0x83] sm:$0xff] %vm14731_vm6, %v4500_v37  ;;  %v4346_v31 = vmul.f32 %v11164_v20, %v4306_v55  ;;  %v4657_v34 = vpack.c.bf16 %v4629_v61, %v4628_v59  ;;  %v14942_v37 = vld [vmem:[#allocation112_spill] sm:$0xff] }
 0x3ef   : > { %v3552_v55 = vadd.f32 %v14942_v37, %v10895_v25  ;;  %v4571_v59 = vld [vmem:[#allocation4 + $0x60] sm:$0xff] }
 0x3f0   : > { %v11480_v18 = vadd.f32 %v11175_v39, %v4346_v31  ;;  %8604 = vmatmul.msk.bf16.gmra.mxu2 %vm1221_vm2, %v4127_v23  ;;  %v4996_v31 = vld [vmem:[#allocation4 + $0x6a] sm:$0xff] }
 0x3f1   : > { %8614 = vmatmul.msk.bf16.gmra.mxu3 %vm14731_vm6, %v4657_v34  ;;  %v4601_v34 = vpack.c.bf16 %v4572_v38, %v4571_v59  ;;  %v3804_v41 = vadd.f32 %v11141_v51, %v3552_v55  ;;  %v4109_v23 = vld [vmem:[#allocation3 + $0x136] sm:$0xff]  ;;  %v14944_v51 = vld [vmem:[#allocation51_spill] sm:$0xff] }
 0x3f2   : > { %14940 = vst [vmem:[#allocation45_spill] sm:$0xff] %v11480_v18  ;;  %v14632_v58 = vmax.f32 %v11480_v18, 0.0  ;;  %v11488_v13 = vpop.f32.mrf.mxu1 }
 0x3f3   : > { %v4241_v17 = vpop.f32.mrf.mxu2  ;;  %8631 = vmatmul.msk.bf16.gmra.mxu0 %vm14731_vm6, %v4601_v34  ;;  %v4056_v25 = vadd.f32 %v11228_v14, %v3804_v41  ;;  %v8662_v14 = vld [vmem:[%s14494_s12 + $0xc] sm:$0xf] }
 0x3f4   : > { %v4501_v15 = vmul.f32 %v14632_v58, %v14941_v56  ;;  %v4307_v50 = vadd.f32 %v4241_v17, %v4055_v11  ;;  %v4110_v56 = vld [vmem:[#allocation3 + $0x13e] sm:$0x3f]  ;;  %v11502_v11 = vpop.f32.mrf.mxu3  ;;  %v11508_v37 = vpop.f32.mrf.mxu0  ;;  %v5342_v58 = vsel %vm4724_vm5, %v8662_v14, 0 }
 0x3f5   : > { %v4128_v34 = vpack.c.bf16 %v4110_v56, %v4109_v23  ;;  %v4630_v41 = vld [vmem:[#allocation4 + $0x81] sm:$0xff]  ;;  %5351 = vmatpush.bf16.msrb.mxu2 %v5342_v58  ;;  %v14946_v58 = vld [vmem:[#allocation54_spill] sm:$0xff] }
 0x3f6   : > { %4537 = vst.msk [vmem:[#allocation4 + $0x8b] sm:$0xff] %vm14731_vm6, %v4501_v15  ;;  %v4347_v47 = vmul.f32 %v11164_v20, %v4307_v50  ;;  %v4995_v50 = vld [vmem:[#allocation4 + $0x62] sm:$0xff] }
 0x3f7   : > { %v11513_v59 = vpack.c.bf16 %v4996_v31, %v4995_v50  ;;  %v3805_v31 = vadd.f32 %v11181_v12, %v10909_v6  ;;  %v4575_v1 = vld [vmem:[#allocation4 + $0x80] sm:$0xff] }
 0x3f8   : > { %v11499_v61 = vadd.f32 %v11175_v39, %v4347_v47 }
 0x3f9   : > { %v4057_v56 = vadd.f32 %v11244_v30, %v3805_v31  ;;  %v4998_v31 = vld [vmem:[#allocation4 + $0x7a] sm:$0xff] }
 0x3fa   : > { %14943 = vst [vmem:[#allocation48_spill] sm:$0xff] %v11499_v61  ;;  %v14634_v17 = vmax.f32 %v11499_v61, 0.0  ;;  %v11506_v15 = vpop.f32.mrf.mxu1 }
 0x3fb   : > { %v4243_v38 = vpop.f32.mrf.mxu2 }
 0x3fc   : > { %v4502_v55 = vmul.f32 %v14634_v17, %v14944_v51  ;;  %v4308_v47 = vadd.f32 %v4243_v38, %v4056_v25  ;;  %v4737_v50 = vpop.f32.mrf.mxu3  ;;  %v14949_v17 = vld [vmem:[#allocation7_spill] sm:$0xff] }
 0x3fd   : > { %v4631_v57 = vld [vmem:[#allocation4 + $0x89] sm:$0xff]  ;;  %8650 = vmatmul.msk.bf16.gmra.mxu1 %vm14731_vm6, %v11513_v59 }
 0x3fe   : > { %4538 = vst.msk [vmem:[#allocation4 + $0x93] sm:$0xff] %vm14731_vm6, %v4502_v55  ;;  %v4348_v42 = vmul.f32 %v11164_v20, %v4308_v47  ;;  %v4658_v51 = vpack.c.bf16 %v4631_v57, %v4630_v41  ;;  %v4574_v57 = vld [vmem:[#allocation4 + $0x78] sm:$0xff] }
 0x400   : > { %v11526_v23 = vadd.f32 %v11175_v39, %v4348_v42  ;;  %8605 = vmatmul.msk.bf16.gmra.mxu2 %vm1221_vm2, %v4128_v34  ;;  %v3554_v42 = vadd.f32 %v10921_v52, %v10919_v53  ;;  %v11539_v47 = vpop.f32.mrf.mxu0  ;;  %v4573_v34 = vld [vmem:[#allocation4 + $0x70] sm:$0xff] }
 0x401   : > { %8615 = vmatmul.msk.bf16.gmra.mxu3 %vm14731_vm6, %v4658_v51  ;;  %v4602_v14 = vpack.c.bf16 %v4574_v57, %v4573_v34 }
 0x402   : > { %14945 = vst [vmem:[#allocation112_spill] sm:$0xff] %v11526_v23  ;;  %v14635_v25 = vmax.f32 %v11526_v23, 0.0  ;;  %v11532_v38 = vpop.f32.mrf.mxu1  ;;  %v3806_v41 = vadd.f32 %v11211_v32, %v3554_v42 }
 0x403   : > { %v4246_v55 = vpop.f32.mrf.mxu2  ;;  %8632 = vmatmul.msk.bf16.gmra.mxu0 %vm14731_vm6, %v4602_v14 }
 0x404   : > { %v4503_v6 = vmul.f32 %v14635_v25, %v14946_v58  ;;  %v4309_v12 = vadd.f32 %v4246_v55, %v4057_v56  ;;  %v4058_v56 = vadd.f32 %v11262_v28, %v3806_v41  ;;  %v4997_v55 = vld [vmem:[#allocation4 + $0x72] sm:$0xff]  ;;  %v3807_v25 = vadd.f32 %v14949_v17, %v10931_v16 }
 0x405   : > { %v11555_v32 = vpack.c.bf16 %v4998_v31, %v4997_v55  ;;  %v4632_v34 = vld [vmem:[#allocation4 + $0x91] sm:$0xff] }
 0x406   : > { %4539 = vst.msk [vmem:[#allocation4 + $0x9b] sm:$0xff] %vm14731_vm6, %v4503_v6  ;;  %v4349_v30 = vmul.f32 %v11164_v20, %v4309_v12  ;;  %v14948_v6 = vld [vmem:[#allocation57_spill] sm:$0xff]  ;;  %v4739_v12 = vpop.f32.mrf.mxu3  ;;  %v4059_v31 = vadd.f32 %v11278_v49, %v3807_v25 }
 0x408   : > { %v11545_v51 = vadd.f32 %v11175_v39, %v4349_v30  ;;  %v11557_v14 = vpop.f32.mrf.mxu0 }
 0x40a   : > { %14947 = vst [vmem:[#allocation51_spill] sm:$0xff] %v11545_v51  ;;  %v14636_v53 = vmax.f32 %v11545_v51, 0.0  ;;  %v11550_v52 = vpop.f32.mrf.mxu1  ;;  %v5988_v51 = vld [vmem:[#allocation4 + $0x8c] sm:$0xff] }
 0x40b   : > { %v4248_v58 = vpop.f32.mrf.mxu2 }
 0x40c   : > { %v4504_v57 = vmul.f32 %v14636_v53, %v14948_v6  ;;  %v4310_v42 = vadd.f32 %v4248_v58, %v4058_v56 }
 0x40d   : > { %v4633_v30 = vld [vmem:[#allocation4 + $0x99] sm:$0xff]  ;;  %8651 = vmatmul.msk.bf16.gmra.mxu1 %vm14731_vm6, %v11555_v32 }
 0x40e   : > { %4540 = vst.msk [vmem:[#allocation4 + $0xa3] sm:$0xff] %vm14731_vm6, %v4504_v57  ;;  %v4350_v28 = vmul.f32 %v11164_v20, %v4310_v42  ;;  %v4659_v41 = vpack.c.bf16 %v4633_v30, %v4632_v34  ;;  %v4576_v57 = vld [vmem:[#allocation4 + $0x88] sm:$0xff]  ;;  %v14951_v42 = vld [vmem:[#allocation60_spill] sm:$0xff] }
 0x40f   : > { %v14952_v30 = vld [vmem:[#allocation113_spill] sm:$0xff]  ;;  %v4603_v25 = vpack.c.bf16 %v4576_v57, %v4575_v1 }
 0x410   : > { %v11566_v6 = vadd.f32 %v11175_v39, %v4350_v28  ;;  %8663 = vmatmul.msk.bf16.vlgmr.msrb.gmra.mxu2 %vm14731_vm6, %v11317_v27  ;;  %v14953_v28 = vld [vmem:[#allocation114_spill] sm:$0xff]  ;;  %v4893_v53 = vpop.f32.mrf.mxu0 }
 0x411   : > { %8616 = vmatmul.msk.bf16.gmra.mxu3 %vm14731_vm6, %v4659_v41  ;;  %v3556_v41 = vadd.f32 %v14953_v28, %v14952_v30  ;;  %v4894_v27 = vadd.f32 %v4893_v53, %v4737_v50  ;;  %v4999_v28 = vld [vmem:[#allocation4 + $0x82] sm:$0xff] }
 0x412   : > { %14950 = vst [vmem:[#allocation54_spill] sm:$0xff] %v11566_v6  ;;  %v14640_v56 = vmax.f32 %v11566_v6, 0.0  ;;  %v11573_v55 = vpop.f32.mrf.mxu1 }
 0x413   : > { %v4251_v58 = vpop.f32.mrf.mxu2  ;;  %v3808_v60 = vadd.f32 %v11249_v3, %v3556_v41  ;;  %8633 = vmatmul.msk.bf16.gmra.mxu0 %vm14731_vm6, %v4603_v25 }
 0x414   : > { %v4505_v16 = vmul.f32 %v14640_v56, %v14951_v42  ;;  %v4311_v17 = vadd.f32 %v4251_v58, %v4059_v31  ;;  %v4742_v34 = vpop.f32.mrf.mxu3  ;;  %v5000_v31 = vld [vmem:[#allocation4 + $0x8a] sm:$0xff] }
 0x415   : > { %v4060_v58 = vadd.f32 %v11296_v9, %v3808_v60  ;;  %v11594_v3 = vpack.c.bf16 %v5000_v31, %v4999_v28 }
 0x416   : > { %4541 = vst.msk [vmem:[#allocation4 + $0xab] sm:$0xff] %vm14731_vm6, %v4505_v16  ;;  %v4351_v49 = vmul.f32 %v11164_v20, %v4311_v17  ;;  %v14955_v16 = vld [vmem:[#allocation63_spill] sm:$0xff]  ;;  %v4634_v17 = vld [vmem:[#allocation4 + $0xa1] sm:$0xff] }
 0x418   : > { %v11584_v10 = vadd.f32 %v11175_v39, %v4351_v49  ;;  %v4895_v49 = vpop.f32.mrf.mxu0 }
 0x419   : > { %v4896_v25 = vadd.f32 %v4895_v49, %v4739_v12 }
 0x41a   : > { %14954 = vst [vmem:[#allocation57_spill] sm:$0xff] %v11584_v10  ;;  %v14642_v42 = vmax.f32 %v11584_v10, 0.0  ;;  %v5105_v30 = vpop.f32.mrf.mxu1 }
 0x41b   : > { %v4253_v56 = vpop.f32.mrf.mxu2  ;;  %v11592_v1 = vadd.f32 %v5105_v30, %v4894_v27  ;;  %v3809_v27 = vadd.f32 %v11267_v63, %v14956_v21 }
 0x41c   : > { %v4506_v50 = vmul.f32 %v14642_v42, %v14955_v16  ;;  %v4312_v53 = vadd.f32 %v4253_v56, %v4060_v58  ;;  %v4744_v57 = vpop.f32.mrf.mxu3  ;;  %v4578_v16 = vld [vmem:[#allocation4 + $0x98] sm:$0xff] }
 0x41d   : > { %v4635_v41 = vld [vmem:[#allocation4 + $0xa9] sm:$0xff]  ;;  %8652 = vmatmul.msk.bf16.gmra.mxu1 %vm14731_vm6, %v11594_v3  ;;  %v4061_v56 = vadd.f32 %v11312_v26, %v3809_v27 }
 0x41e   : > { %4542 = vst.msk [vmem:[#allocation4 + $0xb3] sm:$0xff] %vm14731_vm6, %v4506_v50  ;;  %v4352_v9 = vmul.f32 %v11164_v20, %v4312_v53  ;;  %v4660_v60 = vpack.c.bf16 %v4635_v41, %v4634_v17  ;;  %v14958_v50 = vld [vmem:[#allocation66_spill] sm:$0xff]  ;;  %v14959_v17 = vld [vmem:[#allocation116_spill] sm:$0xff]  ;;  %v14960_v41 = vld [vmem:[#allocation117_spill] sm:$0xff] }
 0x41f   : > { %v3558_v49 = vadd.f32 %v14960_v41, %v14959_v17 }
 0x420   : > { %v11603_v31 = vadd.f32 %v11175_v39, %v4352_v9  ;;  %8664 = vmatmul.msk.bf16.gmra.mxu2 %vm14731_vm6, %v11354_v22  ;;  %v4898_v9 = vpop.f32.mrf.mxu0  ;;  %v4577_v22 = vld [vmem:[#allocation4 + $0x90] sm:$0xff] }
 0x421   : > { %8617 = vmatmul.msk.bf16.gmra.mxu3 %vm14731_vm6, %v4660_v60  ;;  %v4899_v60 = vadd.f32 %v4898_v9, %v4742_v34  ;;  %v4604_v27 = vpack.c.bf16 %v4578_v16, %v4577_v22  ;;  %v3810_v42 = vadd.f32 %v11283_v54, %v3558_v49 }
 0x422   : > { %14957 = vst [vmem:[#allocation7_spill] sm:$0xff] %v11603_v31  ;;  %v14644_v58 = vmax.f32 %v11603_v31, 0.0  ;;  %v5107_v30 = vpop.f32.mrf.mxu1 }
 0x423   : > { %v4256_v28 = vpop.f32.mrf.mxu2  ;;  %v11613_v63 = vadd.f32 %v5107_v30, %v4896_v25  ;;  %8634 = vmatmul.msk.bf16.gmra.mxu0 %vm14731_vm6, %v4604_v27  ;;  %v5002_v25 = vld [vmem:[#allocation4 + $0x9a] sm:$0xff]  ;;  %v14963_v27 = vld [vmem:[#allocation118_spill] sm:$0xff] }
 0x424   : > { %v4507_v12 = vmul.f32 %v14644_v58, %v14958_v50  ;;  %v4313_v21 = vadd.f32 %v4256_v28, %v4061_v56  ;;  %v4747_v53 = vpop.f32.mrf.mxu3  ;;  %v4062_v56 = vadd.f32 %v11333_v24, %v3810_v42  ;;  %v5001_v50 = vld [vmem:[#allocation4 + $0x92] sm:$0xff] }
 0x425   : > { %v11631_v54 = vpack.c.bf16 %v5002_v25, %v5001_v50  ;;  %v4636_v49 = vld [vmem:[#allocation4 + $0xb1] sm:$0xff] }
 0x426   : > { %4543 = vst.msk [vmem:[#allocation4 + $0xbb] sm:$0xff] %vm14731_vm6, %v4507_v12  ;;  %v4353_v26 = vmul.f32 %v11164_v20, %v4313_v21  ;;  %v14962_v12 = vld [vmem:[#allocation69_spill] sm:$0xff] }
 0x428   : > { %v11621_v2 = vadd.f32 %v11175_v39, %v4353_v26  ;;  %v4900_v22 = vpop.f32.mrf.mxu0 }
 0x429   : > { %v4901_v26 = vadd.f32 %v4900_v22, %v4744_v57 }
 0x42a   : > { %14961 = vst [vmem:[#allocation60_spill] sm:$0xff] %v11621_v2  ;;  %v14645_v30 = vmax.f32 %v11621_v2, 0.0  ;;  %v5110_v28 = vpop.f32.mrf.mxu1 }
 0x42b   : > { %v4258_v17 = vpop.f32.mrf.mxu2  ;;  %v11629_v16 = vadd.f32 %v5110_v28, %v4899_v60 }
 0x42c   : > { %v4508_v34 = vmul.f32 %v14645_v30, %v14962_v12  ;;  %v4314_v21 = vadd.f32 %v4258_v17, %v4062_v56  ;;  %v4749_v41 = vpop.f32.mrf.mxu3  ;;  %v14964_v12 = vld [vmem:[#allocation18_spill] sm:$0xff] }
 0x42d   : > { %v4637_v9 = vld [vmem:[#allocation4 + $0xb9] sm:$0xff]  ;;  %8653 = vmatmul.msk.bf16.gmra.mxu1 %vm14731_vm6, %v11631_v54  ;;  %v3811_v60 = vadd.f32 %v14964_v12, %v14963_v27 }
 0x42e   : > { %4544 = vst.msk [vmem:[#allocation4 + $0xc3] sm:$0xff] %vm14731_vm6, %v4508_v34  ;;  %v4354_v24 = vmul.f32 %v11164_v20, %v4314_v21  ;;  %v4661_v42 = vpack.c.bf16 %v4637_v9, %v4636_v49  ;;  %v4580_v34 = vld [vmem:[#allocation4 + $0xa8] sm:$0xff]  ;;  %v14966_v21 = vld [vmem:[#allocation72_spill] sm:$0xff] }
 0x42f   : > { %v4063_v56 = vadd.f32 %v11349_v29, %v3811_v60 }
 0x430   : > { %v11640_v25 = vadd.f32 %v11175_v39, %v4354_v24  ;;  %8665 = vmatmul.msk.bf16.gmra.mxu2 %vm14731_vm6, %v11393_v35  ;;  %v14967_v24 = vld [vmem:[#allocation119_spill] sm:$0xff]  ;;  %v4903_v12 = vpop.f32.mrf.mxu0  ;;  %v4579_v35 = vld [vmem:[#allocation4 + $0xa0] sm:$0xff] }
 0x431   : > { %8618 = vmatmul.msk.bf16.gmra.mxu3 %vm14731_vm6, %v4661_v42  ;;  %v14968_v42 = vld [vmem:[#allocation120_spill] sm:$0xff]  ;;  %v4904_v60 = vadd.f32 %v4903_v12, %v4747_v53  ;;  %v4605_v58 = vpack.c.bf16 %v4580_v34, %v4579_v35 }
 0x432   : > { %14965 = vst [vmem:[#allocation113_spill] sm:$0xff] %v11640_v25  ;;  %v14647_v28 = vmax.f32 %v11640_v25, 0.0  ;;  %v5112_v50 = vpop.f32.mrf.mxu1  ;;  %v3560_v27 = vadd.f32 %v14968_v42, %v14967_v24 }
 0x433   : > { %v4261_v17 = vpop.f32.mrf.mxu2  ;;  %v11650_v49 = vadd.f32 %v5112_v50, %v4901_v26  ;;  %8635 = vmatmul.msk.bf16.gmra.mxu0 %vm14731_vm6, %v4605_v58  ;;  %v5004_v26 = vld [vmem:[#allocation4 + $0xaa] sm:$0xff] }
 0x434   : > { %v4509_v57 = vmul.f32 %v14647_v28, %v14966_v21  ;;  %v4315_v9 = vadd.f32 %v4261_v17, %v4063_v56  ;;  %v4752_v22 = vpop.f32.mrf.mxu3  ;;  %v3812_v30 = vadd.f32 %v11319_v19, %v3560_v27  ;;  %v5003_v21 = vld [vmem:[#allocation4 + $0xa2] sm:$0xff] }
 0x435   : > { %v11668_v19 = vpack.c.bf16 %v5004_v26, %v5003_v21  ;;  %v4638_v27 = vld [vmem:[#allocation4 + $0xc1] sm:$0xff] }
 0x436   : > { %4545 = vst.msk [vmem:[#allocation4 + $0xcb] sm:$0xff] %vm14731_vm6, %v4509_v57  ;;  %v4355_v29 = vmul.f32 %v11164_v20, %v4315_v9  ;;  %v4064_v56 = vadd.f32 %v11371_v36, %v3812_v30  ;;  %v14970_v57 = vld [vmem:[#allocation75_spill] sm:$0xff] }
 0x438   : > { %v11658_v18 = vadd.f32 %v11175_v39, %v4355_v29  ;;  %v4905_v12 = vpop.f32.mrf.mxu0  ;;  %v14971_v29 = vld [vmem:[#allocation121_spill] sm:$0xff] }
 0x439   : > { %v4906_v35 = vadd.f32 %v4905_v12, %v4749_v41  ;;  %v14976_v12 = vld [vmem:[#allocation123_spill] sm:$0xff] }
 0x43a   : > { %14969 = vst [vmem:[#allocation114_spill] sm:$0xff] %v11658_v18  ;;  %v14648_v50 = vmax.f32 %v11658_v18, 0.0  ;;  %v5115_v17 = vpop.f32.mrf.mxu1 }
 0x43b   : > { %v4263_v24 = vpop.f32.mrf.mxu2  ;;  %v11666_v34 = vadd.f32 %v5115_v17, %v4904_v60 }
 0x43c   : > { %v4510_v53 = vmul.f32 %v14648_v50, %v14970_v57  ;;  %v4316_v9 = vadd.f32 %v4263_v24, %v4064_v56  ;;  %v4754_v42 = vpop.f32.mrf.mxu3  ;;  %v14972_v57 = vld [vmem:[#allocation24_spill] sm:$0xff] }
 0x43d   : > { %v4639_v58 = vld [vmem:[#allocation4 + $0xc9] sm:$0xff]  ;;  %8654 = vmatmul.msk.bf16.gmra.mxu1 %vm14731_vm6, %v11668_v19  ;;  %v3813_v60 = vadd.f32 %v14972_v57, %v14971_v29 }
 0x43e   : > { %4546 = vst.msk [vmem:[#allocation4 + $0xd3] sm:$0xff] %vm14731_vm6, %v4510_v53  ;;  %v4356_v36 = vmul.f32 %v11164_v20, %v4316_v9  ;;  %v4662_v30 = vpack.c.bf16 %v4639_v58, %v4638_v27  ;;  %v4582_v20 = vld [vmem:[#allocation4 + $0xb8] sm:$0xff]  ;;  %v14974_v53 = vld [vmem:[#allocation78_spill] sm:$0xff] }
 0x43f   : > { %v4065_v56 = vadd.f32 %v11388_v48, %v3813_v60  ;;  %v14975_v58 = vld [vmem:[#allocation122_spill] sm:$0xff] }
 0x440   : > { %v11677_v26 = vadd.f32 %v11175_v39, %v4356_v36  ;;  %8666 = vmatmul.msk.bf16.gmra.mxu2 %vm14731_vm6, %v11431_v0  ;;  %v3562_v36 = vadd.f32 %v14976_v12, %v14975_v58  ;;  %v4581_v0 = vld [vmem:[#allocation4 + $0xb0] sm:$0xff]  ;;  %v14978_v58 = vld [vmem:[#allocation81_spill] sm:$0xff] }
 0x441   : > { %8619 = vmatmul.msk.bf16.gmra.mxu3 %vm14731_vm6, %v4662_v30  ;;  %v4908_v30 = vpop.f32.mrf.mxu0  ;;  %v11695_v48 = vld [vmem:[%s14492_s10] ss:$0 sm:$0xff]  ;;  %v4606_v60 = vpack.c.bf16 %v4582_v20, %v4581_v0 }
 0x442   : > { %14973 = vst [vmem:[#allocation63_spill] sm:$0xff] %v11677_v26  ;;  %v14649_v17 = vmax.f32 %v11677_v26, 0.0  ;;  %v5117_v21 = vpop.f32.mrf.mxu1  ;;  %v4909_v57 = vadd.f32 %v4908_v30, %v4752_v22  ;;  %v5005_v22 = vld [vmem:[#allocation4 + $0xb2] sm:$0xff] }
 0x443   : > { %v4266_v24 = vpop.f32.mrf.mxu2  ;;  %v11687_v9 = vadd.f32 %v5117_v21, %v4906_v35  ;;  %v3814_v35 = vadd.f32 %v11365_v62, %v3562_v36  ;;  %8636 = vmatmul.msk.bf16.gmra.mxu0 %vm14731_vm6, %v4606_v60 }
 0x444   : > { %v4511_v41 = vmul.f32 %v14649_v17, %v14974_v53  ;;  %v4317_v39 = vadd.f32 %v4266_v24, %v4065_v56  ;;  %v4757_v27 = vpop.f32.mrf.mxu3  ;;  %v11702_v56 = vld [vmem:[%s14493_s11] ss:$0 sm:$0xff]  ;;  %v5006_v24 = vld [vmem:[#allocation4 + $0xba] sm:$0xff] }
 0x445   : > { %v4066_v53 = vadd.f32 %v11408_v46, %v3814_v35  ;;  %v11715_v36 = vpack.c.bf16 %v5006_v24, %v5005_v22  ;;  %v14979_v17 = vld [vmem:[#allocation124_spill] sm:$0xff] }
 0x446   : > { %4547 = vst.msk [vmem:[#allocation4 + $0xdb] sm:$0xff] %vm14731_vm6, %v4511_v41  ;;  %v4357_v29 = vmul.f32 %v11695_v48, %v4317_v39 }
 0x448   : > { %v11705_v21 = vadd.f32 %v11702_v56, %v4357_v29  ;;  %v4640_v29 = vld [vmem:[#allocation4 + $0xd1] sm:$0xff] }
 0x449   : > { %v4910_v28 = vpop.f32.mrf.mxu0 }
 0x44a   : > { %14977 = vst [vmem:[#allocation115_spill] sm:$0xff] %v11705_v21  ;;  %v14650_v41 = vmax.f32 %v11705_v21, 0.0  ;;  %v5120_v39 = vpop.f32.mrf.mxu1  ;;  %v4911_v50 = vadd.f32 %v4910_v28, %v4754_v42 }
 0x44b   : > { %v4268_v20 = vpop.f32.mrf.mxu2  ;;  %v11713_v12 = vadd.f32 %v5120_v39, %v4909_v57  ;;  %v3815_v57 = vadd.f32 %v11386_v43, %v14979_v17 }
 0x44c   : > { %v4512_v62 = vmul.f32 %v14650_v41, %v14978_v58  ;;  %v4318_v30 = vadd.f32 %v4268_v20, %v4066_v53  ;;  %v4759_v0 = vpop.f32.mrf.mxu3  ;;  %v4584_v58 = vld [vmem:[#allocation4 + $0xc8] sm:$0xff] }
 0x44d   : > { %v4641_v60 = vld [vmem:[#allocation4 + $0xd9] sm:$0xff]  ;;  %8655 = vmatmul.msk.bf16.gmra.mxu1 %vm14731_vm6, %v11715_v36  ;;  %v4067_v53 = vadd.f32 %v11426_v4, %v3815_v57 }
 0x44e   : > { %4548 = vst.msk [vmem:[#allocation4 + $0xe3] sm:$0xff] %vm14731_vm6, %v4512_v62  ;;  %v4358_v46 = vmul.f32 %v11695_v48, %v4318_v30  ;;  %v4663_v35 = vpack.c.bf16 %v4641_v60, %v4640_v29  ;;  %v14981_v62 = vld [vmem:[#allocation84_spill] sm:$0xff]  ;;  %v14982_v30 = vld [vmem:[#allocation125_spill] sm:$0xff]  ;;  %v14983_v29 = vld [vmem:[#allocation126_spill] sm:$0xff] }
 0x44f   : > { %v3564_v60 = vadd.f32 %v14983_v29, %v14982_v30 }
 0x450   : > { %v11724_v24 = vadd.f32 %v11702_v56, %v4358_v46  ;;  %8667 = vmatmul.msk.bf16.gmra.mxu2 %vm14731_vm6, %v11471_v8  ;;  %v4583_v8 = vld [vmem:[#allocation4 + $0xc0] sm:$0xff] }
 0x451   : > { %8620 = vmatmul.msk.bf16.gmra.mxu3 %vm14731_vm6, %v4663_v35  ;;  %v4913_v46 = vpop.f32.mrf.mxu0  ;;  %v4607_v57 = vpack.c.bf16 %v4584_v58, %v4583_v8  ;;  %v3816_v41 = vadd.f32 %v11413_v7, %v3564_v60 }
 0x452   : > { %14980 = vst [vmem:[#allocation66_spill] sm:$0xff] %v11724_v24  ;;  %v14652_v39 = vmax.f32 %v11724_v24, 0.0  ;;  %v5122_v22 = vpop.f32.mrf.mxu1  ;;  %v4914_v35 = vadd.f32 %v4913_v46, %v4757_v27 }
 0x453   : > { %v4271_v20 = vpop.f32.mrf.mxu2  ;;  %v11734_v43 = vadd.f32 %v5122_v22, %v4911_v50  ;;  %8637 = vmatmul.msk.bf16.gmra.mxu0 %vm14731_vm6, %v4607_v57  ;;  %v5008_v50 = vld [vmem:[#allocation4 + $0xca] sm:$0xff]  ;;  %v14985_v57 = vld [vmem:[#allocation127_spill] sm:$0xff] }
 0x454   : > { %v4513_v28 = vmul.f32 %v14652_v39, %v14981_v62  ;;  %v4319_v42 = vadd.f32 %v4271_v20, %v4067_v53  ;;  %v4762_v17 = vpop.f32.mrf.mxu3  ;;  %v4068_v53 = vadd.f32 %v11448_v44, %v3816_v41  ;;  %v5007_v62 = vld [vmem:[#allocation4 + $0xc2] sm:$0xff] }
 0x455   : > { %v11752_v7 = vpack.c.bf16 %v5008_v50, %v5007_v62  ;;  %v4642_v60 = vld [vmem:[#allocation4 + $0xe1] sm:$0xff] }
 0x456   : > { %4549 = vst.msk [vmem:[#allocation4 + $0xeb] sm:$0xff] %vm14731_vm6, %v4513_v28  ;;  %v4359_v4 = vmul.f32 %v11695_v48, %v4319_v42  ;;  %v14984_v28 = vld [vmem:[#allocation87_spill] sm:$0xff] }
 0x458   : > { %v11742_v61 = vadd.f32 %v11702_v56, %v4359_v4 }
 0x459   : > { %v4915_v8 = vpop.f32.mrf.mxu0 }
 0x45a   : > { %v14653_v22 = vmax.f32 %v11742_v61, 0.0  ;;  %v5125_v20 = vpop.f32.mrf.mxu1  ;;  %v4916_v4 = vadd.f32 %v4915_v8, %v4759_v0  ;;  %v14988_v8 = vld [vmem:[#allocation129_spill] sm:$0xff] }
 0x45b   : > { %v4273_v30 = vpop.f32.mrf.mxu2  ;;  %v11750_v58 = vadd.f32 %v5125_v20, %v4914_v35  ;;  %v3817_v35 = vadd.f32 %v11434_v40, %v14985_v57 }
 0x45c   : > { %v4514_v27 = vmul.f32 %v14653_v22, %v14984_v28  ;;  %v4320_v42 = vadd.f32 %v4273_v30, %v4068_v53  ;;  %v4764_v29 = vpop.f32.mrf.mxu3  ;;  %v4586_v28 = vld [vmem:[#allocation4 + $0xd8] sm:$0xff] }
 0x45d   : > { %v4643_v46 = vld [vmem:[#allocation4 + $0xe9] sm:$0xff]  ;;  %8656 = vmatmul.msk.bf16.gmra.mxu1 %vm14731_vm6, %v11752_v7  ;;  %v4069_v53 = vadd.f32 %v11466_v45, %v3817_v35 }
 0x45e   : > { %4550 = vst.msk [vmem:[#allocation4 + $0xf3] sm:$0xff] %vm14731_vm6, %v4514_v27  ;;  %v4360_v44 = vmul.f32 %v11695_v48, %v4320_v42  ;;  %v4664_v41 = vpack.c.bf16 %v4643_v46, %v4642_v60  ;;  %v14986_v27 = vld [vmem:[#allocation90_spill] sm:$0xff]  ;;  %v14987_v46 = vld [vmem:[#allocation128_spill] sm:$0xff] }
 0x460   : > { %v11761_v50 = vadd.f32 %v11702_v56, %v4360_v44  ;;  %8668 = vmatmul.msk.bf16.gmra.mxu2 %vm14731_vm6, %v11513_v59  ;;  %v3566_v44 = vadd.f32 %v14988_v8, %v14987_v46  ;;  %v4585_v59 = vld [vmem:[#allocation4 + $0xd0] sm:$0xff] }
 0x461   : > { %8621 = vmatmul.msk.bf16.gmra.mxu3 %vm14731_vm6, %v4664_v41  ;;  %v4918_v41 = vpop.f32.mrf.mxu0  ;;  %v4608_v35 = vpack.c.bf16 %v4586_v28, %v4585_v59 }
 0x462   : > { %v14654_v20 = vmax.f32 %v11761_v50, 0.0  ;;  %v5127_v62 = vpop.f32.mrf.mxu1  ;;  %v4919_v57 = vadd.f32 %v4918_v41, %v4762_v17  ;;  %v3818_v39 = vadd.f32 %v11458_v33, %v3566_v44 }
 0x463   : > { %v4276_v30 = vpop.f32.mrf.mxu2  ;;  %v11771_v40 = vadd.f32 %v5127_v62, %v4916_v4  ;;  %8638 = vmatmul.msk.bf16.gmra.mxu0 %vm14731_vm6, %v4608_v35  ;;  %v5010_v4 = vld [vmem:[#allocation4 + $0xda] sm:$0xff]  ;;  %v14990_v35 = vld [vmem:[#allocation130_spill] sm:$0xff] }
 0x464   : > { %v4515_v0 = vmul.f32 %v14654_v20, %v14986_v27  ;;  %v4321_v42 = vadd.f32 %v4276_v30, %v4069_v53  ;;  %v4767_v60 = vpop.f32.mrf.mxu3  ;;  %v4070_v53 = vadd.f32 %v11488_v13, %v3818_v39  ;;  %v5009_v27 = vld [vmem:[#allocation4 + $0xd2] sm:$0xff] }
 0x465   : > { %v11789_v33 = vpack.c.bf16 %v5010_v4, %v5009_v27  ;;  %v4644_v44 = vld [vmem:[#allocation4 + $0xf1] sm:$0xff] }
 0x466   : > { %4551 = vst.msk [vmem:[#allocation4 + $0xfb] sm:$0xff] %vm14731_vm6, %v4515_v0  ;;  %v4361_v45 = vmul.f32 %v11695_v48, %v4321_v42  ;;  %v14989_v0 = vld [vmem:[#allocation93_spill] sm:$0xff] }
 0x468   : > { %v11779_v22 = vadd.f32 %v11702_v56, %v4361_v45 }
 0x469   : > { %v4920_v59 = vpop.f32.mrf.mxu0 }
 0x46a   : > { %v14655_v62 = vmax.f32 %v11779_v22, 0.0  ;;  %v5130_v30 = vpop.f32.mrf.mxu1  ;;  %v4921_v45 = vadd.f32 %v4920_v59, %v4764_v29  ;;  %v14993_v59 = vld [vmem:[#allocation132_spill] sm:$0xff] }
 0x46b   : > { %v4278_v46 = vpop.f32.mrf.mxu2  ;;  %v11787_v28 = vadd.f32 %v5130_v30, %v4919_v57  ;;  %v3819_v57 = vadd.f32 %v11485_v5, %v14990_v35 }
 0x46c   : > { %v4516_v17 = vmul.f32 %v14655_v62, %v14989_v0  ;;  %v4322_v42 = vadd.f32 %v4278_v46, %v4070_v53  ;;  %v4769_v8 = vpop.f32.mrf.mxu3  ;;  %v4588_v0 = vld [vmem:[#allocation4 + $0xe8] sm:$0xff] }
 0x46d   : > { %v4645_v41 = vld [vmem:[#allocation4 + $0xf9] sm:$0xff]  ;;  %8657 = vmatmul.msk.bf16.gmra.mxu1 %vm14731_vm6, %v11789_v33  ;;  %v4071_v53 = vadd.f32 %v11506_v15, %v3819_v57 }
 0x46e   : > { %4552 = vst.msk [vmem:[#allocation4 + $0x103] sm:$0xff] %vm14731_vm6, %v4516_v17  ;;  %v4362_v13 = vmul.f32 %v11695_v48, %v4322_v42  ;;  %v4665_v39 = vpack.c.bf16 %v4645_v41, %v4644_v44  ;;  %v14991_v17 = vld [vmem:[#allocation96_spill] sm:$0xff]  ;;  %v14992_v41 = vld [vmem:[#allocation131_spill] sm:$0xff] }
 0x470   : > { %v11798_v4 = vadd.f32 %v11702_v56, %v4362_v13  ;;  %8669 = vmatmul.msk.bf16.gmra.mxu2 %vm14731_vm6, %v11555_v32  ;;  %v3568_v13 = vadd.f32 %v14993_v59, %v14992_v41  ;;  %v4587_v32 = vld [vmem:[#allocation4 + $0xe0] sm:$0xff] }
 0x471   : > { %8622 = vmatmul.msk.bf16.gmra.mxu3 %vm14731_vm6, %v4665_v39  ;;  %v4923_v39 = vpop.f32.mrf.mxu0  ;;  %v4609_v57 = vpack.c.bf16 %v4588_v0, %v4587_v32 }
 0x472   : > { %v14660_v30 = vmax.f32 %v11798_v4, 0.0  ;;  %v5132_v27 = vpop.f32.mrf.mxu1  ;;  %v4924_v35 = vadd.f32 %v4923_v39, %v4767_v60  ;;  %v3820_v20 = vadd.f32 %v11508_v37, %v3568_v13 }
 0x473   : > { %v4281_v46 = vpop.f32.mrf.mxu2  ;;  %v11808_v5 = vadd.f32 %v5132_v27, %v4921_v45  ;;  %8639 = vmatmul.msk.bf16.gmra.mxu0 %vm14731_vm6, %v4609_v57  ;;  %v5012_v45 = vld [vmem:[#allocation4 + $0xea] sm:$0xff] }
 0x474   : > { %v4517_v29 = vmul.f32 %v14660_v30, %v14991_v17  ;;  %v4323_v42 = vadd.f32 %v4281_v46, %v4071_v53  ;;  %v4772_v44 = vpop.f32.mrf.mxu3  ;;  %v4072_v53 = vadd.f32 %v11532_v38, %v3820_v20  ;;  %v5011_v17 = vld [vmem:[#allocation4 + $0xe2] sm:$0xff] }
 0x475   : > { %v11826_v37 = vpack.c.bf16 %v5012_v45, %v5011_v17  ;;  %v4646_v13 = vld [vmem:[#allocation4 + $0x101] sm:$0xff] }
 0x476   : > { %4553 = vst.msk [vmem:[#allocation4 + $0x10b] sm:$0xff] %vm14731_vm6, %v4517_v29  ;;  %v4363_v15 = vmul.f32 %v11695_v48, %v4323_v42  ;;  %v14995_v29 = vld [vmem:[#allocation99_spill] sm:$0xff]  ;;  %v14996_v57 = vld [vmem:[#allocation133_spill] sm:$0xff] }
 0x477   : > { %v3821_v45 = vadd.f32 %v11539_v47, %v14996_v57 }
 0x478   : > { %v11816_v62 = vadd.f32 %v11702_v56, %v4363_v15 }
 0x479   : > { %v4925_v32 = vpop.f32.mrf.mxu0 }
 0x47a   : > { %14994 = vst [vmem:[#allocation116_spill] sm:$0xff] %v11816_v62  ;;  %v14656_v27 = vmax.f32 %v11816_v62, 0.0  ;;  %v5135_v46 = vpop.f32.mrf.mxu1  ;;  %v4926_v15 = vadd.f32 %v4925_v32, %v4769_v8  ;;  %v4073_v8 = vadd.f32 %v11550_v52, %v3821_v45 }
 0x47b   : > { %v4283_v41 = vpop.f32.mrf.mxu2  ;;  %v11824_v0 = vadd.f32 %v5135_v46, %v4924_v35  ;;  %v8681_v35 = vld [vmem:[%s14494_s12 + $0x10] sm:$0xf] }
 0x47c   : > { %v4518_v60 = vmul.f32 %v14656_v27, %v14995_v29  ;;  %v4324_v42 = vadd.f32 %v4283_v41, %v4072_v53  ;;  %v4774_v59 = vpop.f32.mrf.mxu3  ;;  %v5590_v46 = vsel %vm4724_vm5, %v8681_v35, 0  ;;  %v4589_v35 = vld [vmem:[#allocation4 + $0xf0] sm:$0xff] }
 0x47d   : > { %v4647_v39 = vld [vmem:[#allocation4 + $0x109] sm:$0xff]  ;;  %8658 = vmatmul.msk.bf16.gmra.mxu1 %vm14731_vm6, %v11826_v37  ;;  %5599 = vmatpush.bf16.msrb.mxu3 %v5590_v46 }
 0x47e   : > { %4554 = vst.msk [vmem:[#allocation4 + $0x113] sm:$0xff] %vm14731_vm6, %v4518_v60  ;;  %v4364_v38 = vmul.f32 %v11695_v48, %v4324_v42  ;;  %v4666_v20 = vpack.c.bf16 %v4647_v39, %v4646_v13  ;;  %v4590_v60 = vld [vmem:[#allocation4 + $0xf8] sm:$0xff]  ;;  %v14998_v42 = vld [vmem:[#allocation102_spill] sm:$0xff] }
 0x47f   : > { %v4610_v45 = vpack.c.bf16 %v4590_v60, %v4589_v35 }
 0x480   : > { %v11838_v53 = vadd.f32 %v11702_v56, %v4364_v38  ;;  %8670 = vmatmul.msk.bf16.gmra.mxu2 %vm14731_vm6, %v11594_v3  ;;  %v14999_v38 = vld [vmem:[#allocation134_spill] sm:$0xff] }
 0x481   : > { %8623 = vmatmul.msk.bf16.gmra.mxu3 %vm14731_vm6, %v4666_v20  ;;  %v3570_v3 = vadd.f32 %v11502_v11, %v14999_v38  ;;  %v4928_v20 = vpop.f32.mrf.mxu0 }
 0x482   : > { %14997 = vst [vmem:[#allocation117_spill] sm:$0xff] %v11838_v53  ;;  %v14657_v17 = vmax.f32 %v11838_v53, 0.0  ;;  %v5137_v41 = vpop.f32.mrf.mxu1  ;;  %v4929_v57 = vadd.f32 %v4928_v20, %v4772_v44 }
 0x483   : > { %v4286_v29 = vpop.f32.mrf.mxu2  ;;  %v11849_v13 = vadd.f32 %v5137_v41, %v4926_v15  ;;  %v3822_v46 = vadd.f32 %v11557_v14, %v3570_v3  ;;  %8640 = vmatmul.msk.bf16.gmra.mxu0 %vm14731_vm6, %v4610_v45  ;;  %v5014_v15 = vld [vmem:[#allocation4 + $0xfa] sm:$0xff] }
 0x484   : > { %v4519_v47 = vmul.f32 %v14657_v17, %v14998_v42  ;;  %v4325_v39 = vadd.f32 %v4286_v29, %v4073_v8  ;;  %v4777_v32 = vpop.f32.mrf.mxu3  ;;  %v5013_v29 = vld [vmem:[#allocation4 + $0xf2] sm:$0xff] }
 0x485   : > { %v4074_v8 = vadd.f32 %v11573_v55, %v3822_v46  ;;  %v11867_v14 = vpack.c.bf16 %v5014_v15, %v5013_v29  ;;  %v4648_v3 = vld [vmem:[#allocation4 + $0x111] sm:$0xff]  ;;  %v15003_v29 = vld [vmem:[#allocation108_spill] sm:$0xff] }
 0x486   : > { %4555 = vst.msk [vmem:[#allocation4 + $0x11b] sm:$0xff] %vm14731_vm6, %v4519_v47  ;;  %v4365_v52 = vmul.f32 %v11695_v48, %v4325_v39  ;;  %v15001_v47 = vld [vmem:[#allocation105_spill] sm:$0xff]  ;;  %v5479_v17 = vld [vmem:[#allocation4 + $0x13] sm:$0xff] }
 0x488   : > { %v11857_v27 = vadd.f32 %v11702_v56, %v4365_v52 }
 0x489   : > { %v4930_v35 = vpop.f32.mrf.mxu0 }
 0x48a   : > { %15000 = vst [vmem:[#allocation69_spill] sm:$0xff] %v11857_v27  ;;  %v14658_v11 = vmax.f32 %v11857_v27, 0.0  ;;  %v5140_v41 = vpop.f32.mrf.mxu1  ;;  %v4931_v45 = vadd.f32 %v4930_v35, %v4774_v59  ;;  %v5016_v35 = vld [vmem:[#allocation4 + $0x10a] sm:$0xff] }
 0x48b   : > { %v4288_v42 = vpop.f32.mrf.mxu2  ;;  %v11865_v60 = vadd.f32 %v5140_v41, %v4929_v57  ;;  %v4592_v41 = vld [vmem:[#allocation4 + $0x108] sm:$0xff] }
 0x48c   : > { %v4520_v44 = vmul.f32 %v14658_v11, %v15001_v47  ;;  %v4326_v39 = vadd.f32 %v4288_v42, %v4074_v8  ;;  %v4779_v38 = vpop.f32.mrf.mxu3 }
 0x48d   : > { %v4649_v20 = vld [vmem:[#allocation4 + $0x119] sm:$0x3f]  ;;  %8659 = vmatmul.msk.bf16.gmra.mxu1 %vm14731_vm6, %v11867_v14 }
 0x48e   : > { %4556 = vst.msk [vmem:[#allocation4 + $0x123] sm:$0xff] %vm14731_vm6, %v4520_v44  ;;  %v4366_v55 = vmul.f32 %v11695_v48, %v4326_v39  ;;  %v4667_v52 = vpack.c.bf16 %v4649_v20, %v4648_v3  ;;  %v4591_v39 = vld [vmem:[#allocation4 + $0x100] sm:$0xff] }
 0x48f   : > { %v4611_v20 = vpack.c.bf16 %v4592_v41, %v4591_v39 }
 0x490   : > { %v11874_v46 = vadd.f32 %v11702_v56, %v4366_v55  ;;  %8671 = vmatmul.msk.bf16.gmra.mxu2 %vm14731_vm6, %v11631_v54  ;;  %v8700_v54 = vld [vmem:[%s14494_s12 + $0x14] sm:$0xf] }
 0x491   : > { %8624 = vmatmul.msk.bf16.gmra.mxu3 %vm14731_vm6, %v4667_v52  ;;  %v5838_v47 = vsel %vm4724_vm5, %v8700_v54, 0  ;;  %v4933_v44 = vpop.f32.mrf.mxu0  ;;  %v5015_v52 = vld [vmem:[#allocation4 + $0x102] sm:$0xff] }
 0x492   : > { %15002 = vst [vmem:[#allocation118_spill] sm:$0xff] %v11874_v46  ;;  %v14659_v57 = vmax.f32 %v11874_v46, 0.0  ;;  %v5142_v15 = vpop.f32.mrf.mxu1  ;;  %5847 = vmatpush.bf16.msra.mxu0 %v5838_v47  ;;  %v4934_v3 = vadd.f32 %v4933_v44, %v4777_v32  ;;  %v8719_v47 = vld [vmem:[%s14494_s12 + $0x18] sm:$0xf] }
 0x493   : > { %v5353_v8 = vpop.f32.mrf.mxu2  ;;  %v11883_v42 = vadd.f32 %v5142_v15, %v4931_v45  ;;  %8641 = vmatmul.msk.bf16.gmra.mxu0 %vm14731_vm6, %v4611_v20  ;;  %v6086_v44 = vsel %vm4724_vm5, %v8719_v47, 0  ;;  %v5482_v47 = vld [vmem:[#allocation4 + $0x2b] sm:$0xff] }
 0x494   : > { %v4521_v48 = vmul.f32 %v14659_v57, %v15003_v29  ;;  %v4782_v59 = vpop.f32.mrf.mxu3  ;;  %v11886_v56 = vadd.f32 %v5353_v8, %v11592_v1  ;;  %v5480_v1 = vld [vmem:[#allocation4 + $0x1b] sm:$0xff]  ;;  %v11895_v8 = vpack.c.bf16 %v5016_v35, %v5015_v52  ;;  %6095 = vmatpush.bf16.msra.mxu1 %v6086_v44 }
 0x495   : > { %v5515_v32 = vpack.c.bf16 %v5480_v1, %v5479_v17 }
 0x496   : > { %4558 = vst.msk [vmem:[#allocation4 + $0x12b] sm:$0x3f] %vm4557_vm8, %v4521_v48 }
 0x499   : > { %v4935_v48 = vpop.f32.mrf.mxu0 }
 0x49a   : > { %v5145_v55 = vpop.f32.mrf.mxu1  ;;  %v4936_v41 = vadd.f32 %v4935_v48, %v4779_v38  ;;  %v11915_v48 = vld [vmem:[#allocation4 + $0x112] sm:$0xff] }
 0x49b   : > { %v5355_v45 = vpop.f32.mrf.mxu2  ;;  %v11893_v15 = vadd.f32 %v5145_v55, %v4934_v3  ;;  %v4594_v3 = vld [vmem:[#allocation4 + $0x118] sm:$0x3f]  ;;  %v4593_v55 = vld [vmem:[#allocation4 + $0x110] sm:$0xff] }
 0x49c   : > { %v4784_v29 = vpop.f32.mrf.mxu3  ;;  %v11898_v54 = vadd.f32 %v5355_v45, %v11613_v63  ;;  %v4612_v45 = vpack.c.bf16 %v4594_v3, %v4593_v55 }
 0x49d   : > { %8660 = vmatmul.msk.bf16.gmra.mxu1 %vm14731_vm6, %v11895_v8  ;;  %v5762_v21 = vld [vmem:[#allocation4 + $0x12c] sm:$0x3f] }
 0x4a0   : > { %8672 = vmatmul.msk.bf16.gmra.mxu2 %vm14731_vm6, %v11668_v19  ;;  %v5018_v19 = vld [vmem:[#allocation4 + $0x11a] sm:$0x3f] }
 0x4a1   : > { %8682 = vmatmul.msk.bf16.vlgmr.msrb.gmra.mxu3 %vm14731_vm6, %v5515_v32  ;;  %v4938_v38 = vpop.f32.mrf.mxu0 }
 0x4a2   : > { %v5147_v63 = vpop.f32.mrf.mxu1  ;;  %v4939_v52 = vadd.f32 %v4938_v38, %v4782_v59 }
 0x4a3   : > { %v5358_v39 = vpop.f32.mrf.mxu2  ;;  %v11909_v20 = vadd.f32 %v5147_v63, %v4936_v41  ;;  %8642 = vmatmul.msk.bf16.gmra.mxu0 %vm14731_vm6, %v4612_v45  ;;  %v5036_v41 = vpack.c.bf16 %v5018_v19, %v11915_v48 }
 0x4a4   : > { %v4787_v35 = vpop.f32.mrf.mxu3  ;;  %v11912_v17 = vadd.f32 %v5358_v39, %v11629_v16  ;;  %v5481_v39 = vld [vmem:[#allocation4 + $0x23] sm:$0xff] }
 0x4a5   : > { %v5516_v59 = vpack.c.bf16 %v5482_v47, %v5481_v39  ;;  %v5484_v39 = vld [vmem:[#allocation4 + $0x3b] sm:$0xff] }
 0x4a9   : > { %v4940_v11 = vpop.f32.mrf.mxu0 }
 0x4aa   : > { %v5150_v1 = vpop.f32.mrf.mxu1  ;;  %v4941_v3 = vadd.f32 %v4940_v11, %v4784_v29  ;;  %v5976_v11 = vld [vmem:[#allocation4 + $0x2c] sm:$0xff] }
 0x4ab   : > { %v5360_v32 = vpop.f32.mrf.mxu2  ;;  %v11917_v44 = vadd.f32 %v5150_v1, %v4939_v52  ;;  %v5728_v52 = vld [vmem:[#allocation4 + $0x1c] sm:$0xff] }
 0x4ac   : > { %v4789_v63 = vpop.f32.mrf.mxu3  ;;  %v11921_v16 = vadd.f32 %v5360_v32, %v11650_v49  ;;  %v5727_v32 = vld [vmem:[#allocation4 + $0x14] sm:$0xff] }
 0x4ad   : > { %8661 = vmatmul.msk.bf16.gmra.mxu1 %vm14731_vm6, %v5036_v41  ;;  %v5763_v41 = vpack.c.bf16 %v5728_v52, %v5727_v32 }
 0x4b0   : > { %8673 = vmatmul.msk.bf16.gmra.mxu2 %vm14731_vm6, %v11715_v36  ;;  %v5975_v36 = vld [vmem:[#allocation4 + $0x24] sm:$0xff] }
 0x4b1   : > { %8683 = vmatmul.msk.bf16.gmra.mxu3 %vm14731_vm6, %v5516_v59  ;;  %v4943_v1 = vpop.f32.mrf.mxu0  ;;  %v6011_v30 = vpack.c.bf16 %v5976_v11, %v5975_v36  ;;  %v5978_v36 = vld [vmem:[#allocation4 + $0x3c] sm:$0xff] }
 0x4b2   : > { %v5152_v38 = vpop.f32.mrf.mxu1  ;;  %v4944_v57 = vadd.f32 %v4943_v1, %v4787_v35 }
 0x4b3   : > { %v5363_v55 = vpop.f32.mrf.mxu2  ;;  %v11927_v45 = vadd.f32 %v5152_v38, %v4941_v3  ;;  %8701 = vmatmul.msk.bf16.vlgmr.msra.gmra.mxu0 %vm14731_vm6, %v5763_v41 }
 0x4b4   : > { %v4792_v19 = vpop.f32.mrf.mxu3  ;;  %v11930_v49 = vadd.f32 %v5363_v55, %v11666_v34  ;;  %v5483_v34 = vld [vmem:[#allocation4 + $0x33] sm:$0xff] }
 0x4b5   : > { %v5517_v35 = vpack.c.bf16 %v5484_v39, %v5483_v34  ;;  %v5486_v34 = vld [vmem:[#allocation4 + $0x4b] sm:$0xff] }
 0x4b9   : > { %v4945_v55 = vpop.f32.mrf.mxu0 }
 0x4ba   : > { %v5155_v29 = vpop.f32.mrf.mxu1  ;;  %v4946_v52 = vadd.f32 %v4945_v55, %v4789_v63  ;;  %v5977_v63 = vld [vmem:[#allocation4 + $0x34] sm:$0xff] }
 0x4bb   : > { %v5365_v47 = vpop.f32.mrf.mxu2  ;;  %v11933_v59 = vadd.f32 %v5155_v29, %v4944_v57  ;;  %v6012_v55 = vpack.c.bf16 %v5978_v36, %v5977_v63  ;;  %v5980_v63 = vld [vmem:[#allocation4 + $0x4c] sm:$0xff] }
 0x4bc   : > { %v4794_v3 = vpop.f32.mrf.mxu3  ;;  %v11936_v38 = vadd.f32 %v5365_v47, %v11687_v9 }
 0x4bd   : > { %8720 = vmatmul.msk.bf16.vlgmr.msra.gmra.mxu1 %vm14731_vm6, %v6011_v30 }
 0x4c0   : > { %8674 = vmatmul.msk.bf16.gmra.mxu2 %vm14731_vm6, %v11752_v7 }
 0x4c1   : > { %8684 = vmatmul.msk.bf16.gmra.mxu3 %vm14731_vm6, %v5517_v35  ;;  %v4948_v9 = vpop.f32.mrf.mxu0 }
 0x4c2   : > { %v5157_v1 = vpop.f32.mrf.mxu1  ;;  %v4949_v29 = vadd.f32 %v4948_v9, %v4792_v19 }
 0x4c3   : > { %v5368_v32 = vpop.f32.mrf.mxu2  ;;  %v11942_v57 = vadd.f32 %v5157_v1, %v4946_v52  ;;  %8702 = vmatmul.msk.bf16.gmra.mxu0 %vm14731_vm6, %v6011_v30  ;;  %v5485_v1 = vld [vmem:[#allocation4 + $0x43] sm:$0xff] }
 0x4c4   : > { %v4797_v41 = vpop.f32.mrf.mxu3  ;;  %v11945_v11 = vadd.f32 %v5368_v32, %v11713_v12  ;;  %v5518_v12 = vpack.c.bf16 %v5486_v34, %v5485_v1  ;;  %v5488_v34 = vld [vmem:[#allocation4 + $0x5b] sm:$0xff] }
 0x4c9   : > { %v4950_v62 = vpop.f32.mrf.mxu0 }
 0x4ca   : > { %v5160_v47 = vpop.f32.mrf.mxu1  ;;  %v4951_v19 = vadd.f32 %v4950_v62, %v4794_v3  ;;  %v5979_v62 = vld [vmem:[#allocation4 + $0x44] sm:$0xff] }
 0x4cb   : > { %v5370_v39 = vpop.f32.mrf.mxu2  ;;  %v11948_v7 = vadd.f32 %v5160_v47, %v4949_v29  ;;  %v6013_v1 = vpack.c.bf16 %v5980_v63, %v5979_v62  ;;  %v5982_v62 = vld [vmem:[#allocation4 + $0x5c] sm:$0xff] }
 0x4cc   : > { %v4799_v35 = vpop.f32.mrf.mxu3  ;;  %v11951_v52 = vadd.f32 %v5370_v39, %v11734_v43 }
 0x4cd   : > { %8721 = vmatmul.msk.bf16.gmra.mxu1 %vm14731_vm6, %v6012_v55 }
 0x4d0   : > { %8675 = vmatmul.msk.bf16.gmra.mxu2 %vm14731_vm6, %v11789_v33 }
 0x4d1   : > { %8685 = vmatmul.msk.bf16.gmra.mxu3 %vm14731_vm6, %v5518_v12  ;;  %v4953_v43 = vpop.f32.mrf.mxu0 }
 0x4d2   : > { %v5162_v30 = vpop.f32.mrf.mxu1  ;;  %v4954_v47 = vadd.f32 %v4953_v43, %v4797_v41 }
 0x4d3   : > { %v5373_v32 = vpop.f32.mrf.mxu2  ;;  %v11957_v9 = vadd.f32 %v5162_v30, %v4951_v19  ;;  %8703 = vmatmul.msk.bf16.gmra.mxu0 %vm14731_vm6, %v6012_v55  ;;  %v5487_v30 = vld [vmem:[#allocation4 + $0x53] sm:$0xff] }
 0x4d4   : > { %v4802_v29 = vpop.f32.mrf.mxu3  ;;  %v11960_v36 = vadd.f32 %v5373_v32, %v11750_v58  ;;  %v5519_v58 = vpack.c.bf16 %v5488_v34, %v5487_v30  ;;  %v5490_v34 = vld [vmem:[#allocation4 + $0x6b] sm:$0xff] }
 0x4d9   : > { %v4955_v53 = vpop.f32.mrf.mxu0 }
 0x4da   : > { %v5165_v39 = vpop.f32.mrf.mxu1  ;;  %v4956_v41 = vadd.f32 %v4955_v53, %v4799_v35  ;;  %v5981_v53 = vld [vmem:[#allocation4 + $0x54] sm:$0xff] }
 0x4db   : > { %v5375_v3 = vpop.f32.mrf.mxu2  ;;  %v11963_v33 = vadd.f32 %v5165_v39, %v4954_v47  ;;  %v6014_v30 = vpack.c.bf16 %v5982_v62, %v5981_v53  ;;  %v5984_v53 = vld [vmem:[#allocation4 + $0x6c] sm:$0xff] }
 0x4dc   : > { %v4804_v12 = vpop.f32.mrf.mxu3  ;;  %v11966_v19 = vadd.f32 %v5375_v3, %v11771_v40 }
 0x4dd   : > { %8722 = vmatmul.msk.bf16.gmra.mxu1 %vm14731_vm6, %v6013_v1 }
 0x4e0   : > { %8676 = vmatmul.msk.bf16.gmra.mxu2 %vm14731_vm6, %v11826_v37 }
 0x4e1   : > { %8686 = vmatmul.msk.bf16.gmra.mxu3 %vm14731_vm6, %v5519_v58  ;;  %v4958_v40 = vpop.f32.mrf.mxu0 }
 0x4e2   : > { %v5167_v55 = vpop.f32.mrf.mxu1  ;;  %v4959_v39 = vadd.f32 %v4958_v40, %v4802_v29 }
 0x4e3   : > { %v5378_v32 = vpop.f32.mrf.mxu2  ;;  %v11972_v43 = vadd.f32 %v5167_v55, %v4956_v41  ;;  %8704 = vmatmul.msk.bf16.gmra.mxu0 %vm14731_vm6, %v6013_v1  ;;  %v5489_v55 = vld [vmem:[#allocation4 + $0x63] sm:$0xff] }
 0x4e4   : > { %v4807_v47 = vpop.f32.mrf.mxu3  ;;  %v11975_v63 = vadd.f32 %v5378_v32, %v11787_v28  ;;  %v5520_v28 = vpack.c.bf16 %v5490_v34, %v5489_v55  ;;  %v5492_v34 = vld [vmem:[#allocation4 + $0x7b] sm:$0xff] }
 0x4e9   : > { %v4960_v27 = vpop.f32.mrf.mxu0 }
 0x4ea   : > { %v5170_v3 = vpop.f32.mrf.mxu1  ;;  %v4961_v29 = vadd.f32 %v4960_v27, %v4804_v12  ;;  %v5983_v27 = vld [vmem:[#allocation4 + $0x64] sm:$0xff] }
 0x4eb   : > { %v5380_v35 = vpop.f32.mrf.mxu2  ;;  %v11978_v37 = vadd.f32 %v5170_v3, %v4959_v39  ;;  %v6015_v55 = vpack.c.bf16 %v5984_v53, %v5983_v27  ;;  %v5986_v27 = vld [vmem:[#allocation4 + $0x7c] sm:$0xff] }
 0x4ec   : > { %v4809_v58 = vpop.f32.mrf.mxu3  ;;  %v11981_v41 = vadd.f32 %v5380_v35, %v11808_v5 }
 0x4ed   : > { %8723 = vmatmul.msk.bf16.gmra.mxu1 %vm14731_vm6, %v6014_v30 }
 0x4f0   : > { %8677 = vmatmul.msk.bf16.gmra.mxu2 %vm14731_vm6, %v11867_v14 }
 0x4f1   : > { %8687 = vmatmul.msk.bf16.gmra.mxu3 %vm14731_vm6, %v5520_v28  ;;  %v4963_v5 = vpop.f32.mrf.mxu0 }
 0x4f2   : > { %v5172_v1 = vpop.f32.mrf.mxu1  ;;  %v4964_v3 = vadd.f32 %v4963_v5, %v4807_v47 }
 0x4f3   : > { %v5383_v32 = vpop.f32.mrf.mxu2  ;;  %v11987_v40 = vadd.f32 %v5172_v1, %v4961_v29  ;;  %8705 = vmatmul.msk.bf16.gmra.mxu0 %vm14731_vm6, %v6014_v30  ;;  %v5491_v1 = vld [vmem:[#allocation4 + $0x73] sm:$0xff] }
 0x4f4   : > { %v4812_v39 = vpop.f32.mrf.mxu3  ;;  %v11990_v62 = vadd.f32 %v5383_v32, %v11824_v0  ;;  %v5521_v0 = vpack.c.bf16 %v5492_v34, %v5491_v1  ;;  %v5264_v34 = vld [vmem:[#allocation4 + $0x11a] sm:$0xff] }
 0x4f9   : > { %v4965_v46 = vpop.f32.mrf.mxu0 }
 0x4fa   : > { %v5175_v35 = vpop.f32.mrf.mxu1  ;;  %v4966_v47 = vadd.f32 %v4965_v46, %v4809_v58  ;;  %v5985_v46 = vld [vmem:[#allocation4 + $0x74] sm:$0xff] }
 0x4fb   : > { %v5385_v12 = vpop.f32.mrf.mxu2  ;;  %v11993_v14 = vadd.f32 %v5175_v35, %v4964_v3 }
 0x4fc   : > { %v4814_v28 = vpop.f32.mrf.mxu3  ;;  %v11996_v29 = vadd.f32 %v5385_v12, %v11849_v13 }
 0x4fd   : > { %8724 = vmatmul.msk.bf16.gmra.mxu1 %vm14731_vm6, %v6015_v55 }
 0x500   : > { %8678 = vmatmul.msk.bf16.gmra.mxu2 %vm14731_vm6, %v11895_v8  ;;  %v5494_v8 = vld [vmem:[#allocation4 + $0x8b] sm:$0xff] }
 0x501   : > { %8688 = vmatmul.msk.bf16.gmra.mxu3 %vm14731_vm6, %v5521_v0  ;;  %v4968_v13 = vpop.f32.mrf.mxu0  ;;  %v6016_v0 = vpack.c.bf16 %v5986_v27, %v5985_v46 }
 0x502   : > { %v5177_v30 = vpop.f32.mrf.mxu1  ;;  %v4969_v35 = vadd.f32 %v4968_v13, %v4812_v39  ;;  %v5283_v39 = vpack.c.bf16 %v5264_v34, %v11915_v48  ;;  %v5987_v34 = vld [vmem:[#allocation4 + $0x84] sm:$0xff] }
 0x503   : > { %v5388_v32 = vpop.f32.mrf.mxu2  ;;  %v12002_v5 = vadd.f32 %v5177_v30, %v4966_v47  ;;  %8706 = vmatmul.msk.bf16.gmra.mxu0 %vm14731_vm6, %v6015_v55  ;;  %v5493_v30 = vld [vmem:[#allocation4 + $0x83] sm:$0xff] }
 0x504   : > { %v4817_v3 = vpop.f32.mrf.mxu3  ;;  %v12005_v53 = vadd.f32 %v5388_v32, %v11865_v60  ;;  %v5522_v55 = vpack.c.bf16 %v5494_v8, %v5493_v30  ;;  %v5266_v8 = vld [vmem:[#allocation4 + $0x12a] sm:$0x3f]  ;;  %v5496_v30 = vld [vmem:[#allocation4 + $0x9b] sm:$0xff] }
 0x509   : > { %v4970_v60 = vpop.f32.mrf.mxu0 }
 0x50a   : > { %v5180_v12 = vpop.f32.mrf.mxu1  ;;  %v4971_v32 = vadd.f32 %v4970_v60, %v4814_v28 }
 0x50b   : > { %v5390_v58 = vpop.f32.mrf.mxu2  ;;  %v12008_v1 = vadd.f32 %v5180_v12, %v4969_v35 }
 0x50c   : > { %v4819_v23 = vpop.f32.mrf.mxu3  ;;  %v12011_v47 = vadd.f32 %v5390_v58, %v11883_v42 }
 0x50d   : > { %8725 = vmatmul.msk.bf16.gmra.mxu1 %vm14731_vm6, %v6016_v0 }
 0x510   : > { %8679 = vmatmul.msk.bf16.gmra.mxu2 %vm14731_vm6, %v5283_v39  ;;  %v6017_v39 = vpack.c.bf16 %v5988_v51, %v5987_v34 }
 0x511   : > { %8689 = vmatmul.msk.bf16.gmra.mxu3 %vm14731_vm6, %v5522_v55  ;;  %v4973_v46 = vpop.f32.mrf.mxu0 }
 0x512   : > { %v5182_v13 = vpop.f32.mrf.mxu1  ;;  %v4974_v58 = vadd.f32 %v4973_v46, %v4817_v3  ;;  %v5265_v3 = vld [vmem:[#allocation4 + $0x122] sm:$0xff] }
 0x513   : > { %v5393_v35 = vpop.f32.mrf.mxu2  ;;  %v12017_v12 = vadd.f32 %v5182_v13, %v4971_v32  ;;  %8707 = vmatmul.msk.bf16.gmra.mxu0 %vm14731_vm6, %v6016_v0  ;;  %v5495_v13 = vld [vmem:[#allocation4 + $0x93] sm:$0xff]  ;;  %v5284_v46 = vpack.c.bf16 %v5266_v8, %v5265_v3  ;;  %v5990_v8 = vld [vmem:[#allocation4 + $0x9c] sm:$0xff] }
 0x514   : > { %v4822_v27 = vpop.f32.mrf.mxu3  ;;  %v12020_v42 = vadd.f32 %v5393_v35, %v11893_v15  ;;  %v8738_v15 = vld [vmem:[%s14494_s12 + $0x1c] sm:$0xf]  ;;  %v5523_v6 = vpack.c.bf16 %v5496_v30, %v5495_v13  ;;  %v5989_v30 = vld [vmem:[#allocation4 + $0x94] sm:$0xff] }
 0x515   : > { %v6334_v0 = vsel %vm4724_vm5, %v8738_v15, 0  ;;  %v5498_v13 = vld [vmem:[#allocation4 + $0xab] sm:$0xff] }
 0x516   : > { %6343 = vmatpush.bf16.msra.mxu2 %v6334_v0 }
 0x519   : > { %v4975_v35 = vpop.f32.mrf.mxu0 }
 0x51a   : > { %v5185_v48 = vpop.f32.mrf.mxu1 }
 0x51b   : > { %v5395_v28 = vpop.f32.mrf.mxu2  ;;  %v12023_v60 = vadd.f32 %v5185_v48, %v4974_v58  ;;  %v4976_v58 = vadd.f32 %v4975_v35, %v4819_v23  ;;  %v6018_v35 = vpack.c.bf16 %v5990_v8, %v5989_v30 }
 0x51c   : > { %v4824_v55 = vpop.f32.mrf.mxu3  ;;  %v12026_v32 = vadd.f32 %v5395_v28, %v11909_v20 }
 0x51d   : > { %8726 = vmatmul.msk.bf16.gmra.mxu1 %vm14731_vm6, %v6017_v39 }
 0x520   : > { %8680 = vmatmul.msk.bf16.gmra.mxu2 %vm14731_vm6, %v5284_v46 }
 0x521   : > { %8690 = vmatmul.msk.bf16.gmra.mxu3 %vm14731_vm6, %v5523_v6  ;;  %v4978_v10 = vpop.f32.mrf.mxu0  ;;  %v6224_v6 = vld [vmem:[#allocation4 + $0x2d] sm:$0xff] }
 0x522   : > { %v5187_v51 = vpop.f32.mrf.mxu1  ;;  %v4979_v31 = vadd.f32 %v4978_v10, %v4822_v27 }
 0x523   : > { %v5398_v20 = vpop.f32.mrf.mxu2  ;;  %v12035_v48 = vadd.f32 %v5187_v51, %v4976_v58  ;;  %8708 = vmatmul.msk.bf16.gmra.mxu0 %vm14731_vm6, %v6017_v39  ;;  %v6223_v51 = vld [vmem:[#allocation4 + $0x25] sm:$0xff] }
 0x524   : > { %v12038_v34 = vadd.f32 %v5398_v20, %v11917_v44  ;;  %v5601_v28 = vpop.f32.mrf.mxu3  ;;  %v6259_v39 = vpack.c.bf16 %v6224_v6, %v6223_v51  ;;  %v5991_v6 = vld [vmem:[#allocation4 + $0xa4] sm:$0xff] }
 0x525   : > { %v5691_v15 = vadd.f32 %v5601_v28, %v11886_v56  ;;  %v5497_v56 = vld [vmem:[#allocation4 + $0xa3] sm:$0xff] }
 0x526   : > { %v5524_v27 = vpack.c.bf16 %v5498_v13, %v5497_v56  ;;  %v5992_v13 = vld [vmem:[#allocation4 + $0xac] sm:$0xff]  ;;  %v5500_v56 = vld [vmem:[#allocation4 + $0xbb] sm:$0xff] }
 0x527   : > { %v6226_v51 = vld [vmem:[#allocation4 + $0x3d] sm:$0xff] }
 0x529   : > { %v4980_v10 = vpop.f32.mrf.mxu0 }
 0x52a   : > { %v5190_v23 = vpop.f32.mrf.mxu1  ;;  %v4981_v20 = vadd.f32 %v4980_v10, %v4824_v55 }
 0x52b   : > { %v5400_v3 = vpop.f32.mrf.mxu2  ;;  %v12042_v0 = vadd.f32 %v5190_v23, %v4979_v31 }
 0x52c   : > { %v12045_v46 = vadd.f32 %v5400_v3, %v11927_v45  ;;  %v5603_v44 = vpop.f32.mrf.mxu3 }
 0x52d   : > { %v5692_v58 = vadd.f32 %v5603_v44, %v11898_v54  ;;  %8727 = vmatmul.msk.bf16.gmra.mxu1 %vm14731_vm6, %v6018_v35 }
 0x530   : > { %8739 = vmatmul.msk.bf16.vlgmr.msra.gmra.mxu2 %vm14731_vm6, %v6259_v39 }
 0x531   : > { %8691 = vmatmul.msk.bf16.gmra.mxu3 %vm14731_vm6, %v5524_v27  ;;  %v5849_v30 = vpop.f32.mrf.mxu0  ;;  %v6019_v27 = vpack.c.bf16 %v5992_v13, %v5991_v6 }
 0x532   : > { %v5192_v31 = vpop.f32.mrf.mxu1  ;;  %v5939_v3 = vadd.f32 %v5849_v30, %v5691_v15 }
 0x533   : > { %v5403_v28 = vpop.f32.mrf.mxu2  ;;  %v12051_v8 = vadd.f32 %v5192_v31, %v4981_v20  ;;  %8709 = vmatmul.msk.bf16.gmra.mxu0 %vm14731_vm6, %v6018_v35  ;;  %v6225_v31 = vld [vmem:[#allocation4 + $0x35] sm:$0xff] }
 0x534   : > { %v12054_v45 = vadd.f32 %v5403_v28, %v11933_v59  ;;  %v5606_v54 = vpop.f32.mrf.mxu3  ;;  %v6260_v28 = vpack.c.bf16 %v6226_v51, %v6225_v31  ;;  %v5993_v51 = vld [vmem:[#allocation4 + $0xb4] sm:$0xff] }
 0x535   : > { %v5693_v23 = vadd.f32 %v5606_v54, %v11912_v17  ;;  %v5499_v17 = vld [vmem:[#allocation4 + $0xb3] sm:$0xff] }
 0x536   : > { %v5525_v35 = vpack.c.bf16 %v5500_v56, %v5499_v17  ;;  %v5994_v56 = vld [vmem:[#allocation4 + $0xbc] sm:$0xff]  ;;  %v5502_v17 = vld [vmem:[#allocation4 + $0xcb] sm:$0xff] }
 0x537   : > { %v6228_v31 = vld [vmem:[#allocation4 + $0x4d] sm:$0xff] }
 0x539   : > { %v5851_v15 = vpop.f32.mrf.mxu0 }
 0x53a   : > { %v6097_v55 = vpop.f32.mrf.mxu1  ;;  %v5940_v54 = vadd.f32 %v5851_v15, %v5692_v58 }
 0x53b   : > { %v5405_v44 = vpop.f32.mrf.mxu2  ;;  %v12058_v10 = vadd.f32 %v6097_v55, %v5939_v3 }
 0x53c   : > { %v12061_v39 = vadd.f32 %v5405_v44, %v11942_v57  ;;  %v5608_v59 = vpop.f32.mrf.mxu3 }
 0x53d   : > { %v5694_v20 = vadd.f32 %v5608_v59, %v11921_v16  ;;  %8728 = vmatmul.msk.bf16.gmra.mxu1 %vm14731_vm6, %v6019_v27 }
 0x540   : > { %8740 = vmatmul.msk.bf16.gmra.mxu2 %vm14731_vm6, %v6260_v28 }
 0x541   : > { %8692 = vmatmul.msk.bf16.gmra.mxu3 %vm14731_vm6, %v5525_v35  ;;  %v5854_v6 = vpop.f32.mrf.mxu0  ;;  %v6020_v35 = vpack.c.bf16 %v5994_v56, %v5993_v51 }
 0x542   : > { %v6099_v30 = vpop.f32.mrf.mxu1  ;;  %v5941_v44 = vadd.f32 %v5854_v6, %v5693_v23 }
 0x543   : > { %v5408_v3 = vpop.f32.mrf.mxu2  ;;  %v12067_v13 = vadd.f32 %v6099_v30, %v5940_v54  ;;  %8710 = vmatmul.msk.bf16.gmra.mxu0 %vm14731_vm6, %v6019_v27  ;;  %v6227_v30 = vld [vmem:[#allocation4 + $0x45] sm:$0xff] }
 0x544   : > { %v12070_v57 = vadd.f32 %v5408_v3, %v11948_v7  ;;  %v5611_v16 = vpop.f32.mrf.mxu3  ;;  %v6261_v3 = vpack.c.bf16 %v6228_v31, %v6227_v30  ;;  %v5995_v31 = vld [vmem:[#allocation4 + $0xc4] sm:$0xff] }
 0x545   : > { %v5695_v55 = vadd.f32 %v5611_v16, %v11930_v49  ;;  %v5501_v49 = vld [vmem:[#allocation4 + $0xc3] sm:$0xff] }
 0x546   : > { %v5526_v27 = vpack.c.bf16 %v5502_v17, %v5501_v49  ;;  %v5996_v17 = vld [vmem:[#allocation4 + $0xcc] sm:$0xff]  ;;  %v5504_v49 = vld [vmem:[#allocation4 + $0xdb] sm:$0xff] }
 0x547   : > { %v6230_v30 = vld [vmem:[#allocation4 + $0x5d] sm:$0xff] }
 0x549   : > { %v5856_v23 = vpop.f32.mrf.mxu0 }
 0x54a   : > { %v6102_v58 = vpop.f32.mrf.mxu1  ;;  %v5942_v16 = vadd.f32 %v5856_v23, %v5694_v20 }
 0x54b   : > { %v5410_v59 = vpop.f32.mrf.mxu2  ;;  %v12074_v15 = vadd.f32 %v6102_v58, %v5941_v44 }
 0x54c   : > { %v12077_v28 = vadd.f32 %v5410_v59, %v11957_v9  ;;  %v5613_v7 = vpop.f32.mrf.mxu3 }
 0x54d   : > { %v5696_v54 = vadd.f32 %v5613_v7, %v11936_v38  ;;  %8729 = vmatmul.msk.bf16.gmra.mxu1 %vm14731_vm6, %v6020_v35 }
 0x550   : > { %8741 = vmatmul.msk.bf16.gmra.mxu2 %vm14731_vm6, %v6261_v3 }
 0x551   : > { %8693 = vmatmul.msk.bf16.gmra.mxu3 %vm14731_vm6, %v5526_v27  ;;  %v5859_v51 = vpop.f32.mrf.mxu0  ;;  %v6021_v27 = vpack.c.bf16 %v5996_v17, %v5995_v31 }
 0x552   : > { %v6104_v6 = vpop.f32.mrf.mxu1  ;;  %v5943_v59 = vadd.f32 %v5859_v51, %v5695_v55 }
 0x553   : > { %v5413_v44 = vpop.f32.mrf.mxu2  ;;  %v12083_v56 = vadd.f32 %v6104_v6, %v5942_v16  ;;  %8711 = vmatmul.msk.bf16.gmra.mxu0 %vm14731_vm6, %v6020_v35  ;;  %v6229_v6 = vld [vmem:[#allocation4 + $0x55] sm:$0xff] }
 0x554   : > { %v12086_v9 = vadd.f32 %v5413_v44, %v11963_v33  ;;  %v5616_v38 = vpop.f32.mrf.mxu3  ;;  %v6262_v44 = vpack.c.bf16 %v6230_v30, %v6229_v6  ;;  %v5997_v30 = vld [vmem:[#allocation4 + $0xd4] sm:$0xff] }
 0x555   : > { %v5697_v58 = vadd.f32 %v5616_v38, %v11945_v11  ;;  %v5503_v11 = vld [vmem:[#allocation4 + $0xd3] sm:$0xff] }
 0x556   : > { %v5527_v35 = vpack.c.bf16 %v5504_v49, %v5503_v11  ;;  %v5998_v49 = vld [vmem:[#allocation4 + $0xdc] sm:$0xff]  ;;  %v5506_v11 = vld [vmem:[#allocation4 + $0xeb] sm:$0xff] }
 0x557   : > { %v6232_v6 = vld [vmem:[#allocation4 + $0x6d] sm:$0xff] }
 0x559   : > { %v5861_v55 = vpop.f32.mrf.mxu0 }
 0x55a   : > { %v6107_v20 = vpop.f32.mrf.mxu1  ;;  %v5944_v38 = vadd.f32 %v5861_v55, %v5696_v54 }
 0x55b   : > { %v5415_v7 = vpop.f32.mrf.mxu2  ;;  %v12090_v23 = vadd.f32 %v6107_v20, %v5943_v59 }
 0x55c   : > { %v12093_v3 = vadd.f32 %v5415_v7, %v11972_v43  ;;  %v5618_v33 = vpop.f32.mrf.mxu3 }
 0x55d   : > { %v5698_v16 = vadd.f32 %v5618_v33, %v11951_v52  ;;  %8730 = vmatmul.msk.bf16.gmra.mxu1 %vm14731_vm6, %v6021_v27 }
 0x560   : > { %8742 = vmatmul.msk.bf16.gmra.mxu2 %vm14731_vm6, %v6262_v44 }
 0x561   : > { %8694 = vmatmul.msk.bf16.gmra.mxu3 %vm14731_vm6, %v5527_v35  ;;  %v5864_v31 = vpop.f32.mrf.mxu0  ;;  %v6022_v35 = vpack.c.bf16 %v5998_v49, %v5997_v30 }
 0x562   : > { %v6109_v51 = vpop.f32.mrf.mxu1  ;;  %v5945_v7 = vadd.f32 %v5864_v31, %v5697_v58 }
 0x563   : > { %v5418_v59 = vpop.f32.mrf.mxu2  ;;  %v12099_v17 = vadd.f32 %v6109_v51, %v5944_v38  ;;  %8712 = vmatmul.msk.bf16.gmra.mxu0 %vm14731_vm6, %v6021_v27  ;;  %v6231_v51 = vld [vmem:[#allocation4 + $0x65] sm:$0xff] }
 0x564   : > { %v12102_v43 = vadd.f32 %v5418_v59, %v11978_v37  ;;  %v5621_v52 = vpop.f32.mrf.mxu3  ;;  %v6263_v59 = vpack.c.bf16 %v6232_v6, %v6231_v51  ;;  %v5999_v6 = vld [vmem:[#allocation4 + $0xe4] sm:$0xff] }
 0x565   : > { %v5699_v20 = vadd.f32 %v5621_v52, %v11960_v36  ;;  %v5505_v36 = vld [vmem:[#allocation4 + $0xe3] sm:$0xff] }
 0x566   : > { %v5528_v27 = vpack.c.bf16 %v5506_v11, %v5505_v36  ;;  %v6000_v11 = vld [vmem:[#allocation4 + $0xec] sm:$0xff]  ;;  %v5508_v36 = vld [vmem:[#allocation4 + $0xfb] sm:$0xff] }
 0x567   : > { %v6234_v51 = vld [vmem:[#allocation4 + $0x7d] sm:$0xff] }
 0x569   : > { %v5866_v58 = vpop.f32.mrf.mxu0 }
 0x56a   : > { %v6112_v54 = vpop.f32.mrf.mxu1  ;;  %v5946_v52 = vadd.f32 %v5866_v58, %v5698_v16 }
 0x56b   : > { %v5420_v33 = vpop.f32.mrf.mxu2  ;;  %v12106_v55 = vadd.f32 %v6112_v54, %v5945_v7 }
 0x56c   : > { %v12109_v44 = vadd.f32 %v5420_v33, %v11987_v40  ;;  %v5623_v37 = vpop.f32.mrf.mxu3 }
 0x56d   : > { %v5700_v38 = vadd.f32 %v5623_v37, %v11966_v19  ;;  %8731 = vmatmul.msk.bf16.gmra.mxu1 %vm14731_vm6, %v6022_v35 }
 0x570   : > { %8743 = vmatmul.msk.bf16.gmra.mxu2 %vm14731_vm6, %v6263_v59 }
 0x571   : > { %8695 = vmatmul.msk.bf16.gmra.mxu3 %vm14731_vm6, %v5528_v27  ;;  %v5869_v30 = vpop.f32.mrf.mxu0  ;;  %v6023_v27 = vpack.c.bf16 %v6000_v11, %v5999_v6 }
 0x572   : > { %v6114_v31 = vpop.f32.mrf.mxu1  ;;  %v5947_v33 = vadd.f32 %v5869_v30, %v5699_v20 }
 0x573   : > { %v5423_v7 = vpop.f32.mrf.mxu2  ;;  %v12115_v49 = vadd.f32 %v6114_v31, %v5946_v52  ;;  %8713 = vmatmul.msk.bf16.gmra.mxu0 %vm14731_vm6, %v6022_v35  ;;  %v6233_v31 = vld [vmem:[#allocation4 + $0x75] sm:$0xff] }
 0x574   : > { %v12118_v40 = vadd.f32 %v5423_v7, %v11993_v14  ;;  %v5626_v19 = vpop.f32.mrf.mxu3  ;;  %v6264_v7 = vpack.c.bf16 %v6234_v51, %v6233_v31  ;;  %v6001_v51 = vld [vmem:[#allocation4 + $0xf4] sm:$0xff] }
 0x575   : > { %v5701_v54 = vadd.f32 %v5626_v19, %v11975_v63  ;;  %v5507_v63 = vld [vmem:[#allocation4 + $0xf3] sm:$0xff] }
 0x576   : > { %v5529_v35 = vpack.c.bf16 %v5508_v36, %v5507_v63  ;;  %v5510_v63 = vld [vmem:[#allocation4 + $0x10b] sm:$0xff] }
 0x577   : > { %v6236_v31 = vld [vmem:[#allocation4 + $0x8d] sm:$0xff] }
 0x579   : > { %v5871_v20 = vpop.f32.mrf.mxu0 }
 0x57a   : > { %v6117_v16 = vpop.f32.mrf.mxu1  ;;  %v5948_v19 = vadd.f32 %v5871_v20, %v5700_v38  ;;  %v6002_v38 = vld [vmem:[#allocation4 + $0xfc] sm:$0xff] }
 0x57b   : > { %v5425_v37 = vpop.f32.mrf.mxu2  ;;  %v12122_v58 = vadd.f32 %v6117_v16, %v5947_v33 }
 0x57c   : > { %v12125_v59 = vadd.f32 %v5425_v37, %v12002_v5  ;;  %v5628_v14 = vpop.f32.mrf.mxu3 }
 0x57d   : > { %v5702_v52 = vadd.f32 %v5628_v14, %v11981_v41  ;;  %8732 = vmatmul.msk.bf16.gmra.mxu1 %vm14731_vm6, %v6023_v27 }
 0x580   : > { %8744 = vmatmul.msk.bf16.gmra.mxu2 %vm14731_vm6, %v6264_v7 }
 0x581   : > { %8696 = vmatmul.msk.bf16.gmra.mxu3 %vm14731_vm6, %v5529_v35  ;;  %v5874_v6 = vpop.f32.mrf.mxu0  ;;  %v6024_v35 = vpack.c.bf16 %v6002_v38, %v6001_v51 }
 0x582   : > { %v6119_v30 = vpop.f32.mrf.mxu1  ;;  %v5949_v37 = vadd.f32 %v5874_v6, %v5701_v54  ;;  %v6235_v54 = vld [vmem:[#allocation4 + $0x85] sm:$0xff] }
 0x583   : > { %v5428_v33 = vpop.f32.mrf.mxu2  ;;  %v12131_v11 = vadd.f32 %v6119_v30, %v5948_v19  ;;  %8714 = vmatmul.msk.bf16.gmra.mxu0 %vm14731_vm6, %v6023_v27  ;;  %v5509_v19 = vld [vmem:[#allocation4 + $0x103] sm:$0xff] }
 0x584   : > { %v12134_v5 = vadd.f32 %v5428_v33, %v12008_v1  ;;  %v5631_v41 = vpop.f32.mrf.mxu3  ;;  %v5530_v27 = vpack.c.bf16 %v5510_v63, %v5509_v19  ;;  %v6265_v33 = vpack.c.bf16 %v6236_v31, %v6235_v54  ;;  %v6003_v63 = vld [vmem:[#allocation4 + $0x104] sm:$0xff] }
 0x585   : > { %v12137_v16 = vadd.f32 %v5631_v41, %v11990_v62  ;;  %v6238_v19 = vld [vmem:[#allocation4 + $0x9d] sm:$0xff] }
 0x589   : > { %v5876_v30 = vpop.f32.mrf.mxu0 }
 0x58a   : > { %v6122_v36 = vpop.f32.mrf.mxu1  ;;  %v5950_v41 = vadd.f32 %v5876_v30, %v5702_v52  ;;  %v6004_v52 = vld [vmem:[#allocation4 + $0x10c] sm:$0xff] }
 0x58b   : > { %v5430_v14 = vpop.f32.mrf.mxu2  ;;  %v12140_v20 = vadd.f32 %v6122_v36, %v5949_v37  ;;  %v6025_v54 = vpack.c.bf16 %v6004_v52, %v6003_v63 }
 0x58c   : > { %v12143_v1 = vadd.f32 %v5430_v14, %v12017_v12  ;;  %v5633_v7 = vpop.f32.mrf.mxu3 }
 0x58d   : > { %v12146_v62 = vadd.f32 %v5633_v7, %v11996_v29  ;;  %8733 = vmatmul.msk.bf16.gmra.mxu1 %vm14731_vm6, %v6024_v35  ;;  %v5512_v7 = vld [vmem:[#allocation4 + $0x11b] sm:$0xff] }
 0x590   : > { %8745 = vmatmul.msk.bf16.gmra.mxu2 %vm14731_vm6, %v6265_v33  ;;  %v6237_v33 = vld [vmem:[#allocation4 + $0x95] sm:$0xff] }
 0x591   : > { %8697 = vmatmul.msk.bf16.gmra.mxu3 %vm14731_vm6, %v5530_v27  ;;  %v12159_v51 = vpop.f32.mrf.mxu0 }
 0x592   : > { %v6124_v6 = vpop.f32.mrf.mxu1 }
 0x593   : > { %v5433_v37 = vpop.f32.mrf.mxu2  ;;  %v12151_v12 = vadd.f32 %v6124_v6, %v5950_v41  ;;  %8715 = vmatmul.msk.bf16.gmra.mxu0 %vm14731_vm6, %v6024_v35  ;;  %v6266_v6 = vpack.c.bf16 %v6238_v19, %v6237_v33  ;;  %v6006_v19 = vld [vmem:[#allocation4 + $0x11c] sm:$0xff] }
 0x594   : > { %v12154_v38 = vadd.f32 %v5433_v37, %v12023_v60  ;;  %v5636_v29 = vpop.f32.mrf.mxu3  ;;  %v8757_v37 = vld [vmem:[%s14494_s12 + $0x20] sm:$0xf] }
 0x595   : > { %v12157_v36 = vadd.f32 %v5636_v29, %v12005_v53  ;;  %v5511_v53 = vld [vmem:[#allocation4 + $0x113] sm:$0xff] }
 0x596   : > { %v5531_v35 = vpack.c.bf16 %v5512_v7, %v5511_v53  ;;  %v6005_v53 = vld [vmem:[#allocation4 + $0x114] sm:$0xff] }
 0x599   : > { %v12170_v41 = vpop.f32.mrf.mxu0 }
 0x59a   : > { %v12162_v14 = vpop.f32.mrf.mxu1 }
 0x59b   : > { %v5435_v31 = vpop.f32.mrf.mxu2 }
 0x59c   : > { %v12165_v30 = vadd.f32 %v5435_v31, %v12035_v48  ;;  %v5638_v60 = vpop.f32.mrf.mxu3  ;;  %v6582_v48 = vsel %vm4724_vm5, %v8757_v37, 0  ;;  %v6026_v37 = vpack.c.bf16 %v6006_v19, %v6005_v53 }
 0x59d   : > { %v12168_v27 = vadd.f32 %v5638_v60, %v12011_v47  ;;  %8734 = vmatmul.msk.bf16.gmra.mxu1 %vm14731_vm6, %v6025_v54  ;;  %6591 = vmatpush.bf16.msra.mxu3 %v6582_v48 }
 0x5a0   : > { %8746 = vmatmul.msk.bf16.gmra.mxu2 %vm14731_vm6, %v6266_v6  ;;  %v6240_v6 = vld [vmem:[#allocation4 + $0xad] sm:$0xff] }
 0x5a1   : > { %8698 = vmatmul.msk.bf16.gmra.mxu3 %vm14731_vm6, %v5531_v35  ;;  %v12187_v7 = vpop.f32.mrf.mxu0  ;;  %v5514_v35 = vld [vmem:[#allocation4 + $0x12b] sm:$0x3f] }
 0x5a2   : > { %v12179_v47 = vpop.f32.mrf.mxu1 }
 0x5a3   : > { %v5438_v29 = vpop.f32.mrf.mxu2  ;;  %8716 = vmatmul.msk.bf16.gmra.mxu0 %vm14731_vm6, %v6025_v54 }
 0x5a4   : > { %v12182_v52 = vadd.f32 %v5438_v29, %v12042_v0  ;;  %v5641_v63 = vpop.f32.mrf.mxu3  ;;  %v5513_v29 = vld [vmem:[#allocation4 + $0x123] sm:$0xff] }
 0x5a5   : > { %v12185_v31 = vadd.f32 %v5641_v63, %v12020_v42  ;;  %v6239_v63 = vld [vmem:[#allocation4 + $0xa5] sm:$0xff]  ;;  %v5532_v2 = vpack.c.bf16 %v5514_v35, %v5513_v29  ;;  %v6242_v29 = vld [vmem:[#allocation4 + $0xbd] sm:$0xff] }
 0x5a6   : > { %v6267_v25 = vpack.c.bf16 %v6240_v6, %v6239_v63  ;;  %v6008_v35 = vld [vmem:[#allocation4 + $0x12c] sm:$0xff] }
 0x5a7   : > { %15004 = vst [vmem:[#allocation18_spill] sm:$0xff] %v12185_v31  ;;  %v15006_v31 = vmov 0.0  }
 0x5a8   : > { %4485 = vst.msk [vmem:[#allocation4 + $0x140] sm:$0xf] %vm4484_vm9, %v15006_v31 }
 0x5a9   : > { %v12199_v54 = vpop.f32.mrf.mxu0 }
 0x5aa   : > { %v12190_v60 = vpop.f32.mrf.mxu1 }
 0x5ab   : > { %v5440_v33 = vpop.f32.mrf.mxu2 }
 0x5ac   : > { %v12193_v48 = vadd.f32 %v5440_v33, %v12051_v8  ;;  %v5643_v0 = vpop.f32.mrf.mxu3 }
 0x5ad   : > { %v12196_v42 = vadd.f32 %v5643_v0, %v12026_v32  ;;  %8735 = vmatmul.msk.bf16.gmra.mxu1 %vm14731_vm6, %v6026_v37 }
 0x5af   : > { %15005 = vst [vmem:[#allocation72_spill] sm:$0xff] %v12196_v42  ;;  %v6007_v42 = vld [vmem:[#allocation4 + $0x124] sm:$0xff] }
 0x5b0   : > { %8747 = vmatmul.msk.bf16.gmra.mxu2 %vm14731_vm6, %v6267_v25  ;;  %v6472_v25 = vld [vmem:[#allocation4 + $0x2e] sm:$0xff]  ;;  %v6027_v63 = vpack.c.bf16 %v6008_v35, %v6007_v42 }
 0x5b1   : > { %8699 = vmatmul.msk.bf16.gmra.mxu3 %vm14731_vm6, %v5532_v2  ;;  %v12210_v0 = vpop.f32.mrf.mxu0 }
 0x5b2   : > { %v12204_v8 = vpop.f32.mrf.mxu1  ;;  %15007 = vst [vmem:[#allocation119_spill] sm:$0xff] %v12210_v0 }
 0x5b3   : > { %v6345_v19 = vpop.f32.mrf.mxu2  ;;  %8717 = vmatmul.msk.bf16.gmra.mxu0 %vm14731_vm6, %v6026_v37 }
 0x5b4   : > { %v5646_v53 = vpop.f32.mrf.mxu3  ;;  %v12207_v32 = vadd.f32 %v6345_v19, %v12058_v10  ;;  %v6241_v19 = vld [vmem:[#allocation4 + $0xb5] sm:$0xff] }
 0x5b5   : > { %v5709_v33 = vadd.f32 %v5646_v53, %v12038_v34  ;;  %v6471_v34 = vld [vmem:[#allocation4 + $0x26] sm:$0xff]  ;;  %v6268_v37 = vpack.c.bf16 %v6242_v29, %v6241_v19  ;;  %v6009_v29 = vld [vmem:[#allocation4 + $0x134] sm:$0xff] }
 0x5b6   : > { %v6507_v0 = vpack.c.bf16 %v6472_v25, %v6471_v34  ;;  %v6010_v25 = vld [vmem:[#allocation4 + $0x13c] sm:$0x3f] }
 0x5b7   : > { %v6028_v19 = vpack.c.bf16 %v6010_v25, %v6009_v29 }
 0x5b9   : > { %v12219_v53 = vpop.f32.mrf.mxu0 }
 0x5ba   : > { %v12213_v6 = vpop.f32.mrf.mxu1  ;;  %15009 = vst [vmem:[#allocation75_spill] sm:$0xff] %v12219_v53 }
 0x5bb   : > { %15008 = vst [vmem:[#allocation120_spill] sm:$0xff] %v12213_v6  ;;  %v6347_v2 = vpop.f32.mrf.mxu2 }
 0x5bc   : > { %v5648_v18 = vpop.f32.mrf.mxu3  ;;  %v12216_v26 = vadd.f32 %v6347_v2, %v12067_v13 }
 0x5bd   : > { %v5710_v10 = vadd.f32 %v5648_v18, %v12045_v46  ;;  %8736 = vmatmul.msk.bf16.gmra.mxu1 %vm14731_vm6, %v6027_v63  ;;  %v5780_v63 = vpack.c.bf16 %v5762_v21, %v6007_v42 }
 0x5c0   : > { %8748 = vmatmul.msk.bf16.gmra.mxu2 %vm14731_vm6, %v6268_v37  ;;  %v6244_v37 = vld [vmem:[#allocation4 + $0xcd] sm:$0xff] }
 0x5c1   : > { %8758 = vmatmul.msk.bf16.vlgmr.msra.gmra.mxu3 %vm14731_vm6, %v6507_v0  ;;  %v5894_v46 = vpop.f32.mrf.mxu0 }
 0x5c2   : > { %v12224_v6 = vpop.f32.mrf.mxu1  ;;  %v12230_v53 = vadd.f32 %v5894_v46, %v5709_v33  ;;  %v6473_v33 = vld [vmem:[#allocation4 + $0x36] sm:$0xff] }
 0x5c3   : > { %15010 = vst [vmem:[#allocation121_spill] sm:$0xff] %v12224_v6  ;;  %v6350_v35 = vpop.f32.mrf.mxu2  ;;  %8718 = vmatmul.msk.bf16.gmra.mxu0 %vm14731_vm6, %v5780_v63  ;;  %v6474_v6 = vld [vmem:[#allocation4 + $0x3e] sm:$0xff] }
 0x5c4   : > { %v5651_v13 = vpop.f32.mrf.mxu3  ;;  %v12227_v2 = vadd.f32 %v6350_v35, %v12074_v15  ;;  %15011 = vst [vmem:[#allocation24_spill] sm:$0xff] %v12230_v53  ;;  %v6243_v35 = vld [vmem:[#allocation4 + $0xc5] sm:$0xff]  ;;  %v6508_v42 = vpack.c.bf16 %v6474_v6, %v6473_v33 }
 0x5c5   : > { %v5711_v18 = vadd.f32 %v5651_v13, %v12054_v45  ;;  %v6269_v21 = vpack.c.bf16 %v6244_v37, %v6243_v35  ;;  %v6476_v37 = vld [vmem:[#allocation4 + $0x4e] sm:$0xff] }
 0x5c9   : > { %v5896_v13 = vpop.f32.mrf.mxu0 }
 0x5ca   : > { %v12233_v0 = vpop.f32.mrf.mxu1  ;;  %v12240_v46 = vadd.f32 %v5896_v13, %v5710_v10  ;;  %v6246_v10 = vld [vmem:[#allocation4 + $0xdd] sm:$0xff] }
 0x5cb   : > { %15012 = vst [vmem:[#allocation78_spill] sm:$0xff] %v12233_v0  ;;  %v6352_v34 = vpop.f32.mrf.mxu2 }
 0x5cc   : > { %v5653_v24 = vpop.f32.mrf.mxu3  ;;  %v12236_v15 = vadd.f32 %v6352_v34, %v12083_v56  ;;  %15013 = vst [vmem:[#allocation122_spill] sm:$0xff] %v12240_v46 }
 0x5cd   : > { %v5712_v45 = vadd.f32 %v5653_v24, %v12061_v39  ;;  %8737 = vmatmul.msk.bf16.gmra.mxu1 %vm14731_vm6, %v6028_v19 }
 0x5d0   : > { %8749 = vmatmul.msk.bf16.gmra.mxu2 %vm14731_vm6, %v6269_v21  ;;  %v6245_v21 = vld [vmem:[#allocation4 + $0xd5] sm:$0xff] }
 0x5d1   : > { %8759 = vmatmul.msk.bf16.gmra.mxu3 %vm14731_vm6, %v6508_v42  ;;  %v5899_v39 = vpop.f32.mrf.mxu0  ;;  %v6475_v42 = vld [vmem:[#allocation4 + $0x46] sm:$0xff] }
 0x5d2   : > { %v12244_v63 = vpop.f32.mrf.mxu1  ;;  %v12250_v34 = vadd.f32 %v5899_v39, %v5711_v18  ;;  %v6509_v0 = vpack.c.bf16 %v6476_v37, %v6475_v42  ;;  %v6248_v37 = vld [vmem:[#allocation4 + $0xed] sm:$0xff] }
 0x5d3   : > { %15014 = vst [vmem:[#allocation123_spill] sm:$0xff] %v12244_v63  ;;  %v6355_v29 = vpop.f32.mrf.mxu2  ;;  %v6477_v63 = vld [vmem:[#allocation4 + $0x56] sm:$0xff] }
 0x5d4   : > { %v5656_v56 = vpop.f32.mrf.mxu3  ;;  %v12247_v25 = vadd.f32 %v6355_v29, %v12090_v23  ;;  %15015 = vst [vmem:[#allocation81_spill] sm:$0xff] %v12250_v34  ;;  %v6270_v29 = vpack.c.bf16 %v6246_v10, %v6245_v21  ;;  %v6488_v34 = vld [vmem:[#allocation4 + $0xae] sm:$0xff] }
 0x5d5   : > { %v5713_v24 = vadd.f32 %v5656_v56, %v12070_v57 }
 0x5d9   : > { %v5901_v23 = vpop.f32.mrf.mxu0 }
 0x5da   : > { %v12252_v19 = vpop.f32.mrf.mxu1  ;;  %v12258_v57 = vadd.f32 %v5901_v23, %v5712_v45  ;;  %v6478_v45 = vld [vmem:[#allocation4 + $0x5e] sm:$0xff] }
 0x5db   : > { %15016 = vst [vmem:[#allocation124_spill] sm:$0xff] %v12252_v19  ;;  %v6357_v6 = vpop.f32.mrf.mxu2  ;;  %v6510_v46 = vpack.c.bf16 %v6478_v45, %v6477_v63  ;;  %v6480_v45 = vld [vmem:[#allocation4 + $0x6e] sm:$0xff] }
 0x5dc   : > { %v5658_v35 = vpop.f32.mrf.mxu3  ;;  %v12255_v33 = vadd.f32 %v6357_v6, %v12099_v17 }
 0x5dd   : > { %v5714_v13 = vadd.f32 %v5658_v35, %v12077_v28 }
 0x5e0   : > { %8750 = vmatmul.msk.bf16.gmra.mxu2 %vm14731_vm6, %v6270_v29  ;;  %v6247_v29 = vld [vmem:[#allocation4 + $0xe5] sm:$0xff] }
 0x5e1   : > { %8760 = vmatmul.msk.bf16.gmra.mxu3 %vm14731_vm6, %v6509_v0  ;;  %v5904_v6 = vpop.f32.mrf.mxu0 }
 0x5e2   : > { %v12262_v18 = vpop.f32.mrf.mxu1  ;;  %v5961_v35 = vadd.f32 %v5904_v6, %v5713_v24 }
 0x5e3   : > { %v6360_v56 = vpop.f32.mrf.mxu2 }
 0x5e4   : > { %v5661_v39 = vpop.f32.mrf.mxu3  ;;  %v12265_v17 = vadd.f32 %v6360_v56, %v12106_v55  ;;  %v6271_v56 = vpack.c.bf16 %v6248_v37, %v6247_v29 }
 0x5e5   : > { %v5715_v28 = vadd.f32 %v5661_v39, %v12086_v9 }
 0x5e9   : > { %v5906_v55 = vpop.f32.mrf.mxu0 }
 0x5ea   : > { %v6152_v53 = vpop.f32.mrf.mxu1  ;;  %v5962_v9 = vadd.f32 %v5906_v55, %v5714_v13  ;;  %v6250_v13 = vld [vmem:[#allocation4 + $0xfd] sm:$0xff] }
 0x5eb   : > { %v6362_v10 = vpop.f32.mrf.mxu2  ;;  %v12268_v21 = vadd.f32 %v6152_v53, %v5961_v35 }
 0x5ec   : > { %v5663_v42 = vpop.f32.mrf.mxu3  ;;  %v12271_v0 = vadd.f32 %v6362_v10, %v12115_v49 }
 0x5ed   : > { %v5716_v23 = vadd.f32 %v5663_v42, %v12093_v3 }
 0x5f0   : > { %8751 = vmatmul.msk.bf16.gmra.mxu2 %vm14731_vm6, %v6271_v56  ;;  %v6479_v56 = vld [vmem:[#allocation4 + $0x66] sm:$0xff] }
 0x5f1   : > { %8761 = vmatmul.msk.bf16.gmra.mxu3 %vm14731_vm6, %v6510_v46  ;;  %v5909_v35 = vpop.f32.mrf.mxu0 }
 0x5f2   : > { %v6154_v24 = vpop.f32.mrf.mxu1  ;;  %v5963_v10 = vadd.f32 %v5909_v35, %v5715_v28 }
 0x5f3   : > { %v6365_v39 = vpop.f32.mrf.mxu2  ;;  %v12276_v53 = vadd.f32 %v6154_v24, %v5962_v9  ;;  %v6511_v24 = vpack.c.bf16 %v6480_v45, %v6479_v56  ;;  %v6481_v56 = vld [vmem:[#allocation4 + $0x76] sm:$0xff] }
 0x5f4   : > { %v5666_v6 = vpop.f32.mrf.mxu3  ;;  %v12279_v49 = vadd.f32 %v6365_v39, %v12122_v58  ;;  %v6249_v58 = vld [vmem:[#allocation4 + $0xf5] sm:$0xff] }
 0x5f5   : > { %v12282_v3 = vadd.f32 %v5666_v6, %v12102_v43  ;;  %v6272_v43 = vpack.c.bf16 %v6250_v13, %v6249_v58  ;;  %v6482_v13 = vld [vmem:[#allocation4 + $0x7e] sm:$0xff] }
 0x5f6   : > { %v6251_v58 = vld [vmem:[#allocation4 + $0x105] sm:$0xff] }
 0x5f9   : > { %v5911_v9 = vpop.f32.mrf.mxu0 }
 0x5fa   : > { %v6157_v37 = vpop.f32.mrf.mxu1  ;;  %v5964_v39 = vadd.f32 %v5911_v9, %v5716_v23 }
 0x5fb   : > { %v6367_v63 = vpop.f32.mrf.mxu2  ;;  %v12284_v42 = vadd.f32 %v6157_v37, %v5963_v10 }
 0x5fc   : > { %v5668_v46 = vpop.f32.mrf.mxu3  ;;  %v12287_v29 = vadd.f32 %v6367_v63, %v12131_v11  ;;  %v6252_v63 = vld [vmem:[#allocation4 + $0x10d] sm:$0xff] }
 0x5fd   : > { %v12290_v55 = vadd.f32 %v5668_v46, %v12109_v44  ;;  %v6273_v9 = vpack.c.bf16 %v6252_v63, %v6251_v58 }
 0x600   : > { %8752 = vmatmul.msk.bf16.gmra.mxu2 %vm14731_vm6, %v6272_v43  ;;  %v6512_v43 = vpack.c.bf16 %v6482_v13, %v6481_v56 }
 0x601   : > { %8762 = vmatmul.msk.bf16.gmra.mxu3 %vm14731_vm6, %v6511_v24 }
 0x602   : > { %v6159_v28 = vpop.f32.mrf.mxu1 }
 0x603   : > { %v6370_v6 = vpop.f32.mrf.mxu2  ;;  %v12294_v35 = vadd.f32 %v6159_v28, %v5964_v39  ;;  %v6484_v28 = vld [vmem:[#allocation4 + $0x8e] sm:$0xff] }
 0x604   : > { %v5671_v10 = vpop.f32.mrf.mxu3  ;;  %v12297_v11 = vadd.f32 %v6370_v6, %v12140_v20 }
 0x605   : > { %v12300_v44 = vadd.f32 %v5671_v10, %v12118_v40  ;;  %v6253_v10 = vld [vmem:[#allocation4 + $0x115] sm:$0xff] }
 0x60b   : > { %v6372_v37 = vpop.f32.mrf.mxu2 }
 0x60c   : > { %v5673_v45 = vpop.f32.mrf.mxu3  ;;  %v12303_v23 = vadd.f32 %v6372_v37, %v12151_v12  ;;  %v6254_v12 = vld [vmem:[#allocation4 + $0x11d] sm:$0xff]  ;;  %v6483_v37 = vld [vmem:[#allocation4 + $0x86] sm:$0xff] }
 0x60d   : > { %v12306_v46 = vadd.f32 %v5673_v45, %v12125_v59  ;;  %v6274_v63 = vpack.c.bf16 %v6254_v12, %v6253_v10  ;;  %v6513_v13 = vpack.c.bf16 %v6484_v28, %v6483_v37  ;;  %v6485_v12 = vld [vmem:[#allocation4 + $0x96] sm:$0xff] }
 0x610   : > { %8753 = vmatmul.msk.bf16.gmra.mxu2 %vm14731_vm6, %v6273_v9  ;;  %v6255_v9 = vld [vmem:[#allocation4 + $0x125] sm:$0xff] }
 0x611   : > { %8763 = vmatmul.msk.bf16.gmra.mxu3 %vm14731_vm6, %v6512_v43  ;;  %v6256_v43 = vld [vmem:[#allocation4 + $0x12d] sm:$0xff] }
 0x612   : > { %v6275_v28 = vpack.c.bf16 %v6256_v43, %v6255_v9  ;;  %v6487_v43 = vld [vmem:[#allocation4 + $0xa6] sm:$0xff] }
 0x613   : > { %v12310_v40 = vpop.f32.mrf.mxu2 }
 0x614   : > { %v5676_v20 = vpop.f32.mrf.mxu3 }
 0x615   : > { %v12313_v24 = vadd.f32 %v5676_v20, %v12134_v5 }
 0x61b   : > { %v12315_v39 = vpop.f32.mrf.mxu2 }
 0x61c   : > { %v5678_v59 = vpop.f32.mrf.mxu3 }
 0x61d   : > { %v12318_v6 = vadd.f32 %v5678_v59, %v12143_v1  ;;  %v6486_v1 = vld [vmem:[#allocation4 + $0x9e] sm:$0xff] }
 0x61e   : > { %v6514_v10 = vpack.c.bf16 %v6486_v1, %v6485_v12  ;;  %v6515_v1 = vpack.c.bf16 %v6488_v34, %v6487_v43 }
 0x620   : > { %8754 = vmatmul.msk.bf16.gmra.mxu2 %vm14731_vm6, %v6274_v63 }
 0x621   : > { %8764 = vmatmul.msk.bf16.gmra.mxu3 %vm14731_vm6, %v6513_v13  ;;  %v6257_v13 = vld [vmem:[#allocation4 + $0x135] sm:$0xff] }
 0x623   : > { %v12322_v45 = vpop.f32.mrf.mxu2 }
 0x624   : > { %v5681_v5 = vpop.f32.mrf.mxu3 }
 0x625   : > { %v12325_v58 = vadd.f32 %v5681_v5, %v12154_v38  ;;  %v6258_v5 = vld [vmem:[#allocation4 + $0x13d] sm:$0x3f] }
 0x627   : > { %15017 = vst [vmem:[#allocation84_spill] sm:$0xff] %v12325_v58  ;;  %v6504_v58 = vld [vmem:[#allocation4 + $0x12e] sm:$0xff] }
 0x62b   : > { %v12327_v56 = vpop.f32.mrf.mxu2 }
 0x62c   : > { %v5683_v20 = vpop.f32.mrf.mxu3 }
 0x62d   : > { %v12330_v59 = vadd.f32 %v5683_v20, %v12165_v30  ;;  %v6276_v20 = vpack.c.bf16 %v6258_v5, %v6257_v13 }
 0x630   : > { %8755 = vmatmul.msk.bf16.gmra.mxu2 %vm14731_vm6, %v6275_v28 }
 0x631   : > { %8765 = vmatmul.msk.bf16.gmra.mxu3 %vm14731_vm6, %v6514_v10 }
 0x633   : > { %v12334_v37 = vpop.f32.mrf.mxu2 }
 0x634   : > { %15018 = vst [vmem:[#allocation125_spill] sm:$0xff] %v12334_v37  ;;  %v5686_v38 = vpop.f32.mrf.mxu3 }
 0x635   : > { %v12337_v63 = vadd.f32 %v5686_v38, %v12182_v52  ;;  %v6490_v38 = vld [vmem:[#allocation4 + $0xbe] sm:$0xff] }
 0x63b   : > { %v12339_v19 = vpop.f32.mrf.mxu2 }
 0x63c   : > { %15019 = vst [vmem:[#allocation126_spill] sm:$0xff] %v12339_v19  ;;  %v5688_v30 = vpop.f32.mrf.mxu3  ;;  %v6491_v19 = vld [vmem:[#allocation4 + $0xc6] sm:$0xff] }
 0x63d   : > { %v12342_v9 = vadd.f32 %v5688_v30, %v12193_v48  ;;  %v6489_v48 = vld [vmem:[#allocation4 + $0xb6] sm:$0xff] }
 0x63e   : > { %v6516_v5 = vpack.c.bf16 %v6490_v38, %v6489_v48 }
 0x640   : > { %8756 = vmatmul.msk.bf16.gmra.mxu2 %vm14731_vm6, %v6276_v20 }
 0x641   : > { %8766 = vmatmul.msk.bf16.gmra.mxu3 %vm14731_vm6, %v6515_v1 }
 0x643   : > { %v12346_v12 = vpop.f32.mrf.mxu2 }
 0x644   : > { %15020 = vst [vmem:[#allocation87_spill] sm:$0xff] %v12346_v12  ;;  %v6593_v52 = vpop.f32.mrf.mxu3 }
 0x645   : > { %v12349_v28 = vadd.f32 %v6593_v52, %v12207_v32  ;;  %v6492_v32 = vld [vmem:[#allocation4 + $0xce] sm:$0xff] }
 0x64b   : > { %v12351_v10 = vpop.f32.mrf.mxu2 }
 0x64c   : > { %15021 = vst [vmem:[#allocation127_spill] sm:$0xff] %v12351_v10  ;;  %v6595_v37 = vpop.f32.mrf.mxu3 }
 0x64d   : > { %v12354_v13 = vadd.f32 %v6595_v37, %v12216_v26  ;;  %v6517_v26 = vpack.c.bf16 %v6492_v32, %v6491_v19  ;;  %v6493_v19 = vld [vmem:[#allocation4 + $0xd6] sm:$0xff] }
 0x651   : > { %8767 = vmatmul.msk.bf16.gmra.mxu3 %vm14731_vm6, %v6516_v5 }
 0x653   : > { %v12357_v34 = vpop.f32.mrf.mxu2 }
 0x654   : > { %15022 = vst [vmem:[#allocation90_spill] sm:$0xff] %v12357_v34  ;;  %v6598_v30 = vpop.f32.mrf.mxu3  ;;  %v6499_v34 = vld [vmem:[#allocation4 + $0x106] sm:$0xff] }
 0x655   : > { %v12360_v20 = vadd.f32 %v6598_v30, %v12227_v2  ;;  %v6494_v30 = vld [vmem:[#allocation4 + $0xde] sm:$0xff] }
 0x656   : > { %v6518_v32 = vpack.c.bf16 %v6494_v30, %v6493_v19 }
 0x65b   : > { %v12362_v43 = vpop.f32.mrf.mxu2 }
 0x65c   : > { %15023 = vst [vmem:[#allocation128_spill] sm:$0xff] %v12362_v43  ;;  %v6600_v1 = vpop.f32.mrf.mxu3 }
 0x65d   : > { %v12365_v52 = vadd.f32 %v6600_v1, %v12236_v15 }
 0x661   : > { %8768 = vmatmul.msk.bf16.gmra.mxu3 %vm14731_vm6, %v6517_v26 }
 0x663   : > { %v6400_v37 = vpop.f32.mrf.mxu2 }
 0x664   : > { %v12369_v38 = vadd.f32 %v6400_v37, %v12268_v21  ;;  %v6603_v48 = vpop.f32.mrf.mxu3 }
 0x665   : > { %v12372_v5 = vadd.f32 %v6603_v48, %v12247_v25  ;;  %v6496_v48 = vld [vmem:[#allocation4 + $0xee] sm:$0xff] }
 0x66b   : > { %v6402_v2 = vpop.f32.mrf.mxu2 }
 0x66c   : > { %v12375_v12 = vadd.f32 %v6402_v2, %v12276_v53  ;;  %v6605_v10 = vpop.f32.mrf.mxu3 }
 0x66d   : > { %v12378_v15 = vadd.f32 %v6605_v10, %v12255_v33  ;;  %v6495_v10 = vld [vmem:[#allocation4 + $0xe6] sm:$0xff] }
 0x66e   : > { %v6519_v30 = vpack.c.bf16 %v6496_v48, %v6495_v10 }
 0x671   : > { %8769 = vmatmul.msk.bf16.gmra.mxu3 %vm14731_vm6, %v6518_v32  ;;  %v6498_v32 = vld [vmem:[#allocation4 + $0xfe] sm:$0xff] }
 0x673   : > { %v6405_v1 = vpop.f32.mrf.mxu2 }
 0x674   : > { %v12382_v21 = vadd.f32 %v6405_v1, %v12284_v42  ;;  %v6608_v26 = vpop.f32.mrf.mxu3 }
 0x675   : > { %v12385_v25 = vadd.f32 %v6608_v26, %v12265_v17  ;;  %v6497_v26 = vld [vmem:[#allocation4 + $0xf6] sm:$0xff] }
 0x67b   : > { %v6407_v37 = vpop.f32.mrf.mxu2 }
 0x67c   : > { %v12388_v53 = vadd.f32 %v6407_v37, %v12294_v35  ;;  %v6610_v2 = vpop.f32.mrf.mxu3  ;;  %v6520_v35 = vpack.c.bf16 %v6498_v32, %v6497_v26  ;;  %v5953_v32 = vadd.f32 %v12187_v7, %v12157_v36 }
 0x67d   : > { %v12391_v33 = vadd.f32 %v6610_v2, %v12271_v0  ;;  %v6500_v0 = vld [vmem:[#allocation4 + $0x10e] sm:$0xff] }
 0x67e   : > { %v6521_v48 = vpack.c.bf16 %v6500_v0, %v6499_v34  ;;  %v6201_v26 = vadd.f32 %v12190_v60, %v5953_v32  ;;  %v5952_v34 = vadd.f32 %v12170_v41, %v12146_v62  ;;  %v12420_v62 = vld [vmem:[%s14495_s13] ss:$0 sm:$0xff] }
 0x680   : > { %v6449_v0 = vadd.f32 %v12322_v45, %v6201_v26 }
 0x681   : > { %8770 = vmatmul.msk.bf16.gmra.mxu3 %vm14731_vm6, %v6519_v30  ;;  %v6502_v30 = vld [vmem:[#allocation4 + $0x11e] sm:$0xff] }
 0x684   : > { %v6613_v19 = vpop.f32.mrf.mxu3 }
 0x685   : > { %v12395_v42 = vadd.f32 %v6613_v19, %v12279_v49  ;;  %v6501_v19 = vld [vmem:[#allocation4 + $0x116] sm:$0xff] }
 0x686   : > { %v6522_v43 = vpack.c.bf16 %v6502_v30, %v6501_v19  ;;  %v6503_v19 = vld [vmem:[#allocation4 + $0x126] sm:$0xff] }
 0x687   : > { %v6523_v60 = vpack.c.bf16 %v6504_v58, %v6503_v19 }
 0x68c   : > { %v6615_v17 = vpop.f32.mrf.mxu3 }
 0x68d   : > { %v12398_v1 = vadd.f32 %v6615_v17, %v12287_v29  ;;  %v5954_v17 = vadd.f32 %v12199_v54, %v12168_v27  ;;  %v5951_v27 = vadd.f32 %v12159_v51, %v12137_v16  ;;  %v12426_v54 = vld [vmem:[%s14496_s14] ss:$0 sm:$0xff] }
 0x691   : > { %8771 = vmatmul.msk.bf16.gmra.mxu3 %vm14731_vm6, %v6520_v35  ;;  %v6202_v35 = vadd.f32 %v12204_v8, %v5954_v17 }
 0x694   : > { %v6618_v37 = vpop.f32.mrf.mxu3 }
 0x69c   : > { %v6620_v2 = vpop.f32.mrf.mxu3 }
 0x6a1   : > { %8772 = vmatmul.msk.bf16.gmra.mxu3 %vm14731_vm6, %v6521_v48  ;;  %v6200_v48 = vadd.f32 %v12179_v47, %v5952_v34  ;;  %v6199_v47 = vadd.f32 %v12162_v14, %v5951_v27 }
 0x6a3   : > { %v6448_v7 = vadd.f32 %v12315_v39, %v6200_v48  ;;  %v6447_v51 = vadd.f32 %v12310_v40, %v6199_v47  ;;  %v6505_v40 = vld [vmem:[#allocation4 + $0x136] sm:$0xff] }
 0x6a4   : > { %v6623_v10 = vpop.f32.mrf.mxu3 }
 0x6ac   : > { %v6625_v49 = vpop.f32.mrf.mxu3 }
 0x6ad   : > { %v6696_v8 = vadd.f32 %v6625_v49, %v6448_v7  ;;  %v6694_v49 = vadd.f32 %v6620_v2, %v12303_v23 }
 0x6af   : > { %v6736_v58 = vmul.f32 %v12420_v62, %v6696_v8  ;;  %v6730_v8 = vmul.f32 %v12420_v62, %v12391_v33 }
 0x6b1   : > { %8773 = vmatmul.msk.bf16.gmra.mxu3 %vm14731_vm6, %v6522_v43  ;;  %v6450_v43 = vadd.f32 %v12327_v56, %v6202_v35  ;;  %v6695_v56 = vadd.f32 %v6623_v10, %v6447_v51  ;;  %v6776_v26 = vadd.f32 %v12426_v54, %v6736_v58  ;;  %v6506_v10 = vld [vmem:[#allocation4 + $0x13e] sm:$0x3f]  ;;  %v6693_v35 = vadd.f32 %v6618_v37, %v12297_v11 }
 0x6b2   : > { %v6524_v19 = vpack.c.bf16 %v6506_v10, %v6505_v40  ;;  %v6732_v11 = vmul.f32 %v12420_v62, %v12398_v1  ;;  %v6729_v51 = vmul.f32 %v12420_v62, %v12385_v25  ;;  %v6725_v40 = vmul.f32 %v12420_v62, %v12360_v20 }
 0x6b3   : > { %v6735_v17 = vmul.f32 %v12420_v62, %v6695_v56  ;;  %v6733_v23 = vmul.f32 %v12420_v62, %v6693_v35  ;;  %v6728_v56 = vmul.f32 %v12420_v62, %v12378_v15  ;;  %v6724_v35 = vmul.f32 %v12420_v62, %v12354_v13  ;;  %v12507_v13 = vld [vmem:[%s14484_s2] sm:$0x3] }
 0x6b4   : > { %v6628_v29 = vpop.f32.mrf.mxu3  ;;  %v6769_v33 = vadd.f32 %v12426_v54, %v6729_v51  ;;  %v6723_v20 = vmul.f32 %v12420_v62, %v12349_v28  ;;  %v12517_v28 = vperm.slane %v12507_v13, 0 }
 0x6b5   : > { %v6697_v30 = vadd.f32 %v6628_v29, %v6449_v0  ;;  %v6734_v0 = vmul.f32 %v12420_v62, %v6694_v49  ;;  %v6775_v48 = vadd.f32 %v12426_v54, %v6735_v17  ;;  %v6773_v37 = vadd.f32 %v12426_v54, %v6733_v23 }
 0x6b6   : > { %v6768_v25 = vadd.f32 %v12426_v54, %v6728_v56  ;;  %v6805_v49 = vmax.f32 %v6769_v33, 0.0  ;;  %v6726_v17 = vmul.f32 %v12420_v62, %v12365_v52  ;;  %v6765_v52 = vadd.f32 %v12426_v54, %v6725_v40 }
 0x6b7   : > { %v6737_v45 = vmul.f32 %v12420_v62, %v6697_v30  ;;  %v6774_v2 = vadd.f32 %v12426_v54, %v6734_v0  ;;  %v6809_v47 = vmax.f32 %v6773_v37, 0.0  ;;  %v6764_v23 = vadd.f32 %v12426_v54, %v6724_v35 }
 0x6b9   : > { %v6777_v14 = vadd.f32 %v12426_v54, %v6737_v45  ;;  %v6810_v27 = vmax.f32 %v6774_v2, 0.0  ;;  %v6801_v2 = vmax.f32 %v6765_v52, 0.0  ;;  %v6800_v37 = vmax.f32 %v6764_v23, 0.0 }
 0x6bb   : > { %v6813_v34 = vmax.f32 %v6777_v14, 0.0 }
 0x6bc   : > { %v6630_v36 = vpop.f32.mrf.mxu3 }
 0x6bd   : > { %v6698_v41 = vadd.f32 %v6630_v36, %v6450_v43  ;;  %v6812_v43 = vmax.f32 %v6776_v26, 0.0  ;;  %v6811_v36 = vmax.f32 %v6775_v48, 0.0  ;;  %v6804_v26 = vmax.f32 %v6768_v25, 0.0 }
 0x6be   : > { %v6835_v48 = vlaneseq }
 0x6bf   : > { %v6738_v16 = vmul.f32 %v12420_v62, %v6698_v41  ;;  %v6731_v41 = vmul.f32 %v12420_v62, %v12395_v42  ;;  %v6770_v42 = vadd.f32 %v12426_v54, %v6730_v8 }
 0x6c1   : > { %8774 = vmatmul.msk.bf16.gmra.mxu3 %vm14731_vm6, %v6523_v60  ;;  %v6778_v39 = vadd.f32 %v12426_v54, %v6738_v16  ;;  %v6772_v60 = vadd.f32 %v12426_v54, %v6732_v11  ;;  %v6771_v1 = vadd.f32 %v12426_v54, %v6731_v41  ;;  %v6806_v58 = vmax.f32 %v6770_v42, 0.0  ;;  %v12510_v11 = vpop.f32.mrf.mxu0  ;;  %v12519_v41 = vpop.f32.mrf.mxu1 }
 0x6c2   : > { %v14696_v42 = vmov 1.0  }
 0x6c3   : > { %v6814_v29 = vmax.f32 %v6778_v39, 0.0  ;;  %v6808_v45 = vmax.f32 %v6772_v60, 0.0  ;;  %v6807_v39 = vmax.f32 %v6771_v1, 0.0  ;;  %v12528_v1 = vpop.f32.mrf.mxu2 }
 0x6c4   : > { %v12435_v32 = vpop.f32.mrf.mxu3 }
 0x6c5   : > { %8849 = vmatpush.xpose.msk.msrb.mxu0 %vm14731_vm6, %v6814_v29  ;;  %v6727_v29 = vmul.f32 %v12420_v62, %v12372_v5  ;;  %v6766_v5 = vadd.f32 %v12426_v54, %v6726_v17 }
 0x6c7   : > { %v6767_v15 = vadd.f32 %v12426_v54, %v6727_v29  ;;  %v6802_v0 = vmax.f32 %v6766_v5, 0.0 }
 0x6c9   : > { %8850 = vmatpush.xpose.msk.msrb.mxu0 %vm14731_vm6, %v6813_v34  ;;  %v6803_v10 = vmax.f32 %v6767_v15, 0.0  ;;  %v12550_v56 = vpop.f32.mrf.mxu0 }
 0x6cb   : > { %v12582_v15 = vpop.f32.mrf.mxu2 }
 0x6cc   : > { %v12445_v30 = vpop.f32.mrf.mxu3 }
 0x6cd   : > { %8851 = vmatpush.xpose.msk.msrb.mxu0 %vm14731_vm6, %v6812_v43 }
 0x6d1   : > { %8775 = vmatmul.msk.bf16.gmra.mxu3 %vm14731_vm6, %v6524_v19  ;;  %8852 = vmatpush.xpose.msk.msrb.mxu0 %vm14731_vm6, %v6811_v36  ;;  %v12502_v36 = vshrl.u32 %v6835_v48, 7  ;;  %v5919_v52 = vpop.f32.mrf.mxu0 }
 0x6d3   : > { %v12526_v8 = vadd.s32 240, %v12502_v36  ;;  %v12533_v51 = vadd.s32 232, %v12502_v36  ;;  %v12564_v25 = vadd.s32 208, %v12502_v36  ;;  %v12602_v40 = vadd.s32 184, %v12502_v36 }
 0x6d4   : > { %v12455_v7 = vpop.f32.mrf.mxu3  ;;  %v12614_v35 = vadd.s32 176, %v12502_v36 }
 0x6d5   : > { %8853 = vmatpush.xpose.msk.msrb.mxu0 %vm14731_vm6, %v6810_v27  ;;  %v12514_v27 = vadd.s32 248, %v12502_v36  ;;  %15025 = vst [vmem:[#allocation93_spill] sm:$0xff] %v12526_v8  ;;  %vm14770_vm11 = vcmp.eq.s32.totalorder %v12526_v8, %v12517_v28  ;;  %vm14775_vm12 = vcmp.eq.s32.totalorder %v12533_v51, %v12517_v28  ;;  %vm14771_vm0 = vcmp.eq.s32.totalorder %v12564_v25, %v12517_v28  ;;  %v15049_v8 = vld [vmem:[#allocation63_spill] sm:$0xff] }
 0x6d6   : > { %15026 = vst [vmem:[#allocation130_spill] sm:$0xff] %v12533_v51  ;;  %vm14727_vm4 = vcmp.eq.s32.totalorder %v12602_v40, %v12517_v28  ;;  %vm14725_vm5 = vcmp.eq.s32.totalorder %v12614_v35, %v12517_v28 }
 0x6d7   : > { %15024 = vst [vmem:[#allocation129_spill] sm:$0xff] %v12514_v27  ;;  %vm14768_vm10 = vcmp.eq.s32.totalorder %v12514_v27, %v12517_v28 }
 0x6d8   : > { %15030 = vst [vmem:[#allocation99_spill] sm:$0xff] %v12564_v25  ;;  %v15047_v25 = vld [vmem:[#allocation115_spill] sm:$0xff] }
 0x6d9   : > { %8854 = vmatpush.xpose.msk.msrb.mxu0 %vm14731_vm6, %v6809_v47  ;;  %15033 = vst [vmem:[#allocation134_spill] sm:$0xff] %v12602_v40 }
 0x6da   : > { %15034 = vst [vmem:[#allocation105_spill] sm:$0xff] %v12614_v35 }
 0x6dc   : > { %v12465_v16 = vpop.f32.mrf.mxu3 }
 0x6dd   : > { %8855 = vmatpush.xpose.msk.msrb.mxu0 %vm14731_vm6, %v6808_v45 }
 0x6e1   : > { %8856 = vmatpush.xpose.msk.msrb.mxu0 %vm14731_vm6, %v6807_v39  ;;  %v12548_v39 = vadd.s32 216, %v12502_v36 }
 0x6e3   : > { %15028 = vst [vmem:[#allocation131_spill] sm:$0xff] %v12548_v39  ;;  %vm14773_vm15 = vcmp.eq.s32.totalorder %v12548_v39, %v12517_v28  ;;  %v15048_v39 = vmax.f32 %v15047_v25, 0.0 }
 0x6e4   : > { %v12475_v14 = vpop.f32.mrf.mxu3 }
 0x6e5   : > { %8857 = vmatpush.xpose.msk.msrb.mxu0 %vm14731_vm6, %v6806_v58  ;;  %v12556_v58 = vand.u32 127, %v6835_v48  ;;  %v12632_v48 = vadd.s32 160, %v12502_v36 }
 0x6e7   : > { %15029 = vst [vmem:[#allocation132_spill] sm:$0xff] %v12556_v58  ;;  %vm7093_vm14 = vcmp.eq.s32.totalorder %v12556_v58, %v12502_v36  ;;  %vm14677_vm8 = vcmp.eq.s32.totalorder %v12632_v48, %v12517_v28  ;;  %v15041_v58 = vmax.f32 %v11798_v4, 0.0 }
 0x6e8   : > { %v12580_v17 = vsel %vm7093_vm14, 1.0, %v15006_v31  ;;  %15036 = vst [vmem:[#allocation140_spill] sm:$0xff] %v12632_v48  ;;  %v5967_v31 = vadd.f32 %v5919_v52, %v12300_v44  ;;  %v15053_v52 = vld [vmem:[#allocation113_spill] sm:$0xff] }
 0x6e9   : > { %8858 = vmatpush.xpose.msk.msrb.mxu0 %vm14731_vm6, %v6805_v49  ;;  %v12566_v49 = vpop.f32.mrf.mxu1 }
 0x6ec   : > { %v12485_v34 = vpop.f32.mrf.mxu3 }
 0x6ed   : > { %8859 = vmatpush.xpose.msk.msrb.mxu0 %vm14731_vm6, %v6804_v26  ;;  %v12591_v26 = vadd.s32 192, %v12502_v36 }
 0x6ef   : > { %15032 = vst [vmem:[#allocation102_spill] sm:$0xff] %v12591_v26  ;;  %vm14729_vm3 = vcmp.eq.s32.totalorder %v12591_v26, %v12517_v28 }
 0x6f1   : > { %8860 = vmatpush.xpose.msk.msrb.mxu0 %vm14731_vm6, %v6803_v10 }
 0x6f4   : > { %v6648_v43 = vpop.f32.mrf.mxu3 }
 0x6f5   : > { %v12496_v19 = vadd.f32 %v6648_v43, %v12369_v38  ;;  %8861 = vmatpush.xpose.msk.msrb.mxu0 %vm14731_vm6, %v6802_v0  ;;  %v6763_v38 = vadd.f32 %v12426_v54, %v6723_v20  ;;  %v12623_v0 = vadd.s32 168, %v12502_v36  ;;  %v12634_v43 = vpop.f32.mrf.mxu2  ;;  %v12643_v20 = vadd.s32 152, %v12502_v36 }
 0x6f7   : > { %v6799_v45 = vmax.f32 %v6763_v38, 0.0  ;;  %15035 = vst [vmem:[#allocation108_spill] sm:$0xff] %v12623_v0  ;;  %vm14676_vm7 = vcmp.eq.s32.totalorder %v12623_v0, %v12517_v28  ;;  %vm14720_vm9 = vcmp.eq.s32.totalorder %v12643_v20, %v12517_v28  ;;  %v12663_v38 = vadd.s32 136, %v12502_v36 }
 0x6f8   : > { %15037 = vst [vmem:[#allocation141_spill] sm:$0xff] %v12643_v20  ;;  %v15042_v0 = vmax.f32 %v11779_v22, 0.0 }
 0x6f9   : > { %8862 = vmatpush.xpose.msk.msrb.mxu0 %vm14731_vm6, %v6801_v2  ;;  %v12654_v2 = vadd.s32 144, %v12502_v36  ;;  %15039 = vst [vmem:[#allocation143_spill] sm:$0xff] %v12663_v38 }
 0x6fb   : > { %15038 = vst [vmem:[#allocation142_spill] sm:$0xff] %v12654_v2  ;;  %vm14717_vm14 = vcmp.eq.s32.totalorder %v12654_v2, %v12517_v28 }
 0x6fc   : > { %v6650_v60 = vpop.f32.mrf.mxu3 }
 0x6fd   : > { %v12522_v47 = vadd.f32 %v6650_v60, %v12375_v12  ;;  %8863 = vmatpush.xpose.msk.msrb.mxu0 %vm14731_vm6, %v6800_v37  ;;  %v12539_v12 = vadd.s32 224, %v12502_v36  ;;  %v5921_v37 = vpop.f32.mrf.mxu0  ;;  %v12672_v60 = vadd.s32 128, %v12502_v36 }
 0x6ff   : > { %15027 = vst [vmem:[#allocation96_spill] sm:$0xff] %v12539_v12  ;;  %vm14774_vm13 = vcmp.eq.s32.totalorder %v12539_v12, %v12517_v28 }
 0x700   : > { %15040 = vst [vmem:[#allocation144_spill] sm:$0xff] %v12672_v60 }
 0x701   : > { %8864 = vmatpush.xpose.msk.msrb.mxu0 %vm14731_vm6, %v6799_v45 }
 0x704   : > { %v6653_v33 = vpop.f32.mrf.mxu3  ;;  %8865 = vmatmul.msk.f32.vlgmr.msrb.gmra.mxu0 %vm14731_vm6, %v12580_v17 }
 0x705   : > { %8904 = vmatpush.msk.msra.mxu0 %vm14768_vm10, %v14696_v42  ;;  %v12559_v29 = vadd.f32 %v6653_v33, %v12382_v21  ;;  %v12577_v21 = vadd.s32 200, %v12502_v36  ;;  %v6417_v33 = vpop.f32.mrf.mxu2  ;;  %v5924_v20 = vpop.f32.mrf.mxu0 }
 0x707   : > { %8905 = vmatpush.msk.msra.mxu0 %vm14770_vm11, %v14696_v42  ;;  %15031 = vst [vmem:[#allocation133_spill] sm:$0xff] %v12577_v21  ;;  %vm14772_vm1 = vcmp.eq.s32.totalorder %v12577_v21, %v12517_v28 }
 0x709   : > { %8906 = vmatpush.msk.msra.mxu0 %vm14775_vm12, %v14696_v42 }
 0x70b   : > { %8907 = vmatpush.msk.msra.mxu0 %vm14774_vm13, %v14696_v42 }
 0x70c   : > { %v6655_v5 = vpop.f32.mrf.mxu3 }
 0x70d   : > { %8908 = vmatpush.msk.msra.mxu0 %vm14773_vm15, %v14696_v42  ;;  %v12609_v10 = vadd.f32 %v6655_v5, %v12388_v53  ;;  %v6167_v53 = vpop.f32.mrf.mxu1  ;;  %v6420_v35 = vpop.f32.mrf.mxu2 }
 0x70e   : > { %v5926_v40 = vpop.f32.mrf.mxu0 }
 0x70f   : > { %8909 = vmatpush.msk.msra.mxu0 %vm14771_vm0, %v14696_v42 }
 0x711   : > { %8910 = vmatpush.msk.msra.mxu0 %vm14772_vm1, %v14696_v42 }
 0x713   : > { %8911 = vmatpush.msk.msra.mxu0 %vm14729_vm3, %v14696_v42 }
 0x714   : > { %v12645_v23 = vpop.f32.mrf.mxu3 }
 0x715   : > { %8912 = vmatpush.msk.msra.mxu0 %vm14727_vm4, %v14696_v42  ;;  %v6169_v45 = vpop.f32.mrf.mxu1 }
 0x717   : > { %8913 = vmatpush.msk.msra.mxu0 %vm14725_vm5, %v14696_v42 }
 0x719   : > { %8914 = vmatpush.msk.msra.mxu0 %vm14676_vm7, %v14696_v42  ;;  %vm14716_vm7 = vcmp.eq.s32.totalorder %v12663_v38, %v12517_v28  ;;  %v15043_v38 = vmax.f32 %v11761_v50, 0.0  ;;  %v12713_v50 = vpop.f32.mrf.mxu0 }
 0x71b   : > { %8915 = vmatpush.msk.msra.mxu0 %vm14677_vm8, %v14696_v42  ;;  %vm14715_vm8 = vcmp.eq.s32.totalorder %v12672_v60, %v12517_v28  ;;  %v15045_v60 = vld [vmem:[#allocation66_spill] sm:$0xff] }
 0x71c   : > { %v6660_v5 = vpop.f32.mrf.mxu3  ;;  %v15046_v21 = vmax.f32 %v15045_v60, 0.0 }
 0x71d   : > { %8916 = vmatpush.msk.msra.mxu0 %vm14720_vm9, %v14696_v42  ;;  %v6172_v2 = vpop.f32.mrf.mxu1 }
 0x71f   : > { %8917 = vmatpush.msk.msra.mxu0 %vm14717_vm14, %v14696_v42 }
 0x721   : > { %8918 = vmatpush.msk.msra.mxu0 %vm14716_vm7, %v14696_v42 }
 0x723   : > { %8919 = vmatpush.msk.msra.mxu0 %vm14715_vm8, %v14696_v42  ;;  %v15044_v42 = vmax.f32 %v11742_v61, 0.0 }
 0x724   : > { %v6663_v48 = vpop.f32.mrf.mxu3 }
 0x725   : > { %8980 = vmatpush.xpose.msk.msrb.mxu0 %vm1221_vm2, %v15041_v58  ;;  %v6174_v4 = vpop.f32.mrf.mxu1  ;;  %v6422_v58 = vpop.f32.mrf.mxu2 }
 0x729   : > { %8981 = vmatpush.xpose.msk.msrb.mxu0 %vm1221_vm2, %v15042_v0  ;;  %v5969_v0 = vadd.f32 %v5924_v20, %v12313_v24 }
 0x72b   : > { %v6217_v61 = vadd.f32 %v6172_v2, %v5969_v0  ;;  %v15051_v2 = vld [vmem:[#allocation114_spill] sm:$0xff] }
 0x72c   : > { %v6665_v26 = vpop.f32.mrf.mxu3  ;;  %v15052_v0 = vmax.f32 %v15051_v2, 0.0 }
 0x72d   : > { %8982 = vmatpush.xpose.msk.msrb.mxu0 %vm1221_vm2, %v15043_v38  ;;  %v5970_v38 = vadd.f32 %v5926_v40, %v12318_v6  ;;  %v12716_v12 = vpop.f32.mrf.mxu1  ;;  %v6465_v60 = vadd.f32 %v6420_v35, %v6217_v61  ;;  %v12722_v24 = vpop.f32.mrf.mxu2  ;;  %v15055_v61 = vld [vmem:[#allocation60_spill] sm:$0xff] }
 0x72f   : > { %v6218_v51 = vadd.f32 %v6174_v4, %v5970_v38 }
 0x731   : > { %8983 = vmatpush.xpose.msk.msrb.mxu0 %vm1221_vm2, %v15044_v42  ;;  %v5968_v42 = vadd.f32 %v5921_v37, %v12306_v46  ;;  %v6466_v20 = vadd.f32 %v6422_v58, %v6218_v51  ;;  %v6215_v46 = vadd.f32 %v6167_v53, %v5967_v31  ;;  %v5931_v51 = vpop.f32.mrf.mxu0 }
 0x733   : > { %v6216_v25 = vadd.f32 %v6169_v45, %v5968_v42  ;;  %v5966_v45 = vadd.f32 %v12550_v56, %v12290_v55  ;;  %v6463_v4 = vadd.f32 %v12634_v43, %v6215_v46  ;;  %v5965_v55 = vadd.f32 %v12510_v11, %v12282_v3  ;;  %v15057_v11 = vld [vmem:[#allocation7_spill] sm:$0xff] }
 0x734   : > { %v6668_v22 = vpop.f32.mrf.mxu3  ;;  %v15056_v42 = vmax.f32 %v15055_v61, 0.0 }
 0x735   : > { %8984 = vmatpush.xpose.msk.msrb.mxu0 %vm1221_vm2, %v15046_v21  ;;  %v15050_v21 = vmax.f32 %v15049_v8, 0.0  ;;  %v6464_v6 = vadd.f32 %v6417_v33, %v6216_v25  ;;  %v6214_v33 = vadd.f32 %v12566_v49, %v5966_v45  ;;  %v6179_v31 = vpop.f32.mrf.mxu1  ;;  %v6427_v56 = vpop.f32.mrf.mxu2  ;;  %v6213_v49 = vadd.f32 %v12519_v41, %v5965_v55 }
 0x737   : > { %v6712_v35 = vadd.f32 %v6665_v26, %v6464_v6  ;;  %v6711_v26 = vadd.f32 %v6663_v48, %v6463_v4  ;;  %v6462_v38 = vadd.f32 %v12582_v15, %v6214_v33  ;;  %v6461_v3 = vadd.f32 %v12528_v1, %v6213_v49 }
 0x738   : > { %v15058_v15 = vmax.f32 %v15057_v11, 0.0  ;;  %v6748_v4 = vmul.f32 %v12420_v62, %v12609_v10  ;;  %v6747_v10 = vmul.f32 %v12420_v62, %v12559_v29  ;;  %v6746_v29 = vmul.f32 %v12420_v62, %v12522_v47 }
 0x739   : > { %8985 = vmatpush.xpose.msk.msrb.mxu0 %vm1221_vm2, %v15048_v39  ;;  %v6713_v39 = vadd.f32 %v6668_v22, %v6465_v60  ;;  %v6752_v53 = vmul.f32 %v12420_v62, %v6712_v35  ;;  %v6710_v48 = vadd.f32 %v6660_v5, %v6462_v38  ;;  %v6751_v60 = vmul.f32 %v12420_v62, %v6711_v26 }
 0x73a   : > { %v6788_v61 = vadd.f32 %v12426_v54, %v6748_v4  ;;  %v15073_v4 = vld [vmem:[#allocation90_spill] sm:$0xff] }
 0x73b   : > { %v6753_v8 = vmul.f32 %v12420_v62, %v6713_v39  ;;  %v6709_v39 = vadd.f32 %v12645_v23, %v6461_v3  ;;  %v6750_v6 = vmul.f32 %v12420_v62, %v6710_v48  ;;  %v6791_v41 = vadd.f32 %v12426_v54, %v6751_v60  ;;  %v15061_v23 = vld [vmem:[#allocation54_spill] sm:$0xff] }
 0x73c   : > { %v6670_v27 = vpop.f32.mrf.mxu3  ;;  %v15062_v45 = vmax.f32 %v15061_v23, 0.0 }
 0x73d   : > { %8986 = vmatpush.xpose.msk.msrb.mxu0 %vm1221_vm2, %v15050_v21  ;;  %v6714_v40 = vadd.f32 %v6670_v27, %v6466_v20  ;;  %v15054_v27 = vmax.f32 %v15053_v52, 0.0  ;;  %v6793_v58 = vadd.f32 %v12426_v54, %v6753_v8  ;;  %v6792_v21 = vadd.f32 %v12426_v54, %v6752_v53  ;;  %v5934_v20 = vpop.f32.mrf.mxu0  ;;  %v6430_v46 = vpop.f32.mrf.mxu2  ;;  %v15063_v53 = vld [vmem:[#allocation51_spill] sm:$0xff] }
 0x73e   : > { %v6749_v35 = vmul.f32 %v12420_v62, %v6709_v39  ;;  %v6790_v8 = vadd.f32 %v12426_v54, %v6750_v6  ;;  %v15068_v6 = vld [vmem:[#allocation128_spill] sm:$0xff] }
 0x73f   : > { %v6754_v37 = vmul.f32 %v12420_v62, %v6714_v40  ;;  %v6829_v25 = vmax.f32 %v6793_v58, 0.0  ;;  %v6828_v5 = vmax.f32 %v6792_v21, 0.0  ;;  %v6182_v40 = vpop.f32.mrf.mxu1  ;;  %v15064_v58 = vmax.f32 %v15063_v53, 0.0  ;;  %v15065_v21 = vld [vmem:[#allocation112_spill] sm:$0xff] }
 0x740   : > { %v6826_v52 = vmax.f32 %v6790_v8, 0.0  ;;  %v6786_v8 = vadd.f32 %v12426_v54, %v6746_v29 }
 0x741   : > { %8987 = vmatpush.xpose.msk.msrb.mxu0 %vm1221_vm2, %v15052_v0  ;;  %v6794_v44 = vadd.f32 %v12426_v54, %v6754_v37  ;;  %v15059_v0 = vld [vmem:[#allocation57_spill] sm:$0xff]  ;;  %v6827_v37 = vmax.f32 %v6791_v41, 0.0 }
 0x742   : > { %v15060_v1 = vmax.f32 %v15059_v0, 0.0  ;;  %v15070_v0 = vld [vmem:[#allocation124_spill] sm:$0xff]  ;;  %v6822_v53 = vmax.f32 %v6786_v8, 0.0  ;;  %v12855_v8 = vadd.s32 112, %v12502_v36 }
 0x743   : > { %v6830_v22 = vmax.f32 %v6794_v44, 0.0  ;;  %v6789_v44 = vadd.f32 %v12426_v54, %v6749_v35 }
 0x744   : > { %v12742_v43 = vpop.f32.mrf.mxu3 }
 0x745   : > { %8988 = vmatpush.xpose.msk.msrb.mxu0 %vm1221_vm2, %v15054_v27  ;;  %8866 = vmatpush.xpose.msk.msrb.mxu1 %vm14731_vm6, %v6830_v22  ;;  %v5973_v27 = vadd.f32 %v5934_v20, %v12337_v63  ;;  %v5936_v33 = vpop.f32.mrf.mxu0  ;;  %v5972_v63 = vadd.f32 %v5931_v51, %v12330_v59  ;;  %v6432_v49 = vpop.f32.mrf.mxu2  ;;  %v6824_v59 = vmax.f32 %v6788_v61, 0.0  ;;  %v15067_v20 = vld [vmem:[#allocation84_spill] sm:$0xff] }
 0x746   : > { %v5974_v38 = vadd.f32 %v5936_v33, %v12342_v9  ;;  %v6208_v9 = vadd.f32 %v12262_v18, %v12258_v57  ;;  %v5971_v39 = vadd.f32 %v12713_v50, %v15067_v20  ;;  %v15071_v18 = vld [vmem:[#allocation48_spill] sm:$0xff]  ;;  %v6745_v50 = vmul.f32 %v12420_v62, %v12496_v19 }
 0x747   : > { %v6221_v22 = vadd.f32 %v6182_v40, %v5973_v27  ;;  %v6184_v55 = vpop.f32.mrf.mxu1  ;;  %v6220_v3 = vadd.f32 %v6179_v31, %v5972_v63  ;;  %v15069_v40 = vld [vmem:[#allocation81_spill] sm:$0xff]  ;;  %v15072_v47 = vmax.f32 %v15071_v18, 0.0  ;;  %v15075_v27 = vld [vmem:[#allocation123_spill] sm:$0xff]  ;;  %v15077_v61 = vld [vmem:[#allocation72_spill] sm:$0xff] }
 0x748   : > { %v6222_v48 = vadd.f32 %v6184_v55, %v5974_v38  ;;  %v6456_v41 = vadd.f32 %v15068_v6, %v6208_v9  ;;  %v6219_v31 = vadd.f32 %v12716_v12, %v5971_v39  ;;  %v15085_v18 = vld [vmem:[#allocation126_spill] sm:$0xff] }
 0x749   : > { %8989 = vmatpush.xpose.msk.msrb.mxu0 %vm1221_vm2, %v15056_v42  ;;  %8867 = vmatpush.xpose.msk.msrb.mxu1 %vm14731_vm6, %v6829_v25  ;;  %v6825_v42 = vmax.f32 %v6789_v44, 0.0  ;;  %v6469_v60 = vadd.f32 %v6430_v46, %v6221_v22  ;;  %v15066_v25 = vmax.f32 %v15065_v21, 0.0  ;;  %v6468_v46 = vadd.f32 %v6427_v56, %v6220_v3 }
 0x74a   : > { %v6470_v11 = vadd.f32 %v6432_v49, %v6222_v48  ;;  %v6704_v35 = vadd.f32 %v12485_v34, %v6456_v41  ;;  %v6467_v12 = vadd.f32 %v12722_v24, %v6219_v31  ;;  %v15080_v49 = vld [vmem:[#allocation78_spill] sm:$0xff] }
 0x74c   : > { %v6675_v2 = vpop.f32.mrf.mxu3 }
 0x74d   : > { %8990 = vmatpush.xpose.msk.msrb.mxu0 %vm1221_vm2, %v15058_v15  ;;  %8868 = vmatpush.xpose.msk.msrb.mxu1 %vm14731_vm6, %v6828_v5  ;;  %v6787_v15 = vadd.f32 %v12426_v54, %v6747_v10  ;;  %v6716_v23 = vadd.f32 %v6675_v2, %v6468_v46  ;;  %v6785_v2 = vadd.f32 %v12426_v54, %v6745_v50  ;;  %v15076_v10 = vld [vmem:[#allocation127_spill] sm:$0xff] }
 0x74e   : > { %v15084_v46 = vld [vmem:[#allocation119_spill] sm:$0xff] }
 0x74f   : > { %v6756_v22 = vmul.f32 %v12420_v62, %v6716_v23 }
 0x751   : > { %8991 = vmatpush.xpose.msk.msrb.mxu0 %vm1221_vm2, %v15060_v1  ;;  %8869 = vmatpush.xpose.msk.msrb.mxu1 %vm14731_vm6, %v6827_v37  ;;  %v6207_v1 = vadd.f32 %v15070_v0, %v15069_v40  ;;  %v6823_v37 = vmax.f32 %v6787_v15, 0.0  ;;  %v6796_v3 = vadd.f32 %v12426_v54, %v6756_v22  ;;  %v12841_v40 = vadd.s32 120, %v12502_v36 }
 0x752   : > { %v12844_v0 = vperm.slane %v12507_v13, 1 }
 0x753   : > { %v6455_v44 = vadd.f32 %v15073_v4, %v6207_v1  ;;  %v15083_v1 = vld [vmem:[#allocation18_spill] sm:$0xff] }
 0x754   : > { %v6678_v26 = vpop.f32.mrf.mxu3  ;;  %vm14718_vm8 = vcmp.eq.s32.totalorder %v12841_v40, %v12844_v0  ;;  %vm14719_vm7 = vcmp.eq.s32.totalorder %v12855_v8, %v12844_v0 }
 0x755   : > { %8992 = vmatpush.xpose.msk.msrb.mxu0 %vm1221_vm2, %v15062_v45  ;;  %8870 = vmatpush.xpose.msk.msrb.mxu1 %vm14731_vm6, %v6826_v52  ;;  %v6717_v51 = vadd.f32 %v6678_v26, %v6469_v60  ;;  %v15074_v52 = vld [vmem:[#allocation122_spill] sm:$0xff]  ;;  %v6703_v19 = vadd.f32 %v12475_v14, %v6455_v44  ;;  %v6744_v26 = vmul.f32 %v12420_v62, %v6704_v35  ;;  %v15079_v14 = vld [vmem:[#allocation24_spill] sm:$0xff]  ;;  %v12873_v44 = vadd.s32 96, %v12502_v36 }
 0x756   : > { %v6206_v33 = vadd.f32 %v15075_v27, %v15074_v52  ;;  %v6205_v48 = vadd.f32 %v15080_v49, %v15079_v14  ;;  %v12964_v49 = vadd.s32 32, %v12502_v36 }
 0x757   : > { %v6757_v56 = vmul.f32 %v12420_v62, %v6717_v51  ;;  %v6784_v21 = vadd.f32 %v12426_v54, %v6744_v26 }
 0x758   : > { %v6454_v24 = vadd.f32 %v15076_v10, %v6206_v33  ;;  %v12938_v10 = vadd.s32 272, %v12502_v36 }
 0x759   : > { %8993 = vmatpush.xpose.msk.msrb.mxu0 %vm1221_vm2, %v15064_v58  ;;  %8871 = vmatpush.xpose.msk.msrb.mxu1 %vm14731_vm6, %v6825_v42  ;;  %v6715_v58 = vadd.f32 %v12742_v43, %v6467_v12  ;;  %v6797_v55 = vadd.f32 %v12426_v54, %v6757_v56  ;;  %v15078_v42 = vld [vmem:[#allocation75_spill] sm:$0xff]  ;;  %v6743_v43 = vmul.f32 %v12420_v62, %v6703_v19  ;;  %v6820_v6 = vmax.f32 %v6784_v21, 0.0 }
 0x75a   : > { %v5956_v63 = vadd.f32 %v15078_v42, %v15077_v61  ;;  %v6702_v60 = vadd.f32 %v12465_v16, %v6454_v24  ;;  %v12861_v56 = vadd.s32 104, %v12502_v36  ;;  %v12947_v61 = vadd.s32 40, %v12502_v36 }
 0x75b   : > { %v6755_v9 = vmul.f32 %v12420_v62, %v6715_v58  ;;  %v6833_v29 = vmax.f32 %v6797_v55, 0.0  ;;  %v6783_v39 = vadd.f32 %v12426_v54, %v6743_v43  ;;  %v12924_v55 = vadd.s32 56, %v12502_v36 }
 0x75c   : > { %v6680_v5 = vpop.f32.mrf.mxu3  ;;  %v6742_v20 = vmul.f32 %v12420_v62, %v6702_v60  ;;  %vm14721_vm14 = vcmp.eq.s32.totalorder %v12861_v56, %v12844_v0  ;;  %v12951_v42 = vadd.s32 264, %v12502_v36  ;;  %vm14741_vm4 = vcmp.eq.s32.totalorder %v12938_v10, %v12517_v28 }
 0x75d   : > { %8994 = vmatpush.xpose.msk.msrb.mxu0 %vm1221_vm2, %v15066_v25  ;;  %v6718_v57 = vadd.f32 %v6680_v5, %v6470_v11  ;;  %8872 = vmatpush.xpose.msk.msrb.mxu1 %vm14731_vm6, %v6824_v59  ;;  %v6821_v25 = vmax.f32 %v6785_v2, 0.0  ;;  %v15081_v11 = vld [vmem:[#allocation87_spill] sm:$0xff]  ;;  %v15082_v59 = vld [vmem:[#allocation121_spill] sm:$0xff]  ;;  %v6795_v41 = vadd.f32 %v12426_v54, %v6755_v9  ;;  %v6832_v5 = vmax.f32 %v6796_v3, 0.0  ;;  %v15090_v9 = vld [vmem:[#allocation118_spill] sm:$0xff] }
 0x75e   : > { %v6453_v15 = vadd.f32 %v15081_v11, %v6205_v48  ;;  %v6204_v51 = vadd.f32 %v15082_v59, %v5956_v63  ;;  %v6782_v13 = vadd.f32 %v12426_v54, %v6742_v20  ;;  %v15089_v63 = vmov 0.0   ;;  %v15098_v20 = vld [vmem:[#allocation129_spill] sm:$0xff] }
 0x75f   : > { %v6758_v45 = vmul.f32 %v12420_v62, %v6718_v57  ;;  %v5955_v57 = vadd.f32 %v15084_v46, %v15083_v1  ;;  %v6831_v23 = vmax.f32 %v6795_v41, 0.0  ;;  %v12971_v48 = vadd.s32 256, %v12502_v36  ;;  %v15101_v41 = vld [vmem:[#allocation96_spill] sm:$0xff]  ;;  %v15103_v1 = vld [vmem:[#allocation99_spill] sm:$0xff]  ;;  %v15104_v46 = vld [vmem:[#allocation133_spill] sm:$0xff] }
 0x760   : > { %v6701_v16 = vadd.f32 %v12455_v7, %v6453_v15  ;;  %v15086_v7 = vld [vmem:[#allocation120_spill] sm:$0xff]  ;;  %v6818_v12 = vmax.f32 %v6782_v13, 0.0  ;;  %v12982_v60 = vadd.s32 24, %v12502_v36  ;;  %v12998_v43 = vadd.s32 16, %v12502_v36  ;;  %v15094_v15 = vld [vmem:[#allocation117_spill] sm:$0xff]  ;;  %v15111_v13 = vld [vmem:[#allocation142_spill] sm:$0xff] }
 0x761   : > { %8995 = vmatpush.xpose.msk.msrb.mxu0 %vm1221_vm2, %v15072_v47  ;;  %v6798_v34 = vadd.f32 %v12426_v54, %v6758_v45  ;;  %8873 = vmatpush.xpose.msk.msrb.mxu1 %vm14731_vm6, %v6823_v37  ;;  %v6452_v47 = vadd.f32 %v15085_v18, %v6204_v51  ;;  %v6203_v31 = vadd.f32 %v15086_v7, %v5955_v57  ;;  %v6819_v37 = vmax.f32 %v6783_v39, 0.0  ;;  %v15087_v45 = vld [vmem:[#allocation125_spill] sm:$0xff]  ;;  %v15096_v51 = vld [vmem:[#allocation116_spill] sm:$0xff]  ;;  %v15105_v57 = vld [vmem:[#allocation102_spill] sm:$0xff] }
 0x762   : > { %v6741_v50 = vmul.f32 %v12420_v62, %v6701_v16  ;;  %v15091_v3 = vmax.f32 %v15090_v9, 0.0  ;;  %v15095_v59 = vmax.f32 %v15094_v15, 0.0  ;;  %v15097_v16 = vmax.f32 %v15096_v51, 0.0  ;;  %v15099_v39 = vld [vmem:[#allocation93_spill] sm:$0xff]  ;;  %v15106_v18 = vld [vmem:[#allocation134_spill] sm:$0xff]  ;;  %v15108_v7 = vld [vmem:[#allocation108_spill] sm:$0xff] }
 0x763   : > { %v6834_v38 = vmax.f32 %v6798_v34, 0.0  ;;  %v6700_v35 = vadd.f32 %v12445_v30, %v6452_v47  ;;  %v6451_v4 = vadd.f32 %v15087_v45, %v6203_v31  ;;  %v15088_v30 = vmov 1.0   ;;  %v15107_v47 = vld [vmem:[#allocation105_spill] sm:$0xff]  ;;  %v15109_v31 = vld [vmem:[#allocation140_spill] sm:$0xff] }
 0x764   : > { %v6781_v33 = vadd.f32 %v12426_v54, %v6741_v50  ;;  %v12883_v34 = vadd.s32 88, %v12502_v36  ;;  %v15110_v50 = vld [vmem:[#allocation141_spill] sm:$0xff]  ;;  %v15114_v45 = vld [vmem:[#allocation144_spill] sm:$0xff] }
 0x765   : > { %8874 = vmatpush.xpose.msk.msrb.mxu1 %vm14731_vm6, %v6822_v53  ;;  %8883 = vmatpush.xpose.msk.msrb.mxu2 %vm14731_vm6, %v6834_v38  ;;  %v6699_v52 = vadd.f32 %v12435_v32, %v6451_v4  ;;  %v6740_v27 = vmul.f32 %v12420_v62, %v6700_v35  ;;  %v12893_v32 = vadd.s32 80, %v12502_v36  ;;  %v12904_v53 = vadd.s32 72, %v12502_v36 }
 0x766   : > { %v6817_v2 = vmax.f32 %v6781_v33, 0.0  ;;  %v6871_v38 = vadd.s32 280, %v12502_v36  ;;  %v15115_v33 = vld [vmem:[#allocation103_spill] sm:$0xff] }
 0x767   : > { %v6739_v19 = vmul.f32 %v12420_v62, %v6699_v52  ;;  %v6780_v26 = vadd.f32 %v12426_v54, %v6740_v27  ;;  %vm14723_vm9 = vcmp.eq.s32.totalorder %v12893_v32, %v12844_v0  ;;  %v12914_v62 = vadd.s32 64, %v12502_v36  ;;  %v13318_v52 = vld [vmem:[%s14489_s7] ss:$0 sm:$0xff] }
 0x768   : > { %vm6945_vm5 = vcmp.eq.s32.totalorder %v6871_v38, %v12517_v28  ;;  %vm6946_vm3 = vcmp.eq.s32.totalorder %v6871_v38, %v12844_v0 }
 0x769   : > { %8875 = vmatpush.xpose.msk.msrb.mxu1 %vm14731_vm6, %v6821_v25  ;;  %8884 = vmatpush.xpose.msk.msrb.mxu2 %vm14731_vm6, %v6833_v29  ;;  %v6779_v58 = vadd.f32 %v12426_v54, %v6739_v19  ;;  %v6816_v22 = vmax.f32 %v6780_v26, 0.0  ;;  %v12934_v54 = vadd.s32 48, %v12502_v36  ;;  %v12959_v14 = vsel %vm6945_vm5, 1.0, %v15089_v63  ;;  %v15092_v29 = vld [vmem:[#allocation69_spill] sm:$0xff] }
 0x76a   : > { %vm14733_vm5 = vcmp.eq.s32.totalorder %v12947_v61, %v12844_v0  ;;  %v13011_v21 = vsel %vm6946_vm3, 1.0, %v15089_v63  ;;  %v13016_v25 = vadd.s32 8, %v12502_v36  ;;  %vm14743_vm3 = vcmp.eq.s32.totalorder %v12938_v10, %v12844_v0  ;;  %v15116_v19 = vld [vmem:[#allocation45_spill] sm:$0xff] }
 0x76b   : > { %v6815_v24 = vmax.f32 %v6779_v58, 0.0  ;;  %v15093_v11 = vmax.f32 %v15092_v29, 0.0  ;;  %v15117_v26 = vmax.f32 %v15116_v19, 0.0  ;;  %v15122_v58 = vld [vmem:[#allocation100_spill] sm:$0xff] }
 0x76c   : > { %v15138_v19 = vld [vmem:[#allocation36_spill] sm:$0xff] }
 0x76d   : > { %8876 = vmatpush.xpose.msk.msrb.mxu1 %vm14731_vm6, %v6820_v6  ;;  %8885 = vmatpush.xpose.msk.msrb.mxu2 %vm14731_vm6, %v6832_v5  ;;  %v15100_v6 = vld [vmem:[#allocation130_spill] sm:$0xff]  ;;  %v15102_v5 = vld [vmem:[#allocation131_spill] sm:$0xff] }
 0x771   : > { %8877 = vmatpush.xpose.msk.msrb.mxu1 %vm14731_vm6, %v6819_v37  ;;  %8886 = vmatpush.xpose.msk.msrb.mxu2 %vm14731_vm6, %v6831_v23  ;;  %v15112_v37 = vld [vmem:[#allocation132_spill] sm:$0xff]  ;;  %v15113_v23 = vld [vmem:[#allocation143_spill] sm:$0xff] }
 0x774   : > { %8887 = vmatmul.msk.f32.vlgmr.msrb.gmra.mxu2 %vm14731_vm6, %v12580_v17 }
 0x775   : > { %8925 = vmatpush.msk.msra.mxu2 %vm14718_vm8, %v15088_v30  ;;  %8878 = vmatpush.xpose.msk.msrb.mxu1 %vm14731_vm6, %v6818_v12  ;;  %vm14722_vm8 = vcmp.eq.s32.totalorder %v12873_v44, %v12844_v0  ;;  %v2051_v12 = vmul.f32 %v13318_v52, %v15115_v33 }
 0x777   : > { %8926 = vmatpush.msk.msra.mxu2 %vm14719_vm7, %v15088_v30  ;;  %vm14724_vm7 = vcmp.eq.s32.totalorder %v12883_v34, %v12844_v0 }
 0x779   : > { %8927 = vmatpush.msk.msra.mxu2 %vm14721_vm14, %v15088_v30  ;;  %8879 = vmatpush.xpose.msk.msrb.mxu1 %vm14731_vm6, %v6817_v2  ;;  %vm14726_vm14 = vcmp.eq.s32.totalorder %v12904_v53, %v12844_v0  ;;  %v13345_v2 = vld [vmem:[%s14490_s8] ss:$0 sm:$0xff] }
 0x77a   : > { %v2091_v38 = vadd.f32 %v13345_v2, %v2051_v12 }
 0x77b   : > { %8928 = vmatpush.msk.msra.mxu2 %vm14722_vm8, %v15088_v30  ;;  %vm14728_vm8 = vcmp.eq.s32.totalorder %v12914_v62, %v12844_v0 }
 0x77c   : > { %v2127_v15 = vmax.f32 %v2091_v38, 0.0 }
 0x77d   : > { %8929 = vmatpush.msk.msra.mxu2 %vm14724_vm7, %v15088_v30  ;;  %8880 = vmatpush.xpose.msk.msrb.mxu1 %vm14731_vm6, %v6816_v22  ;;  %vm14730_vm7 = vcmp.eq.s32.totalorder %v12924_v55, %v12844_v0  ;;  %v2050_v22 = vmul.f32 %v13318_v52, %v15122_v58  ;;  %v15145_v58 = vld [vmem:[#allocation91_spill] sm:$0xff] }
 0x77f   : > { %8930 = vmatpush.msk.msra.mxu2 %vm14723_vm9, %v15088_v30  ;;  %vm14744_vm9 = vcmask 1045504  }
 0x781   : > { %8931 = vmatpush.msk.msra.mxu2 %vm14726_vm14, %v15088_v30  ;;  %8881 = vmatpush.xpose.msk.msrb.mxu1 %vm14731_vm6, %v6815_v24  ;;  %vm14732_vm14 = vcmp.eq.s32.totalorder %v12934_v54, %v12844_v0  ;;  %v7224_v35 = vpop.f32.mrf.mxu0  ;;  %v15123_v24 = vld [vmem:[#allocation42_spill] sm:$0xff] }
 0x782   : > { %v15124_v9 = vmax.f32 %v15123_v24, 0.0 }
 0x783   : > { %8932 = vmatpush.msk.msra.mxu2 %vm14728_vm8, %v15088_v30  ;;  %vm14736_vm8 = vcmp.eq.s32.totalorder %v12951_v42, %v12517_v28 }
 0x784   : > { %8882 = vmatmul.msk.f32.vlgmr.msrb.gmra.mxu1 %vm14731_vm6, %v12580_v17  ;;  %vm14735_vm6 = vcmp.eq.s32.totalorder %v12971_v48, %v12517_v28 }
 0x785   : > { %8920 = vmatpush.msk.msra.mxu1 %vm14744_vm9, %v12959_v14  ;;  %8933 = vmatpush.msk.msra.mxu2 %vm14730_vm7, %v15088_v30  ;;  %vm14734_vm7 = vcmp.eq.s32.totalorder %v12964_v49, %v12844_v0 }
 0x787   : > { %8934 = vmatpush.msk.msra.mxu2 %vm14732_vm14, %v15088_v30  ;;  %8921 = vmatpush.msk.msra.mxu1 %vm14741_vm4, %v15088_v30  ;;  %vm14740_vm14 = vcmp.eq.s32.totalorder %v12982_v60, %v12844_v0  ;;  %vm14745_vm4 = vcmp.eq.s32.totalorder %v12883_v34, %v12517_v28 }
 0x789   : > { %8935 = vmatpush.msk.msra.mxu2 %vm14733_vm5, %v15088_v30  ;;  %8922 = vmatpush.msk.msra.mxu1 %vm14736_vm8, %v15088_v30  ;;  %vm14739_vm5 = vcmp.eq.s32.totalorder %v12998_v43, %v12844_v0  ;;  %vm14738_vm8 = vcmp.eq.s32.totalorder %v12502_v36, %v12844_v0 }
 0x78b   : > { %8936 = vmatpush.msk.msra.mxu2 %vm14734_vm7, %v15088_v30  ;;  %8923 = vmatpush.msk.msra.mxu1 %vm14735_vm6, %v15088_v30  ;;  %vm14742_vm7 = vcmp.eq.s32.totalorder %v12951_v42, %v12844_v0  ;;  %vm14737_vm6 = vcmp.eq.s32.totalorder %v13016_v25, %v12844_v0 }
 0x78d   : > { %8957 = vmatpush.msk.msrb.mxu1 %vm14744_vm9, %v13011_v21  ;;  %8937 = vmatpush.msk.msra.mxu2 %vm14740_vm14, %v15088_v30  ;;  %vm6899_vm14 = vcmp.eq.s32.totalorder %v12873_v44, %v12517_v28  ;;  %vm14748_vm9 = vcmp.eq.s32.totalorder %v12914_v62, %v12517_v28 }
 0x78f   : > { %8958 = vmatpush.msk.msrb.mxu1 %vm14743_vm3, %v15088_v30  ;;  %8938 = vmatpush.msk.msra.mxu2 %vm14739_vm5, %v15088_v30  ;;  %vm6901_vm5 = vcmp.eq.s32.totalorder %v12861_v56, %v12517_v28  ;;  %vm14747_vm3 = vcmp.eq.s32.totalorder %v12904_v53, %v12517_v28 }
 0x791   : > { %8959 = vmatpush.msk.msrb.mxu1 %vm14742_vm7, %v15088_v30  ;;  %8939 = vmatpush.msk.msra.mxu2 %vm14737_vm6, %v15088_v30  ;;  %vm6905_vm6 = vcmp.eq.s32.totalorder %v12841_v40, %v12517_v28  ;;  %vm14746_vm7 = vcmp.eq.s32.totalorder %v12893_v32, %v12517_v28 }
 0x792   : > { %8888 = vmatpush.msk.msrb.mxu3 %vm6905_vm6, %v15088_v30 }
 0x793   : > { %8940 = vmatpush.msk.msra.mxu2 %vm14738_vm8, %v15088_v30  ;;  %vm6903_vm8 = vcmp.eq.s32.totalorder %v12855_v8, %v12517_v28 }
 0x794   : > { %8889 = vmatpush.msk.msrb.mxu3 %vm6903_vm8, %v15088_v30  ;;  %7354 = vmatmul.f32.vlgmr.msra.gmra.mxu2 %v7224_v35 }
 0x795   : > { %8997 = vmatpush.xpose.msk.msrb.mxu2 %vm1221_vm2, %v15091_v3  ;;  %v15129_v3 = vld [vmem:[#allocation97_spill] sm:$0xff] }
 0x796   : > { %8890 = vmatpush.msk.msrb.mxu3 %vm6901_vm5, %v15088_v30  ;;  %v2049_v29 = vmul.f32 %v13318_v52, %v15129_v3 }
 0x798   : > { %8891 = vmatpush.msk.msrb.mxu3 %vm6899_vm14, %v15088_v30  ;;  %v2089_v33 = vadd.f32 %v13345_v2, %v2049_v29  ;;  %v15152_v29 = vld [vmem:[#allocation88_spill] sm:$0xff] }
 0x799   : > { %8998 = vmatpush.xpose.msk.msrb.mxu2 %vm1221_vm2, %v15093_v11  ;;  %v2090_v11 = vadd.f32 %v13345_v2, %v2050_v22  ;;  %v2047_v22 = vmul.f32 %v13318_v52, %v15145_v58  ;;  %v15165_v58 = vld [vmem:[#allocation82_spill] sm:$0xff] }
 0x79a   : > { %8892 = vmatpush.msk.msrb.mxu3 %vm14745_vm4, %v15088_v30  ;;  %vm14749_vm4 = vcmp.eq.s32.totalorder %v12924_v55, %v12517_v28  ;;  %v2125_v24 = vmax.f32 %v2089_v33, 0.0 }
 0x79b   : > { %v2126_v12 = vmax.f32 %v2090_v11, 0.0  ;;  %v2046_v11 = vmul.f32 %v13318_v52, %v15152_v29  ;;  %v15171_v29 = vld [vmem:[#allocation79_spill] sm:$0xff] }
 0x79c   : > { %8893 = vmatpush.msk.msrb.mxu3 %vm14746_vm7, %v15088_v30  ;;  %vm14750_vm7 = vcmp.eq.s32.totalorder %v12934_v54, %v12517_v28 }
 0x79d   : > { %8999 = vmatpush.xpose.msk.msrb.mxu2 %vm1221_vm2, %v15095_v59  ;;  %v15130_v59 = vld [vmem:[#allocation39_spill] sm:$0xff]  ;;  %v2086_v33 = vadd.f32 %v13345_v2, %v2046_v11  ;;  %v2043_v11 = vmul.f32 %v13318_v52, %v15171_v29  ;;  %v15183_v29 = vld [vmem:[#allocation70_spill] sm:$0xff] }
 0x79e   : > { %8894 = vmatpush.msk.msrb.mxu3 %vm14747_vm3, %v15088_v30  ;;  %vm14751_vm3 = vcmp.eq.s32.totalorder %v12947_v61, %v12517_v28  ;;  %v15131_v51 = vmax.f32 %v15130_v59, 0.0 }
 0x7a0   : > { %8895 = vmatpush.msk.msrb.mxu3 %vm14748_vm9, %v15088_v30  ;;  %vm14752_vm9 = vcmp.eq.s32.totalorder %v12964_v49, %v12517_v28 }
 0x7a1   : > { %9000 = vmatpush.xpose.msk.msrb.mxu2 %vm1221_vm2, %v15097_v16 }
 0x7a2   : > { %8896 = vmatpush.msk.msrb.mxu3 %vm14749_vm4, %v15088_v30  ;;  %vm14753_vm4 = vcmp.eq.s32.totalorder %v12982_v60, %v12517_v28 }
 0x7a4   : > { %8897 = vmatpush.msk.msrb.mxu3 %vm14750_vm7, %v15088_v30  ;;  %vm14754_vm7 = vcmp.eq.s32.totalorder %v12998_v43, %v12517_v28 }
 0x7a5   : > { %9018 = vmatpush.msk.msra.mxu2 %vm14768_vm10, %v15088_v30  ;;  %vm7400_vm10 = vcmp.eq.s32.totalorder %v15112_v37, %v13016_v25 }
 0x7a6   : > { %8898 = vmatpush.msk.msrb.mxu3 %vm14751_vm3, %v15088_v30  ;;  %vm14755_vm3 = vcmp.eq.s32.totalorder %v13016_v25, %v12517_v28  ;;  %v13283_v4 = vsel %vm7400_vm10, 1.0, %v15089_v63  ;;  %vm14776_vm10 = vcmask 244736  }
 0x7a7   : > { %9019 = vmatpush.msk.msra.mxu2 %vm14770_vm11, %v15088_v30  ;;  %vm6908_vm11 = vcmp.eq.s32.totalorder %v15114_v45, %v12844_v0 }
 0x7a8   : > { %8899 = vmatpush.msk.msrb.mxu3 %vm14752_vm9, %v15088_v30  ;;  %vm14756_vm9 = vcmp.eq.s32.totalorder %v12502_v36, %v12517_v28  ;;  %9001 = vmatmul.msk.f32.vlgmr.msrb.gmra.mxu2 %vm1221_vm2, %v13283_v4 }
 0x7a9   : > { %9020 = vmatpush.msk.msra.mxu2 %vm14775_vm12, %v15088_v30  ;;  %vm15136_vm12 = vcmp.eq.s32.totalorder %v12934_v54, %v12517_v28 }
 0x7aa   : > { %8900 = vmatpush.msk.msrb.mxu3 %vm14753_vm4, %v15088_v30  ;;  %vm14757_vm4 = vcmp.eq.s32.totalorder %v15098_v20, %v12844_v0 }
 0x7ab   : > { %9021 = vmatpush.msk.msra.mxu2 %vm14774_vm13, %v15088_v30  ;;  %vm15121_vm13 = vcmp.eq.s32.totalorder %v12893_v32, %v12517_v28 }
 0x7ac   : > { %8901 = vmatpush.msk.msrb.mxu3 %vm14754_vm7, %v15088_v30  ;;  %vm14758_vm7 = vcmp.eq.s32.totalorder %v15099_v39, %v12844_v0 }
 0x7ad   : > { %9022 = vmatpush.msk.msra.mxu2 %vm14773_vm15, %v15088_v30  ;;  %vm15120_vm15 = vcmp.eq.s32.totalorder %v15106_v18, %v12517_v28 }
 0x7ae   : > { %8902 = vmatpush.msk.msrb.mxu3 %vm14755_vm3, %v15088_v30  ;;  %vm14759_vm3 = vcmp.eq.s32.totalorder %v15100_v6, %v12844_v0 }
 0x7af   : > { %9023 = vmatpush.msk.msra.mxu2 %vm14771_vm0, %v15088_v30  ;;  %vm15118_vm0 = vcmp.eq.s32.totalorder %v15105_v57, %v12517_v28 }
 0x7b0   : > { %8903 = vmatpush.msk.msrb.mxu3 %vm14756_vm9, %v15088_v30  ;;  %vm14760_vm9 = vcmp.eq.s32.totalorder %v12971_v48, %v12844_v0 }
 0x7b1   : > { %8960 = vmatpush.msk.msrb.mxu1 %vm14760_vm9, %v15088_v30  ;;  %vm14764_vm9 = vcmp.eq.s32.totalorder %v15104_v46, %v12844_v0  ;;  %7294 = vmatmul.f32.vlgmr.msrb.gmra.mxu3 %v7224_v35  ;;  %v15137_v35 = vld [vmem:[#allocation94_spill] sm:$0xff] }
 0x7b2   : > { %8941 = vmatpush.msk.msra.mxu3 %vm14757_vm4, %v15088_v30  ;;  %vm14761_vm4 = vcmp.eq.s32.totalorder %v15101_v41, %v12844_v0  ;;  %9024 = vmatpush.msk.msra.mxu2 %vm14772_vm1, %v15088_v30  ;;  %vm15119_vm1 = vcmp.eq.s32.totalorder %v12883_v34, %v12517_v28 }
 0x7b4   : > { %8942 = vmatpush.msk.msra.mxu3 %vm14758_vm7, %v15088_v30  ;;  %vm14762_vm7 = vcmp.eq.s32.totalorder %v15102_v5, %v12844_v0  ;;  %9025 = vmatpush.msk.msra.mxu2 %vm15118_vm0, %v15088_v30  ;;  %vm15125_vm0 = vcmp.eq.s32.totalorder %v15107_v47, %v12517_v28 }
 0x7b6   : > { %8943 = vmatpush.msk.msra.mxu3 %vm14759_vm3, %v15088_v30  ;;  %vm14763_vm3 = vcmp.eq.s32.totalorder %v15103_v1, %v12844_v0  ;;  %9026 = vmatpush.msk.msra.mxu2 %vm15120_vm15, %v15088_v30  ;;  %vm15126_vm15 = vcmp.eq.s32.totalorder %v12904_v53, %v12517_v28 }
 0x7b8   : > { %8944 = vmatpush.msk.msra.mxu3 %vm14761_vm4, %v15088_v30  ;;  %vm14765_vm4 = vcmp.eq.s32.totalorder %v15105_v57, %v12844_v0  ;;  %9027 = vmatpush.msk.msra.mxu2 %vm15125_vm0, %v15088_v30  ;;  %vm15132_vm0 = vcmp.eq.s32.totalorder %v15109_v31, %v12517_v28 }
 0x7ba   : > { %8945 = vmatpush.msk.msra.mxu3 %vm14762_vm7, %v15088_v30  ;;  %vm6922_vm7 = vcmp.eq.s32.totalorder %v15106_v18, %v12844_v0 }
 0x7bc   : > { %8946 = vmatpush.msk.msra.mxu3 %vm14763_vm3, %v15088_v30  ;;  %vm14766_vm3 = vcmp.eq.s32.totalorder %v15107_v47, %v12844_v0 }
 0x7be   : > { %8947 = vmatpush.msk.msra.mxu3 %vm14764_vm9, %v15088_v30  ;;  %vm14767_vm9 = vcmp.eq.s32.totalorder %v15108_v7, %v12844_v0 }
 0x7c0   : > { %8948 = vmatpush.msk.msra.mxu3 %vm14765_vm4, %v15088_v30  ;;  %vm14769_vm4 = vcmp.eq.s32.totalorder %v15109_v31, %v12844_v0 }
 0x7c2   : > { %8949 = vmatpush.msk.msra.mxu3 %vm6922_vm7, %v15088_v30 }
 0x7c4   : > { %8950 = vmatpush.msk.msra.mxu3 %vm14766_vm3, %v15088_v30  ;;  %vm6914_vm3 = vcmp.eq.s32.totalorder %v15110_v50, %v12844_v0 }
 0x7c6   : > { %8951 = vmatpush.msk.msra.mxu3 %vm14767_vm9, %v15088_v30  ;;  %vm6912_vm9 = vcmp.eq.s32.totalorder %v15111_v13, %v12844_v0 }
 0x7c8   : > { %8952 = vmatpush.msk.msra.mxu3 %vm14769_vm4, %v15088_v30  ;;  %vm6910_vm4 = vcmp.eq.s32.totalorder %v15113_v23, %v12844_v0 }
 0x7ca   : > { %8953 = vmatpush.msk.msra.mxu3 %vm6914_vm3, %v15088_v30 }
 0x7cc   : > { %8954 = vmatpush.msk.msra.mxu3 %vm6912_vm9, %v15088_v30 }
 0x7ce   : > { %8955 = vmatpush.msk.msra.mxu3 %vm6910_vm4, %v15088_v30 }
 0x7d0   : > { %8956 = vmatpush.msk.msra.mxu3 %vm6908_vm11, %v15088_v30 }
 0x7d2   : > { %9002 = vmatpush.msk.msrb.mxu3 %vm6905_vm6, %v15088_v30 }
 0x7d4   : > { %9003 = vmatpush.msk.msrb.mxu3 %vm6903_vm8, %v15088_v30 }
 0x7d6   : > { %9004 = vmatpush.msk.msrb.mxu3 %vm6901_vm5, %v15088_v30 }
 0x7d8   : > { %9005 = vmatpush.msk.msrb.mxu3 %vm6899_vm14, %v15088_v30 }
 0x7da   : > { %9006 = vmatpush.msk.msrb.mxu3 %vm15119_vm1, %v15088_v30  ;;  %vm15128_vm1 = vcmp.eq.s32.totalorder %v12914_v62, %v12517_v28 }
 0x7dc   : > { %9007 = vmatpush.msk.msrb.mxu3 %vm15121_vm13, %v15088_v30  ;;  %vm15127_vm13 = vcmp.eq.s32.totalorder %v15108_v7, %v12517_v28 }
 0x7dd   : > { %9028 = vmatpush.msk.msra.mxu2 %vm15127_vm13, %v15088_v30  ;;  %vm15134_vm13 = vcmask 64512  }
 0x7de   : > { %9008 = vmatpush.msk.msrb.mxu3 %vm15126_vm15, %v15088_v30  ;;  %vm15133_vm15 = vcmp.eq.s32.totalorder %v12924_v55, %v12517_v28 }
 0x7df   : > { %9029 = vmatpush.msk.msra.mxu2 %vm15132_vm0, %v15088_v30  ;;  %vm15140_vm0 = vcmp.eq.s32.totalorder %v15111_v13, %v12517_v28 }
 0x7e0   : > { %9009 = vmatpush.msk.msrb.mxu3 %vm15128_vm1, %v15088_v30  ;;  %vm15135_vm1 = vcmp.eq.s32.totalorder %v15110_v50, %v12517_v28 }
 0x7e1   : > { %9030 = vmatpush.msk.msra.mxu2 %vm15135_vm1, %v15088_v30  ;;  %vm15144_vm1 = vcmp.eq.s32.totalorder %v12964_v49, %v12517_v28 }
 0x7e2   : > { %9010 = vmatpush.msk.msrb.mxu3 %vm15133_vm15, %v15088_v30  ;;  %vm15141_vm15 = vcmp.eq.s32.totalorder %v12947_v61, %v12517_v28 }
 0x7e3   : > { %9031 = vmatpush.msk.msra.mxu2 %vm15140_vm0, %v15088_v30  ;;  %vm15148_vm0 = vcmp.eq.s32.totalorder %v15114_v45, %v12517_v28 }
 0x7e4   : > { %9011 = vmatpush.msk.msrb.mxu3 %vm15136_vm12, %v15088_v30  ;;  %vm15142_vm12 = vmmov %vm15134_vm13 }
 0x7e6   : > { %9012 = vmatpush.msk.msrb.mxu3 %vm15141_vm15, %v15088_v30  ;;  %vm15149_vm15 = vcmask 1045504  }
 0x7e8   : > { %9013 = vmatpush.msk.msrb.mxu3 %vm15144_vm1, %v15088_v30  ;;  %vm15151_vm1 = vcmp.eq.s32.totalorder %v12938_v10, %v12844_v0 }
 0x7f7   : > { %v7264_v27 = vpop.f32.mrf.mxu2 }
 0x7f8   : > { %8924 = vmatmul.msk.f32.vlgmr.msra.gmra.mxu1 %vm14776_vm10, %v7264_v27 }
 0x7f9   : > { %8963 = vmatpush.xpose.msk.msra.mxu1 %vm1221_vm2, %v15117_v26  ;;  %v15139_v26 = vmax.f32 %v15138_v19, 0.0  ;;  %v15160_v19 = vld [vmem:[#allocation27_spill] sm:$0xff] }
 0x7fd   : > { %8964 = vmatpush.xpose.msk.msra.mxu1 %vm1221_vm2, %v15124_v9  ;;  %v15146_v9 = vld [vmem:[#allocation33_spill] sm:$0xff] }
 0x7fe   : > { %v15147_v3 = vmax.f32 %v15146_v9, 0.0  ;;  %v15166_v9 = vld [vmem:[#allocation139_spill] sm:$0xff] }
 0x800   : > { %8961 = vmatmul.msk.f32.vlgmr.msrb.gmra.mxu1 %vm14776_vm10, %v7264_v27  ;;  %v2048_v27 = vmul.f32 %v13318_v52, %v15137_v35 }
 0x801   : > { %8965 = vmatpush.xpose.msk.msra.mxu1 %vm1221_vm2, %v15131_v51  ;;  %v7244_v16 = vpop.f32.mrf.mxu1  ;;  %v15153_v51 = vld [vmem:[#allocation30_spill] sm:$0xff] }
 0x802   : > { %7314 = vmatmul.f32.vlgmr.msra.gmra.mxu0 %v7244_v16  ;;  %v2088_v38 = vadd.f32 %v13345_v2, %v2048_v27  ;;  %7374 = vmatmul.f32.vlgmr.msra.gmra.mxu3 %v7244_v16  ;;  %v15154_v35 = vmax.f32 %v15153_v51, 0.0  ;;  %v15159_v16 = vld [vmem:[#allocation85_spill] sm:$0xff] }
 0x803   : > { %9093 = vmatpush.xpose.msk.msra.mxu0 %vm15134_vm13, %v2127_v15  ;;  %vm15143_vm13 = vcmp.eq.s32.totalorder %v15113_v23, %v12517_v28  ;;  %v2087_v15 = vadd.f32 %v13345_v2, %v2047_v22  ;;  %v2045_v27 = vmul.f32 %v13318_v52, %v15159_v16  ;;  %v2044_v22 = vmul.f32 %v13318_v52, %v15165_v58  ;;  %v15172_v51 = vld [vmem:[#allocation21_spill] sm:$0xff]  ;;  %v15175_v16 = vld [vmem:[#allocation76_spill] sm:$0xff] }
 0x804   : > { %9032 = vmatpush.msk.msra.mxu2 %vm15143_vm13, %v15088_v30  ;;  %vm15150_vm13 = vcmp.eq.s32.totalorder %v12982_v60, %v12517_v28  ;;  %v2124_v59 = vmax.f32 %v2088_v38, 0.0  ;;  %v15179_v58 = vld [vmem:[#allocation73_spill] sm:$0xff] }
 0x805   : > { %8966 = vmatpush.xpose.msk.msra.mxu1 %vm1221_vm2, %v15139_v26  ;;  %9014 = vmatpush.msk.msrb.mxu3 %vm15150_vm13, %v15088_v30  ;;  %vm15157_vm13 = vcmp.eq.s32.totalorder %v13016_v25, %v12517_v28  ;;  %v15161_v26 = vmax.f32 %v15160_v19, 0.0  ;;  %v2085_v38 = vadd.f32 %v13345_v2, %v2045_v27  ;;  %v2042_v27 = vmul.f32 %v13318_v52, %v15175_v16  ;;  %v15176_v19 = vld [vmem:[#allocation138_spill] sm:$0xff]  ;;  %v15186_v16 = vld [vmem:[#allocation67_spill] sm:$0xff] }
 0x806   : > { %9033 = vmatpush.msk.msra.mxu2 %vm15148_vm0, %v15088_v30  ;;  %vm15155_vm0 = vcmp.eq.s32.totalorder %v12998_v43, %v12517_v28 }
 0x807   : > { %9094 = vmatpush.xpose.msk.msra.mxu0 %vm15142_vm12, %v2126_v12  ;;  %9015 = vmatpush.msk.msrb.mxu3 %vm15155_vm0, %v15088_v30  ;;  %v2123_v12 = vmax.f32 %v2087_v15, 0.0  ;;  %vm15162_vm0 = vcmp.eq.s32.totalorder %v12502_v36, %v12517_v28  ;;  %v2084_v15 = vadd.f32 %v13345_v2, %v2044_v22  ;;  %v2041_v22 = vmul.f32 %v13318_v52, %v15179_v58  ;;  %v15190_v58 = vld [vmem:[#allocation64_spill] sm:$0xff] }
 0x808   : > { %9071 = vmatpush.msk.msrb.mxu2 %vm15149_vm15, %v13011_v21  ;;  %vm15156_vm15 = vcmp.eq.s32.totalorder %v12951_v42, %v12844_v0 }
 0x809   : > { %8967 = vmatpush.xpose.msk.msra.mxu1 %vm1221_vm2, %v15147_v3  ;;  %9016 = vmatpush.msk.msrb.mxu3 %vm15157_vm13, %v15088_v30  ;;  %vm15164_vm13 = vcmp.eq.s32.totalorder %v12938_v10, %v12517_v28  ;;  %v15167_v3 = vmax.f32 %v15166_v9, 0.0  ;;  %v15180_v9 = vld [vmem:[#allocation15_spill] sm:$0xff] }
 0x80a   : > { %8996 = vmatmul.msk.f32.vlgmr.msrb.gmra.mxu0 %vm1221_vm2, %v13283_v4  ;;  %9072 = vmatpush.msk.msrb.mxu2 %vm15151_vm1, %v15088_v30  ;;  %vm15158_vm1 = vcmp.eq.s32.totalorder %v12971_v48, %v12844_v0 }
 0x80b   : > { %9095 = vmatpush.xpose.msk.msra.mxu0 %vm15142_vm12, %v2125_v24  ;;  %9017 = vmatpush.msk.msrb.mxu3 %vm15162_vm0, %v15088_v30  ;;  %v2122_v24 = vmax.f32 %v2086_v33, 0.0  ;;  %vm15169_vm0 = vmmov %vm15142_vm12  ;;  %v2083_v33 = vadd.f32 %v13345_v2, %v2043_v11  ;;  %v2040_v11 = vmul.f32 %v13318_v52, %v15183_v29  ;;  %v15194_v29 = vld [vmem:[#allocation61_spill] sm:$0xff] }
 0x80c   : > { %9073 = vmatpush.msk.msrb.mxu2 %vm15156_vm15, %v15088_v30  ;;  %vm15163_vm15 = vcmask 1045504  }
 0x80d   : > { %8968 = vmatpush.xpose.msk.msra.mxu1 %vm1221_vm2, %v15154_v35  ;;  %9034 = vmatpush.msk.msra.mxu3 %vm15163_vm15, %v12959_v14  ;;  %vm15170_vm15 = vcmp.eq.s32.totalorder %v12971_v48, %v12517_v28  ;;  %v15173_v35 = vmax.f32 %v15172_v51, 0.0  ;;  %v15184_v51 = vld [vmem:[#allocation12_spill] sm:$0xff] }
 0x80e   : > { %9074 = vmatpush.msk.msrb.mxu2 %vm15158_vm1, %v15088_v30  ;;  %vm15168_vm1 = vcmp.eq.s32.totalorder %v12951_v42, %v12517_v28 }
 0x80f   : > { %9096 = vmatpush.xpose.msk.msra.mxu0 %vm15142_vm12, %v2124_v59  ;;  %9035 = vmatpush.msk.msra.mxu3 %vm15164_vm13, %v15088_v30  ;;  %v2121_v59 = vmax.f32 %v2085_v38, 0.0  ;;  %vm15178_vm13 = vmmov %vm15169_vm0  ;;  %v2082_v38 = vadd.f32 %v13345_v2, %v2042_v27  ;;  %v2039_v27 = vmul.f32 %v13318_v52, %v15186_v16  ;;  %v15198_v16 = vld [vmem:[#allocation58_spill] sm:$0xff] }
 0x811   : > { %8969 = vmatpush.xpose.msk.msra.mxu1 %vm1221_vm2, %v15161_v26  ;;  %9036 = vmatpush.msk.msra.mxu3 %vm15168_vm1, %v15088_v30  ;;  %v15177_v26 = vmax.f32 %v15176_v19, 0.0  ;;  %vm15182_vm1 = vmmov %vm15169_vm0  ;;  %v15187_v19 = vld [vmem:[#allocation9_spill] sm:$0xff] }
 0x813   : > { %9097 = vmatpush.xpose.msk.msra.mxu0 %vm15142_vm12, %v2123_v12  ;;  %9037 = vmatpush.msk.msra.mxu3 %vm15170_vm15, %v15088_v30  ;;  %vm15174_vm12 = vmmov %vm15169_vm0  ;;  %v2120_v12 = vmax.f32 %v2084_v15, 0.0  ;;  %v2081_v15 = vadd.f32 %v13345_v2, %v2041_v22  ;;  %v2038_v22 = vmul.f32 %v13318_v52, %v15190_v58 }
 0x814   : > { %vm15189_vm15 = vmmov %vm15169_vm0 }
 0x815   : > { %8970 = vmatpush.xpose.msk.msra.mxu1 %vm1221_vm2, %v15167_v3  ;;  %v15181_v3 = vmax.f32 %v15180_v9, 0.0  ;;  %v15191_v9 = vld [vmem:[#allocation137_spill] sm:$0xff] }
 0x817   : > { %9098 = vmatpush.xpose.msk.msra.mxu0 %vm15169_vm0, %v2122_v24  ;;  %v2119_v24 = vmax.f32 %v2083_v33, 0.0  ;;  %v2080_v33 = vadd.f32 %v13345_v2, %v2040_v11  ;;  %v2037_v11 = vmul.f32 %v13318_v52, %v15194_v29  ;;  %v15215_v29 = vld [vmem:[#allocation41_spill] sm:$0xff] }
 0x819   : > { %8971 = vmatpush.xpose.msk.msra.mxu1 %vm1221_vm2, %v15173_v35  ;;  %v15185_v35 = vmax.f32 %v15184_v51, 0.0  ;;  %v15195_v51 = vld [vmem:[#allocation136_spill] sm:$0xff] }
 0x81b   : > { %9099 = vmatpush.xpose.msk.msra.mxu0 %vm15174_vm12, %v2121_v59  ;;  %v2118_v59 = vmax.f32 %v2082_v38, 0.0  ;;  %v2079_v38 = vadd.f32 %v13345_v2, %v2039_v27  ;;  %vm15193_vm12 = vmmov %vm15169_vm0  ;;  %v2036_v27 = vmul.f32 %v13318_v52, %v15198_v16  ;;  %v15224_v16 = vld [vmem:[#allocation32_spill] sm:$0xff] }
 0x81d   : > { %8972 = vmatpush.xpose.msk.msra.mxu1 %vm1221_vm2, %v15177_v26  ;;  %v15188_v26 = vmax.f32 %v15187_v19, 0.0  ;;  %v15199_v19 = vld [vmem:[#allocation135_spill] sm:$0xff]  ;;  %v2076_v58 = vadd.f32 %v13345_v2, %v2036_v27  ;;  %v15225_v27 = vmax.f32 %v15224_v16, 0.0 }
 0x81f   : > { %9100 = vmatpush.xpose.msk.msra.mxu0 %vm15178_vm13, %v2120_v12  ;;  %v2117_v12 = vmax.f32 %v2081_v15, 0.0  ;;  %v2078_v15 = vadd.f32 %v13345_v2, %v2038_v22  ;;  %vm15197_vm13 = vmmov %vm15169_vm0 }
 0x821   : > { %8973 = vmatpush.xpose.msk.msra.mxu1 %vm1221_vm2, %v15181_v3  ;;  %v15192_v3 = vmax.f32 %v15191_v9, 0.0  ;;  %v15212_v9 = vld [vmem:[#allocation44_spill] sm:$0xff] }
 0x823   : > { %9101 = vmatpush.xpose.msk.msra.mxu0 %vm15182_vm1, %v2119_v24  ;;  %v2116_v24 = vmax.f32 %v2080_v33, 0.0  ;;  %v2077_v33 = vadd.f32 %v13345_v2, %v2037_v11  ;;  %vm15201_vm1 = vcmp.eq.s32.totalorder %v15098_v20, %v12844_v0  ;;  %v15216_v11 = vmax.f32 %v15215_v29, 0.0 }
 0x825   : > { %8974 = vmatpush.xpose.msk.msra.mxu1 %vm1221_vm2, %v15185_v35  ;;  %v15196_v35 = vmax.f32 %v15195_v51, 0.0  ;;  %v2113_v22 = vmax.f32 %v2077_v33, 0.0  ;;  %v15222_v51 = vld [vmem:[#allocation35_spill] sm:$0xff]  ;;  %v15226_v33 = vld [vmem:[#allocation29_spill] sm:$0xff] }
 0x827   : > { %9102 = vmatpush.xpose.msk.msra.mxu0 %vm15169_vm0, %v2118_v59  ;;  %v2115_v59 = vmax.f32 %v2079_v38, 0.0  ;;  %v2112_v38 = vmax.f32 %v2076_v58, 0.0  ;;  %v15231_v58 = vld [vmem:[#allocation23_spill] sm:$0xff] }
 0x829   : > { %8975 = vmatpush.xpose.msk.msra.mxu1 %vm1221_vm2, %v15188_v26  ;;  %v15200_v26 = vmax.f32 %v15199_v19, 0.0  ;;  %v15228_v19 = vld [vmem:[#allocation26_spill] sm:$0xff] }
 0x82b   : > { %9103 = vmatpush.xpose.msk.msra.mxu0 %vm15189_vm15, %v2117_v12  ;;  %v2114_v12 = vmax.f32 %v2078_v15, 0.0  ;;  %vm15202_vm15 = vcmp.eq.s32.totalorder %v15099_v39, %v12844_v0  ;;  %v15219_v15 = vld [vmem:[#allocation38_spill] sm:$0xff] }
 0x82d   : > { %8976 = vmatpush.xpose.msk.msra.mxu1 %vm1221_vm2, %v15192_v3  ;;  %v15213_v3 = vmax.f32 %v15212_v9, 0.0 }
 0x82f   : > { %9104 = vmatpush.xpose.msk.msra.mxu0 %vm15193_vm12, %v2116_v24  ;;  %vm15203_vm12 = vmmov %vm15169_vm0 }
 0x831   : > { %8977 = vmatpush.xpose.msk.msra.mxu1 %vm1221_vm2, %v15196_v35  ;;  %v15223_v35 = vmax.f32 %v15222_v51, 0.0 }
 0x833   : > { %9105 = vmatpush.xpose.msk.msra.mxu0 %vm15197_vm13, %v2115_v59  ;;  %vm15204_vm13 = vcmp.eq.s32.totalorder %v15100_v6, %v12844_v0  ;;  %v15220_v59 = vmax.f32 %v15219_v15, 0.0 }
 0x835   : > { %8978 = vmatpush.xpose.msk.msra.mxu1 %vm1221_vm2, %v15200_v26  ;;  %v15229_v26 = vmax.f32 %v15228_v19, 0.0 }
 0x837   : > { %9106 = vmatpush.xpose.msk.msra.mxu0 %vm15169_vm0, %v2114_v12  ;;  %v15227_v12 = vmax.f32 %v15226_v33, 0.0 }
 0x838   : > { %8979 = vmatmul.msk.f32.vlgmr.msra.gmra.mxu1 %vm1221_vm2, %v13283_v4  ;;  %vm15205_vm2 = vcmp.eq.s32.totalorder %v15101_v41, %v12844_v0  ;;  %v15207_v4 = vld [vmem:[#allocation47_spill] sm:$0xff] }
 0x839   : > { %9055 = vmatpush.msk.msrb.mxu1 %vm15201_vm1, %v15088_v30  ;;  %vm7995_vm1 = vcmask 195584   ;;  %v15208_v24 = vmax.f32 %v15207_v4, 0.0 }
 0x83b   : > { %9056 = vmatpush.msk.msrb.mxu1 %vm15202_vm15, %v15088_v30  ;;  %9107 = vmatpush.xpose.msk.msra.mxu0 %vm15203_vm12, %v2113_v22  ;;  %vm15206_vm15 = vcmp.eq.s32.totalorder %v15102_v5, %v12844_v0  ;;  %vm15209_vm12 = vcmp.eq.s32.totalorder %v15103_v1, %v12844_v0  ;;  %v15232_v22 = vmax.f32 %v15231_v58, 0.0  ;;  %v7295_v58 = vpop.f32.mrf.mxu3 }
 0x83d   : > { %9057 = vmatpush.msk.msrb.mxu1 %vm15204_vm13, %v15088_v30  ;;  %vm15210_vm13 = vmmov %vm15169_vm0 }
 0x83f   : > { %9058 = vmatpush.msk.msrb.mxu1 %vm15205_vm2, %v15088_v30  ;;  %9108 = vmatpush.xpose.msk.msra.mxu0 %vm15169_vm0, %v2112_v38  ;;  %vm15211_vm2 = vcmp.eq.s32.totalorder %v15104_v46, %v12844_v0  ;;  %vm15214_vm0 = vcmp.eq.s32.totalorder %v15105_v57, %v12844_v0  ;;  %v15235_v38 = vld [vmem:[#allocation20_spill] sm:$0xff] }
 0x840   : > { %v15236_v4 = vmax.f32 %v15235_v38, 0.0 }
 0x841   : > { %9059 = vmatpush.msk.msrb.mxu1 %vm15206_vm15, %v15088_v30  ;;  %vm15217_vm15 = vcmp.eq.s32.totalorder %v15107_v47, %v12844_v0 }
 0x842   : > { %9109 = vmatmul.msk.f32.vlgmr.msra.gmra.mxu0 %vm15210_vm13, %v12580_v17  ;;  %vm15221_vm13 = vcmp.eq.s32.totalorder %v15109_v31, %v12844_v0 }
 0x843   : > { %9190 = vmatpush.xpose.msk.msrb.mxu0 %vm7995_vm1, %v15208_v24  ;;  %9060 = vmatpush.msk.msrb.mxu1 %vm15209_vm12, %v15088_v30  ;;  %vm15218_vm12 = vcmp.eq.s32.totalorder %v15108_v7, %v12844_v0  ;;  %v15239_v24 = vld [vmem:[#allocation17_spill] sm:$0xff] }
 0x844   : > { %v15240_v9 = vmax.f32 %v15239_v24, 0.0  ;;  %v15262_v24 = vld [vmem:[#allocation52_spill] sm:$0xff] }
 0x845   : > { %9061 = vmatpush.msk.msrb.mxu1 %vm15211_vm2, %v15088_v30  ;;  %vm15230_vm2 = vcmp.eq.s32.totalorder %v12883_v34, %v12517_v28 }
 0x847   : > { %9191 = vmatpush.xpose.msk.msrb.mxu0 %vm7995_vm1, %v15213_v3  ;;  %9062 = vmatpush.msk.msrb.mxu1 %vm15214_vm0, %v15088_v30  ;;  %vm15233_vm0 = vcmp.eq.s32.totalorder %v12893_v32, %v12517_v28  ;;  %v15243_v3 = vld [vmem:[#allocation14_spill] sm:$0xff] }
 0x848   : > { %v15244_v29 = vmax.f32 %v15243_v3, 0.0 }
 0x849   : > { %9063 = vmatpush.msk.msrb.mxu1 %vm6922_vm7, %v15088_v30 }
 0x84b   : > { %9192 = vmatpush.xpose.msk.msrb.mxu0 %vm7995_vm1, %v15216_v11  ;;  %9064 = vmatpush.msk.msrb.mxu1 %vm15217_vm15, %v15088_v30  ;;  %vm15234_vm15 = vcmp.eq.s32.totalorder %v12904_v53, %v12517_v28  ;;  %v15247_v11 = vld [vmem:[#allocation11_spill] sm:$0xff] }
 0x84c   : > { %v15248_v15 = vmax.f32 %v15247_v11, 0.0 }
 0x84d   : > { %9065 = vmatpush.msk.msrb.mxu1 %vm15218_vm12, %v15088_v30  ;;  %vm15237_vm12 = vcmp.eq.s32.totalorder %v12914_v62, %v12517_v28 }
 0x84f   : > { %9193 = vmatpush.xpose.msk.msrb.mxu0 %vm7995_vm1, %v15220_v59  ;;  %9066 = vmatpush.msk.msrb.mxu1 %vm15221_vm13, %v15088_v30  ;;  %vm15238_vm13 = vcmp.eq.s32.totalorder %v12924_v55, %v12517_v28  ;;  %v15251_v59 = vld [vmem:[#allocation8_spill] sm:$0xff] }
 0x850   : > { %v15252_v51 = vmax.f32 %v15251_v59, 0.0 }
 0x851   : > { %9067 = vmatpush.msk.msrb.mxu1 %vm6914_vm3, %v15088_v30 }
 0x853   : > { %9194 = vmatpush.xpose.msk.msrb.mxu0 %vm7995_vm1, %v15223_v35  ;;  %9068 = vmatpush.msk.msrb.mxu1 %vm6912_vm9, %v15088_v30  ;;  %v15254_v35 = vld [vmem:[#allocation6_spill] sm:$0xff] }
 0x854   : > { %v15255_v16 = vmax.f32 %v15254_v35, 0.0  ;;  %v15270_v35 = vld [vmem:[#allocation46_spill] sm:$0xff] }
 0x855   : > { %9069 = vmatpush.msk.msrb.mxu1 %vm6910_vm4, %v15088_v30 }
 0x857   : > { %9195 = vmatpush.xpose.msk.msrb.mxu0 %vm7995_vm1, %v15225_v27  ;;  %9070 = vmatpush.msk.msrb.mxu1 %vm6908_vm11, %v15088_v30  ;;  %v15256_v27 = vld [vmem:[#allocation5_spill] sm:$0xff] }
 0x858   : > { %v15257_v33 = vmax.f32 %v15256_v27, 0.0 }
 0x859   : > { %9115 = vmatpush.msk.msra.mxu1 %vm6905_vm6, %v15088_v30 }
 0x85b   : > { %9196 = vmatpush.xpose.msk.msrb.mxu0 %vm7995_vm1, %v15227_v12  ;;  %9116 = vmatpush.msk.msra.mxu1 %vm6903_vm8, %v15088_v30  ;;  %v15259_v12 = vld [vmem:[#allocation55_spill] sm:$0xff] }
 0x85c   : > { %v2035_v19 = vmul.f32 %v13318_v52, %v15259_v12  ;;  %v7355_v12 = vpop.f32.mrf.mxu2 }
 0x85d   : > { %9117 = vmatpush.msk.msra.mxu1 %vm6901_vm5, %v15088_v30 }
 0x85e   : > { %v2075_v3 = vadd.f32 %v13345_v2, %v2035_v19  ;;  %v15275_v19 = vld [vmem:[#allocation43_spill] sm:$0xff] }
 0x85f   : > { %9197 = vmatpush.xpose.msk.msrb.mxu0 %vm7995_vm1, %v15229_v26  ;;  %9118 = vmatpush.msk.msra.mxu1 %vm6899_vm14, %v15088_v30 }
 0x860   : > { %v2111_v59 = vmax.f32 %v2075_v3, 0.0  ;;  %v15279_v3 = vld [vmem:[#allocation40_spill] sm:$0xff] }
 0x861   : > { %9119 = vmatpush.msk.msra.mxu1 %vm15230_vm2, %v15088_v30  ;;  %vm15241_vm2 = vcmp.eq.s32.totalorder %v12934_v54, %v12517_v28 }
 0x863   : > { %9198 = vmatpush.xpose.msk.msrb.mxu0 %vm7995_vm1, %v15232_v22  ;;  %9120 = vmatpush.msk.msra.mxu1 %vm15233_vm0, %v15088_v30  ;;  %vm15242_vm0 = vcmp.eq.s32.totalorder %v12947_v61, %v12517_v28 }
 0x865   : > { %9121 = vmatpush.msk.msra.mxu1 %vm15234_vm15, %v15088_v30  ;;  %vm15245_vm15 = vcmp.eq.s32.totalorder %v12964_v49, %v12517_v28 }
 0x867   : > { %9199 = vmatpush.xpose.msk.msrb.mxu0 %vm7995_vm1, %v15236_v4  ;;  %9122 = vmatpush.msk.msra.mxu1 %vm15237_vm12, %v15088_v30  ;;  %vm15246_vm12 = vcmp.eq.s32.totalorder %v12982_v60, %v12517_v28 }
 0x869   : > { %9123 = vmatpush.msk.msra.mxu1 %vm15238_vm13, %v15088_v30  ;;  %vm15249_vm13 = vcmp.eq.s32.totalorder %v12998_v43, %v12517_v28 }
 0x86b   : > { %9200 = vmatpush.xpose.msk.msrb.mxu0 %vm7995_vm1, %v15240_v9  ;;  %9124 = vmatpush.msk.msra.mxu1 %vm15241_vm2, %v15088_v30  ;;  %vm15250_vm2 = vcmp.eq.s32.totalorder %v13016_v25, %v12517_v28  ;;  %v2034_v9 = vmul.f32 %v13318_v52, %v15262_v24 }
 0x86d   : > { %9125 = vmatpush.msk.msra.mxu1 %vm15242_vm0, %v15088_v30  ;;  %vm15253_vm0 = vcmp.eq.s32.totalorder %v12502_v36, %v12517_v28 }
 0x86f   : > { %9201 = vmatpush.xpose.msk.msrb.mxu0 %vm7995_vm1, %v15244_v29  ;;  %9126 = vmatpush.msk.msra.mxu1 %vm15245_vm15, %v15088_v30  ;;  %vm15258_vm15 = vcmp.eq.s32.totalorder %v12841_v40, %v12844_v0  ;;  %v15265_v29 = vld [vmem:[#allocation49_spill] sm:$0xff] }
 0x870   : > { %v2033_v11 = vmul.f32 %v13318_v52, %v15265_v29  ;;  %v2030_v29 = vmul.f32 %v13318_v52, %v15279_v3 }
 0x871   : > { %9127 = vmatpush.msk.msra.mxu1 %vm15246_vm12, %v15088_v30  ;;  %vm15260_vm12 = vcmp.eq.s32.totalorder %v12855_v8, %v12844_v0 }
 0x872   : > { %v2073_v27 = vadd.f32 %v13345_v2, %v2033_v11 }
 0x873   : > { %9202 = vmatpush.xpose.msk.msrb.mxu0 %vm7995_vm1, %v15248_v15  ;;  %9128 = vmatpush.msk.msra.mxu1 %vm15249_vm13, %v15088_v30  ;;  %vm15261_vm13 = vcmp.eq.s32.totalorder %v12861_v56, %v12844_v0  ;;  %v2074_v15 = vadd.f32 %v13345_v2, %v2034_v9 }
 0x875   : > { %9129 = vmatpush.msk.msra.mxu1 %vm15250_vm2, %v15088_v30  ;;  %v7335_v38 = vpop.f32.mrf.mxu1  ;;  %vm15263_vm2 = vcmp.eq.s32.totalorder %v12873_v44, %v12844_v0 }
 0x877   : > { %9203 = vmatpush.xpose.msk.msrb.mxu0 %vm7995_vm1, %v15252_v51  ;;  %9130 = vmatpush.msk.msra.mxu1 %vm15253_vm0, %v15088_v30  ;;  %vm15264_vm0 = vcmp.eq.s32.totalorder %v12883_v34, %v12844_v0 }
 0x87b   : > { %9204 = vmatpush.xpose.msk.msrb.mxu0 %vm7995_vm1, %v15255_v16  ;;  %v2032_v16 = vmul.f32 %v13318_v52, %v15270_v35  ;;  %v2070_v35 = vadd.f32 %v13345_v2, %v2030_v29 }
 0x87d   : > { %v7395_v24 = vpop.f32.mrf.mxu1 }
 0x87f   : > { %9205 = vmatpush.xpose.msk.msrb.mxu0 %vm7995_vm1, %v15257_v33  ;;  %v7315_v26 = vpop.f32.mrf.mxu0  ;;  %v2110_v33 = vmax.f32 %v2074_v15, 0.0 }
 0x880   : > { %v7316_v22 = vadd.f32 %v7315_v26, %v7295_v58  ;;  %v2031_v26 = vmul.f32 %v13318_v52, %v15275_v19  ;;  %v2072_v58 = vadd.f32 %v13345_v2, %v2032_v16  ;;  %v2106_v19 = vmax.f32 %v2070_v35, 0.0  ;;  %v15296_v35 = vld [vmem:[#allocation22_spill] sm:$0xff] }
 0x882   : > { %v7336_v4 = vadd.f32 %v7335_v38, %v7316_v22  ;;  %v2109_v22 = vmax.f32 %v2073_v27, 0.0  ;;  %v2071_v11 = vadd.f32 %v13345_v2, %v2031_v26  ;;  %v2108_v15 = vmax.f32 %v2072_v58, 0.0  ;;  %v15287_v27 = vld [vmem:[#allocation34_spill] sm:$0xff]  ;;  %v15290_v26 = vld [vmem:[#allocation31_spill] sm:$0xff] }
 0x883   : > { %9266 = vmatpush.msk.msra.mxu0 %vm15258_vm15, %v15088_v30  ;;  %vm15266_vm15 = vcmp.eq.s32.totalorder %v12893_v32, %v12844_v0  ;;  %v2027_v58 = vmul.f32 %v13318_v52, %v15290_v26 }
 0x884   : > { %7398 = vst [vmem:[%s13755_s27] sm:$0xff] %v7336_v4  ;;  %v2107_v16 = vmax.f32 %v2071_v11, 0.0  ;;  %v15294_v11 = vld [vmem:[#allocation25_spill] sm:$0xff] }
 0x885   : > { %9267 = vmatpush.msk.msra.mxu0 %vm15260_vm12, %v15088_v30  ;;  %vm15267_vm12 = vcmask 64512   ;;  %v7375_v38 = vpop.f32.mrf.mxu3  ;;  %v2067_v3 = vadd.f32 %v13345_v2, %v2027_v58 }
 0x886   : > { %v7376_v4 = vadd.f32 %v7375_v38, %v7355_v12 }
 0x887   : > { %9268 = vmatpush.msk.msra.mxu0 %vm15261_vm13, %v15088_v30  ;;  %v7551_v51 = vpop.f32.mrf.mxu0  ;;  %vm15268_vm13 = vcmask 1045504  }
 0x888   : > { %7613 = vmatmul.f32.vlgmr.msra.gmra.mxu2 %v7551_v51  ;;  %7673 = vmatmul.f32.vlgmr.msrb.gmra.mxu1 %v7551_v51  ;;  %v7396_v9 = vadd.f32 %v7395_v24, %v7376_v4  ;;  %v7571_v4 = vpop.f32.mrf.mxu2  ;;  %v15292_v24 = vld [vmem:[#allocation28_spill] sm:$0xff] }
 0x889   : > { %9269 = vmatpush.msk.msra.mxu0 %vm15263_vm2, %v15088_v30  ;;  %9076 = vmatpush.xpose.msk.msra.mxu2 %vm15267_vm12, %v2111_v59  ;;  %vm15269_vm2 = vcmp.eq.s32.totalorder %v12904_v53, %v12844_v0  ;;  %v15283_v59 = vld [vmem:[#allocation37_spill] sm:$0xff] }
 0x88a   : > { %9147 = vmatpush.msk.msrb.mxu1 %vm15268_vm13, %v12959_v14  ;;  %vm15273_vm13 = vcmp.eq.s32.totalorder %v12951_v42, %v12517_v28  ;;  %7399 = vst [vmem:[%s13755_s27 + $0x8] sm:$0xff] %v7396_v9  ;;  %v2029_v51 = vmul.f32 %v13318_v52, %v15283_v59  ;;  %v2026_v9 = vmul.f32 %v13318_v52, %v15292_v24 }
 0x88b   : > { %9270 = vmatpush.msk.msra.mxu0 %vm15264_vm0, %v15088_v30  ;;  %vm15271_vm0 = vcmp.eq.s32.totalorder %v12938_v10, %v12517_v28 }
 0x88c   : > { %9148 = vmatpush.msk.msrb.mxu1 %vm15271_vm0, %v15088_v30  ;;  %vm15276_vm0 = vcmp.eq.s32.totalorder %v12971_v48, %v12517_v28  ;;  %v2069_v12 = vadd.f32 %v13345_v2, %v2029_v51  ;;  %v2066_v59 = vadd.f32 %v13345_v2, %v2026_v9  ;;  %v2103_v51 = vmax.f32 %v2067_v3, 0.0 }
 0x88d   : > { %9271 = vmatpush.msk.msra.mxu0 %vm15266_vm15, %v15088_v30  ;;  %vm15272_vm15 = vcmp.eq.s32.totalorder %v12914_v62, %v12844_v0  ;;  %9077 = vmatpush.xpose.msk.msra.mxu2 %vm15267_vm12, %v2110_v33  ;;  %v2028_v33 = vmul.f32 %v13318_v52, %v15287_v27 }
 0x88e   : > { %9149 = vmatpush.msk.msrb.mxu1 %vm15273_vm13, %v15088_v30  ;;  %vm15278_vm13 = vcmp.eq.s32.totalorder %v12947_v61, %v12844_v0  ;;  %v2105_v38 = vmax.f32 %v2069_v12, 0.0  ;;  %v15298_v12 = vld [vmem:[#allocation19_spill] sm:$0xff] }
 0x88f   : > { %9272 = vmatpush.msk.msra.mxu0 %vm15269_vm2, %v15088_v30  ;;  %vm15274_vm2 = vcmp.eq.s32.totalorder %v12924_v55, %v12844_v0 }
 0x890   : > { %9150 = vmatpush.msk.msrb.mxu1 %vm15276_vm0, %v15088_v30  ;;  %vm15281_vm0 = vmmov %vm15267_vm12  ;;  %9075 = vmatmul.msk.f32.vlgmr.msrb.gmra.mxu2 %vm14776_vm10, %v7571_v4 }
 0x891   : > { %9273 = vmatpush.msk.msra.mxu0 %vm15272_vm15, %v15088_v30  ;;  %vm15277_vm15 = vcmp.eq.s32.totalorder %v12934_v54, %v12844_v0  ;;  %9078 = vmatpush.xpose.msk.msra.mxu2 %vm15267_vm12, %v2109_v22  ;;  %vm15284_vm12 = vcmp.eq.s32.totalorder %v12998_v43, %v12844_v0  ;;  %v2068_v22 = vadd.f32 %v13345_v2, %v2028_v33  ;;  %v2102_v33 = vmax.f32 %v2066_v59, 0.0 }
 0x893   : > { %9274 = vmatpush.msk.msra.mxu0 %vm15274_vm2, %v15088_v30  ;;  %vm15280_vm2 = vcmp.eq.s32.totalorder %v12964_v49, %v12844_v0  ;;  %v2104_v29 = vmax.f32 %v2068_v22, 0.0  ;;  %v15300_v22 = vld [vmem:[#allocation16_spill] sm:$0xff] }
 0x895   : > { %9275 = vmatpush.msk.msra.mxu0 %vm15277_vm15, %v15088_v30  ;;  %9079 = vmatpush.xpose.msk.msra.mxu2 %vm15281_vm0, %v2108_v15  ;;  %vm15282_vm15 = vcmp.eq.s32.totalorder %v12982_v60, %v12844_v0  ;;  %v2025_v15 = vmul.f32 %v13318_v52, %v15294_v11 }
 0x897   : > { %9276 = vmatpush.msk.msra.mxu0 %vm15278_vm13, %v15088_v30  ;;  %vm15285_vm13 = vmmov %vm15281_vm0  ;;  %vm15288_vm0 = vcmp.eq.s32.totalorder %v12502_v36, %v12844_v0  ;;  %v2065_v27 = vadd.f32 %v13345_v2, %v2025_v15 }
 0x899   : > { %9277 = vmatpush.msk.msra.mxu0 %vm15280_vm2, %v15088_v30  ;;  %9080 = vmatpush.xpose.msk.msra.mxu2 %vm15285_vm13, %v2107_v16  ;;  %vm15286_vm2 = vcmp.eq.s32.totalorder %v13016_v25, %v12844_v0  ;;  %v2024_v16 = vmul.f32 %v13318_v52, %v15296_v35  ;;  %v2101_v58 = vmax.f32 %v2065_v27, 0.0 }
 0x89b   : > { %9278 = vmatpush.msk.msra.mxu0 %vm15282_vm15, %v15088_v30  ;;  %vm15289_vm15 = vmmov %vm15285_vm13  ;;  %v2064_v26 = vadd.f32 %v13345_v2, %v2024_v16 }
 0x89d   : > { %9279 = vmatpush.msk.msra.mxu0 %vm15284_vm12, %v15088_v30  ;;  %9081 = vmatpush.xpose.msk.msra.mxu2 %vm15289_vm15, %v2106_v19  ;;  %vm15291_vm12 = vmmov %vm15285_vm13  ;;  %v2023_v19 = vmul.f32 %v13318_v52, %v15298_v12  ;;  %v2100_v9 = vmax.f32 %v2064_v26, 0.0 }
 0x89e   : > { %vm15293_vm13 = vmmov %vm15291_vm12 }
 0x89f   : > { %9280 = vmatpush.msk.msra.mxu0 %vm15286_vm2, %v15088_v30  ;;  %vm15295_vm2 = vmmov %vm15291_vm12  ;;  %v2063_v24 = vadd.f32 %v13345_v2, %v2023_v19 }
 0x8a1   : > { %9281 = vmatpush.msk.msra.mxu0 %vm15288_vm0, %v15088_v30  ;;  %9082 = vmatpush.xpose.msk.msra.mxu2 %vm15291_vm12, %v2105_v38  ;;  %vm15297_vm0 = vmmov %vm15295_vm2  ;;  %v2022_v38 = vmul.f32 %v13318_v52, %v15300_v22  ;;  %v2099_v59 = vmax.f32 %v2063_v24, 0.0  ;;  %v15332_v24 = vld [vmem:[#allocation109_spill] sm:$0xff] }
 0x8a2   : > { %vm15299_vm15 = vmmov %vm15297_vm0 }
 0x8a3   : > { %vm15301_vm12 = vmmov %vm15297_vm0  ;;  %v2062_v15 = vadd.f32 %v13345_v2, %v2022_v38 }
 0x8a5   : > { %9083 = vmatpush.xpose.msk.msra.mxu2 %vm15293_vm13, %v2104_v29  ;;  %v15302_v29 = vld [vmem:[#allocation13_spill] sm:$0xff]  ;;  %vm15303_vm13 = vcmp.eq.s32.totalorder %v12841_v40, %v12844_v0  ;;  %v2098_v27 = vmax.f32 %v2062_v15, 0.0  ;;  %v15336_v15 = vld [vmem:[#allocation106_spill] sm:$0xff] }
 0x8a6   : > { %v2021_v11 = vmul.f32 %v13318_v52, %v15302_v29 }
 0x8a8   : > { %v2061_v16 = vadd.f32 %v13345_v2, %v2021_v11 }
 0x8a9   : > { %9084 = vmatpush.xpose.msk.msra.mxu2 %vm15295_vm2, %v2103_v51  ;;  %vm15304_vm2 = vcmp.eq.s32.totalorder %v12855_v8, %v12844_v0  ;;  %v15305_v51 = vld [vmem:[#allocation10_spill] sm:$0xff] }
 0x8aa   : > { %v2020_v35 = vmul.f32 %v13318_v52, %v15305_v51  ;;  %v2097_v12 = vmax.f32 %v2061_v16, 0.0 }
 0x8ad   : > { %9085 = vmatpush.xpose.msk.msra.mxu2 %vm15297_vm0, %v2102_v33  ;;  %v2060_v33 = vadd.f32 %v13345_v2, %v2020_v35 }
 0x8af   : > { %v2096_v19 = vmax.f32 %v2060_v33, 0.0 }
 0x8b1   : > { %9086 = vmatpush.xpose.msk.msra.mxu2 %vm15299_vm15, %v2101_v58  ;;  %vm15306_vm15 = vcmp.eq.s32.totalorder %v12861_v56, %v12844_v0  ;;  %v15327_v58 = vld [vmem:[#allocation110_spill] sm:$0xff] }
 0x8b2   : > { %v2054_v22 = vmul.f32 %v13318_v52, %v15327_v58  ;;  %v15388_v58 = vld [vmem:[#allocation83_spill] sm:$0xff] }
 0x8b4   : > { %v2094_v29 = vadd.f32 %v13345_v2, %v2054_v22  ;;  %v15389_v22 = vmax.f32 %v15388_v58, 0.0  ;;  %v15408_v58 = vld [vmem:[#allocation53_spill] sm:$0xff] }
 0x8b5   : > { %v7531_v3 = vpop.f32.mrf.mxu1  ;;  %9087 = vmatpush.xpose.msk.msra.mxu2 %vm15301_vm12, %v2100_v9  ;;  %vm15307_vm12 = vcmp.eq.s32.totalorder %v12873_v44, %v12844_v0  ;;  %v2053_v9 = vmul.f32 %v13318_v52, %v15332_v24 }
 0x8b6   : > { %7593 = vmatmul.f32.vlgmr.msrb.gmra.mxu3 %v7531_v3  ;;  %v2130_v35 = vmax.f32 %v2094_v29, 0.0 }
 0x8b7   : > { %9039 = vmatpush.msk.msrb.mxu3 %vm15303_vm13, %v15088_v30  ;;  %vm15308_vm13 = vmmov %vm15297_vm0  ;;  %v2093_v51 = vadd.f32 %v13345_v2, %v2053_v9  ;;  %v15392_v9 = vld [vmem:[#allocation77_spill] sm:$0xff] }
 0x8b8   : > { %v15393_v29 = vmax.f32 %v15392_v9, 0.0 }
 0x8b9   : > { %9040 = vmatpush.msk.msrb.mxu3 %vm15304_vm2, %v15088_v30  ;;  %9088 = vmatpush.xpose.msk.msra.mxu2 %vm15297_vm0, %v2099_v59  ;;  %vm15309_vm2 = vcmp.eq.s32.totalorder %v12883_v34, %v12844_v0  ;;  %vm15310_vm0 = vcmp.eq.s32.totalorder %v12893_v32, %v12844_v0  ;;  %v2052_v59 = vmul.f32 %v13318_v52, %v15336_v15  ;;  %v2129_v16 = vmax.f32 %v2093_v51, 0.0 }
 0x8bb   : > { %9041 = vmatpush.msk.msrb.mxu3 %vm15306_vm15, %v15088_v30  ;;  %vm15311_vm15 = vmmov %vm15308_vm13 }
 0x8bd   : > { %9042 = vmatpush.msk.msrb.mxu3 %vm15307_vm12, %v15088_v30  ;;  %9089 = vmatpush.xpose.msk.msra.mxu2 %vm15308_vm13, %v2098_v27  ;;  %vm15312_vm12 = vcmp.eq.s32.totalorder %v12904_v53, %v12844_v0  ;;  %vm15313_vm13 = vcmp.eq.s32.totalorder %v12914_v62, %v12844_v0 }
 0x8be   : > { %9038 = vmatmul.msk.f32.vlgmr.msra.gmra.mxu3 %vm14776_vm10, %v7571_v4  ;;  %vm15314_vm10 = vmmov %vm15311_vm15  ;;  %v15322_v4 = vld [vmem:[#allocation111_spill] sm:$0xff] }
 0x8bf   : > { %9043 = vmatpush.msk.msrb.mxu3 %vm15309_vm2, %v15088_v30  ;;  %vm15315_vm2 = vcmp.eq.s32.totalorder %v15098_v20, %v12844_v0  ;;  %v2055_v26 = vmul.f32 %v13318_v52, %v15322_v4  ;;  %v15386_v4 = vld [vmem:[#allocation86_spill] sm:$0xff] }
 0x8c1   : > { %9044 = vmatpush.msk.msrb.mxu3 %vm15310_vm0, %v15088_v30  ;;  %9090 = vmatpush.xpose.msk.msra.mxu2 %vm15311_vm15, %v2097_v12  ;;  %vm15316_vm0 = vcmp.eq.s32.totalorder %v12924_v55, %v12844_v0  ;;  %vm15317_vm15 = vmmov %vm15314_vm10  ;;  %v2095_v38 = vadd.f32 %v13345_v2, %v2055_v26  ;;  %v15384_v12 = vld [vmem:[#allocation89_spill] sm:$0xff]  ;;  %v15387_v26 = vmax.f32 %v15386_v4, 0.0 }
 0x8c3   : > { %9045 = vmatpush.msk.msrb.mxu3 %vm15312_vm12, %v15088_v30  ;;  %vm15318_vm12 = vcmp.eq.s32.totalorder %v12934_v54, %v12844_v0  ;;  %v2131_v11 = vmax.f32 %v2095_v38, 0.0  ;;  %v15390_v38 = vld [vmem:[#allocation80_spill] sm:$0xff] }
 0x8c4   : > { %v15391_v24 = vmax.f32 %v15390_v38, 0.0 }
 0x8c5   : > { %9046 = vmatpush.msk.msrb.mxu3 %vm15313_vm13, %v15088_v30  ;;  %9091 = vmatpush.xpose.msk.msra.mxu2 %vm15314_vm10, %v2096_v19  ;;  %vm15319_vm10 = vcmp.eq.s32.totalorder %v15099_v39, %v12844_v0  ;;  %vm15320_vm13 = vcmp.eq.s32.totalorder %v12947_v61, %v12844_v0  ;;  %v15385_v19 = vmax.f32 %v15384_v12, 0.0 }
 0x8c7   : > { %9047 = vmatpush.msk.msrb.mxu3 %vm15316_vm0, %v15088_v30  ;;  %vm15323_vm0 = vcmp.eq.s32.totalorder %v12964_v49, %v12844_v0 }
 0x8c8   : > { %9092 = vmatmul.msk.f32.vlgmr.msra.gmra.mxu2 %vm15317_vm15, %v12580_v17  ;;  %vm15324_vm15 = vcmp.eq.s32.totalorder %v15101_v41, %v12844_v0 }
 0x8c9   : > { %9168 = vmatpush.msk.msrb.mxu2 %vm15315_vm2, %v15088_v30  ;;  %9048 = vmatpush.msk.msrb.mxu3 %vm15318_vm12, %v15088_v30  ;;  %vm15321_vm2 = vcmp.eq.s32.totalorder %v15100_v6, %v12844_v0  ;;  %vm15325_vm12 = vcmp.eq.s32.totalorder %v12982_v60, %v12844_v0 }
 0x8cb   : > { %9169 = vmatpush.msk.msrb.mxu2 %vm15319_vm10, %v15088_v30  ;;  %9049 = vmatpush.msk.msrb.mxu3 %vm15320_vm13, %v15088_v30  ;;  %vm15326_vm10 = vcmp.eq.s32.totalorder %v15102_v5, %v12844_v0  ;;  %vm15328_vm13 = vcmp.eq.s32.totalorder %v12998_v43, %v12844_v0 }
 0x8cd   : > { %9170 = vmatpush.msk.msrb.mxu2 %vm15321_vm2, %v15088_v30  ;;  %9050 = vmatpush.msk.msrb.mxu3 %vm15323_vm0, %v15088_v30  ;;  %vm15329_vm2 = vcmp.eq.s32.totalorder %v15103_v1, %v12844_v0  ;;  %vm15330_vm0 = vcmp.eq.s32.totalorder %v13016_v25, %v12844_v0 }
 0x8cf   : > { %9171 = vmatpush.msk.msrb.mxu2 %vm15324_vm15, %v15088_v30  ;;  %9051 = vmatpush.msk.msrb.mxu3 %vm15325_vm12, %v15088_v30  ;;  %vm15331_vm15 = vcmp.eq.s32.totalorder %v15104_v46, %v12844_v0  ;;  %vm15333_vm12 = vcmp.eq.s32.totalorder %v12502_v36, %v12844_v0 }
 0x8d1   : > { %9172 = vmatpush.msk.msrb.mxu2 %vm15326_vm10, %v15088_v30  ;;  %9052 = vmatpush.msk.msrb.mxu3 %vm15328_vm13, %v15088_v30  ;;  %vm15334_vm10 = vcmp.eq.s32.totalorder %v15105_v57, %v12844_v0  ;;  %vm15335_vm13 = vcmask 64512  }
 0x8d3   : > { %9173 = vmatpush.msk.msrb.mxu2 %vm15329_vm2, %v15088_v30  ;;  %9053 = vmatpush.msk.msrb.mxu3 %vm15330_vm0, %v15088_v30  ;;  %vm15337_vm2 = vcmp.eq.s32.totalorder %v15107_v47, %v12844_v0  ;;  %vm15338_vm0 = vmmov %vm15335_vm13 }
 0x8d5   : > { %9174 = vmatpush.msk.msrb.mxu2 %vm15331_vm15, %v15088_v30  ;;  %9054 = vmatpush.msk.msrb.mxu3 %vm15333_vm12, %v15088_v30  ;;  %vm15339_vm15 = vcmp.eq.s32.totalorder %v15108_v7, %v12844_v0  ;;  %vm15340_vm12 = vcmp.eq.s32.totalorder %v15109_v31, %v12844_v0 }
 0x8d6   : > { %7653 = vmatmul.f32.vlgmr.msrb.gmra.mxu3 %v7531_v3  ;;  %v2092_v3 = vadd.f32 %v13345_v2, %v2052_v59  ;;  %v7844_v2 = vpop.f32.mrf.mxu0  ;;  %v15396_v59 = vld [vmem:[#allocation71_spill] sm:$0xff] }
 0x8d7   : > { %9175 = vmatpush.msk.msrb.mxu2 %vm15334_vm10, %v15088_v30  ;;  %9110 = vmatpush.xpose.msk.msra.mxu3 %vm15335_vm13, %v2131_v11  ;;  %vm15341_vm10 = vmmov %vm15338_vm0  ;;  %v15394_v11 = vld [vmem:[#allocation74_spill] sm:$0xff]  ;;  %v15397_v51 = vmax.f32 %v15396_v59, 0.0 }
 0x8d8   : > { %v2128_v52 = vmax.f32 %v2092_v3, 0.0  ;;  %vm15342_vm13 = vmmov %vm15338_vm0  ;;  %v15395_v15 = vmax.f32 %v15394_v11, 0.0 }
 0x8d9   : > { %9176 = vmatpush.msk.msrb.mxu2 %vm6922_vm7, %v15088_v30 }
 0x8db   : > { %9177 = vmatpush.msk.msrb.mxu2 %vm15337_vm2, %v15088_v30  ;;  %9111 = vmatpush.xpose.msk.msra.mxu3 %vm15338_vm0, %v2130_v35  ;;  %vm15343_vm2 = vcmp.eq.s32.totalorder %v15098_v20, %v12517_v28  ;;  %vm15344_vm0 = vcmp.eq.s32.totalorder %v15099_v39, %v12517_v28  ;;  %v15398_v35 = vld [vmem:[#allocation68_spill] sm:$0xff] }
 0x8dc   : > { %v15399_v3 = vmax.f32 %v15398_v35, 0.0 }
 0x8dd   : > { %9178 = vmatpush.msk.msrb.mxu2 %vm15339_vm15, %v15088_v30  ;;  %vm15345_vm15 = vmmov %vm15341_vm10 }
 0x8df   : > { %9179 = vmatpush.msk.msrb.mxu2 %vm15340_vm12, %v15088_v30  ;;  %9112 = vmatpush.xpose.msk.msra.mxu3 %vm15341_vm10, %v2129_v16  ;;  %vm15346_vm12 = vcmp.eq.s32.totalorder %v15100_v6, %v12517_v28  ;;  %vm15347_vm10 = vcmp.eq.s32.totalorder %v15101_v41, %v12517_v28  ;;  %v15400_v16 = vld [vmem:[#allocation65_spill] sm:$0xff] }
 0x8e1   : > { %9180 = vmatpush.msk.msrb.mxu2 %vm6914_vm3, %v15088_v30 }
 0x8e3   : > { %9181 = vmatpush.msk.msrb.mxu2 %vm6912_vm9, %v15088_v30  ;;  %9113 = vmatpush.xpose.msk.msra.mxu3 %vm15342_vm13, %v2128_v52  ;;  %vm15350_vm13 = vcmp.eq.s32.totalorder %v12883_v34, %v12517_v28  ;;  %v15401_v52 = vmax.f32 %v15400_v16, 0.0 }
 0x8e5   : > { %9182 = vmatpush.msk.msrb.mxu2 %vm6910_vm4, %v15088_v30 }
 0x8e6   : > { %9114 = vmatmul.msk.f32.vlgmr.msra.gmra.mxu3 %vm15345_vm15, %v12580_v17  ;;  %vm15355_vm15 = vcmp.eq.s32.totalorder %v15106_v18, %v12517_v28  ;;  %v15378_v17 = vld [vmem:[#allocation95_spill] sm:$0xff] }
 0x8e7   : > { %9131 = vmatpush.msk.msrb.mxu3 %vm15343_vm2, %v15088_v30  ;;  %9183 = vmatpush.msk.msrb.mxu2 %vm6908_vm11, %v15088_v30  ;;  %vm15352_vm2 = vcmp.eq.s32.totalorder %v12893_v32, %v12517_v28  ;;  %v15379_v27 = vmax.f32 %v15378_v17, 0.0 }
 0x8e8   : > { %7966 = vmatmul.f32.vlgmr.msrb.gmra.mxu2 %v7844_v2 }
 0x8e9   : > { %9132 = vmatpush.msk.msrb.mxu3 %vm15344_vm0, %v15088_v30  ;;  %9229 = vmatpush.msk.msra.mxu2 %vm6905_vm6, %v15088_v30  ;;  %vm15348_vm6 = vcmp.eq.s32.totalorder %v15102_v5, %v12517_v28  ;;  %vm15354_vm0 = vcmp.eq.s32.totalorder %v12904_v53, %v12517_v28 }
 0x8eb   : > { %9133 = vmatpush.msk.msrb.mxu3 %vm15346_vm12, %v15088_v30  ;;  %9230 = vmatpush.msk.msra.mxu2 %vm6903_vm8, %v15088_v30  ;;  %vm15349_vm8 = vcmp.eq.s32.totalorder %v15103_v1, %v12517_v28  ;;  %vm15356_vm12 = vcmp.eq.s32.totalorder %v12914_v62, %v12517_v28 }
 0x8ed   : > { %9134 = vmatpush.msk.msrb.mxu3 %vm15347_vm10, %v15088_v30  ;;  %9231 = vmatpush.msk.msra.mxu2 %vm6901_vm5, %v15088_v30  ;;  %vm15351_vm5 = vcmp.eq.s32.totalorder %v15104_v46, %v12517_v28  ;;  %vm15357_vm10 = vcmp.eq.s32.totalorder %v15107_v47, %v12517_v28 }
 0x8ef   : > { %9135 = vmatpush.msk.msrb.mxu3 %vm15348_vm6, %v15088_v30  ;;  %9232 = vmatpush.msk.msra.mxu2 %vm6899_vm14, %v15088_v30  ;;  %vm15353_vm14 = vcmp.eq.s32.totalorder %v15105_v57, %v12517_v28  ;;  %vm15358_vm6 = vcmp.eq.s32.totalorder %v12924_v55, %v12517_v28 }
 0x8f1   : > { %9136 = vmatpush.msk.msrb.mxu3 %vm15349_vm8, %v15088_v30  ;;  %9233 = vmatpush.msk.msra.mxu2 %vm15350_vm13, %v15088_v30  ;;  %vm15359_vm8 = vcmp.eq.s32.totalorder %v15108_v7, %v12517_v28  ;;  %vm15360_vm13 = vcmp.eq.s32.totalorder %v12934_v54, %v12517_v28 }
 0x8f3   : > { %9137 = vmatpush.msk.msrb.mxu3 %vm15351_vm5, %v15088_v30  ;;  %9234 = vmatpush.msk.msra.mxu2 %vm15352_vm2, %v15088_v30  ;;  %vm15361_vm5 = vcmp.eq.s32.totalorder %v15109_v31, %v12517_v28  ;;  %vm15362_vm2 = vcmp.eq.s32.totalorder %v12947_v61, %v12517_v28 }
 0x8f5   : > { %9138 = vmatpush.msk.msrb.mxu3 %vm15353_vm14, %v15088_v30  ;;  %9235 = vmatpush.msk.msra.mxu2 %vm15354_vm0, %v15088_v30  ;;  %vm15363_vm14 = vcmp.eq.s32.totalorder %v15110_v50, %v12517_v28  ;;  %vm15364_vm0 = vcmp.eq.s32.totalorder %v12964_v49, %v12517_v28 }
 0x8f7   : > { %9139 = vmatpush.msk.msrb.mxu3 %vm15355_vm15, %v15088_v30  ;;  %9236 = vmatpush.msk.msra.mxu2 %vm15356_vm12, %v15088_v30  ;;  %vm15365_vm15 = vcmp.eq.s32.totalorder %v15111_v13, %v12517_v28  ;;  %vm15366_vm12 = vcmp.eq.s32.totalorder %v12982_v60, %v12517_v28 }
 0x8f9   : > { %9140 = vmatpush.msk.msrb.mxu3 %vm15357_vm10, %v15088_v30  ;;  %9237 = vmatpush.msk.msra.mxu2 %vm15358_vm6, %v15088_v30  ;;  %vm15367_vm10 = vcmp.eq.s32.totalorder %v15113_v23, %v12517_v28  ;;  %vm15368_vm6 = vcmp.eq.s32.totalorder %v12998_v43, %v12517_v28 }
 0x8fb   : > { %9141 = vmatpush.msk.msrb.mxu3 %vm15359_vm8, %v15088_v30  ;;  %9238 = vmatpush.msk.msra.mxu2 %vm15360_vm13, %v15088_v30  ;;  %vm15369_vm8 = vcmp.eq.s32.totalorder %v15114_v45, %v12517_v28  ;;  %vm15370_vm13 = vcmask 1045504  }
 0x8fd   : > { %9142 = vmatpush.msk.msrb.mxu3 %vm15361_vm5, %v15088_v30  ;;  %9239 = vmatpush.msk.msra.mxu2 %vm15362_vm2, %v15088_v30  ;;  %vm15371_vm5 = vcmp.eq.s32.totalorder %v13016_v25, %v12517_v28  ;;  %vm15372_vm2 = vcmp.eq.s32.totalorder %v12938_v10, %v12844_v0 }
 0x8ff   : > { %9143 = vmatpush.msk.msrb.mxu3 %vm15363_vm14, %v15088_v30  ;;  %9240 = vmatpush.msk.msra.mxu2 %vm15364_vm0, %v15088_v30  ;;  %vm15373_vm14 = vcmp.eq.s32.totalorder %v12502_v36, %v12517_v28  ;;  %vm15374_vm0 = vmmov %vm15370_vm13 }
 0x901   : > { %9144 = vmatpush.msk.msrb.mxu3 %vm15365_vm15, %v15088_v30  ;;  %9241 = vmatpush.msk.msra.mxu2 %vm15366_vm12, %v15088_v30  ;;  %vm15375_vm15 = vcmp.eq.s32.totalorder %v12951_v42, %v12844_v0  ;;  %vm15376_vm12 = vcmp.eq.s32.totalorder %v12938_v10, %v12517_v28 }
 0x903   : > { %9145 = vmatpush.msk.msrb.mxu3 %vm15367_vm10, %v15088_v30  ;;  %9242 = vmatpush.msk.msra.mxu2 %vm15368_vm6, %v15088_v30  ;;  %vm15377_vm10 = vcmp.eq.s32.totalorder %v12971_v48, %v12844_v0  ;;  %vm15380_vm6 = vcmp.eq.s32.totalorder %v12951_v42, %v12517_v28 }
 0x905   : > { %9146 = vmatpush.msk.msrb.mxu3 %vm15369_vm8, %v15088_v30  ;;  %9243 = vmatpush.msk.msra.mxu2 %vm15371_vm5, %v15088_v30  ;;  %vm15381_vm8 = vcmp.eq.s32.totalorder %v12971_v48, %v12517_v28  ;;  %vm15413_vm5 = vcmp.eq.s32.totalorder %v12855_v8, %v12844_v0  ;;  %v7674_v8 = vpop.f32.mrf.mxu1 }
 0x906   : > { %7906 = vmatmul.f32.vlgmr.msrb.gmra.mxu3 %v7844_v2  ;;  %v15402_v2 = vld [vmem:[#allocation62_spill] sm:$0xff] }
 0x907   : > { %9184 = vmatpush.msk.msra.mxu3 %vm15370_vm13, %v13011_v21  ;;  %9244 = vmatpush.msk.msra.mxu2 %vm15373_vm14, %v15088_v30  ;;  %v15403_v17 = vmax.f32 %v15402_v2, 0.0  ;;  %vm15412_vm13 = vcmp.eq.s32.totalorder %v12841_v40, %v12844_v0  ;;  %vm15414_vm14 = vcmp.eq.s32.totalorder %v12861_v56, %v12844_v0 }
 0x909   : > { %9185 = vmatpush.msk.msra.mxu3 %vm15372_vm2, %v15088_v30  ;;  %9261 = vmatpush.msk.msrb.mxu2 %vm15374_vm0, %v12959_v14  ;;  %v15382_v14 = vld [vmem:[#allocation92_spill] sm:$0xff]  ;;  %vm7992_vm2 = vcmp.eq.s32.totalorder %v15112_v37, %v12998_v43  ;;  %vm15415_vm0 = vcmp.eq.s32.totalorder %v12873_v44, %v12844_v0 }
 0x90a   : > { %v15383_v33 = vmax.f32 %v15382_v14, 0.0  ;;  %v9189_v59 = vsel %vm7992_vm2, 1.0, %v15089_v63  ;;  %vm15423_vm2 = vcmp.eq.s32.totalorder %v12964_v49, %v12844_v0 }
 0x90b   : > { %9186 = vmatpush.msk.msra.mxu3 %vm15375_vm15, %v15088_v30  ;;  %9262 = vmatpush.msk.msrb.mxu2 %vm15376_vm12, %v15088_v30  ;;  %vm15416_vm15 = vcmp.eq.s32.totalorder %v12883_v34, %v12844_v0  ;;  %vm15417_vm12 = vcmp.eq.s32.totalorder %v12893_v32, %v12844_v0  ;;  %v15431_v32 = vld [vmem:[#allocation107_spill] sm:$0xff] }
 0x90c   : > { %9206 = vmatmul.msk.f32.vlgmr.msrb.gmra.mxu0 %vm7995_vm1, %v9189_v59 }
 0x90d   : > { %9187 = vmatpush.msk.msra.mxu3 %vm15377_vm10, %v15088_v30  ;;  %9263 = vmatpush.msk.msrb.mxu2 %vm15380_vm6, %v15088_v30  ;;  %vm15418_vm10 = vcmp.eq.s32.totalorder %v12904_v53, %v12844_v0  ;;  %vm15419_vm6 = vcmp.eq.s32.totalorder %v12914_v62, %v12844_v0  ;;  %v15432_v53 = vmax.f32 %v15431_v32, 0.0  ;;  %v15435_v62 = vld [vmem:[#allocation104_spill] sm:$0xff] }
 0x90f   : > { %9207 = vmatpush.xpose.msk.msrb.mxu3 %vm7995_vm1, %v15379_v27  ;;  %9264 = vmatpush.msk.msrb.mxu2 %vm15381_vm8, %v15088_v30  ;;  %v15404_v27 = vld [vmem:[#allocation59_spill] sm:$0xff]  ;;  %vm15420_vm8 = vcmp.eq.s32.totalorder %v12924_v55, %v12844_v0  ;;  %v15438_v55 = vld [vmem:[#allocation101_spill] sm:$0xff] }
 0x910   : > { %v15405_v14 = vmax.f32 %v15404_v27, 0.0 }
 0x913   : > { %9208 = vmatpush.xpose.msk.msrb.mxu3 %vm7995_vm1, %v15383_v33  ;;  %v7614_v33 = vpop.f32.mrf.mxu2 }
 0x917   : > { %9209 = vmatpush.xpose.msk.msrb.mxu3 %vm7995_vm1, %v15385_v19  ;;  %v15406_v19 = vld [vmem:[#allocation56_spill] sm:$0xff] }
 0x918   : > { %v15407_v4 = vmax.f32 %v15406_v19, 0.0 }
 0x91b   : > { %9210 = vmatpush.xpose.msk.msrb.mxu3 %vm7995_vm1, %v15387_v26  ;;  %v7694_v38 = vpop.f32.mrf.mxu2 }
 0x91f   : > { %9211 = vmatpush.xpose.msk.msrb.mxu3 %vm7995_vm1, %v15389_v22  ;;  %v15409_v22 = vmax.f32 %v15408_v58, 0.0 }
 0x923   : > { %9212 = vmatpush.xpose.msk.msrb.mxu3 %vm7995_vm1, %v15391_v24 }
 0x927   : > { %9213 = vmatpush.xpose.msk.msrb.mxu3 %vm7995_vm1, %v15393_v29  ;;  %v15410_v29 = vld [vmem:[#allocation50_spill] sm:$0xff] }
 0x928   : > { %v15411_v11 = vmax.f32 %v15410_v29, 0.0 }
 0x92b   : > { %9214 = vmatpush.xpose.msk.msrb.mxu3 %vm7995_vm1, %v15395_v15 }
 0x92f   : > { %9215 = vmatpush.xpose.msk.msrb.mxu3 %vm7995_vm1, %v15397_v51 }
 0x933   : > { %9216 = vmatpush.xpose.msk.msrb.mxu3 %vm7995_vm1, %v15399_v3 }
 0x937   : > { %9217 = vmatpush.xpose.msk.msrb.mxu3 %vm7995_vm1, %v15401_v52 }
 0x939   : > { %v7594_v12 = vpop.f32.mrf.mxu3 }
 0x93a   : > { %v7615_v26 = vadd.f32 %v7614_v33, %v7594_v12 }
 0x93b   : > { %9218 = vmatpush.xpose.msk.msrb.mxu3 %vm7995_vm1, %v15403_v17 }
 0x93f   : > { %9219 = vmatpush.xpose.msk.msrb.mxu3 %vm7995_vm1, %v15405_v14 }
 0x941   : > { %v7634_v24 = vpop.f32.mrf.mxu3 }
 0x942   : > { %v7635_v9 = vadd.f32 %v7634_v24, %v7615_v26 }
 0x943   : > { %9220 = vmatpush.xpose.msk.msrb.mxu3 %vm7995_vm1, %v15407_v4 }
 0x944   : > { %7697 = vst [vmem:[%s13755_s27 + $0x10] sm:$0xff] %v7635_v9 }
 0x947   : > { %9221 = vmatpush.xpose.msk.msrb.mxu3 %vm7995_vm1, %v15409_v22 }
 0x94b   : > { %9222 = vmatpush.xpose.msk.msrb.mxu3 %vm7995_vm1, %v15411_v11  ;;  %v7824_v15 = vpop.f32.mrf.mxu2 }
 0x94c   : > { %7886 = vmatmul.f32.vlgmr.msra.gmra.mxu1 %v7824_v15 }
 0x94d   : > { %9152 = vmatpush.msk.msra.mxu1 %vm15412_vm13, %v15088_v30  ;;  %vm15421_vm13 = vcmp.eq.s32.totalorder %v12934_v54, %v12844_v0  ;;  %v15439_v54 = vmax.f32 %v15438_v55, 0.0 }
 0x94f   : > { %9153 = vmatpush.msk.msra.mxu1 %vm15413_vm5, %v15088_v30  ;;  %vm15422_vm5 = vcmp.eq.s32.totalorder %v12947_v61, %v12844_v0 }
 0x951   : > { %9154 = vmatpush.msk.msra.mxu1 %vm15414_vm14, %v15088_v30  ;;  %vm15424_vm14 = vcmp.eq.s32.totalorder %v12982_v60, %v12844_v0 }
 0x953   : > { %9155 = vmatpush.msk.msra.mxu1 %vm15415_vm0, %v15088_v30  ;;  %vm15425_vm0 = vcmp.eq.s32.totalorder %v12998_v43, %v12844_v0 }
 0x955   : > { %9156 = vmatpush.msk.msra.mxu1 %vm15416_vm15, %v15088_v30  ;;  %vm15426_vm15 = vcmp.eq.s32.totalorder %v13016_v25, %v12844_v0 }
 0x957   : > { %9157 = vmatpush.msk.msra.mxu1 %vm15417_vm12, %v15088_v30  ;;  %vm15427_vm12 = vcmask 244736  }
 0x959   : > { %9158 = vmatpush.msk.msra.mxu1 %vm15418_vm10, %v15088_v30  ;;  %v7654_v40 = vpop.f32.mrf.mxu3  ;;  %vm15428_vm10 = vmmov %vm15427_vm12 }
 0x95a   : > { %v7675_v56 = vadd.f32 %v7674_v8, %v7654_v40 }
 0x95b   : > { %9159 = vmatpush.msk.msra.mxu1 %vm15419_vm6, %v15088_v30  ;;  %vm15429_vm6 = vcmp.eq.s32.totalorder %v12502_v36, %v12844_v0  ;;  %v15436_v36 = vmax.f32 %v15435_v62, 0.0 }
 0x95c   : > { %v7695_v44 = vadd.f32 %v7694_v38, %v7675_v56 }
 0x95d   : > { %9160 = vmatpush.msk.msra.mxu1 %vm15420_vm8, %v15088_v30  ;;  %vm15430_vm8 = vcmask 1045504  }
 0x95e   : > { %7698 = vst [vmem:[%s13755_s27 + $0x18] sm:$0xff] %v7695_v44 }
 0x95f   : > { %9161 = vmatpush.msk.msra.mxu1 %vm15421_vm13, %v15088_v30  ;;  %vm15433_vm13 = vcmp.eq.s32.totalorder %v12938_v10, %v12844_v0  ;;  %v15440_v10 = vld [vmem:[#allocation98_spill] sm:$0xff] }
 0x960   : > { %v15441_v61 = vmax.f32 %v15440_v10, 0.0 }
 0x961   : > { %9162 = vmatpush.msk.msra.mxu1 %vm15422_vm5, %v15088_v30  ;;  %vm15434_vm5 = vcmp.eq.s32.totalorder %v12951_v42, %v12844_v0 }
 0x963   : > { %9163 = vmatpush.msk.msra.mxu1 %vm15423_vm2, %v15088_v30  ;;  %vm15437_vm2 = vcmp.eq.s32.totalorder %v12971_v48, %v12844_v0 }
 0x965   : > { %9164 = vmatpush.msk.msra.mxu1 %vm15424_vm14, %v15088_v30  ;;  %vm15442_vm14 = vcmp.eq.s32.totalorder %v15098_v20, %v12517_v28 }
 0x967   : > { %9165 = vmatpush.msk.msra.mxu1 %vm15425_vm0, %v15088_v30  ;;  %vm15443_vm0 = vcmp.eq.s32.totalorder %v15099_v39, %v12517_v28 }
 0x969   : > { %9166 = vmatpush.msk.msra.mxu1 %vm15426_vm15, %v15088_v30  ;;  %v7864_v34 = vpop.f32.mrf.mxu3  ;;  %vm15444_vm15 = vcmp.eq.s32.totalorder %v15100_v6, %v12517_v28 }
 0x96a   : > { %9151 = vmatmul.msk.f32.vlgmr.msrb.gmra.mxu1 %vm15427_vm12, %v7864_v34  ;;  %9188 = vmatmul.msk.f32.vlgmr.msra.gmra.mxu3 %vm15428_vm10, %v7864_v34  ;;  %vm15445_vm12 = vcmp.eq.s32.totalorder %v15101_v41, %v12517_v28  ;;  %vm15446_vm10 = vcmp.eq.s32.totalorder %v15102_v5, %v12517_v28 }
 0x96b   : > { %9167 = vmatpush.msk.msra.mxu1 %vm15429_vm6, %v15088_v30  ;;  %9298 = vmatpush.msk.msra.mxu3 %vm15430_vm8, %v13011_v21  ;;  %vm15448_vm6 = vcmp.eq.s32.totalorder %v15104_v46, %v12517_v28  ;;  %vm15449_vm8 = vcmp.eq.s32.totalorder %v15105_v57, %v12517_v28  ;;  %v7967_v25 = vpop.f32.mrf.mxu2 }
 0x96d   : > { %9224 = vmatpush.xpose.msk.msrb.mxu1 %vm7995_vm1, %v15432_v53  ;;  %9299 = vmatpush.msk.msra.mxu3 %vm15433_vm13, %v15088_v30  ;;  %vm15450_vm13 = vcmp.eq.s32.totalorder %v15106_v18, %v12517_v28 }
 0x96f   : > { %9300 = vmatpush.msk.msra.mxu3 %vm15434_vm5, %v15088_v30  ;;  %vm15451_vm5 = vcmp.eq.s32.totalorder %v15107_v47, %v12517_v28 }
 0x971   : > { %9225 = vmatpush.xpose.msk.msrb.mxu1 %vm7995_vm1, %v15436_v36  ;;  %9301 = vmatpush.msk.msra.mxu3 %vm15437_vm2, %v15088_v30  ;;  %vm15452_vm2 = vcmp.eq.s32.totalorder %v15108_v7, %v12517_v28 }
 0x972   : > { %7946 = vmatmul.f32.vlgmr.msra.gmra.mxu1 %v7824_v15  ;;  %9223 = vmatmul.msk.f32.vlgmr.msrb.gmra.mxu3 %vm7995_vm1, %v9189_v59 }
 0x975   : > { %9226 = vmatpush.xpose.msk.msrb.mxu1 %vm7995_vm1, %v15439_v54 }
 0x979   : > { %9227 = vmatpush.xpose.msk.msrb.mxu1 %vm7995_vm1, %v15441_v61 }
 0x97c   : > { %9228 = vmatmul.msk.f32.vlgmr.msrb.gmra.mxu1 %vm7995_vm1, %v9189_v59  ;;  %vm15447_vm1 = vcmp.eq.s32.totalorder %v15103_v1, %v12517_v28 }
 0x97d   : > { %9245 = vmatpush.msk.msra.mxu1 %vm15442_vm14, %v15088_v30  ;;  %vm15453_vm14 = vcmp.eq.s32.totalorder %v15109_v31, %v12517_v28 }
 0x97f   : > { %9246 = vmatpush.msk.msra.mxu1 %vm15443_vm0, %v15088_v30  ;;  %vm15454_vm0 = vcmp.eq.s32.totalorder %v15110_v50, %v12517_v28 }
 0x981   : > { %9247 = vmatpush.msk.msra.mxu1 %vm15444_vm15, %v15088_v30  ;;  %vm15455_vm15 = vcmp.eq.s32.totalorder %v15111_v13, %v12517_v28 }
 0x983   : > { %9248 = vmatpush.msk.msra.mxu1 %vm15445_vm12, %v15088_v30  ;;  %vm15456_vm12 = vcmp.eq.s32.totalorder %v15113_v23, %v12517_v28 }
 0x985   : > { %9249 = vmatpush.msk.msra.mxu1 %vm15446_vm10, %v15088_v30  ;;  %vm15457_vm10 = vcmp.eq.s32.totalorder %v15114_v45, %v12517_v28 }
 0x987   : > { %9250 = vmatpush.msk.msra.mxu1 %vm15447_vm1, %v15088_v30  ;;  %vm15458_vm1 = vcmp.eq.s32.totalorder %v15098_v20, %v12844_v0 }
 0x989   : > { %9251 = vmatpush.msk.msra.mxu1 %vm15448_vm6, %v15088_v30  ;;  %v8124_v42 = vpop.f32.mrf.mxu0  ;;  %vm15459_vm6 = vcmp.eq.s32.totalorder %v15099_v39, %v12844_v0  ;;  %v7907_v63 = vpop.f32.mrf.mxu3 }
 0x98a   : > { %8186 = vmatmul.f32.vlgmr.msra.gmra.mxu2 %v8124_v42  ;;  %8246 = vmatmul.f32.vlgmr.msra.gmra.mxu0 %v8124_v42 }
 0x98b   : > { %9252 = vmatpush.msk.msra.mxu1 %vm15449_vm8, %v15088_v30  ;;  %9282 = vmatpush.msk.msra.mxu2 %vm15458_vm1, %v15088_v30  ;;  %vm15460_vm8 = vcmp.eq.s32.totalorder %v15100_v6, %v12844_v0 }
 0x98d   : > { %9253 = vmatpush.msk.msra.mxu1 %vm15450_vm13, %v15088_v30  ;;  %9283 = vmatpush.msk.msra.mxu2 %vm15459_vm6, %v15088_v30  ;;  %vm15461_vm13 = vcmp.eq.s32.totalorder %v15101_v41, %v12844_v0 }
 0x98f   : > { %9254 = vmatpush.msk.msra.mxu1 %vm15451_vm5, %v15088_v30  ;;  %9284 = vmatpush.msk.msra.mxu2 %vm15460_vm8, %v15088_v30  ;;  %vm15462_vm5 = vcmp.eq.s32.totalorder %v15102_v5, %v12844_v0 }
 0x991   : > { %9255 = vmatpush.msk.msra.mxu1 %vm15452_vm2, %v15088_v30  ;;  %9285 = vmatpush.msk.msra.mxu2 %vm15461_vm13, %v15088_v30  ;;  %vm15463_vm2 = vcmp.eq.s32.totalorder %v15103_v1, %v12844_v0 }
 0x993   : > { %9256 = vmatpush.msk.msra.mxu1 %vm15453_vm14, %v15088_v30  ;;  %9286 = vmatpush.msk.msra.mxu2 %vm15462_vm5, %v15088_v30  ;;  %vm15464_vm14 = vcmp.eq.s32.totalorder %v15104_v46, %v12844_v0 }
 0x995   : > { %9257 = vmatpush.msk.msra.mxu1 %vm15454_vm0, %v15088_v30  ;;  %9287 = vmatpush.msk.msra.mxu2 %vm15463_vm2, %v15088_v30  ;;  %vm15465_vm0 = vcmp.eq.s32.totalorder %v15105_v57, %v12844_v0 }
 0x997   : > { %9258 = vmatpush.msk.msra.mxu1 %vm15455_vm15, %v15088_v30  ;;  %9288 = vmatpush.msk.msra.mxu2 %vm15464_vm14, %v15088_v30  ;;  %vm15466_vm15 = vcmp.eq.s32.totalorder %v15107_v47, %v12844_v0 }
 0x999   : > { %9259 = vmatpush.msk.msra.mxu1 %vm15456_vm12, %v15088_v30  ;;  %9289 = vmatpush.msk.msra.mxu2 %vm15465_vm0, %v15088_v30  ;;  %vm15467_vm12 = vcmp.eq.s32.totalorder %v15108_v7, %v12844_v0 }
 0x99b   : > { %9260 = vmatpush.msk.msra.mxu1 %vm15457_vm10, %v15088_v30  ;;  %9290 = vmatpush.msk.msra.mxu2 %vm6922_vm7, %v15088_v30  ;;  %vm15468_vm10 = vcmp.eq.s32.totalorder %v15109_v31, %v12844_v0  ;;  %vm15469_vm7 = vcmask 244736  }
 0x99d   : > { %9291 = vmatpush.msk.msra.mxu2 %vm15466_vm15, %v15088_v30 }
 0x99f   : > { %9292 = vmatpush.msk.msra.mxu2 %vm15467_vm12, %v15088_v30 }
 0x9a1   : > { %9293 = vmatpush.msk.msra.mxu2 %vm15468_vm10, %v15088_v30 }
 0x9a3   : > { %9294 = vmatpush.msk.msra.mxu2 %vm6914_vm3, %v15088_v30 }
 0x9a5   : > { %9295 = vmatpush.msk.msra.mxu2 %vm6912_vm9, %v15088_v30  ;;  %vm15470_vm9 = vmmov %vm15469_vm7 }
 0x9a7   : > { %9296 = vmatpush.msk.msra.mxu2 %vm6910_vm4, %v15088_v30 }
 0x9a9   : > { %9297 = vmatpush.msk.msra.mxu2 %vm6908_vm11, %v15088_v30 }
 0x9c9   : > { %v7887_v28 = vpop.f32.mrf.mxu1 }
 0x9ca   : > { %v7908_v49 = vadd.f32 %v7907_v63, %v7887_v28 }
 0x9e7   : > { %v7927_v48 = vpop.f32.mrf.mxu1 }
 0x9e8   : > { %v7928_v60 = vadd.f32 %v7927_v48, %v7908_v49 }
 0x9ea   : > { %7990 = vst [vmem:[%s13755_s27 + $0x20] sm:$0xff] %v7928_v60 }
 0x9ed   : > { %v7987_v43 = vpop.f32.mrf.mxu3 }
 0x9ef   : > { %v7947_v21 = vpop.f32.mrf.mxu1 }
 0x9f0   : > { %v7968_v20 = vadd.f32 %v7967_v25, %v7947_v21 }
 0x9f2   : > { %v7988_v39 = vadd.f32 %v7987_v43, %v7968_v20 }
 0x9f4   : > { %7991 = vst [vmem:[%s13755_s27 + $0x28] sm:$0xff] %v7988_v39 }
 0x9f5   : > { %v8144_v6 = vpop.f32.mrf.mxu3 }
 0x9f6   : > { %8206 = vmatmul.f32.vlgmr.msra.gmra.mxu1 %v8144_v6 }
 0x9f9   : > { %v8164_v41 = vpop.f32.mrf.mxu1 }
 0x9fa   : > { %9265 = vmatmul.msk.f32.vlgmr.msrb.gmra.mxu2 %vm15469_vm7, %v8164_v41  ;;  %9302 = vmatmul.msk.f32.vlgmr.msra.gmra.mxu3 %vm15470_vm9, %v8164_v41 }
 0xa02   : > { %8266 = vmatmul.f32.vlgmr.msra.gmra.mxu2 %v8144_v6 }
 0xa07   : > { %v8247_v0 = vpop.f32.mrf.mxu0 }
 0xa0d   : > { %v8187_v5 = vpop.f32.mrf.mxu2 }
 0xa73   : > { %v8207_v1 = vpop.f32.mrf.mxu1 }
 0xa74   : > { %v8208_v46 = vadd.f32 %v8207_v1, %v8187_v5 }
 0xa7d   : > { %v8227_v57 = vpop.f32.mrf.mxu2  ;;  %v8287_v7 = vpop.f32.mrf.mxu3 }
 0xa7e   : > { %v8228_v18 = vadd.f32 %v8227_v57, %v8208_v46 }
 0xa80   : > { %8290 = vst [vmem:[%s13755_s27 + $0x30] sm:$0xff] %v8228_v18 }
 0xa85   : > { %v8267_v30 = vpop.f32.mrf.mxu2 }
 0xa86   : > { %v8268_v47 = vadd.f32 %v8267_v30, %v8247_v0 }
 0xa88   : > { %v8288_v31 = vadd.f32 %v8287_v7, %v8268_v47 }
 0xa8a   : > { %8291 = vst [vmem:[%s13755_s27 + $0x38] sm:$0xff] %v8288_v31 }
 0xa8b PF: > { %s25_s18 = sadd.s32 1, %s9427_s18  }
 0xa8c   : > { %p22_p4 = scmp.ge.s32.totalorder %s25_s18, 4  }
 0xa8e   :  { %24 = sbr.rel (!%p22_p4) target bundleno = 1 (0x1), region = 126 }

</bundles_post_ra>
